<compile_context>
chip_gen: v7x
topology: tpu7x:2x2x1
jax: 0.10.0
libtpu: 0.0.40
codegen_flags: <defaults>
</compile_context>

<pallas_src>
import functools

import numpy as np
import jax
import jax.numpy as jnp
from jax import lax
from jax.experimental import pallas as pl
from jax.experimental.pallas import tpu as pltpu


# ----------------------------- config -----------------------------
class CFG:
    input_channels = 4
    dim_cnn = 16
    num_blocks_cnn = 1
    vit_length = 8
    dim_vit = 32
    num_blocks_vit = 1
    elo_dim = 16


OUTPUT_DIM = 16
SIDE_INFO_DIM = OUTPUT_DIM + 6 + 6 + 1 + 64 + 64          # 157
OUT_TOTAL = OUTPUT_DIM + SIDE_INFO_DIM + 1                # 174  (fc1 | fc2 | fc3)
N_ELO = 10
HEADS = 4
DIM_HEAD = 64
LN_EPS = 1e-5
PAD_MARGIN = 9            # margin rows of the shifted-row conv scratch


# --------------------------- in-kernel helpers ---------------------------
def _ln(x, g, b):
    mu = jnp.mean(x, axis=-1, keepdims=True)
    var = jnp.mean((x - mu) ** 2, axis=-1, keepdims=True)
    return (x - mu) * lax.rsqrt(var + LN_EPS) * g + b


def _softmax(x):
    x = x - jnp.max(x, axis=-1, keepdims=True)
    e = jnp.exp(x)
    return e * pl.reciprocal(jnp.sum(e, axis=-1, keepdims=True), approx=True)


def _mm(a, b):
    # bf16 operands (MXU-native), f32 accumulation.
    return jnp.dot(a.astype(jnp.bfloat16), b.astype(jnp.bfloat16),
                   preferred_element_type=jnp.float32)


def _conv3x3(act, w_ref, s_ref, b_ref, pad_ref, patch_ref, mask, M, C,
             relu, residual=None):
    """3x3 'same' conv + folded BN on (M, C) row-major (b, i, j) activations."""
    pad_ref[PAD_MARGIN:PAD_MARGIN + M, :] = act
    t = 0
    for oy in (-1, 0, 1):
        for ox in (-1, 0, 1):
            s = oy * 8 + ox
            shifted = pad_ref[PAD_MARGIN + s:PAD_MARGIN + s + M, :]
            patch_ref[:, t * C:(t + 1) * C] = shifted * mask[:, t:t + 1]
            t += 1
    y = _mm(patch_ref[...], w_ref[...])                    # single MXU matmul, K = 9*C
    y = y * s_ref[...] + b_ref[...]                        # folded BatchNorm (eval)
    if residual is not None:
        y = y + residual
    if relu:
        y = jnp.maximum(y, 0.0)
    return y


# --------------------------- fused forward kernel ---------------------------
def _make_fused_kernel(cfg, bt):
    Cin = cfg.input_channels
    C = cfg.dim_cnn
    CPAD = max(Cin, C)
    L, D = cfg.vit_length, cfg.dim_vit
    H, dh = HEADS, DIM_HEAD
    inner = H * dh
    nb_cnn, nb_vit = cfg.num_blocks_cnn, cfg.num_blocks_vit
    M = bt * 64
    scale = dh ** (-0.5)

    def kernel(*refs):
        it = iter(refs)

        def nxt():
            return next(it)

        x_ref, mask_ref, elo_ref = nxt(), nxt(), nxt()
        stem_w, stem_s, stem_b = nxt(), nxt(), nxt()
        blocks = [tuple(nxt() for _ in range(6)) for _ in range(nb_cnn)]
        last_w, last_s, last_b = nxt(), nxt(), nxt()
        pe_w, pe_b, pe_g, pe_beta, pos = nxt(), nxt(), nxt(), nxt(), nxt()
        layers = [tuple(nxt() for _ in range(12)) for _ in range(nb_vit)]
        tn_g, tn_b, ll_g, ll_b = nxt(), nxt(), nxt(), nxt()
        w12, b12, w31, b31, w3, b3 = nxt(), nxt(), nxt(), nxt(), nxt(), nxt()
        out_ref = nxt()
        pad_ref, patch_ref = nxt(), nxt()

        mask = mask_ref[...]
        # keep the margins of the shifted-row scratch zero (interior is always
        # fully overwritten by each conv); unconditional so it is correct on
        # every core when the batch grid is megacore-sharded.
        zeros_m = jnp.zeros((PAD_MARGIN, CPAD), jnp.float32)
        pad_ref[0:PAD_MARGIN, :] = zeros_m
        pad_ref[PAD_MARGIN + M:2 * PAD_MARGIN + M, :] = zeros_m

        # ------------------- ChessResNet -------------------
        act = _conv3x3(x_ref[...], stem_w, stem_s, stem_b,
                       pad_ref, patch_ref, mask, M, CPAD, relu=True)
        for (w1, s1, b1, w2, s2, b2) in blocks:
            h1 = _conv3x3(act, w1, s1, b1, pad_ref, patch_ref, mask, M, CPAD,
                          relu=True)
            act = _conv3x3(h1, w2, s2, b2, pad_ref, patch_ref, mask, M, CPAD,
                           relu=True, residual=act)
        y = _conv3x3(act, last_w, last_s, last_b, pad_ref, patch_ref, mask, M,
                     CPAD, relu=False)                      # (M, L)

        # ------ tokens + patch embedding: token l == CNN output channel l ------
        # x_pe[b, l, :] = sum_p y[b*64+p, l] * pe_w[p, :]  (transposed-lhs matmul)
        rows = []
        for b in range(bt):
            yb = y[b * 64:(b + 1) * 64, :]                  # (64, L)
            rows.append(lax.dot_general(
                yb.astype(jnp.bfloat16), pe_w[...].astype(jnp.bfloat16),
                dimension_numbers=(((0,), (0,)), ((), ())),
                preferred_element_type=jnp.float32))        # (L, D)
        x = jnp.stack(rows, axis=0) + pe_b[...]             # (bt, L, D)
        x = _ln(x, pe_g[...], pe_beta[...])
        x = x + pos[...]                                    # positional embedding

        elo = elo_ref[...]                                  # (bt, 2*elo_dim)

        # ------------------- transformer -------------------
        for (a_g, a_b, wqkv, welo, wout, bout,
             f_g, f_b, fw1, fb1, fw2, fb2) in layers:
            # --- Elo-aware attention ---
            xn = _ln(x, a_g[...], a_b[...])
            qkv = _mm(xn.reshape(bt * L, D), wqkv[...])     # (bt*L, 3*inner)
            eloq = _mm(elo, welo[...])                      # (bt, inner)
            qs, ks, vs = [], [], []
            for h in range(H):
                lo = h * dh
                qh = qkv[:, lo:lo + dh].reshape(bt, L, dh)
                qh = qh + eloq[:, lo:lo + dh][:, None, :]
                kh = qkv[:, inner + lo:inner + lo + dh].reshape(bt, L, dh)
                vh = qkv[:, 2 * inner + lo:2 * inner + lo + dh].reshape(bt, L, dh)
                qs.append(qh); ks.append(kh); vs.append(vh)
            q = jnp.concatenate(qs, axis=0)                 # (H*bt, L, dh)
            k = jnp.concatenate(ks, axis=0)
            v = jnp.concatenate(vs, axis=0)
            dots = jnp.einsum('gld,gmd->glm',
                              q.astype(jnp.bfloat16), k.astype(jnp.bfloat16),
                              preferred_element_type=jnp.float32) * scale
            attn = _softmax(dots)
            o = jnp.einsum('glm,gmd->gld',
                           attn.astype(jnp.bfloat16), v.astype(jnp.bfloat16),
                           preferred_element_type=jnp.float32)   # (H*bt, L, dh)
            yat = None
            for h in range(H):
                oh = o[h * bt:(h + 1) * bt].reshape(bt * L, dh)
                c = _mm(oh, wout[h * dh:(h + 1) * dh, :])
                yat = c if yat is None else yat + c
            x = x + (yat + bout[...]).reshape(bt, L, D)     # residual

            # --- FeedForward ---
            xn2 = _ln(x, f_g[...], f_b[...]).reshape(bt * L, D)
            hmid = _mm(xn2, fw1[...]) + fb1[...]
            # TODO(synk): torch nn.GELU default is exact (erf); tanh approximation used here.
            hmid = jax.nn.gelu(hmid, approximate=True)
            yff = _mm(hmid, fw2[...]) + fb2[...]
            x = x + yff.reshape(bt, L, D)                   # residual

        # ------------------- output heads -------------------
        x = _ln(x, tn_g[...], tn_b[...])                    # transformer final norm
        xm = jnp.mean(x, axis=1)                            # mean over tokens -> (bt, D)
        xm = _ln(xm, ll_g[...], ll_b[...])                  # last_ln
        o12 = _mm(xm, w12[...]) + b12[...]                  # fused fc_1 | fc_2
        h3 = jnp.maximum(_mm(xm, w31[...]) + b31[...], 0.0)
        o3 = _mm(h3, w3[...]) + b3[...]                     # fc_3
        out_ref[:, 0:OUTPUT_DIM + SIDE_INFO_DIM] = o12
        out_ref[:, OUTPUT_DIM + SIDE_INFO_DIM:OUT_TOTAL] = o3

    return kernel


# --------------------------- wrapper ---------------------------
def _w_spec(shape):
    rank = len(shape)

    def idx(i):
        return (0,) * rank

    return pl.BlockSpec(tuple(shape), idx)


def maia2_forward(params, boards, elos_self, elos_oppo, cfg, batch_tile=None):
    B = boards.shape[0]
    Cin, C = cfg.input_channels, cfg.dim_cnn
    CPAD = max(Cin, C)
    assert CPAD == C, "implementation assumes dim_cnn >= input_channels"
    elo2 = 2 * cfg.elo_dim

    # batch tile: bt == B, or a multiple of 8 (keeps (bt, ...) blocks sublane-legal)
    if batch_tile is None:
        bt = 8 if (B > 8 and B % 8 == 0) else B
    else:
        bt = batch_tile
    assert B % bt == 0
    nb = B // bt
    M = bt * 64

    # ---- layout glue: NCHW boards -> (b, i, j)-row-major rows, channels -> CPAD ----
    x = boards.reshape(B, Cin, 8, 8).astype(jnp.float32)
    x_rows = jnp.transpose(x, (0, 2, 3, 1)).reshape(B * 64, Cin)
    if CPAD > Cin:
        x_rows = jnp.pad(x_rows, ((0, 0), (0, CPAD - Cin)))

    # stem conv weight: pad input channels to CPAD with zero rows
    stem_w = params['stem_w'].reshape(9, Cin, C)
    stem_w = jnp.pad(stem_w, ((0, 0), (0, CPAD - Cin), (0, 0))).reshape(9 * CPAD, C)

    # static 3x3 'same'-conv edge-validity mask per (row, tap)
    r = np.arange(M)
    bi = (r % 64) // 8
    bj = r % 8
    mask_cols = []
    for oy in (-1, 0, 1):
        for ox in (-1, 0, 1):
            mask_cols.append(((bi + oy >= 0) & (bi + oy < 8) &
                              (bj + ox >= 0) & (bj + ox < 8)).astype(np.float32))
    conv_mask = jnp.asarray(np.stack(mask_cols, axis=1))    # (M, 9)

    # elo embedding lookup (tiny gather on the XLA side)
    elo_emb = jnp.concatenate(
        [jnp.take(params['elo_table'], elos_self, axis=0),
         jnp.take(params['elo_table'], elos_oppo, axis=0)], axis=1)   # (B, elo2)

    # fuse fc_1 / fc_2 into one lane-dense output projection
    w12 = jnp.concatenate([params['fc1_w'], params['fc2_w']], axis=1)
    b12 = jnp.concatenate([params['fc1_b'], params['fc2_b']], axis=1)

    inputs = [x_rows, conv_mask, elo_emb, stem_w,
              params['stem_scale'], params['stem_bias']]
    in_specs = [pl.BlockSpec((M, CPAD), lambda i: (i, 0)),
                _w_spec((M, 9)),
                pl.BlockSpec((bt, elo2), lambda i: (i, 0)),
                _w_spec((9 * CPAD, C)),
                _w_spec((1, C)), _w_spec((1, C))]

    def add_w(arr):
        inputs.append(arr)
        in_specs.append(_w_spec(arr.shape))

    for blk in params['blocks']:
        for name in ('w1', 's1', 'b1', 'w2', 's2', 'b2'):
            add_w(blk[name])
    for name in ('last_w', 'last_scale', 'last_bias',
                 'pe_w', 'pe_b', 'pe_ln_g', 'pe_ln_b', 'pos'):
        add_w(params[name])
    for lyr in params['layers']:
        for name in ('attn_ln_g', 'attn_ln_b', 'wqkv', 'welo', 'wout', 'bout',
                     'ff_ln_g', 'ff_ln_b', 'w1', 'b1', 'w2', 'b2'):
            add_w(lyr[name])
    for arr in (params['tnorm_g'], params['tnorm_b'],
                params['lastln_g'], params['lastln_b'],
                w12, b12, params['fc31_w'], params['fc31_b'],
                params['fc3_w'], params['fc3_b']):
        add_w(arr)

    out = pl.pallas_call(
        _make_fused_kernel(cfg, bt),
        out_shape=jax.ShapeDtypeStruct((B, OUT_TOTAL), jnp.float32),
        grid=(nb,),
        in_specs=in_specs,
        out_specs=pl.BlockSpec((bt, OUT_TOTAL), lambda i: (i, 0)),
        scratch_shapes=[
            pltpu.VMEM((M + 2 * PAD_MARGIN, CPAD), jnp.float32),   # shifted rows
            pltpu.VMEM((M, 9 * CPAD), jnp.float32),                # im2col patches
        ],
        compiler_params=pltpu.CompilerParams(
            dimension_semantics=("parallel",),
            vmem_limit_bytes=32 * 1024 * 1024),
    )(*inputs)

    logits_maia = out[:, :OUTPUT_DIM]
    logits_side_info = out[:, OUTPUT_DIM:OUTPUT_DIM + SIDE_INFO_DIM]
    logits_value = out[:, OUTPUT_DIM + SIDE_INFO_DIM]
    return logits_maia, logits_side_info, logits_value


# --------------------------- parameters ---------------------------
def init_params(key, cfg):
    keys = iter(jax.random.split(key, 64))

    def nrm(shape, s=0.05):
        return (s * jax.random.normal(next(keys), shape)).astype(jnp.float32)

    C, D, L = cfg.dim_cnn, cfg.dim_vit, cfg.vit_length
    inner = HEADS * DIM_HEAD
    elo2 = cfg.elo_dim * 2
    p = {}
    # ChessResNet (conv weights stored (9*Cin, Cout); BN folded into scale/bias)
    p['stem_w'] = nrm((9 * cfg.input_channels, C), 0.1)
    p['stem_scale'] = 1.0 + nrm((1, C)); p['stem_bias'] = nrm((1, C))
    p['blocks'] = []
    for _ in range(cfg.num_blocks_cnn):
        p['blocks'].append(dict(
            w1=nrm((9 * C, C), 0.1), s1=1.0 + nrm((1, C)), b1=nrm((1, C)),
            w2=nrm((9 * C, C), 0.1), s2=1.0 + nrm((1, C)), b2=nrm((1, C))))
    p['last_w'] = nrm((9 * C, L), 0.1)
    p['last_scale'] = 1.0 + nrm((1, L)); p['last_bias'] = nrm((1, L))
    # patch embedding + positional embedding
    p['pe_w'] = nrm((64, D), 0.1); p['pe_b'] = nrm((1, D))
    p['pe_ln_g'] = 1.0 + nrm((1, D)); p['pe_ln_b'] = nrm((1, D))
    p['pos'] = nrm((1, L, D), 1.0)
    # transformer layers
    p['layers'] = []
    for _ in range(cfg.num_blocks_vit):
        p['layers'].append(dict(
            attn_ln_g=1.0 + nrm((1, D)), attn_ln_b=nrm((1, D)),
            wqkv=nrm((D, 3 * inner)), welo=nrm((elo2, inner)),
            wout=nrm((inner, D)), bout=nrm((1, D)),
            ff_ln_g=1.0 + nrm((1, D)), ff_ln_b=nrm((1, D)),
            w1=nrm((D, D)), b1=nrm((1, D)),
            w2=nrm((D, D)), b2=nrm((1, D))))
    # final norms + heads
    p['tnorm_g'] = 1.0 + nrm((1, D)); p['tnorm_b'] = nrm((1, D))
    p['lastln_g'] = 1.0 + nrm((1, D)); p['lastln_b'] = nrm((1, D))
    p['fc1_w'] = nrm((D, OUTPUT_DIM)); p['fc1_b'] = nrm((1, OUTPUT_DIM))
    p['fc2_w'] = nrm((D, SIDE_INFO_DIM)); p['fc2_b'] = nrm((1, SIDE_INFO_DIM))
    p['fc31_w'] = nrm((D, 128)); p['fc31_b'] = nrm((1, 128))
    p['fc3_w'] = nrm((128, 1)); p['fc3_b'] = nrm((1, 1))
    p['elo_table'] = nrm((N_ELO, cfg.elo_dim), 1.0)
    return p


# --------------------------- main ---------------------------
if __name__ == "__main__":
    cfg = CFG()
    key = jax.random.PRNGKey(0)
    kp, kb, ks, ko = jax.random.split(key, 4)
    params = init_params(kp, cfg)

    B = 2
    boards = jax.random.normal(kb, (B, cfg.input_channels, 8, 8), dtype=jnp.float32)
    elos_self = jax.random.randint(ks, (B,), 0, N_ELO, dtype=jnp.int32)
    elos_oppo = jax.random.randint(ko, (B,), 0, N_ELO, dtype=jnp.int32)

    fwd = jax.jit(functools.partial(maia2_forward, cfg=cfg))
    logits_maia, logits_side_info, logits_value = fwd(params, boards,
                                                      elos_self, elos_oppo)
    jax.block_until_ready((logits_maia, logits_side_info, logits_value))

    assert logits_maia.shape == (B, OUTPUT_DIM)
    assert logits_side_info.shape == (B, SIDE_INFO_DIM)
    assert logits_value.shape == (B,)
    print("KERNEL_OK")
</pallas_src>

<mosaic_0001>
module attributes {stable_mosaic.version = 11 : i64} {
  func.func @kernel(%arg0: i32, %arg1: memref<128x16xf32, #tpu.memory_space<vmem>>, %arg2: memref<128x9xf32, #tpu.memory_space<vmem>>, %arg3: memref<2x32xf32, #tpu.memory_space<vmem>>, %arg4: memref<144x16xf32, #tpu.memory_space<vmem>>, %arg5: memref<1x16xf32, #tpu.memory_space<vmem>>, %arg6: memref<1x16xf32, #tpu.memory_space<vmem>>, %arg7: memref<144x16xf32, #tpu.memory_space<vmem>>, %arg8: memref<1x16xf32, #tpu.memory_space<vmem>>, %arg9: memref<1x16xf32, #tpu.memory_space<vmem>>, %arg10: memref<144x16xf32, #tpu.memory_space<vmem>>, %arg11: memref<1x16xf32, #tpu.memory_space<vmem>>, %arg12: memref<1x16xf32, #tpu.memory_space<vmem>>, %arg13: memref<144x8xf32, #tpu.memory_space<vmem>>, %arg14: memref<1x8xf32, #tpu.memory_space<vmem>>, %arg15: memref<1x8xf32, #tpu.memory_space<vmem>>, %arg16: memref<64x32xf32, #tpu.memory_space<vmem>>, %arg17: memref<1x32xf32, #tpu.memory_space<vmem>>, %arg18: memref<1x32xf32, #tpu.memory_space<vmem>>, %arg19: memref<1x32xf32, #tpu.memory_space<vmem>>, %arg20: memref<1x8x32xf32, #tpu.memory_space<vmem>>, %arg21: memref<1x32xf32, #tpu.memory_space<vmem>>, %arg22: memref<1x32xf32, #tpu.memory_space<vmem>>, %arg23: memref<32x768xf32, #tpu.memory_space<vmem>>, %arg24: memref<32x256xf32, #tpu.memory_space<vmem>>, %arg25: memref<256x32xf32, #tpu.memory_space<vmem>>, %arg26: memref<1x32xf32, #tpu.memory_space<vmem>>, %arg27: memref<1x32xf32, #tpu.memory_space<vmem>>, %arg28: memref<1x32xf32, #tpu.memory_space<vmem>>, %arg29: memref<32x32xf32, #tpu.memory_space<vmem>>, %arg30: memref<1x32xf32, #tpu.memory_space<vmem>>, %arg31: memref<32x32xf32, #tpu.memory_space<vmem>>, %arg32: memref<1x32xf32, #tpu.memory_space<vmem>>, %arg33: memref<1x32xf32, #tpu.memory_space<vmem>>, %arg34: memref<1x32xf32, #tpu.memory_space<vmem>>, %arg35: memref<1x32xf32, #tpu.memory_space<vmem>>, %arg36: memref<1x32xf32, #tpu.memory_space<vmem>>, %arg37: memref<32x173xf32, #tpu.memory_space<vmem>>, %arg38: memref<1x173xf32, #tpu.memory_space<vmem>>, %arg39: memref<32x128xf32, #tpu.memory_space<vmem>>, %arg40: memref<1x128xf32, #tpu.memory_space<vmem>>, %arg41: memref<128x1xf32, #tpu.memory_space<vmem>>, %arg42: memref<1x1xf32, #tpu.memory_space<vmem>>, %arg43: memref<2x174xf32, #tpu.memory_space<vmem>>, %arg44: memref<146x16xf32, #tpu.memory_space<vmem>>, %arg45: memref<128x144xf32, #tpu.memory_space<vmem>>) attributes {dimension_semantics = [#tpu.dimension_semantics<parallel>], iteration_bounds = array<i64: 1>, scalar_prefetch = 0 : i64, scratch_operands = 2 : i64, tpu.core_type = #tpu.core_type<tc>, window_params = [{transform_indices = @transform_0, window_bounds = array<i64: 128, 16>}, {pipeline_mode = #tpu.pipeline_mode<synchronous>, transform_indices = @transform_1, window_bounds = array<i64: 128, 9>}, {transform_indices = @transform_2, window_bounds = array<i64: 2, 32>}, {pipeline_mode = #tpu.pipeline_mode<synchronous>, transform_indices = @transform_3, window_bounds = array<i64: 144, 16>}, {pipeline_mode = #tpu.pipeline_mode<synchronous>, transform_indices = @transform_4, window_bounds = array<i64: 1, 16>}, {pipeline_mode = #tpu.pipeline_mode<synchronous>, transform_indices = @transform_5, window_bounds = array<i64: 1, 16>}, {pipeline_mode = #tpu.pipeline_mode<synchronous>, transform_indices = @transform_6, window_bounds = array<i64: 144, 16>}, {pipeline_mode = #tpu.pipeline_mode<synchronous>, transform_indices = @transform_7, window_bounds = array<i64: 1, 16>}, {pipeline_mode = #tpu.pipeline_mode<synchronous>, transform_indices = @transform_8, window_bounds = array<i64: 1, 16>}, {pipeline_mode = #tpu.pipeline_mode<synchronous>, transform_indices = @transform_9, window_bounds = array<i64: 144, 16>}, {pipeline_mode = #tpu.pipeline_mode<synchronous>, transform_indices = @transform_10, window_bounds = array<i64: 1, 16>}, {pipeline_mode = #tpu.pipeline_mode<synchronous>, transform_indices = @transform_11, window_bounds = array<i64: 1, 16>}, {pipeline_mode = #tpu.pipeline_mode<synchronous>, transform_indices = @transform_12, window_bounds = array<i64: 144, 8>}, {pipeline_mode = #tpu.pipeline_mode<synchronous>, transform_indices = @transform_13, window_bounds = array<i64: 1, 8>}, {pipeline_mode = #tpu.pipeline_mode<synchronous>, transform_indices = @transform_14, window_bounds = array<i64: 1, 8>}, {pipeline_mode = #tpu.pipeline_mode<synchronous>, transform_indices = @transform_15, window_bounds = array<i64: 64, 32>}, {pipeline_mode = #tpu.pipeline_mode<synchronous>, transform_indices = @transform_16, window_bounds = array<i64: 1, 32>}, {pipeline_mode = #tpu.pipeline_mode<synchronous>, transform_indices = @transform_17, window_bounds = array<i64: 1, 32>}, {pipeline_mode = #tpu.pipeline_mode<synchronous>, transform_indices = @transform_18, window_bounds = array<i64: 1, 32>}, {pipeline_mode = #tpu.pipeline_mode<synchronous>, transform_indices = @transform_19, window_bounds = array<i64: 1, 8, 32>}, {pipeline_mode = #tpu.pipeline_mode<synchronous>, transform_indices = @transform_20, window_bounds = array<i64: 1, 32>}, {pipeline_mode = #tpu.pipeline_mode<synchronous>, transform_indices = @transform_21, window_bounds = array<i64: 1, 32>}, {pipeline_mode = #tpu.pipeline_mode<synchronous>, transform_indices = @transform_22, window_bounds = array<i64: 32, 768>}, {pipeline_mode = #tpu.pipeline_mode<synchronous>, transform_indices = @transform_23, window_bounds = array<i64: 32, 256>}, {pipeline_mode = #tpu.pipeline_mode<synchronous>, transform_indices = @transform_24, window_bounds = array<i64: 256, 32>}, {pipeline_mode = #tpu.pipeline_mode<synchronous>, transform_indices = @transform_25, window_bounds = array<i64: 1, 32>}, {pipeline_mode = #tpu.pipeline_mode<synchronous>, transform_indices = @transform_26, window_bounds = array<i64: 1, 32>}, {pipeline_mode = #tpu.pipeline_mode<synchronous>, transform_indices = @transform_27, window_bounds = array<i64: 1, 32>}, {pipeline_mode = #tpu.pipeline_mode<synchronous>, transform_indices = @transform_28, window_bounds = array<i64: 32, 32>}, {pipeline_mode = #tpu.pipeline_mode<synchronous>, transform_indices = @transform_29, window_bounds = array<i64: 1, 32>}, {pipeline_mode = #tpu.pipeline_mode<synchronous>, transform_indices = @transform_30, window_bounds = array<i64: 32, 32>}, {pipeline_mode = #tpu.pipeline_mode<synchronous>, transform_indices = @transform_31, window_bounds = array<i64: 1, 32>}, {pipeline_mode = #tpu.pipeline_mode<synchronous>, transform_indices = @transform_32, window_bounds = array<i64: 1, 32>}, {pipeline_mode = #tpu.pipeline_mode<synchronous>, transform_indices = @transform_33, window_bounds = array<i64: 1, 32>}, {pipeline_mode = #tpu.pipeline_mode<synchronous>, transform_indices = @transform_34, window_bounds = array<i64: 1, 32>}, {pipeline_mode = #tpu.pipeline_mode<synchronous>, transform_indices = @transform_35, window_bounds = array<i64: 1, 32>}, {pipeline_mode = #tpu.pipeline_mode<synchronous>, transform_indices = @transform_36, window_bounds = array<i64: 32, 173>}, {pipeline_mode = #tpu.pipeline_mode<synchronous>, transform_indices = @transform_37, window_bounds = array<i64: 1, 173>}, {pipeline_mode = #tpu.pipeline_mode<synchronous>, transform_indices = @transform_38, window_bounds = array<i64: 32, 128>}, {pipeline_mode = #tpu.pipeline_mode<synchronous>, transform_indices = @transform_39, window_bounds = array<i64: 1, 128>}, {pipeline_mode = #tpu.pipeline_mode<synchronous>, transform_indices = @transform_40, window_bounds = array<i64: 128, 1>}, {pipeline_mode = #tpu.pipeline_mode<synchronous>, transform_indices = @transform_41, window_bounds = array<i64: 1, 1>}, {transform_indices = @transform_42, window_bounds = array<i64: 2, 174>}]} {
    %c0 = arith.constant 0 : index
    %c0_0 = arith.constant 0 : index
    %0 = vector.load %arg2[%c0, %c0_0] : memref<128x9xf32, #tpu.memory_space<vmem>>, vector<128x9xf32>
    %cst = arith.constant 0.000000e+00 : f32
    %1 = vector.broadcast %cst : f32 to vector<9x16xf32>
    %c0_1 = arith.constant 0 : index
    %c0_2 = arith.constant 0 : index
    %2 = vector.load %arg44[%c0_1, %c0_2] : memref<146x16xf32, #tpu.memory_space<vmem>>, vector<9x16xf32>
    tpu.vector_store %arg44[%c0_1, %c0_2], %1 {strides = array<i32>} : memref<146x16xf32, #tpu.memory_space<vmem>>, vector<9x16xf32>,
    %c137 = arith.constant 137 : index
    %c0_3 = arith.constant 0 : index
    %3 = vector.load %arg44[%c137, %c0_3] : memref<146x16xf32, #tpu.memory_space<vmem>>, vector<9x16xf32>
    tpu.vector_store %arg44[%c137, %c0_3], %1 {strides = array<i32>} : memref<146x16xf32, #tpu.memory_space<vmem>>, vector<9x16xf32>,
    %c0_4 = arith.constant 0 : index
    %c0_5 = arith.constant 0 : index
    %4 = vector.load %arg1[%c0_4, %c0_5] : memref<128x16xf32, #tpu.memory_space<vmem>>, vector<128x16xf32>
    %c9 = arith.constant 9 : index
    %c0_6 = arith.constant 0 : index
    %5 = vector.load %arg44[%c9, %c0_6] : memref<146x16xf32, #tpu.memory_space<vmem>>, vector<128x16xf32>
    tpu.vector_store %arg44[%c9, %c0_6], %4 {strides = array<i32>} : memref<146x16xf32, #tpu.memory_space<vmem>>, vector<128x16xf32>,
    %c0_7 = arith.constant 0 : index
    %c0_8 = arith.constant 0 : index
    %6 = vector.load %arg44[%c0_7, %c0_8] : memref<146x16xf32, #tpu.memory_space<vmem>>, vector<128x16xf32>
    %7 = vector.extract_strided_slice %0 {offsets = [0, 0], sizes = [128, 1], strides = [1, 1]} : vector<128x9xf32> to vector<128x1xf32>
    %8 = vector.broadcast %7 : vector<128x1xf32> to vector<128x16xf32>
    %9 = arith.mulf %6, %8 : vector<128x16xf32>
    %c0_9 = arith.constant 0 : index
    %c0_10 = arith.constant 0 : index
    %10 = vector.load %arg45[%c0_9, %c0_10] : memref<128x144xf32, #tpu.memory_space<vmem>>, vector<128x16xf32>
    tpu.vector_store %arg45[%c0_9, %c0_10], %9 {strides = array<i32>} : memref<128x144xf32, #tpu.memory_space<vmem>>, vector<128x16xf32>,
    %c1 = arith.constant 1 : index
    %c0_11 = arith.constant 0 : index
    %11 = vector.load %arg44[%c1, %c0_11] : memref<146x16xf32, #tpu.memory_space<vmem>>, vector<128x16xf32>
    %12 = vector.extract_strided_slice %0 {offsets = [0, 1], sizes = [128, 1], strides = [1, 1]} : vector<128x9xf32> to vector<128x1xf32>
    %13 = vector.broadcast %12 : vector<128x1xf32> to vector<128x16xf32>
    %14 = arith.mulf %11, %13 : vector<128x16xf32>
    %c0_12 = arith.constant 0 : index
    %c16 = arith.constant 16 : index
    %15 = vector.load %arg45[%c0_12, %c16] : memref<128x144xf32, #tpu.memory_space<vmem>>, vector<128x16xf32>
    tpu.vector_store %arg45[%c0_12, %c16], %14 {strides = array<i32>} : memref<128x144xf32, #tpu.memory_space<vmem>>, vector<128x16xf32>,
    %c2 = arith.constant 2 : index
    %c0_13 = arith.constant 0 : index
    %16 = vector.load %arg44[%c2, %c0_13] : memref<146x16xf32, #tpu.memory_space<vmem>>, vector<128x16xf32>
    %17 = vector.extract_strided_slice %0 {offsets = [0, 2], sizes = [128, 1], strides = [1, 1]} : vector<128x9xf32> to vector<128x1xf32>
    %18 = vector.broadcast %17 : vector<128x1xf32> to vector<128x16xf32>
    %19 = arith.mulf %16, %18 : vector<128x16xf32>
    %c0_14 = arith.constant 0 : index
    %c32 = arith.constant 32 : index
    %20 = vector.load %arg45[%c0_14, %c32] : memref<128x144xf32, #tpu.memory_space<vmem>>, vector<128x16xf32>
    tpu.vector_store %arg45[%c0_14, %c32], %19 {strides = array<i32>} : memref<128x144xf32, #tpu.memory_space<vmem>>, vector<128x16xf32>,
    %c8 = arith.constant 8 : index
    %c0_15 = arith.constant 0 : index
    %21 = vector.load %arg44[%c8, %c0_15] : memref<146x16xf32, #tpu.memory_space<vmem>>, vector<128x16xf32>
    %22 = vector.extract_strided_slice %0 {offsets = [0, 3], sizes = [128, 1], strides = [1, 1]} : vector<128x9xf32> to vector<128x1xf32>
    %23 = vector.broadcast %22 : vector<128x1xf32> to vector<128x16xf32>
    %24 = arith.mulf %21, %23 : vector<128x16xf32>
    %c0_16 = arith.constant 0 : index
    %c48 = arith.constant 48 : index
    %25 = vector.load %arg45[%c0_16, %c48] : memref<128x144xf32, #tpu.memory_space<vmem>>, vector<128x16xf32>
    tpu.vector_store %arg45[%c0_16, %c48], %24 {strides = array<i32>} : memref<128x144xf32, #tpu.memory_space<vmem>>, vector<128x16xf32>,
    %c9_17 = arith.constant 9 : index
    %c0_18 = arith.constant 0 : index
    %26 = vector.load %arg44[%c9_17, %c0_18] : memref<146x16xf32, #tpu.memory_space<vmem>>, vector<128x16xf32>
    %27 = vector.extract_strided_slice %0 {offsets = [0, 4], sizes = [128, 1], strides = [1, 1]} : vector<128x9xf32> to vector<128x1xf32>
    %28 = vector.broadcast %27 : vector<128x1xf32> to vector<128x16xf32>
    %29 = arith.mulf %26, %28 : vector<128x16xf32>
    %c0_19 = arith.constant 0 : index
    %c64 = arith.constant 64 : index
    %30 = vector.load %arg45[%c0_19, %c64] : memref<128x144xf32, #tpu.memory_space<vmem>>, vector<128x16xf32>
    tpu.vector_store %arg45[%c0_19, %c64], %29 {strides = array<i32>} : memref<128x144xf32, #tpu.memory_space<vmem>>, vector<128x16xf32>,
    %c10 = arith.constant 10 : index
    %c0_20 = arith.constant 0 : index
    %31 = vector.load %arg44[%c10, %c0_20] : memref<146x16xf32, #tpu.memory_space<vmem>>, vector<128x16xf32>
    %32 = vector.extract_strided_slice %0 {offsets = [0, 5], sizes = [128, 1], strides = [1, 1]} : vector<128x9xf32> to vector<128x1xf32>
    %33 = vector.broadcast %32 : vector<128x1xf32> to vector<128x16xf32>
    %34 = arith.mulf %31, %33 : vector<128x16xf32>
    %c0_21 = arith.constant 0 : index
    %c80 = arith.constant 80 : index
    %35 = vector.load %arg45[%c0_21, %c80] : memref<128x144xf32, #tpu.memory_space<vmem>>, vector<128x16xf32>
    tpu.vector_store %arg45[%c0_21, %c80], %34 {strides = array<i32>} : memref<128x144xf32, #tpu.memory_space<vmem>>, vector<128x16xf32>,
    %c16_22 = arith.constant 16 : index
    %c0_23 = arith.constant 0 : index
    %36 = vector.load %arg44[%c16_22, %c0_23] : memref<146x16xf32, #tpu.memory_space<vmem>>, vector<128x16xf32>
    %37 = vector.extract_strided_slice %0 {offsets = [0, 6], sizes = [128, 1], strides = [1, 1]} : vector<128x9xf32> to vector<128x1xf32>
    %38 = vector.broadcast %37 : vector<128x1xf32> to vector<128x16xf32>
    %39 = arith.mulf %36, %38 : vector<128x16xf32>
    %c0_24 = arith.constant 0 : index
    %c96 = arith.constant 96 : index
    %40 = vector.load %arg45[%c0_24, %c96] : memref<128x144xf32, #tpu.memory_space<vmem>>, vector<128x16xf32>
    tpu.vector_store %arg45[%c0_24, %c96], %39 {strides = array<i32>} : memref<128x144xf32, #tpu.memory_space<vmem>>, vector<128x16xf32>,
    %c17 = arith.constant 17 : index
    %c0_25 = arith.constant 0 : index
    %41 = vector.load %arg44[%c17, %c0_25] : memref<146x16xf32, #tpu.memory_space<vmem>>, vector<128x16xf32>
    %42 = vector.extract_strided_slice %0 {offsets = [0, 7], sizes = [128, 1], strides = [1, 1]} : vector<128x9xf32> to vector<128x1xf32>
    %43 = vector.broadcast %42 : vector<128x1xf32> to vector<128x16xf32>
    %44 = arith.mulf %41, %43 : vector<128x16xf32>
    %c0_26 = arith.constant 0 : index
    %c112 = arith.constant 112 : index
    %45 = vector.load %arg45[%c0_26, %c112] : memref<128x144xf32, #tpu.memory_space<vmem>>, vector<128x16xf32>
    tpu.vector_store %arg45[%c0_26, %c112], %44 {strides = array<i32>} : memref<128x144xf32, #tpu.memory_space<vmem>>, vector<128x16xf32>,
    %c18 = arith.constant 18 : index
    %c0_27 = arith.constant 0 : index
    %46 = vector.load %arg44[%c18, %c0_27] : memref<146x16xf32, #tpu.memory_space<vmem>>, vector<128x16xf32>
    %47 = vector.extract_strided_slice %0 {offsets = [0, 8], sizes = [128, 1], strides = [1, 1]} : vector<128x9xf32> to vector<128x1xf32>
    %48 = vector.broadcast %47 : vector<128x1xf32> to vector<128x16xf32>
    %49 = arith.mulf %46, %48 : vector<128x16xf32>
    %c0_28 = arith.constant 0 : index
    %c128 = arith.constant 128 : index
    %50 = vector.load %arg45[%c0_28, %c128] : memref<128x144xf32, #tpu.memory_space<vmem>>, vector<128x16xf32>
    tpu.vector_store %arg45[%c0_28, %c128], %49 {strides = array<i32>} : memref<128x144xf32, #tpu.memory_space<vmem>>, vector<128x16xf32>,
    %c0_29 = arith.constant 0 : index
    %c0_30 = arith.constant 0 : index
    %51 = vector.load %arg45[%c0_29, %c0_30] : memref<128x144xf32, #tpu.memory_space<vmem>>, vector<128x144xf32>
    %c0_31 = arith.constant 0 : index
    %c0_32 = arith.constant 0 : index
    %52 = vector.load %arg4[%c0_31, %c0_32] : memref<144x16xf32, #tpu.memory_space<vmem>>, vector<144x16xf32>
    %53 = arith.truncf %51 : vector<128x144xf32> to vector<128x144xbf16>
    %54 = arith.truncf %52 : vector<144x16xf32> to vector<144x16xbf16>
    %cst_33 = arith.constant dense<0.000000e+00> : vector<128x16xf32>
    %55 = tpu.matmul %53, %54, %cst_33 {dimension_numbers = #tpu.dot_dimension_numbers<[1], [0], [0], [1], [0, 0, 1, 1], [], []>} : vector<128x144xbf16>, vector<144x16xbf16>, vector<128x16xf32> -> vector<128x16xf32>
    %c0_34 = arith.constant 0 : index
    %c0_35 = arith.constant 0 : index
    %56 = vector.load %arg5[%c0_34, %c0_35] : memref<1x16xf32, #tpu.memory_space<vmem>>, vector<1x16xf32>
    %57 = vector.broadcast %56 : vector<1x16xf32> to vector<128x16xf32>
    %58 = arith.mulf %55, %57 : vector<128x16xf32>
    %c0_36 = arith.constant 0 : index
    %c0_37 = arith.constant 0 : index
    %59 = vector.load %arg6[%c0_36, %c0_37] : memref<1x16xf32, #tpu.memory_space<vmem>>, vector<1x16xf32>
    %60 = vector.broadcast %59 : vector<1x16xf32> to vector<128x16xf32>
    %61 = arith.addf %58, %60 : vector<128x16xf32>
    %cst_38 = arith.constant 0.000000e+00 : f32
    %62 = vector.broadcast %cst_38 : f32 to vector<128x16xf32>
    %63 = arith.maximumf %61, %62 : vector<128x16xf32>
    %c9_39 = arith.constant 9 : index
    %c0_40 = arith.constant 0 : index
    %64 = vector.load %arg44[%c9_39, %c0_40] : memref<146x16xf32, #tpu.memory_space<vmem>>, vector<128x16xf32>
    tpu.vector_store %arg44[%c9_39, %c0_40], %63 {strides = array<i32>} : memref<146x16xf32, #tpu.memory_space<vmem>>, vector<128x16xf32>,
    %c0_41 = arith.constant 0 : index
    %c0_42 = arith.constant 0 : index
    %65 = vector.load %arg44[%c0_41, %c0_42] : memref<146x16xf32, #tpu.memory_space<vmem>>, vector<128x16xf32>
    %66 = vector.extract_strided_slice %0 {offsets = [0, 0], sizes = [128, 1], strides = [1, 1]} : vector<128x9xf32> to vector<128x1xf32>
    %67 = vector.broadcast %66 : vector<128x1xf32> to vector<128x16xf32>
    %68 = arith.mulf %65, %67 : vector<128x16xf32>
    %c0_43 = arith.constant 0 : index
    %c0_44 = arith.constant 0 : index
    %69 = vector.load %arg45[%c0_43, %c0_44] : memref<128x144xf32, #tpu.memory_space<vmem>>, vector<128x16xf32>
    tpu.vector_store %arg45[%c0_43, %c0_44], %68 {strides = array<i32>} : memref<128x144xf32, #tpu.memory_space<vmem>>, vector<128x16xf32>,
    %c1_45 = arith.constant 1 : index
    %c0_46 = arith.constant 0 : index
    %70 = vector.load %arg44[%c1_45, %c0_46] : memref<146x16xf32, #tpu.memory_space<vmem>>, vector<128x16xf32>
    %71 = vector.extract_strided_slice %0 {offsets = [0, 1], sizes = [128, 1], strides = [1, 1]} : vector<128x9xf32> to vector<128x1xf32>
    %72 = vector.broadcast %71 : vector<128x1xf32> to vector<128x16xf32>
    %73 = arith.mulf %70, %72 : vector<128x16xf32>
    %c0_47 = arith.constant 0 : index
    %c16_48 = arith.constant 16 : index
    %74 = vector.load %arg45[%c0_47, %c16_48] : memref<128x144xf32, #tpu.memory_space<vmem>>, vector<128x16xf32>
    tpu.vector_store %arg45[%c0_47, %c16_48], %73 {strides = array<i32>} : memref<128x144xf32, #tpu.memory_space<vmem>>, vector<128x16xf32>,
    %c2_49 = arith.constant 2 : index
    %c0_50 = arith.constant 0 : index
    %75 = vector.load %arg44[%c2_49, %c0_50] : memref<146x16xf32, #tpu.memory_space<vmem>>, vector<128x16xf32>
    %76 = vector.extract_strided_slice %0 {offsets = [0, 2], sizes = [128, 1], strides = [1, 1]} : vector<128x9xf32> to vector<128x1xf32>
    %77 = vector.broadcast %76 : vector<128x1xf32> to vector<128x16xf32>
    %78 = arith.mulf %75, %77 : vector<128x16xf32>
    %c0_51 = arith.constant 0 : index
    %c32_52 = arith.constant 32 : index
    %79 = vector.load %arg45[%c0_51, %c32_52] : memref<128x144xf32, #tpu.memory_space<vmem>>, vector<128x16xf32>
    tpu.vector_store %arg45[%c0_51, %c32_52], %78 {strides = array<i32>} : memref<128x144xf32, #tpu.memory_space<vmem>>, vector<128x16xf32>,
    %c8_53 = arith.constant 8 : index
    %c0_54 = arith.constant 0 : index
    %80 = vector.load %arg44[%c8_53, %c0_54] : memref<146x16xf32, #tpu.memory_space<vmem>>, vector<128x16xf32>
    %81 = vector.extract_strided_slice %0 {offsets = [0, 3], sizes = [128, 1], strides = [1, 1]} : vector<128x9xf32> to vector<128x1xf32>
    %82 = vector.broadcast %81 : vector<128x1xf32> to vector<128x16xf32>
    %83 = arith.mulf %80, %82 : vector<128x16xf32>
    %c0_55 = arith.constant 0 : index
    %c48_56 = arith.constant 48 : index
    %84 = vector.load %arg45[%c0_55, %c48_56] : memref<128x144xf32, #tpu.memory_space<vmem>>, vector<128x16xf32>
    tpu.vector_store %arg45[%c0_55, %c48_56], %83 {strides = array<i32>} : memref<128x144xf32, #tpu.memory_space<vmem>>, vector<128x16xf32>,
    %c9_57 = arith.constant 9 : index
    %c0_58 = arith.constant 0 : index
    %85 = vector.load %arg44[%c9_57, %c0_58] : memref<146x16xf32, #tpu.memory_space<vmem>>, vector<128x16xf32>
    %86 = vector.extract_strided_slice %0 {offsets = [0, 4], sizes = [128, 1], strides = [1, 1]} : vector<128x9xf32> to vector<128x1xf32>
    %87 = vector.broadcast %86 : vector<128x1xf32> to vector<128x16xf32>
    %88 = arith.mulf %85, %87 : vector<128x16xf32>
    %c0_59 = arith.constant 0 : index
    %c64_60 = arith.constant 64 : index
    %89 = vector.load %arg45[%c0_59, %c64_60] : memref<128x144xf32, #tpu.memory_space<vmem>>, vector<128x16xf32>
    tpu.vector_store %arg45[%c0_59, %c64_60], %88 {strides = array<i32>} : memref<128x144xf32, #tpu.memory_space<vmem>>, vector<128x16xf32>,
    %c10_61 = arith.constant 10 : index
    %c0_62 = arith.constant 0 : index
    %90 = vector.load %arg44[%c10_61, %c0_62] : memref<146x16xf32, #tpu.memory_space<vmem>>, vector<128x16xf32>
    %91 = vector.extract_strided_slice %0 {offsets = [0, 5], sizes = [128, 1], strides = [1, 1]} : vector<128x9xf32> to vector<128x1xf32>
    %92 = vector.broadcast %91 : vector<128x1xf32> to vector<128x16xf32>
    %93 = arith.mulf %90, %92 : vector<128x16xf32>
    %c0_63 = arith.constant 0 : index
    %c80_64 = arith.constant 80 : index
    %94 = vector.load %arg45[%c0_63, %c80_64] : memref<128x144xf32, #tpu.memory_space<vmem>>, vector<128x16xf32>
    tpu.vector_store %arg45[%c0_63, %c80_64], %93 {strides = array<i32>} : memref<128x144xf32, #tpu.memory_space<vmem>>, vector<128x16xf32>,
    %c16_65 = arith.constant 16 : index
    %c0_66 = arith.constant 0 : index
    %95 = vector.load %arg44[%c16_65, %c0_66] : memref<146x16xf32, #tpu.memory_space<vmem>>, vector<128x16xf32>
    %96 = vector.extract_strided_slice %0 {offsets = [0, 6], sizes = [128, 1], strides = [1, 1]} : vector<128x9xf32> to vector<128x1xf32>
    %97 = vector.broadcast %96 : vector<128x1xf32> to vector<128x16xf32>
    %98 = arith.mulf %95, %97 : vector<128x16xf32>
    %c0_67 = arith.constant 0 : index
    %c96_68 = arith.constant 96 : index
    %99 = vector.load %arg45[%c0_67, %c96_68] : memref<128x144xf32, #tpu.memory_space<vmem>>, vector<128x16xf32>
    tpu.vector_store %arg45[%c0_67, %c96_68], %98 {strides = array<i32>} : memref<128x144xf32, #tpu.memory_space<vmem>>, vector<128x16xf32>,
    %c17_69 = arith.constant 17 : index
    %c0_70 = arith.constant 0 : index
    %100 = vector.load %arg44[%c17_69, %c0_70] : memref<146x16xf32, #tpu.memory_space<vmem>>, vector<128x16xf32>
    %101 = vector.extract_strided_slice %0 {offsets = [0, 7], sizes = [128, 1], strides = [1, 1]} : vector<128x9xf32> to vector<128x1xf32>
    %102 = vector.broadcast %101 : vector<128x1xf32> to vector<128x16xf32>
    %103 = arith.mulf %100, %102 : vector<128x16xf32>
    %c0_71 = arith.constant 0 : index
    %c112_72 = arith.constant 112 : index
    %104 = vector.load %arg45[%c0_71, %c112_72] : memref<128x144xf32, #tpu.memory_space<vmem>>, vector<128x16xf32>
    tpu.vector_store %arg45[%c0_71, %c112_72], %103 {strides = array<i32>} : memref<128x144xf32, #tpu.memory_space<vmem>>, vector<128x16xf32>,
    %c18_73 = arith.constant 18 : index
    %c0_74 = arith.constant 0 : index
    %105 = vector.load %arg44[%c18_73, %c0_74] : memref<146x16xf32, #tpu.memory_space<vmem>>, vector<128x16xf32>
    %106 = vector.extract_strided_slice %0 {offsets = [0, 8], sizes = [128, 1], strides = [1, 1]} : vector<128x9xf32> to vector<128x1xf32>
    %107 = vector.broadcast %106 : vector<128x1xf32> to vector<128x16xf32>
    %108 = arith.mulf %105, %107 : vector<128x16xf32>
    %c0_75 = arith.constant 0 : index
    %c128_76 = arith.constant 128 : index
    %109 = vector.load %arg45[%c0_75, %c128_76] : memref<128x144xf32, #tpu.memory_space<vmem>>, vector<128x16xf32>
    tpu.vector_store %arg45[%c0_75, %c128_76], %108 {strides = array<i32>} : memref<128x144xf32, #tpu.memory_space<vmem>>, vector<128x16xf32>,
    %c0_77 = arith.constant 0 : index
    %c0_78 = arith.constant 0 : index
    %110 = vector.load %arg45[%c0_77, %c0_78] : memref<128x144xf32, #tpu.memory_space<vmem>>, vector<128x144xf32>
    %c0_79 = arith.constant 0 : index
    %c0_80 = arith.constant 0 : index
    %111 = vector.load %arg7[%c0_79, %c0_80] : memref<144x16xf32, #tpu.memory_space<vmem>>, vector<144x16xf32>
    %112 = arith.truncf %110 : vector<128x144xf32> to vector<128x144xbf16>
    %113 = arith.truncf %111 : vector<144x16xf32> to vector<144x16xbf16>
    %cst_81 = arith.constant dense<0.000000e+00> : vector<128x16xf32>
    %114 = tpu.matmul %112, %113, %cst_81 {dimension_numbers = #tpu.dot_dimension_numbers<[1], [0], [0], [1], [0, 0, 1, 1], [], []>} : vector<128x144xbf16>, vector<144x16xbf16>, vector<128x16xf32> -> vector<128x16xf32>
    %c0_82 = arith.constant 0 : index
    %c0_83 = arith.constant 0 : index
    %115 = vector.load %arg8[%c0_82, %c0_83] : memref<1x16xf32, #tpu.memory_space<vmem>>, vector<1x16xf32>
    %116 = vector.broadcast %115 : vector<1x16xf32> to vector<128x16xf32>
    %117 = arith.mulf %114, %116 : vector<128x16xf32>
    %c0_84 = arith.constant 0 : index
    %c0_85 = arith.constant 0 : index
    %118 = vector.load %arg9[%c0_84, %c0_85] : memref<1x16xf32, #tpu.memory_space<vmem>>, vector<1x16xf32>
    %119 = vector.broadcast %118 : vector<1x16xf32> to vector<128x16xf32>
    %120 = arith.addf %117, %119 : vector<128x16xf32>
    %cst_86 = arith.constant 0.000000e+00 : f32
    %121 = vector.broadcast %cst_86 : f32 to vector<128x16xf32>
    %122 = arith.maximumf %120, %121 : vector<128x16xf32>
    %c9_87 = arith.constant 9 : index
    %c0_88 = arith.constant 0 : index
    %123 = vector.load %arg44[%c9_87, %c0_88] : memref<146x16xf32, #tpu.memory_space<vmem>>, vector<128x16xf32>
    tpu.vector_store %arg44[%c9_87, %c0_88], %122 {strides = array<i32>} : memref<146x16xf32, #tpu.memory_space<vmem>>, vector<128x16xf32>,
    %c0_89 = arith.constant 0 : index
    %c0_90 = arith.constant 0 : index
    %124 = vector.load %arg44[%c0_89, %c0_90] : memref<146x16xf32, #tpu.memory_space<vmem>>, vector<128x16xf32>
    %125 = vector.extract_strided_slice %0 {offsets = [0, 0], sizes = [128, 1], strides = [1, 1]} : vector<128x9xf32> to vector<128x1xf32>
    %126 = vector.broadcast %125 : vector<128x1xf32> to vector<128x16xf32>
    %127 = arith.mulf %124, %126 : vector<128x16xf32>
    %c0_91 = arith.constant 0 : index
    %c0_92 = arith.constant 0 : index
    %128 = vector.load %arg45[%c0_91, %c0_92] : memref<128x144xf32, #tpu.memory_space<vmem>>, vector<128x16xf32>
    tpu.vector_store %arg45[%c0_91, %c0_92], %127 {strides = array<i32>} : memref<128x144xf32, #tpu.memory_space<vmem>>, vector<128x16xf32>,
    %c1_93 = arith.constant 1 : index
    %c0_94 = arith.constant 0 : index
    %129 = vector.load %arg44[%c1_93, %c0_94] : memref<146x16xf32, #tpu.memory_space<vmem>>, vector<128x16xf32>
    %130 = vector.extract_strided_slice %0 {offsets = [0, 1], sizes = [128, 1], strides = [1, 1]} : vector<128x9xf32> to vector<128x1xf32>
    %131 = vector.broadcast %130 : vector<128x1xf32> to vector<128x16xf32>
    %132 = arith.mulf %129, %131 : vector<128x16xf32>
    %c0_95 = arith.constant 0 : index
    %c16_96 = arith.constant 16 : index
    %133 = vector.load %arg45[%c0_95, %c16_96] : memref<128x144xf32, #tpu.memory_space<vmem>>, vector<128x16xf32>
    tpu.vector_store %arg45[%c0_95, %c16_96], %132 {strides = array<i32>} : memref<128x144xf32, #tpu.memory_space<vmem>>, vector<128x16xf32>,
    %c2_97 = arith.constant 2 : index
    %c0_98 = arith.constant 0 : index
    %134 = vector.load %arg44[%c2_97, %c0_98] : memref<146x16xf32, #tpu.memory_space<vmem>>, vector<128x16xf32>
    %135 = vector.extract_strided_slice %0 {offsets = [0, 2], sizes = [128, 1], strides = [1, 1]} : vector<128x9xf32> to vector<128x1xf32>
    %136 = vector.broadcast %135 : vector<128x1xf32> to vector<128x16xf32>
    %137 = arith.mulf %134, %136 : vector<128x16xf32>
    %c0_99 = arith.constant 0 : index
    %c32_100 = arith.constant 32 : index
    %138 = vector.load %arg45[%c0_99, %c32_100] : memref<128x144xf32, #tpu.memory_space<vmem>>, vector<128x16xf32>
    tpu.vector_store %arg45[%c0_99, %c32_100], %137 {strides = array<i32>} : memref<128x144xf32, #tpu.memory_space<vmem>>, vector<128x16xf32>,
    %c8_101 = arith.constant 8 : index
    %c0_102 = arith.constant 0 : index
    %139 = vector.load %arg44[%c8_101, %c0_102] : memref<146x16xf32, #tpu.memory_space<vmem>>, vector<128x16xf32>
    %140 = vector.extract_strided_slice %0 {offsets = [0, 3], sizes = [128, 1], strides = [1, 1]} : vector<128x9xf32> to vector<128x1xf32>
    %141 = vector.broadcast %140 : vector<128x1xf32> to vector<128x16xf32>
    %142 = arith.mulf %139, %141 : vector<128x16xf32>
    %c0_103 = arith.constant 0 : index
    %c48_104 = arith.constant 48 : index
    %143 = vector.load %arg45[%c0_103, %c48_104] : memref<128x144xf32, #tpu.memory_space<vmem>>, vector<128x16xf32>
    tpu.vector_store %arg45[%c0_103, %c48_104], %142 {strides = array<i32>} : memref<128x144xf32, #tpu.memory_space<vmem>>, vector<128x16xf32>,
    %c9_105 = arith.constant 9 : index
    %c0_106 = arith.constant 0 : index
    %144 = vector.load %arg44[%c9_105, %c0_106] : memref<146x16xf32, #tpu.memory_space<vmem>>, vector<128x16xf32>
    %145 = vector.extract_strided_slice %0 {offsets = [0, 4], sizes = [128, 1], strides = [1, 1]} : vector<128x9xf32> to vector<128x1xf32>
    %146 = vector.broadcast %145 : vector<128x1xf32> to vector<128x16xf32>
    %147 = arith.mulf %144, %146 : vector<128x16xf32>
    %c0_107 = arith.constant 0 : index
    %c64_108 = arith.constant 64 : index
    %148 = vector.load %arg45[%c0_107, %c64_108] : memref<128x144xf32, #tpu.memory_space<vmem>>, vector<128x16xf32>
    tpu.vector_store %arg45[%c0_107, %c64_108], %147 {strides = array<i32>} : memref<128x144xf32, #tpu.memory_space<vmem>>, vector<128x16xf32>,
    %c10_109 = arith.constant 10 : index
    %c0_110 = arith.constant 0 : index
    %149 = vector.load %arg44[%c10_109, %c0_110] : memref<146x16xf32, #tpu.memory_space<vmem>>, vector<128x16xf32>
    %150 = vector.extract_strided_slice %0 {offsets = [0, 5], sizes = [128, 1], strides = [1, 1]} : vector<128x9xf32> to vector<128x1xf32>
    %151 = vector.broadcast %150 : vector<128x1xf32> to vector<128x16xf32>
    %152 = arith.mulf %149, %151 : vector<128x16xf32>
    %c0_111 = arith.constant 0 : index
    %c80_112 = arith.constant 80 : index
    %153 = vector.load %arg45[%c0_111, %c80_112] : memref<128x144xf32, #tpu.memory_space<vmem>>, vector<128x16xf32>
    tpu.vector_store %arg45[%c0_111, %c80_112], %152 {strides = array<i32>} : memref<128x144xf32, #tpu.memory_space<vmem>>, vector<128x16xf32>,
    %c16_113 = arith.constant 16 : index
    %c0_114 = arith.constant 0 : index
    %154 = vector.load %arg44[%c16_113, %c0_114] : memref<146x16xf32, #tpu.memory_space<vmem>>, vector<128x16xf32>
    %155 = vector.extract_strided_slice %0 {offsets = [0, 6], sizes = [128, 1], strides = [1, 1]} : vector<128x9xf32> to vector<128x1xf32>
    %156 = vector.broadcast %155 : vector<128x1xf32> to vector<128x16xf32>
    %157 = arith.mulf %154, %156 : vector<128x16xf32>
    %c0_115 = arith.constant 0 : index
    %c96_116 = arith.constant 96 : index
    %158 = vector.load %arg45[%c0_115, %c96_116] : memref<128x144xf32, #tpu.memory_space<vmem>>, vector<128x16xf32>
    tpu.vector_store %arg45[%c0_115, %c96_116], %157 {strides = array<i32>} : memref<128x144xf32, #tpu.memory_space<vmem>>, vector<128x16xf32>,
    %c17_117 = arith.constant 17 : index
    %c0_118 = arith.constant 0 : index
    %159 = vector.load %arg44[%c17_117, %c0_118] : memref<146x16xf32, #tpu.memory_space<vmem>>, vector<128x16xf32>
    %160 = vector.extract_strided_slice %0 {offsets = [0, 7], sizes = [128, 1], strides = [1, 1]} : vector<128x9xf32> to vector<128x1xf32>
    %161 = vector.broadcast %160 : vector<128x1xf32> to vector<128x16xf32>
    %162 = arith.mulf %159, %161 : vector<128x16xf32>
    %c0_119 = arith.constant 0 : index
    %c112_120 = arith.constant 112 : index
    %163 = vector.load %arg45[%c0_119, %c112_120] : memref<128x144xf32, #tpu.memory_space<vmem>>, vector<128x16xf32>
    tpu.vector_store %arg45[%c0_119, %c112_120], %162 {strides = array<i32>} : memref<128x144xf32, #tpu.memory_space<vmem>>, vector<128x16xf32>,
    %c18_121 = arith.constant 18 : index
    %c0_122 = arith.constant 0 : index
    %164 = vector.load %arg44[%c18_121, %c0_122] : memref<146x16xf32, #tpu.memory_space<vmem>>, vector<128x16xf32>
    %165 = vector.extract_strided_slice %0 {offsets = [0, 8], sizes = [128, 1], strides = [1, 1]} : vector<128x9xf32> to vector<128x1xf32>
    %166 = vector.broadcast %165 : vector<128x1xf32> to vector<128x16xf32>
    %167 = arith.mulf %164, %166 : vector<128x16xf32>
    %c0_123 = arith.constant 0 : index
    %c128_124 = arith.constant 128 : index
    %168 = vector.load %arg45[%c0_123, %c128_124] : memref<128x144xf32, #tpu.memory_space<vmem>>, vector<128x16xf32>
    tpu.vector_store %arg45[%c0_123, %c128_124], %167 {strides = array<i32>} : memref<128x144xf32, #tpu.memory_space<vmem>>, vector<128x16xf32>,
    %c0_125 = arith.constant 0 : index
    %c0_126 = arith.constant 0 : index
    %169 = vector.load %arg45[%c0_125, %c0_126] : memref<128x144xf32, #tpu.memory_space<vmem>>, vector<128x144xf32>
    %c0_127 = arith.constant 0 : index
    %c0_128 = arith.constant 0 : index
    %170 = vector.load %arg10[%c0_127, %c0_128] : memref<144x16xf32, #tpu.memory_space<vmem>>, vector<144x16xf32>
    %171 = arith.truncf %169 : vector<128x144xf32> to vector<128x144xbf16>
    %172 = arith.truncf %170 : vector<144x16xf32> to vector<144x16xbf16>
    %cst_129 = arith.constant dense<0.000000e+00> : vector<128x16xf32>
    %173 = tpu.matmul %171, %172, %cst_129 {dimension_numbers = #tpu.dot_dimension_numbers<[1], [0], [0], [1], [0, 0, 1, 1], [], []>} : vector<128x144xbf16>, vector<144x16xbf16>, vector<128x16xf32> -> vector<128x16xf32>
    %c0_130 = arith.constant 0 : index
    %c0_131 = arith.constant 0 : index
    %174 = vector.load %arg11[%c0_130, %c0_131] : memref<1x16xf32, #tpu.memory_space<vmem>>, vector<1x16xf32>
    %175 = vector.broadcast %174 : vector<1x16xf32> to vector<128x16xf32>
    %176 = arith.mulf %173, %175 : vector<128x16xf32>
    %c0_132 = arith.constant 0 : index
    %c0_133 = arith.constant 0 : index
    %177 = vector.load %arg12[%c0_132, %c0_133] : memref<1x16xf32, #tpu.memory_space<vmem>>, vector<1x16xf32>
    %178 = vector.broadcast %177 : vector<1x16xf32> to vector<128x16xf32>
    %179 = arith.addf %176, %178 : vector<128x16xf32>
    %180 = arith.addf %179, %63 : vector<128x16xf32>
    %cst_134 = arith.constant 0.000000e+00 : f32
    %181 = vector.broadcast %cst_134 : f32 to vector<128x16xf32>
    %182 = arith.maximumf %180, %181 : vector<128x16xf32>
    %c9_135 = arith.constant 9 : index
    %c0_136 = arith.constant 0 : index
    %183 = vector.load %arg44[%c9_135, %c0_136] : memref<146x16xf32, #tpu.memory_space<vmem>>, vector<128x16xf32>
    tpu.vector_store %arg44[%c9_135, %c0_136], %182 {strides = array<i32>} : memref<146x16xf32, #tpu.memory_space<vmem>>, vector<128x16xf32>,
    %c0_137 = arith.constant 0 : index
    %c0_138 = arith.constant 0 : index
    %184 = vector.load %arg44[%c0_137, %c0_138] : memref<146x16xf32, #tpu.memory_space<vmem>>, vector<128x16xf32>
    %185 = vector.extract_strided_slice %0 {offsets = [0, 0], sizes = [128, 1], strides = [1, 1]} : vector<128x9xf32> to vector<128x1xf32>
    %186 = vector.broadcast %185 : vector<128x1xf32> to vector<128x16xf32>
    %187 = arith.mulf %184, %186 : vector<128x16xf32>
    %c0_139 = arith.constant 0 : index
    %c0_140 = arith.constant 0 : index
    %188 = vector.load %arg45[%c0_139, %c0_140] : memref<128x144xf32, #tpu.memory_space<vmem>>, vector<128x16xf32>
    tpu.vector_store %arg45[%c0_139, %c0_140], %187 {strides = array<i32>} : memref<128x144xf32, #tpu.memory_space<vmem>>, vector<128x16xf32>,
    %c1_141 = arith.constant 1 : index
    %c0_142 = arith.constant 0 : index
    %189 = vector.load %arg44[%c1_141, %c0_142] : memref<146x16xf32, #tpu.memory_space<vmem>>, vector<128x16xf32>
    %190 = vector.extract_strided_slice %0 {offsets = [0, 1], sizes = [128, 1], strides = [1, 1]} : vector<128x9xf32> to vector<128x1xf32>
    %191 = vector.broadcast %190 : vector<128x1xf32> to vector<128x16xf32>
    %192 = arith.mulf %189, %191 : vector<128x16xf32>
    %c0_143 = arith.constant 0 : index
    %c16_144 = arith.constant 16 : index
    %193 = vector.load %arg45[%c0_143, %c16_144] : memref<128x144xf32, #tpu.memory_space<vmem>>, vector<128x16xf32>
    tpu.vector_store %arg45[%c0_143, %c16_144], %192 {strides = array<i32>} : memref<128x144xf32, #tpu.memory_space<vmem>>, vector<128x16xf32>,
    %c2_145 = arith.constant 2 : index
    %c0_146 = arith.constant 0 : index
    %194 = vector.load %arg44[%c2_145, %c0_146] : memref<146x16xf32, #tpu.memory_space<vmem>>, vector<128x16xf32>
    %195 = vector.extract_strided_slice %0 {offsets = [0, 2], sizes = [128, 1], strides = [1, 1]} : vector<128x9xf32> to vector<128x1xf32>
    %196 = vector.broadcast %195 : vector<128x1xf32> to vector<128x16xf32>
    %197 = arith.mulf %194, %196 : vector<128x16xf32>
    %c0_147 = arith.constant 0 : index
    %c32_148 = arith.constant 32 : index
    %198 = vector.load %arg45[%c0_147, %c32_148] : memref<128x144xf32, #tpu.memory_space<vmem>>, vector<128x16xf32>
    tpu.vector_store %arg45[%c0_147, %c32_148], %197 {strides = array<i32>} : memref<128x144xf32, #tpu.memory_space<vmem>>, vector<128x16xf32>,
    %c8_149 = arith.constant 8 : index
    %c0_150 = arith.constant 0 : index
    %199 = vector.load %arg44[%c8_149, %c0_150] : memref<146x16xf32, #tpu.memory_space<vmem>>, vector<128x16xf32>
    %200 = vector.extract_strided_slice %0 {offsets = [0, 3], sizes = [128, 1], strides = [1, 1]} : vector<128x9xf32> to vector<128x1xf32>
    %201 = vector.broadcast %200 : vector<128x1xf32> to vector<128x16xf32>
    %202 = arith.mulf %199, %201 : vector<128x16xf32>
    %c0_151 = arith.constant 0 : index
    %c48_152 = arith.constant 48 : index
    %203 = vector.load %arg45[%c0_151, %c48_152] : memref<128x144xf32, #tpu.memory_space<vmem>>, vector<128x16xf32>
    tpu.vector_store %arg45[%c0_151, %c48_152], %202 {strides = array<i32>} : memref<128x144xf32, #tpu.memory_space<vmem>>, vector<128x16xf32>,
    %c9_153 = arith.constant 9 : index
    %c0_154 = arith.constant 0 : index
    %204 = vector.load %arg44[%c9_153, %c0_154] : memref<146x16xf32, #tpu.memory_space<vmem>>, vector<128x16xf32>
    %205 = vector.extract_strided_slice %0 {offsets = [0, 4], sizes = [128, 1], strides = [1, 1]} : vector<128x9xf32> to vector<128x1xf32>
    %206 = vector.broadcast %205 : vector<128x1xf32> to vector<128x16xf32>
    %207 = arith.mulf %204, %206 : vector<128x16xf32>
    %c0_155 = arith.constant 0 : index
    %c64_156 = arith.constant 64 : index
    %208 = vector.load %arg45[%c0_155, %c64_156] : memref<128x144xf32, #tpu.memory_space<vmem>>, vector<128x16xf32>
    tpu.vector_store %arg45[%c0_155, %c64_156], %207 {strides = array<i32>} : memref<128x144xf32, #tpu.memory_space<vmem>>, vector<128x16xf32>,
    %c10_157 = arith.constant 10 : index
    %c0_158 = arith.constant 0 : index
    %209 = vector.load %arg44[%c10_157, %c0_158] : memref<146x16xf32, #tpu.memory_space<vmem>>, vector<128x16xf32>
    %210 = vector.extract_strided_slice %0 {offsets = [0, 5], sizes = [128, 1], strides = [1, 1]} : vector<128x9xf32> to vector<128x1xf32>
    %211 = vector.broadcast %210 : vector<128x1xf32> to vector<128x16xf32>
    %212 = arith.mulf %209, %211 : vector<128x16xf32>
    %c0_159 = arith.constant 0 : index
    %c80_160 = arith.constant 80 : index
    %213 = vector.load %arg45[%c0_159, %c80_160] : memref<128x144xf32, #tpu.memory_space<vmem>>, vector<128x16xf32>
    tpu.vector_store %arg45[%c0_159, %c80_160], %212 {strides = array<i32>} : memref<128x144xf32, #tpu.memory_space<vmem>>, vector<128x16xf32>,
    %c16_161 = arith.constant 16 : index
    %c0_162 = arith.constant 0 : index
    %214 = vector.load %arg44[%c16_161, %c0_162] : memref<146x16xf32, #tpu.memory_space<vmem>>, vector<128x16xf32>
    %215 = vector.extract_strided_slice %0 {offsets = [0, 6], sizes = [128, 1], strides = [1, 1]} : vector<128x9xf32> to vector<128x1xf32>
    %216 = vector.broadcast %215 : vector<128x1xf32> to vector<128x16xf32>
    %217 = arith.mulf %214, %216 : vector<128x16xf32>
    %c0_163 = arith.constant 0 : index
    %c96_164 = arith.constant 96 : index
    %218 = vector.load %arg45[%c0_163, %c96_164] : memref<128x144xf32, #tpu.memory_space<vmem>>, vector<128x16xf32>
    tpu.vector_store %arg45[%c0_163, %c96_164], %217 {strides = array<i32>} : memref<128x144xf32, #tpu.memory_space<vmem>>, vector<128x16xf32>,
    %c17_165 = arith.constant 17 : index
    %c0_166 = arith.constant 0 : index
    %219 = vector.load %arg44[%c17_165, %c0_166] : memref<146x16xf32, #tpu.memory_space<vmem>>, vector<128x16xf32>
    %220 = vector.extract_strided_slice %0 {offsets = [0, 7], sizes = [128, 1], strides = [1, 1]} : vector<128x9xf32> to vector<128x1xf32>
    %221 = vector.broadcast %220 : vector<128x1xf32> to vector<128x16xf32>
    %222 = arith.mulf %219, %221 : vector<128x16xf32>
    %c0_167 = arith.constant 0 : index
    %c112_168 = arith.constant 112 : index
    %223 = vector.load %arg45[%c0_167, %c112_168] : memref<128x144xf32, #tpu.memory_space<vmem>>, vector<128x16xf32>
    tpu.vector_store %arg45[%c0_167, %c112_168], %222 {strides = array<i32>} : memref<128x144xf32, #tpu.memory_space<vmem>>, vector<128x16xf32>,
    %c18_169 = arith.constant 18 : index
    %c0_170 = arith.constant 0 : index
    %224 = vector.load %arg44[%c18_169, %c0_170] : memref<146x16xf32, #tpu.memory_space<vmem>>, vector<128x16xf32>
    %225 = vector.extract_strided_slice %0 {offsets = [0, 8], sizes = [128, 1], strides = [1, 1]} : vector<128x9xf32> to vector<128x1xf32>
    %226 = vector.broadcast %225 : vector<128x1xf32> to vector<128x16xf32>
    %227 = arith.mulf %224, %226 : vector<128x16xf32>
    %c0_171 = arith.constant 0 : index
    %c128_172 = arith.constant 128 : index
    %228 = vector.load %arg45[%c0_171, %c128_172] : memref<128x144xf32, #tpu.memory_space<vmem>>, vector<128x16xf32>
    tpu.vector_store %arg45[%c0_171, %c128_172], %227 {strides = array<i32>} : memref<128x144xf32, #tpu.memory_space<vmem>>, vector<128x16xf32>,
    %c0_173 = arith.constant 0 : index
    %c0_174 = arith.constant 0 : index
    %229 = vector.load %arg45[%c0_173, %c0_174] : memref<128x144xf32, #tpu.memory_space<vmem>>, vector<128x144xf32>
    %c0_175 = arith.constant 0 : index
    %c0_176 = arith.constant 0 : index
    %230 = vector.load %arg13[%c0_175, %c0_176] : memref<144x8xf32, #tpu.memory_space<vmem>>, vector<144x8xf32>
    %231 = arith.truncf %229 : vector<128x144xf32> to vector<128x144xbf16>
    %232 = arith.truncf %230 : vector<144x8xf32> to vector<144x8xbf16>
    %cst_177 = arith.constant dense<0.000000e+00> : vector<128x8xf32>
    %233 = tpu.matmul %231, %232, %cst_177 {dimension_numbers = #tpu.dot_dimension_numbers<[1], [0], [0], [1], [0, 0, 1, 1], [], []>} : vector<128x144xbf16>, vector<144x8xbf16>, vector<128x8xf32> -> vector<128x8xf32>
    %c0_178 = arith.constant 0 : index
    %c0_179 = arith.constant 0 : index
    %234 = vector.load %arg14[%c0_178, %c0_179] : memref<1x8xf32, #tpu.memory_space<vmem>>, vector<1x8xf32>
    %235 = vector.broadcast %234 : vector<1x8xf32> to vector<128x8xf32>
    %236 = arith.mulf %233, %235 : vector<128x8xf32>
    %c0_180 = arith.constant 0 : index
    %c0_181 = arith.constant 0 : index
    %237 = vector.load %arg15[%c0_180, %c0_181] : memref<1x8xf32, #tpu.memory_space<vmem>>, vector<1x8xf32>
    %238 = vector.broadcast %237 : vector<1x8xf32> to vector<128x8xf32>
    %239 = arith.addf %236, %238 : vector<128x8xf32>
    %240 = vector.extract_strided_slice %239 {offsets = [0, 0], sizes = [64, 8], strides = [1, 1]} : vector<128x8xf32> to vector<64x8xf32>
    %241 = arith.truncf %240 : vector<64x8xf32> to vector<64x8xbf16>
    %c0_182 = arith.constant 0 : index
    %c0_183 = arith.constant 0 : index
    %242 = vector.load %arg16[%c0_182, %c0_183] : memref<64x32xf32, #tpu.memory_space<vmem>>, vector<64x32xf32>
    %243 = arith.truncf %242 : vector<64x32xf32> to vector<64x32xbf16>
    %cst_184 = arith.constant dense<0.000000e+00> : vector<8x32xf32>
    %244 = tpu.matmul %241, %243, %cst_184 {dimension_numbers = #tpu.dot_dimension_numbers<[0], [0], [1], [1], [0, 1, 1, 1], [], []>} : vector<64x8xbf16>, vector<64x32xbf16>, vector<8x32xf32> -> vector<8x32xf32>
    %245 = vector.extract_strided_slice %239 {offsets = [64, 0], sizes = [64, 8], strides = [1, 1]} : vector<128x8xf32> to vector<64x8xf32>
    %246 = arith.truncf %245 : vector<64x8xf32> to vector<64x8xbf16>
    %c0_185 = arith.constant 0 : index
    %c0_186 = arith.constant 0 : index
    %247 = vector.load %arg16[%c0_185, %c0_186] : memref<64x32xf32, #tpu.memory_space<vmem>>, vector<64x32xf32>
    %248 = arith.truncf %247 : vector<64x32xf32> to vector<64x32xbf16>
    %cst_187 = arith.constant dense<0.000000e+00> : vector<8x32xf32>
    %249 = tpu.matmul %246, %248, %cst_187 {dimension_numbers = #tpu.dot_dimension_numbers<[0], [0], [1], [1], [0, 1, 1, 1], [], []>} : vector<64x8xbf16>, vector<64x32xbf16>, vector<8x32xf32> -> vector<8x32xf32>
    %250 = vector.shape_cast %244 : vector<8x32xf32> to vector<1x8x32xf32>
    %251 = vector.shape_cast %249 : vector<8x32xf32> to vector<1x8x32xf32>
    %252 = tpu.concatenate %250, %251 in 0 : vector<1x8x32xf32>, vector<1x8x32xf32> -> vector<2x8x32xf32>
    %c0_188 = arith.constant 0 : index
    %c0_189 = arith.constant 0 : index
    %253 = vector.load %arg17[%c0_188, %c0_189] : memref<1x32xf32, #tpu.memory_space<vmem>>, vector<1x32xf32>
    %254 = vector.shape_cast %253 : vector<1x32xf32> to vector<1x1x32xf32>
    %255 = vector.broadcast %254 : vector<1x1x32xf32> to vector<2x8x32xf32>
    %256 = arith.addf %252, %255 : vector<2x8x32xf32>
    %c0_190 = arith.constant 0 : index
    %c0_191 = arith.constant 0 : index
    %257 = vector.load %arg18[%c0_190, %c0_191] : memref<1x32xf32, #tpu.memory_space<vmem>>, vector<1x32xf32>
    %c0_192 = arith.constant 0 : index
    %c0_193 = arith.constant 0 : index
    %258 = vector.load %arg19[%c0_192, %c0_193] : memref<1x32xf32, #tpu.memory_space<vmem>>, vector<1x32xf32>
    %cst_194 = arith.constant dense<0.000000e+00> : vector<2x8xf32>
    %259 = vector.multi_reduction <add>, %256, %cst_194 [2] : vector<2x8x32xf32> to vector<2x8xf32>
    %260 = vector.shape_cast %259 : vector<2x8xf32> to vector<2x8x1xf32>
    %cst_195 = arith.constant 3.200000e+01 : f32
    %261 = vector.broadcast %cst_195 : f32 to vector<2x8x1xf32>
    %262 = arith.divf %260, %261 : vector<2x8x1xf32>
    %263 = vector.broadcast %262 : vector<2x8x1xf32> to vector<2x8x32xf32>
    %264 = arith.subf %256, %263 : vector<2x8x32xf32>
    %265 = arith.mulf %264, %264 : vector<2x8x32xf32>
    %cst_196 = arith.constant dense<0.000000e+00> : vector<2x8xf32>
    %266 = vector.multi_reduction <add>, %265, %cst_196 [2] : vector<2x8x32xf32> to vector<2x8xf32>
    %267 = vector.shape_cast %266 : vector<2x8xf32> to vector<2x8x1xf32>
    %cst_197 = arith.constant 3.200000e+01 : f32
    %268 = vector.broadcast %cst_197 : f32 to vector<2x8x1xf32>
    %269 = arith.divf %267, %268 : vector<2x8x1xf32>
    %270 = vector.broadcast %262 : vector<2x8x1xf32> to vector<2x8x32xf32>
    %271 = arith.subf %256, %270 : vector<2x8x32xf32>
    %cst_198 = arith.constant 9.99999974E-6 : f32
    %272 = vector.broadcast %cst_198 : f32 to vector<2x8x1xf32>
    %273 = arith.addf %269, %272 : vector<2x8x1xf32>
    %274 = math.rsqrt %273 : vector<2x8x1xf32>
    %275 = vector.broadcast %274 : vector<2x8x1xf32> to vector<2x8x32xf32>
    %276 = arith.mulf %271, %275 : vector<2x8x32xf32>
    %277 = vector.shape_cast %257 : vector<1x32xf32> to vector<1x1x32xf32>
    %278 = vector.broadcast %277 : vector<1x1x32xf32> to vector<2x8x32xf32>
    %279 = arith.mulf %276, %278 : vector<2x8x32xf32>
    %280 = vector.shape_cast %258 : vector<1x32xf32> to vector<1x1x32xf32>
    %281 = vector.broadcast %280 : vector<1x1x32xf32> to vector<2x8x32xf32>
    %282 = arith.addf %279, %281 : vector<2x8x32xf32>
    %c0_199 = arith.constant 0 : index
    %c0_200 = arith.constant 0 : index
    %c0_201 = arith.constant 0 : index
    %283 = vector.load %arg20[%c0_199, %c0_200, %c0_201] : memref<1x8x32xf32, #tpu.memory_space<vmem>>, vector<1x8x32xf32>
    %284 = vector.broadcast %283 : vector<1x8x32xf32> to vector<2x8x32xf32>
    %285 = arith.addf %282, %284 : vector<2x8x32xf32>
    %c0_202 = arith.constant 0 : index
    %c0_203 = arith.constant 0 : index
    %286 = vector.load %arg3[%c0_202, %c0_203] : memref<2x32xf32, #tpu.memory_space<vmem>>, vector<2x32xf32>
    %c0_204 = arith.constant 0 : index
    %c0_205 = arith.constant 0 : index
    %287 = vector.load %arg21[%c0_204, %c0_205] : memref<1x32xf32, #tpu.memory_space<vmem>>, vector<1x32xf32>
    %c0_206 = arith.constant 0 : index
    %c0_207 = arith.constant 0 : index
    %288 = vector.load %arg22[%c0_206, %c0_207] : memref<1x32xf32, #tpu.memory_space<vmem>>, vector<1x32xf32>
    %cst_208 = arith.constant dense<0.000000e+00> : vector<2x8xf32>
    %289 = vector.multi_reduction <add>, %285, %cst_208 [2] : vector<2x8x32xf32> to vector<2x8xf32>
    %290 = vector.shape_cast %289 : vector<2x8xf32> to vector<2x8x1xf32>
    %cst_209 = arith.constant 3.200000e+01 : f32
    %291 = vector.broadcast %cst_209 : f32 to vector<2x8x1xf32>
    %292 = arith.divf %290, %291 : vector<2x8x1xf32>
    %293 = vector.broadcast %292 : vector<2x8x1xf32> to vector<2x8x32xf32>
    %294 = arith.subf %285, %293 : vector<2x8x32xf32>
    %295 = arith.mulf %294, %294 : vector<2x8x32xf32>
    %cst_210 = arith.constant dense<0.000000e+00> : vector<2x8xf32>
    %296 = vector.multi_reduction <add>, %295, %cst_210 [2] : vector<2x8x32xf32> to vector<2x8xf32>
    %297 = vector.shape_cast %296 : vector<2x8xf32> to vector<2x8x1xf32>
    %cst_211 = arith.constant 3.200000e+01 : f32
    %298 = vector.broadcast %cst_211 : f32 to vector<2x8x1xf32>
    %299 = arith.divf %297, %298 : vector<2x8x1xf32>
    %300 = vector.broadcast %292 : vector<2x8x1xf32> to vector<2x8x32xf32>
    %301 = arith.subf %285, %300 : vector<2x8x32xf32>
    %cst_212 = arith.constant 9.99999974E-6 : f32
    %302 = vector.broadcast %cst_212 : f32 to vector<2x8x1xf32>
    %303 = arith.addf %299, %302 : vector<2x8x1xf32>
    %304 = math.rsqrt %303 : vector<2x8x1xf32>
    %305 = vector.broadcast %304 : vector<2x8x1xf32> to vector<2x8x32xf32>
    %306 = arith.mulf %301, %305 : vector<2x8x32xf32>
    %307 = vector.shape_cast %287 : vector<1x32xf32> to vector<1x1x32xf32>
    %308 = vector.broadcast %307 : vector<1x1x32xf32> to vector<2x8x32xf32>
    %309 = arith.mulf %306, %308 : vector<2x8x32xf32>
    %310 = vector.shape_cast %288 : vector<1x32xf32> to vector<1x1x32xf32>
    %311 = vector.broadcast %310 : vector<1x1x32xf32> to vector<2x8x32xf32>
    %312 = arith.addf %309, %311 : vector<2x8x32xf32>
    %313 = vector.shape_cast %312 : vector<2x8x32xf32> to vector<16x32xf32>
    %c0_213 = arith.constant 0 : index
    %c0_214 = arith.constant 0 : index
    %314 = vector.load %arg23[%c0_213, %c0_214] : memref<32x768xf32, #tpu.memory_space<vmem>>, vector<32x768xf32>
    %315 = arith.truncf %313 : vector<16x32xf32> to vector<16x32xbf16>
    %316 = arith.truncf %314 : vector<32x768xf32> to vector<32x768xbf16>
    %cst_215 = arith.constant dense<0.000000e+00> : vector<16x768xf32>
    %317 = tpu.matmul %315, %316, %cst_215 {dimension_numbers = #tpu.dot_dimension_numbers<[1], [0], [0], [1], [0, 0, 1, 1], [], []>} : vector<16x32xbf16>, vector<32x768xbf16>, vector<16x768xf32> -> vector<16x768xf32>
    %c0_216 = arith.constant 0 : index
    %c0_217 = arith.constant 0 : index
    %318 = vector.load %arg24[%c0_216, %c0_217] : memref<32x256xf32, #tpu.memory_space<vmem>>, vector<32x256xf32>
    %319 = arith.truncf %286 : vector<2x32xf32> to vector<2x32xbf16>
    %320 = arith.truncf %318 : vector<32x256xf32> to vector<32x256xbf16>
    %cst_218 = arith.constant dense<0.000000e+00> : vector<2x256xf32>
    %321 = tpu.matmul %319, %320, %cst_218 {dimension_numbers = #tpu.dot_dimension_numbers<[1], [0], [0], [1], [0, 0, 1, 1], [], []>} : vector<2x32xbf16>, vector<32x256xbf16>, vector<2x256xf32> -> vector<2x256xf32>
    %322 = vector.extract_strided_slice %317 {offsets = [0, 0], sizes = [16, 64], strides = [1, 1]} : vector<16x768xf32> to vector<16x64xf32>
    %323 = vector.shape_cast %322 : vector<16x64xf32> to vector<2x8x64xf32>
    %324 = vector.extract_strided_slice %321 {offsets = [0, 0], sizes = [2, 64], strides = [1, 1]} : vector<2x256xf32> to vector<2x64xf32>
    %325 = vector.shape_cast %324 : vector<2x64xf32> to vector<2x1x64xf32>
    %326 = vector.broadcast %325 : vector<2x1x64xf32> to vector<2x8x64xf32>
    %327 = arith.addf %323, %326 : vector<2x8x64xf32>
    %328 = vector.extract_strided_slice %317 {offsets = [0, 256], sizes = [16, 64], strides = [1, 1]} : vector<16x768xf32> to vector<16x64xf32>
    %329 = vector.shape_cast %328 : vector<16x64xf32> to vector<2x8x64xf32>
    %330 = vector.extract_strided_slice %317 {offsets = [0, 512], sizes = [16, 64], strides = [1, 1]} : vector<16x768xf32> to vector<16x64xf32>
    %331 = vector.shape_cast %330 : vector<16x64xf32> to vector<2x8x64xf32>
    %332 = vector.extract_strided_slice %317 {offsets = [0, 64], sizes = [16, 64], strides = [1, 1]} : vector<16x768xf32> to vector<16x64xf32>
    %333 = vector.shape_cast %332 : vector<16x64xf32> to vector<2x8x64xf32>
    %334 = vector.extract_strided_slice %321 {offsets = [0, 64], sizes = [2, 64], strides = [1, 1]} : vector<2x256xf32> to vector<2x64xf32>
    %335 = vector.shape_cast %334 : vector<2x64xf32> to vector<2x1x64xf32>
    %336 = vector.broadcast %335 : vector<2x1x64xf32> to vector<2x8x64xf32>
    %337 = arith.addf %333, %336 : vector<2x8x64xf32>
    %338 = vector.extract_strided_slice %317 {offsets = [0, 320], sizes = [16, 64], strides = [1, 1]} : vector<16x768xf32> to vector<16x64xf32>
    %339 = vector.shape_cast %338 : vector<16x64xf32> to vector<2x8x64xf32>
    %340 = vector.extract_strided_slice %317 {offsets = [0, 576], sizes = [16, 64], strides = [1, 1]} : vector<16x768xf32> to vector<16x64xf32>
    %341 = vector.shape_cast %340 : vector<16x64xf32> to vector<2x8x64xf32>
    %342 = vector.extract_strided_slice %317 {offsets = [0, 128], sizes = [16, 64], strides = [1, 1]} : vector<16x768xf32> to vector<16x64xf32>
    %343 = vector.shape_cast %342 : vector<16x64xf32> to vector<2x8x64xf32>
    %344 = vector.extract_strided_slice %321 {offsets = [0, 128], sizes = [2, 64], strides = [1, 1]} : vector<2x256xf32> to vector<2x64xf32>
    %345 = vector.shape_cast %344 : vector<2x64xf32> to vector<2x1x64xf32>
    %346 = vector.broadcast %345 : vector<2x1x64xf32> to vector<2x8x64xf32>
    %347 = arith.addf %343, %346 : vector<2x8x64xf32>
    %348 = vector.extract_strided_slice %317 {offsets = [0, 384], sizes = [16, 64], strides = [1, 1]} : vector<16x768xf32> to vector<16x64xf32>
    %349 = vector.shape_cast %348 : vector<16x64xf32> to vector<2x8x64xf32>
    %350 = vector.extract_strided_slice %317 {offsets = [0, 640], sizes = [16, 64], strides = [1, 1]} : vector<16x768xf32> to vector<16x64xf32>
    %351 = vector.shape_cast %350 : vector<16x64xf32> to vector<2x8x64xf32>
    %352 = vector.extract_strided_slice %317 {offsets = [0, 192], sizes = [16, 64], strides = [1, 1]} : vector<16x768xf32> to vector<16x64xf32>
    %353 = vector.shape_cast %352 : vector<16x64xf32> to vector<2x8x64xf32>
    %354 = vector.extract_strided_slice %321 {offsets = [0, 192], sizes = [2, 64], strides = [1, 1]} : vector<2x256xf32> to vector<2x64xf32>
    %355 = vector.shape_cast %354 : vector<2x64xf32> to vector<2x1x64xf32>
    %356 = vector.broadcast %355 : vector<2x1x64xf32> to vector<2x8x64xf32>
    %357 = arith.addf %353, %356 : vector<2x8x64xf32>
    %358 = vector.extract_strided_slice %317 {offsets = [0, 448], sizes = [16, 64], strides = [1, 1]} : vector<16x768xf32> to vector<16x64xf32>
    %359 = vector.shape_cast %358 : vector<16x64xf32> to vector<2x8x64xf32>
    %360 = vector.extract_strided_slice %317 {offsets = [0, 704], sizes = [16, 64], strides = [1, 1]} : vector<16x768xf32> to vector<16x64xf32>
    %361 = vector.shape_cast %360 : vector<16x64xf32> to vector<2x8x64xf32>
    %362 = tpu.concatenate %327, %337, %347, %357 in 0 : vector<2x8x64xf32>, vector<2x8x64xf32>, vector<2x8x64xf32>, vector<2x8x64xf32> -> vector<8x8x64xf32>
    %363 = tpu.concatenate %329, %339, %349, %359 in 0 : vector<2x8x64xf32>, vector<2x8x64xf32>, vector<2x8x64xf32>, vector<2x8x64xf32> -> vector<8x8x64xf32>
    %364 = tpu.concatenate %331, %341, %351, %361 in 0 : vector<2x8x64xf32>, vector<2x8x64xf32>, vector<2x8x64xf32>, vector<2x8x64xf32> -> vector<8x8x64xf32>
    %365 = arith.truncf %362 : vector<8x8x64xf32> to vector<8x8x64xbf16>
    %366 = arith.truncf %363 : vector<8x8x64xf32> to vector<8x8x64xbf16>
    "tpu.trace_start"() <{level = 10 : i32, message = "gld,gmd->glm"}> : () -> ()
    %cst_219 = arith.constant dense<0.000000e+00> : vector<8x8x8xf32>
    %367 = tpu.matmul %365, %366, %cst_219 {dimension_numbers = #tpu.dot_dimension_numbers<[2], [2], [1], [1], [0, 0, 0, 1, 1, 1], [0], [0]>} : vector<8x8x64xbf16>, vector<8x8x64xbf16>, vector<8x8x8xf32> -> vector<8x8x8xf32>
    "tpu.trace_stop"() : () -> ()
    %cst_220 = arith.constant 1.250000e-01 : f32
    %368 = vector.broadcast %cst_220 : f32 to vector<8x8x8xf32>
    %369 = arith.mulf %367, %368 : vector<8x8x8xf32>
    %cst_221 = arith.constant dense<0xFF800000> : vector<8x8xf32>
    %370 = vector.multi_reduction <maximumf>, %369, %cst_221 [2] : vector<8x8x8xf32> to vector<8x8xf32>
    %371 = vector.shape_cast %370 : vector<8x8xf32> to vector<8x8x1xf32>
    %372 = vector.broadcast %371 : vector<8x8x1xf32> to vector<8x8x8xf32>
    %373 = arith.subf %369, %372 : vector<8x8x8xf32>
    %374 = math.exp %373 : vector<8x8x8xf32>
    %cst_222 = arith.constant dense<0.000000e+00> : vector<8x8xf32>
    %375 = vector.multi_reduction <add>, %374, %cst_222 [2] : vector<8x8x8xf32> to vector<8x8xf32>
    %376 = vector.shape_cast %375 : vector<8x8xf32> to vector<8x8x1xf32>
    %377 = tpu.reciprocal %376 {approx = true} : vector<8x8x1xf32> -> vector<8x8x1xf32>
    %378 = vector.broadcast %377 : vector<8x8x1xf32> to vector<8x8x8xf32>
    %379 = arith.mulf %374, %378 : vector<8x8x8xf32>
    %380 = arith.truncf %379 : vector<8x8x8xf32> to vector<8x8x8xbf16>
    %381 = arith.truncf %364 : vector<8x8x64xf32> to vector<8x8x64xbf16>
    "tpu.trace_start"() <{level = 10 : i32, message = "glm,gmd->gld"}> : () -> ()
    %cst_223 = arith.constant dense<0.000000e+00> : vector<8x8x64xf32>
    %382 = tpu.matmul %380, %381, %cst_223 {dimension_numbers = #tpu.dot_dimension_numbers<[2], [1], [1], [2], [0, 0, 0, 1, 1, 2], [0], [0]>} : vector<8x8x8xbf16>, vector<8x8x64xbf16>, vector<8x8x64xf32> -> vector<8x8x64xf32>
    "tpu.trace_stop"() : () -> ()
    %383 = vector.extract_strided_slice %382 {offsets = [0, 0, 0], sizes = [2, 8, 64], strides = [1, 1, 1]} : vector<8x8x64xf32> to vector<2x8x64xf32>
    %384 = vector.shape_cast %383 : vector<2x8x64xf32> to vector<16x64xf32>
    %c0_224 = arith.constant 0 : index
    %c0_225 = arith.constant 0 : index
    %385 = vector.load %arg25[%c0_224, %c0_225] : memref<256x32xf32, #tpu.memory_space<vmem>>, vector<64x32xf32>
    %386 = arith.truncf %384 : vector<16x64xf32> to vector<16x64xbf16>
    %387 = arith.truncf %385 : vector<64x32xf32> to vector<64x32xbf16>
    %cst_226 = arith.constant dense<0.000000e+00> : vector<16x32xf32>
    %388 = tpu.matmul %386, %387, %cst_226 {dimension_numbers = #tpu.dot_dimension_numbers<[1], [0], [0], [1], [0, 0, 1, 1], [], []>} : vector<16x64xbf16>, vector<64x32xbf16>, vector<16x32xf32> -> vector<16x32xf32>
    %389 = vector.extract_strided_slice %382 {offsets = [2, 0, 0], sizes = [2, 8, 64], strides = [1, 1, 1]} : vector<8x8x64xf32> to vector<2x8x64xf32>
    %390 = vector.shape_cast %389 : vector<2x8x64xf32> to vector<16x64xf32>
    %c64_227 = arith.constant 64 : index
    %c0_228 = arith.constant 0 : index
    %391 = vector.load %arg25[%c64_227, %c0_228] : memref<256x32xf32, #tpu.memory_space<vmem>>, vector<64x32xf32>
    %392 = arith.truncf %390 : vector<16x64xf32> to vector<16x64xbf16>
    %393 = arith.truncf %391 : vector<64x32xf32> to vector<64x32xbf16>
    %cst_229 = arith.constant dense<0.000000e+00> : vector<16x32xf32>
    %394 = tpu.matmul %392, %393, %cst_229 {dimension_numbers = #tpu.dot_dimension_numbers<[1], [0], [0], [1], [0, 0, 1, 1], [], []>} : vector<16x64xbf16>, vector<64x32xbf16>, vector<16x32xf32> -> vector<16x32xf32>
    %395 = arith.addf %388, %394 : vector<16x32xf32>
    %396 = vector.extract_strided_slice %382 {offsets = [4, 0, 0], sizes = [2, 8, 64], strides = [1, 1, 1]} : vector<8x8x64xf32> to vector<2x8x64xf32>
    %397 = vector.shape_cast %396 : vector<2x8x64xf32> to vector<16x64xf32>
    %c128_230 = arith.constant 128 : index
    %c0_231 = arith.constant 0 : index
    %398 = vector.load %arg25[%c128_230, %c0_231] : memref<256x32xf32, #tpu.memory_space<vmem>>, vector<64x32xf32>
    %399 = arith.truncf %397 : vector<16x64xf32> to vector<16x64xbf16>
    %400 = arith.truncf %398 : vector<64x32xf32> to vector<64x32xbf16>
    %cst_232 = arith.constant dense<0.000000e+00> : vector<16x32xf32>
    %401 = tpu.matmul %399, %400, %cst_232 {dimension_numbers = #tpu.dot_dimension_numbers<[1], [0], [0], [1], [0, 0, 1, 1], [], []>} : vector<16x64xbf16>, vector<64x32xbf16>, vector<16x32xf32> -> vector<16x32xf32>
    %402 = arith.addf %395, %401 : vector<16x32xf32>
    %403 = vector.extract_strided_slice %382 {offsets = [6, 0, 0], sizes = [2, 8, 64], strides = [1, 1, 1]} : vector<8x8x64xf32> to vector<2x8x64xf32>
    %404 = vector.shape_cast %403 : vector<2x8x64xf32> to vector<16x64xf32>
    %c192 = arith.constant 192 : index
    %c0_233 = arith.constant 0 : index
    %405 = vector.load %arg25[%c192, %c0_233] : memref<256x32xf32, #tpu.memory_space<vmem>>, vector<64x32xf32>
    %406 = arith.truncf %404 : vector<16x64xf32> to vector<16x64xbf16>
    %407 = arith.truncf %405 : vector<64x32xf32> to vector<64x32xbf16>
    %cst_234 = arith.constant dense<0.000000e+00> : vector<16x32xf32>
    %408 = tpu.matmul %406, %407, %cst_234 {dimension_numbers = #tpu.dot_dimension_numbers<[1], [0], [0], [1], [0, 0, 1, 1], [], []>} : vector<16x64xbf16>, vector<64x32xbf16>, vector<16x32xf32> -> vector<16x32xf32>
    %409 = arith.addf %402, %408 : vector<16x32xf32>
    %c0_235 = arith.constant 0 : index
    %c0_236 = arith.constant 0 : index
    %410 = vector.load %arg26[%c0_235, %c0_236] : memref<1x32xf32, #tpu.memory_space<vmem>>, vector<1x32xf32>
    %411 = vector.broadcast %410 : vector<1x32xf32> to vector<16x32xf32>
    %412 = arith.addf %409, %411 : vector<16x32xf32>
    %413 = vector.shape_cast %412 : vector<16x32xf32> to vector<2x8x32xf32>
    %414 = arith.addf %285, %413 : vector<2x8x32xf32>
    %c0_237 = arith.constant 0 : index
    %c0_238 = arith.constant 0 : index
    %415 = vector.load %arg27[%c0_237, %c0_238] : memref<1x32xf32, #tpu.memory_space<vmem>>, vector<1x32xf32>
    %c0_239 = arith.constant 0 : index
    %c0_240 = arith.constant 0 : index
    %416 = vector.load %arg28[%c0_239, %c0_240] : memref<1x32xf32, #tpu.memory_space<vmem>>, vector<1x32xf32>
    %cst_241 = arith.constant dense<0.000000e+00> : vector<2x8xf32>
    %417 = vector.multi_reduction <add>, %414, %cst_241 [2] : vector<2x8x32xf32> to vector<2x8xf32>
    %418 = vector.shape_cast %417 : vector<2x8xf32> to vector<2x8x1xf32>
    %cst_242 = arith.constant 3.200000e+01 : f32
    %419 = vector.broadcast %cst_242 : f32 to vector<2x8x1xf32>
    %420 = arith.divf %418, %419 : vector<2x8x1xf32>
    %421 = vector.broadcast %420 : vector<2x8x1xf32> to vector<2x8x32xf32>
    %422 = arith.subf %414, %421 : vector<2x8x32xf32>
    %423 = arith.mulf %422, %422 : vector<2x8x32xf32>
    %cst_243 = arith.constant dense<0.000000e+00> : vector<2x8xf32>
    %424 = vector.multi_reduction <add>, %423, %cst_243 [2] : vector<2x8x32xf32> to vector<2x8xf32>
    %425 = vector.shape_cast %424 : vector<2x8xf32> to vector<2x8x1xf32>
    %cst_244 = arith.constant 3.200000e+01 : f32
    %426 = vector.broadcast %cst_244 : f32 to vector<2x8x1xf32>
    %427 = arith.divf %425, %426 : vector<2x8x1xf32>
    %428 = vector.broadcast %420 : vector<2x8x1xf32> to vector<2x8x32xf32>
    %429 = arith.subf %414, %428 : vector<2x8x32xf32>
    %cst_245 = arith.constant 9.99999974E-6 : f32
    %430 = vector.broadcast %cst_245 : f32 to vector<2x8x1xf32>
    %431 = arith.addf %427, %430 : vector<2x8x1xf32>
    %432 = math.rsqrt %431 : vector<2x8x1xf32>
    %433 = vector.broadcast %432 : vector<2x8x1xf32> to vector<2x8x32xf32>
    %434 = arith.mulf %429, %433 : vector<2x8x32xf32>
    %435 = vector.shape_cast %415 : vector<1x32xf32> to vector<1x1x32xf32>
    %436 = vector.broadcast %435 : vector<1x1x32xf32> to vector<2x8x32xf32>
    %437 = arith.mulf %434, %436 : vector<2x8x32xf32>
    %438 = vector.shape_cast %416 : vector<1x32xf32> to vector<1x1x32xf32>
    %439 = vector.broadcast %438 : vector<1x1x32xf32> to vector<2x8x32xf32>
    %440 = arith.addf %437, %439 : vector<2x8x32xf32>
    %441 = vector.shape_cast %440 : vector<2x8x32xf32> to vector<16x32xf32>
    %c0_246 = arith.constant 0 : index
    %c0_247 = arith.constant 0 : index
    %442 = vector.load %arg29[%c0_246, %c0_247] : memref<32x32xf32, #tpu.memory_space<vmem>>, vector<32x32xf32>
    %443 = arith.truncf %441 : vector<16x32xf32> to vector<16x32xbf16>
    %444 = arith.truncf %442 : vector<32x32xf32> to vector<32x32xbf16>
    %cst_248 = arith.constant dense<0.000000e+00> : vector<16x32xf32>
    %445 = tpu.matmul %443, %444, %cst_248 {dimension_numbers = #tpu.dot_dimension_numbers<[1], [0], [0], [1], [0, 0, 1, 1], [], []>} : vector<16x32xbf16>, vector<32x32xbf16>, vector<16x32xf32> -> vector<16x32xf32>
    %c0_249 = arith.constant 0 : index
    %c0_250 = arith.constant 0 : index
    %446 = vector.load %arg30[%c0_249, %c0_250] : memref<1x32xf32, #tpu.memory_space<vmem>>, vector<1x32xf32>
    %447 = vector.broadcast %446 : vector<1x32xf32> to vector<16x32xf32>
    %448 = arith.addf %445, %447 : vector<16x32xf32>
    %449 = arith.mulf %448, %448 : vector<16x32xf32>
    %450 = arith.mulf %448, %449 : vector<16x32xf32>
    %cst_251 = arith.constant 4.471500e-02 : f32
    %451 = vector.broadcast %cst_251 : f32 to vector<16x32xf32>
    %452 = arith.mulf %451, %450 : vector<16x32xf32>
    %453 = arith.addf %448, %452 : vector<16x32xf32>
    %cst_252 = arith.constant 0.797884583 : f32
    %454 = vector.broadcast %cst_252 : f32 to vector<16x32xf32>
    %455 = arith.mulf %454, %453 : vector<16x32xf32>
    %456 = math.tanh %455 : vector<16x32xf32>
    %cst_253 = arith.constant 1.000000e+00 : f32
    %457 = vector.broadcast %cst_253 : f32 to vector<16x32xf32>
    %458 = arith.addf %457, %456 : vector<16x32xf32>
    %cst_254 = arith.constant 5.000000e-01 : f32
    %459 = vector.broadcast %cst_254 : f32 to vector<16x32xf32>
    %460 = arith.mulf %459, %458 : vector<16x32xf32>
    %461 = arith.mulf %448, %460 : vector<16x32xf32>
    %c0_255 = arith.constant 0 : index
    %c0_256 = arith.constant 0 : index
    %462 = vector.load %arg31[%c0_255, %c0_256] : memref<32x32xf32, #tpu.memory_space<vmem>>, vector<32x32xf32>
    %463 = arith.truncf %461 : vector<16x32xf32> to vector<16x32xbf16>
    %464 = arith.truncf %462 : vector<32x32xf32> to vector<32x32xbf16>
    %cst_257 = arith.constant dense<0.000000e+00> : vector<16x32xf32>
    %465 = tpu.matmul %463, %464, %cst_257 {dimension_numbers = #tpu.dot_dimension_numbers<[1], [0], [0], [1], [0, 0, 1, 1], [], []>} : vector<16x32xbf16>, vector<32x32xbf16>, vector<16x32xf32> -> vector<16x32xf32>
    %c0_258 = arith.constant 0 : index
    %c0_259 = arith.constant 0 : index
    %466 = vector.load %arg32[%c0_258, %c0_259] : memref<1x32xf32, #tpu.memory_space<vmem>>, vector<1x32xf32>
    %467 = vector.broadcast %466 : vector<1x32xf32> to vector<16x32xf32>
    %468 = arith.addf %465, %467 : vector<16x32xf32>
    %469 = vector.shape_cast %468 : vector<16x32xf32> to vector<2x8x32xf32>
    %470 = arith.addf %414, %469 : vector<2x8x32xf32>
    %c0_260 = arith.constant 0 : index
    %c0_261 = arith.constant 0 : index
    %471 = vector.load %arg33[%c0_260, %c0_261] : memref<1x32xf32, #tpu.memory_space<vmem>>, vector<1x32xf32>
    %c0_262 = arith.constant 0 : index
    %c0_263 = arith.constant 0 : index
    %472 = vector.load %arg34[%c0_262, %c0_263] : memref<1x32xf32, #tpu.memory_space<vmem>>, vector<1x32xf32>
    %cst_264 = arith.constant dense<0.000000e+00> : vector<2x8xf32>
    %473 = vector.multi_reduction <add>, %470, %cst_264 [2] : vector<2x8x32xf32> to vector<2x8xf32>
    %474 = vector.shape_cast %473 : vector<2x8xf32> to vector<2x8x1xf32>
    %cst_265 = arith.constant 3.200000e+01 : f32
    %475 = vector.broadcast %cst_265 : f32 to vector<2x8x1xf32>
    %476 = arith.divf %474, %475 : vector<2x8x1xf32>
    %477 = vector.broadcast %476 : vector<2x8x1xf32> to vector<2x8x32xf32>
    %478 = arith.subf %470, %477 : vector<2x8x32xf32>
    %479 = arith.mulf %478, %478 : vector<2x8x32xf32>
    %cst_266 = arith.constant dense<0.000000e+00> : vector<2x8xf32>
    %480 = vector.multi_reduction <add>, %479, %cst_266 [2] : vector<2x8x32xf32> to vector<2x8xf32>
    %481 = vector.shape_cast %480 : vector<2x8xf32> to vector<2x8x1xf32>
    %cst_267 = arith.constant 3.200000e+01 : f32
    %482 = vector.broadcast %cst_267 : f32 to vector<2x8x1xf32>
    %483 = arith.divf %481, %482 : vector<2x8x1xf32>
    %484 = vector.broadcast %476 : vector<2x8x1xf32> to vector<2x8x32xf32>
    %485 = arith.subf %470, %484 : vector<2x8x32xf32>
    %cst_268 = arith.constant 9.99999974E-6 : f32
    %486 = vector.broadcast %cst_268 : f32 to vector<2x8x1xf32>
    %487 = arith.addf %483, %486 : vector<2x8x1xf32>
    %488 = math.rsqrt %487 : vector<2x8x1xf32>
    %489 = vector.broadcast %488 : vector<2x8x1xf32> to vector<2x8x32xf32>
    %490 = arith.mulf %485, %489 : vector<2x8x32xf32>
    %491 = vector.shape_cast %471 : vector<1x32xf32> to vector<1x1x32xf32>
    %492 = vector.broadcast %491 : vector<1x1x32xf32> to vector<2x8x32xf32>
    %493 = arith.mulf %490, %492 : vector<2x8x32xf32>
    %494 = vector.shape_cast %472 : vector<1x32xf32> to vector<1x1x32xf32>
    %495 = vector.broadcast %494 : vector<1x1x32xf32> to vector<2x8x32xf32>
    %496 = arith.addf %493, %495 : vector<2x8x32xf32>
    %cst_269 = arith.constant dense<0.000000e+00> : vector<2x32xf32>
    %497 = vector.multi_reduction <add>, %496, %cst_269 [1] : vector<2x8x32xf32> to vector<2x32xf32>
    %cst_270 = arith.constant 8.000000e+00 : f32
    %498 = vector.broadcast %cst_270 : f32 to vector<2x32xf32>
    %499 = arith.divf %497, %498 : vector<2x32xf32>
    %c0_271 = arith.constant 0 : index
    %c0_272 = arith.constant 0 : index
    %500 = vector.load %arg35[%c0_271, %c0_272] : memref<1x32xf32, #tpu.memory_space<vmem>>, vector<1x32xf32>
    %c0_273 = arith.constant 0 : index
    %c0_274 = arith.constant 0 : index
    %501 = vector.load %arg36[%c0_273, %c0_274] : memref<1x32xf32, #tpu.memory_space<vmem>>, vector<1x32xf32>
    %cst_275 = arith.constant dense<0.000000e+00> : vector<2xf32>
    %502 = vector.multi_reduction <add>, %499, %cst_275 [1] : vector<2x32xf32> to vector<2xf32>
    %503 = vector.shape_cast %502 : vector<2xf32> to vector<2x1xf32>
    %cst_276 = arith.constant 3.200000e+01 : f32
    %504 = vector.broadcast %cst_276 : f32 to vector<2x1xf32>
    %505 = arith.divf %503, %504 : vector<2x1xf32>
    %506 = vector.broadcast %505 : vector<2x1xf32> to vector<2x32xf32>
    %507 = arith.subf %499, %506 : vector<2x32xf32>
    %508 = arith.mulf %507, %507 : vector<2x32xf32>
    %cst_277 = arith.constant dense<0.000000e+00> : vector<2xf32>
    %509 = vector.multi_reduction <add>, %508, %cst_277 [1] : vector<2x32xf32> to vector<2xf32>
    %510 = vector.shape_cast %509 : vector<2xf32> to vector<2x1xf32>
    %cst_278 = arith.constant 3.200000e+01 : f32
    %511 = vector.broadcast %cst_278 : f32 to vector<2x1xf32>
    %512 = arith.divf %510, %511 : vector<2x1xf32>
    %513 = vector.broadcast %505 : vector<2x1xf32> to vector<2x32xf32>
    %514 = arith.subf %499, %513 : vector<2x32xf32>
    %cst_279 = arith.constant 9.99999974E-6 : f32
    %515 = vector.broadcast %cst_279 : f32 to vector<2x1xf32>
    %516 = arith.addf %512, %515 : vector<2x1xf32>
    %517 = math.rsqrt %516 : vector<2x1xf32>
    %518 = vector.broadcast %517 : vector<2x1xf32> to vector<2x32xf32>
    %519 = arith.mulf %514, %518 : vector<2x32xf32>
    %520 = vector.broadcast %500 : vector<1x32xf32> to vector<2x32xf32>
    %521 = arith.mulf %519, %520 : vector<2x32xf32>
    %522 = vector.broadcast %501 : vector<1x32xf32> to vector<2x32xf32>
    %523 = arith.addf %521, %522 : vector<2x32xf32>
    %c0_280 = arith.constant 0 : index
    %c0_281 = arith.constant 0 : index
    %524 = vector.load %arg37[%c0_280, %c0_281] : memref<32x173xf32, #tpu.memory_space<vmem>>, vector<32x173xf32>
    %525 = arith.truncf %523 : vector<2x32xf32> to vector<2x32xbf16>
    %526 = arith.truncf %524 : vector<32x173xf32> to vector<32x173xbf16>
    %cst_282 = arith.constant dense<0.000000e+00> : vector<2x173xf32>
    %527 = tpu.matmul %525, %526, %cst_282 {dimension_numbers = #tpu.dot_dimension_numbers<[1], [0], [0], [1], [0, 0, 1, 1], [], []>} : vector<2x32xbf16>, vector<32x173xbf16>, vector<2x173xf32> -> vector<2x173xf32>
    %c0_283 = arith.constant 0 : index
    %c0_284 = arith.constant 0 : index
    %528 = vector.load %arg38[%c0_283, %c0_284] : memref<1x173xf32, #tpu.memory_space<vmem>>, vector<1x173xf32>
    %529 = vector.broadcast %528 : vector<1x173xf32> to vector<2x173xf32>
    %530 = arith.addf %527, %529 : vector<2x173xf32>
    %c0_285 = arith.constant 0 : index
    %c0_286 = arith.constant 0 : index
    %531 = vector.load %arg39[%c0_285, %c0_286] : memref<32x128xf32, #tpu.memory_space<vmem>>, vector<32x128xf32>
    %532 = arith.truncf %523 : vector<2x32xf32> to vector<2x32xbf16>
    %533 = arith.truncf %531 : vector<32x128xf32> to vector<32x128xbf16>
    %cst_287 = arith.constant dense<0.000000e+00> : vector<2x128xf32>
    %534 = tpu.matmul %532, %533, %cst_287 {dimension_numbers = #tpu.dot_dimension_numbers<[1], [0], [0], [1], [0, 0, 1, 1], [], []>} : vector<2x32xbf16>, vector<32x128xbf16>, vector<2x128xf32> -> vector<2x128xf32>
    %c0_288 = arith.constant 0 : index
    %c0_289 = arith.constant 0 : index
    %535 = vector.load %arg40[%c0_288, %c0_289] : memref<1x128xf32, #tpu.memory_space<vmem>>, vector<1x128xf32>
    %536 = vector.broadcast %535 : vector<1x128xf32> to vector<2x128xf32>
    %537 = arith.addf %534, %536 : vector<2x128xf32>
    %cst_290 = arith.constant 0.000000e+00 : f32
    %538 = vector.broadcast %cst_290 : f32 to vector<2x128xf32>
    %539 = arith.maximumf %537, %538 : vector<2x128xf32>
    %c0_291 = arith.constant 0 : index
    %c0_292 = arith.constant 0 : index
    %540 = vector.load %arg41[%c0_291, %c0_292] : memref<128x1xf32, #tpu.memory_space<vmem>>, vector<128x1xf32>
    %541 = arith.truncf %539 : vector<2x128xf32> to vector<2x128xbf16>
    %542 = arith.truncf %540 : vector<128x1xf32> to vector<128x1xbf16>
    %cst_293 = arith.constant dense<0.000000e+00> : vector<2x1xf32>
    %543 = tpu.matmul %541, %542, %cst_293 {dimension_numbers = #tpu.dot_dimension_numbers<[1], [0], [0], [1], [0, 0, 1, 1], [], []>} : vector<2x128xbf16>, vector<128x1xbf16>, vector<2x1xf32> -> vector<2x1xf32>
    %c0_294 = arith.constant 0 : index
    %c0_295 = arith.constant 0 : index
    %544 = vector.load %arg42[%c0_294, %c0_295] : memref<1x1xf32, #tpu.memory_space<vmem>>, vector<1x1xf32>
    %545 = vector.broadcast %544 : vector<1x1xf32> to vector<2x1xf32>
    %546 = arith.addf %543, %545 : vector<2x1xf32>
    %c0_296 = arith.constant 0 : index
    %c0_297 = arith.constant 0 : index
    %547 = vector.load %arg43[%c0_296, %c0_297] : memref<2x174xf32, #tpu.memory_space<vmem>>, vector<2x173xf32>
    tpu.vector_store %arg43[%c0_296, %c0_297], %530 {strides = array<i32>} : memref<2x174xf32, #tpu.memory_space<vmem>>, vector<2x173xf32>,
    %c0_298 = arith.constant 0 : index
    %c173 = arith.constant 173 : index
    %548 = vector.load %arg43[%c0_298, %c173] : memref<2x174xf32, #tpu.memory_space<vmem>>, vector<2x1xf32>
    tpu.vector_store %arg43[%c0_298, %c173], %546 {strides = array<i32>} : memref<2x174xf32, #tpu.memory_space<vmem>>, vector<2x1xf32>,
    return
  }
  func.func @transform_0(%arg0: i32) -> (i32, i32) {
    %c0_i32 = arith.constant 0 : i32
    %c0_i32_0 = arith.constant 0 : i32
    return %arg0, %c0_i32 : i32, i32
  }
  func.func @transform_1(%arg0: i32) -> (i32, i32) {
    %c0_i32 = arith.constant 0 : i32
    %c0_i32_0 = arith.constant 0 : i32
    %c0_i32_1 = arith.constant 0 : i32
    return %c0_i32, %c0_i32_0 : i32, i32
  }
  func.func @transform_2(%arg0: i32) -> (i32, i32) {
    %c0_i32 = arith.constant 0 : i32
    %c0_i32_0 = arith.constant 0 : i32
    return %arg0, %c0_i32 : i32, i32
  }
  func.func @transform_3(%arg0: i32) -> (i32, i32) {
    %c0_i32 = arith.constant 0 : i32
    %c0_i32_0 = arith.constant 0 : i32
    %c0_i32_1 = arith.constant 0 : i32
    return %c0_i32, %c0_i32_0 : i32, i32
  }
  func.func @transform_4(%arg0: i32) -> (i32, i32) {
    %c0_i32 = arith.constant 0 : i32
    %c0_i32_0 = arith.constant 0 : i32
    %c0_i32_1 = arith.constant 0 : i32
    return %c0_i32, %c0_i32_0 : i32, i32
  }
  func.func @transform_5(%arg0: i32) -> (i32, i32) {
    %c0_i32 = arith.constant 0 : i32
    %c0_i32_0 = arith.constant 0 : i32
    %c0_i32_1 = arith.constant 0 : i32
    return %c0_i32, %c0_i32_0 : i32, i32
  }
  func.func @transform_6(%arg0: i32) -> (i32, i32) {
    %c0_i32 = arith.constant 0 : i32
    %c0_i32_0 = arith.constant 0 : i32
    %c0_i32_1 = arith.constant 0 : i32
    return %c0_i32, %c0_i32_0 : i32, i32
  }
  func.func @transform_7(%arg0: i32) -> (i32, i32) {
    %c0_i32 = arith.constant 0 : i32
    %c0_i32_0 = arith.constant 0 : i32
    %c0_i32_1 = arith.constant 0 : i32
    return %c0_i32, %c0_i32_0 : i32, i32
  }
  func.func @transform_8(%arg0: i32) -> (i32, i32) {
    %c0_i32 = arith.constant 0 : i32
    %c0_i32_0 = arith.constant 0 : i32
    %c0_i32_1 = arith.constant 0 : i32
    return %c0_i32, %c0_i32_0 : i32, i32
  }
  func.func @transform_9(%arg0: i32) -> (i32, i32) {
    %c0_i32 = arith.constant 0 : i32
    %c0_i32_0 = arith.constant 0 : i32
    %c0_i32_1 = arith.constant 0 : i32
    return %c0_i32, %c0_i32_0 : i32, i32
  }
  func.func @transform_10(%arg0: i32) -> (i32, i32) {
    %c0_i32 = arith.constant 0 : i32
    %c0_i32_0 = arith.constant 0 : i32
    %c0_i32_1 = arith.constant 0 : i32
    return %c0_i32, %c0_i32_0 : i32, i32
  }
  func.func @transform_11(%arg0: i32) -> (i32, i32) {
    %c0_i32 = arith.constant 0 : i32
    %c0_i32_0 = arith.constant 0 : i32
    %c0_i32_1 = arith.constant 0 : i32
    return %c0_i32, %c0_i32_0 : i32, i32
  }
  func.func @transform_12(%arg0: i32) -> (i32, i32) {
    %c0_i32 = arith.constant 0 : i32
    %c0_i32_0 = arith.constant 0 : i32
    %c0_i32_1 = arith.constant 0 : i32
    return %c0_i32, %c0_i32_0 : i32, i32
  }
  func.func @transform_13(%arg0: i32) -> (i32, i32) {
    %c0_i32 = arith.constant 0 : i32
    %c0_i32_0 = arith.constant 0 : i32
    %c0_i32_1 = arith.constant 0 : i32
    return %c0_i32, %c0_i32_0 : i32, i32
  }
  func.func @transform_14(%arg0: i32) -> (i32, i32) {
    %c0_i32 = arith.constant 0 : i32
    %c0_i32_0 = arith.constant 0 : i32
    %c0_i32_1 = arith.constant 0 : i32
    return %c0_i32, %c0_i32_0 : i32, i32
  }
  func.func @transform_15(%arg0: i32) -> (i32, i32) {
    %c0_i32 = arith.constant 0 : i32
    %c0_i32_0 = arith.constant 0 : i32
    %c0_i32_1 = arith.constant 0 : i32
    return %c0_i32, %c0_i32_0 : i32, i32
  }
  func.func @transform_16(%arg0: i32) -> (i32, i32) {
    %c0_i32 = arith.constant 0 : i32
    %c0_i32_0 = arith.constant 0 : i32
    %c0_i32_1 = arith.constant 0 : i32
    return %c0_i32, %c0_i32_0 : i32, i32
  }
  func.func @transform_17(%arg0: i32) -> (i32, i32) {
    %c0_i32 = arith.constant 0 : i32
    %c0_i32_0 = arith.constant 0 : i32
    %c0_i32_1 = arith.constant 0 : i32
    return %c0_i32, %c0_i32_0 : i32, i32
  }
  func.func @transform_18(%arg0: i32) -> (i32, i32) {
    %c0_i32 = arith.constant 0 : i32
    %c0_i32_0 = arith.constant 0 : i32
    %c0_i32_1 = arith.constant 0 : i32
    return %c0_i32, %c0_i32_0 : i32, i32
  }
  func.func @transform_19(%arg0: i32) -> (i32, i32, i32) {
    %c0_i32 = arith.constant 0 : i32
    %c0_i32_0 = arith.constant 0 : i32
    %c0_i32_1 = arith.constant 0 : i32
    %c0_i32_2 = arith.constant 0 : i32
    return %c0_i32, %c0_i32_0, %c0_i32_1 : i32, i32, i32
  }
  func.func @transform_20(%arg0: i32) -> (i32, i32) {
    %c0_i32 = arith.constant 0 : i32
    %c0_i32_0 = arith.constant 0 : i32
    %c0_i32_1 = arith.constant 0 : i32
    return %c0_i32, %c0_i32_0 : i32, i32
  }
  func.func @transform_21(%arg0: i32) -> (i32, i32) {
    %c0_i32 = arith.constant 0 : i32
    %c0_i32_0 = arith.constant 0 : i32
    %c0_i32_1 = arith.constant 0 : i32
    return %c0_i32, %c0_i32_0 : i32, i32
  }
  func.func @transform_22(%arg0: i32) -> (i32, i32) {
    %c0_i32 = arith.constant 0 : i32
    %c0_i32_0 = arith.constant 0 : i32
    %c0_i32_1 = arith.constant 0 : i32
    return %c0_i32, %c0_i32_0 : i32, i32
  }
  func.func @transform_23(%arg0: i32) -> (i32, i32) {
    %c0_i32 = arith.constant 0 : i32
    %c0_i32_0 = arith.constant 0 : i32
    %c0_i32_1 = arith.constant 0 : i32
    return %c0_i32, %c0_i32_0 : i32, i32
  }
  func.func @transform_24(%arg0: i32) -> (i32, i32) {
    %c0_i32 = arith.constant 0 : i32
    %c0_i32_0 = arith.constant 0 : i32
    %c0_i32_1 = arith.constant 0 : i32
    return %c0_i32, %c0_i32_0 : i32, i32
  }
  func.func @transform_25(%arg0: i32) -> (i32, i32) {
    %c0_i32 = arith.constant 0 : i32
    %c0_i32_0 = arith.constant 0 : i32
    %c0_i32_1 = arith.constant 0 : i32
    return %c0_i32, %c0_i32_0 : i32, i32
  }
  func.func @transform_26(%arg0: i32) -> (i32, i32) {
    %c0_i32 = arith.constant 0 : i32
    %c0_i32_0 = arith.constant 0 : i32
    %c0_i32_1 = arith.constant 0 : i32
    return %c0_i32, %c0_i32_0 : i32, i32
  }
  func.func @transform_27(%arg0: i32) -> (i32, i32) {
    %c0_i32 = arith.constant 0 : i32
    %c0_i32_0 = arith.constant 0 : i32
    %c0_i32_1 = arith.constant 0 : i32
    return %c0_i32, %c0_i32_0 : i32, i32
  }
  func.func @transform_28(%arg0: i32) -> (i32, i32) {
    %c0_i32 = arith.constant 0 : i32
    %c0_i32_0 = arith.constant 0 : i32
    %c0_i32_1 = arith.constant 0 : i32
    return %c0_i32, %c0_i32_0 : i32, i32
  }
  func.func @transform_29(%arg0: i32) -> (i32, i32) {
    %c0_i32 = arith.constant 0 : i32
    %c0_i32_0 = arith.constant 0 : i32
    %c0_i32_1 = arith.constant 0 : i32
    return %c0_i32, %c0_i32_0 : i32, i32
  }
  func.func @transform_30(%arg0: i32) -> (i32, i32) {
    %c0_i32 = arith.constant 0 : i32
    %c0_i32_0 = arith.constant 0 : i32
    %c0_i32_1 = arith.constant 0 : i32
    return %c0_i32, %c0_i32_0 : i32, i32
  }
  func.func @transform_31(%arg0: i32) -> (i32, i32) {
    %c0_i32 = arith.constant 0 : i32
    %c0_i32_0 = arith.constant 0 : i32
    %c0_i32_1 = arith.constant 0 : i32
    return %c0_i32, %c0_i32_0 : i32, i32
  }
  func.func @transform_32(%arg0: i32) -> (i32, i32) {
    %c0_i32 = arith.constant 0 : i32
    %c0_i32_0 = arith.constant 0 : i32
    %c0_i32_1 = arith.constant 0 : i32
    return %c0_i32, %c0_i32_0 : i32, i32
  }
  func.func @transform_33(%arg0: i32) -> (i32, i32) {
    %c0_i32 = arith.constant 0 : i32
    %c0_i32_0 = arith.constant 0 : i32
    %c0_i32_1 = arith.constant 0 : i32
    return %c0_i32, %c0_i32_0 : i32, i32
  }
  func.func @transform_34(%arg0: i32) -> (i32, i32) {
    %c0_i32 = arith.constant 0 : i32
    %c0_i32_0 = arith.constant 0 : i32
    %c0_i32_1 = arith.constant 0 : i32
    return %c0_i32, %c0_i32_0 : i32, i32
  }
  func.func @transform_35(%arg0: i32) -> (i32, i32) {
    %c0_i32 = arith.constant 0 : i32
    %c0_i32_0 = arith.constant 0 : i32
    %c0_i32_1 = arith.constant 0 : i32
    return %c0_i32, %c0_i32_0 : i32, i32
  }
  func.func @transform_36(%arg0: i32) -> (i32, i32) {
    %c0_i32 = arith.constant 0 : i32
    %c0_i32_0 = arith.constant 0 : i32
    %c0_i32_1 = arith.constant 0 : i32
    return %c0_i32, %c0_i32_0 : i32, i32
  }
  func.func @transform_37(%arg0: i32) -> (i32, i32) {
    %c0_i32 = arith.constant 0 : i32
    %c0_i32_0 = arith.constant 0 : i32
    %c0_i32_1 = arith.constant 0 : i32
    return %c0_i32, %c0_i32_0 : i32, i32
  }
  func.func @transform_38(%arg0: i32) -> (i32, i32) {
    %c0_i32 = arith.constant 0 : i32
    %c0_i32_0 = arith.constant 0 : i32
    %c0_i32_1 = arith.constant 0 : i32
    return %c0_i32, %c0_i32_0 : i32, i32
  }
  func.func @transform_39(%arg0: i32) -> (i32, i32) {
    %c0_i32 = arith.constant 0 : i32
    %c0_i32_0 = arith.constant 0 : i32
    %c0_i32_1 = arith.constant 0 : i32
    return %c0_i32, %c0_i32_0 : i32, i32
  }
  func.func @transform_40(%arg0: i32) -> (i32, i32) {
    %c0_i32 = arith.constant 0 : i32
    %c0_i32_0 = arith.constant 0 : i32
    %c0_i32_1 = arith.constant 0 : i32
    return %c0_i32, %c0_i32_0 : i32, i32
  }
  func.func @transform_41(%arg0: i32) -> (i32, i32) {
    %c0_i32 = arith.constant 0 : i32
    %c0_i32_0 = arith.constant 0 : i32
    %c0_i32_1 = arith.constant 0 : i32
    return %c0_i32, %c0_i32_0 : i32, i32
  }
  func.func @transform_42(%arg0: i32) -> (i32, i32) {
    %c0_i32 = arith.constant 0 : i32
    %c0_i32_0 = arith.constant 0 : i32
    return %arg0, %c0_i32 : i32, i32
  }
}

</mosaic_0001>

<bundles_post_ra>
// kernel: maia2_forward.1
= control target key start
LH: loop header
LB: loop body
LE: loop exit
PB: predicated region body
PF: predicated region fallthrough
CT: control target
= control target key end

     0   :  { %v11949_v0 = vmov 2   ;;  %v11945_v1 = vmov 1   ;;  %s8319_s3 = smov 1   ;;  %vm193_vm0 = vcmask 130048   ;;  %vm195_vm1 = vcmask 122880   ;;  %s8327_s10 = smov 16   ;;  %s11926_s0 = inlined_call_operand.smem [shape: u32[43], index: -1, kind: input, shape index: {}] }
   0x1   :  { %8136 = vset.pattern.permute.xlu1 %v11949_v0  ;;  %8135 = vset.pattern.permute.xlu0 %v11945_v1  ;;  %s8388_s6 = sld [smem:[%s11926_s0 + %s8319_s3]]   ;;  %v11927_v2 = vmov 0.0   ;;  %v11939_v8 = vmov 3   ;;  %v11935_v10 = vmov 4   ;;  %v11931_v14 = vmov 5   ;;  %s8328_s11 = smov 32  }
   0x2   :  { %194 = vst.msk [vmem:[#allocation2] sm:$0xff] %vm193_vm0, %v11927_v2  ;;  %197 = vst.msk [vmem:[#allocation2 + $0x89] sm:$0xff] %vm193_vm0, %v11927_v2  ;;  %s8399_s9 = sld [smem:[%s11926_s0]]   ;;  %v11933_v16 = vmov 6   ;;  %v11929_v17 = vmov 0   ;;  %v11937_v19 = vmov 7   ;;  %s8329_s12 = smov 48  }
   0x3   :  { %196 = vst.msk [vmem:[#allocation2 + $0x8] sm:$0x1] %vm195_vm1, %v11927_v2  ;;  %198 = vst.msk [vmem:[#allocation2 + $0x91] sm:$0x1] %vm195_vm1, %v11927_v2  ;;  %1809 = vmatprep.subr.bf16.mxu0 %v11929_v17  ;;  %2963 = vmatprep.subr.bf16.mxu1 %v11929_v17  ;;  %s8330_s13 = smov 64   ;;  %s8331_s14 = smov 80  }
   0x4   :  { %s8332_s15 = smov 96   ;;  %s8333_s16 = smov 112   ;;  %vm519_vm2 = vcmask 261248   ;;  %vm696_vm3 = vcmask 392448   ;;  %vm873_vm4 = vcmask 523648   ;;  %vm1050_vm5 = vcmask 654848  }
   0x5   :  { %vm1227_vm6 = vcmask 786048   ;;  %vm1404_vm7 = vcmask 917248   ;;  %s8335_s17 = smov 3   ;;  %vm1581_vm8 = vcmask 1048448   ;;  %s8336_s21 = smov 4   ;;  %vm8348_vm9 = vmmov 0  }
   0x6   :  { %s9012_s20 = sld [smem:[%s11926_s0 + %s8335_s17]]   ;;  %s8337_s25 = smov 5   ;;  %vm5462_vm10 = vcmask 523264   ;;  %vm5580_vm11 = vcmask 261120   ;;  %vm6516_vm12 = vcmask 1043456   ;;  %vm6408_vm13 = vcmask 64512  }
   0x7   :  { %v8402_v3 = vld [vmem:[%s8388_s6] sm:$0xff]  ;;  %v8407_v4 = vld [vmem:[%s8388_s6 + $0x8] sm:$0xff]  ;;  %v8422_v9 = vld [vmem:[%s8388_s6 + $0x38] sm:$0xff]  ;;  %s9757_s24 = sld [smem:[%s11926_s0 + %s8336_s21]]   ;;  %s8338_s29 = smov 6   ;;  %vm7370_vm14 = vcmask 1041409   ;;  %vm7373_vm15 = vcmask 254976  }
   0x8   :  { %553 = vperm.xlu1 %8136, %v8402_v3   ;;  %376 = vperm.xlu0 %8135, %v8402_v3   ;;  %v199_v5 = vld [vmem:[%s8399_s9] sm:$0xff]  ;;  %v200_v6 = vld [vmem:[%s8399_s9 + $0x8] sm:$0xff]  ;;  %v8427_v11 = vld [vmem:[%s8388_s6 + $0x50] sm:$0xff]  ;;  %s9763_s28 = sld [smem:[%s11926_s0 + %s8337_s25]]   ;;  %s8339_s3 = smov 7   ;;  %vm7634_vm1 = vcmask 363522  }
   0x9   :  { %v8414_v7 = vld [vmem:[%s8388_s6 + $0x20] sm:$0xff]  ;;  %215 = vst.msk [vmem:[#allocation2 + $0x9] sm:$0xff] %vm193_vm0, %v199_v5  ;;  %216 = vst.msk [vmem:[#allocation2 + $0x11] sm:$0xff] %vm193_vm0, %v200_v6  ;;  %v201_v12 = vld [vmem:[%s8399_s9 + $0x10] sm:$0xff]  ;;  %s9801_s2 = sld [smem:[%s11926_s0 + %s8338_s29]]   ;;  %s8340_s7 = smov 8  }
   0xa   :  { %217 = vst.msk [vmem:[#allocation2 + $0x19] sm:$0xff] %vm193_vm0, %v201_v12  ;;  %v8434_v13 = vld [vmem:[%s8388_s6 + $0x68] sm:$0xff]  ;;  %v8443_v15 = vld [vmem:[%s8388_s6 + $0x18] sm:$0xff]  ;;  %v8450_v18 = vld [vmem:[%s8388_s6 + $0x30] sm:$0xff]  ;;  %s10349_s17 = sld [smem:[%s11926_s0 + %s8340_s7]]   ;;  %s8341_s18 = smov 9  }
   0xb   :  { %v8457_v20 = vld [vmem:[%s8388_s6 + $0x48] sm:$0xff]  ;;  %v8460_v21 = vld [vmem:[%s8388_s6 + $0x10] sm:$0xff]  ;;  %v8466_v22 = vld [vmem:[%s8388_s6 + $0x60] sm:$0xff]  ;;  %s10394_s21 = sld [smem:[%s11926_s0 + %s8341_s18]]   ;;  %s8342_s22 = smov 10  }
   0xc   :  { %557 = vperm.xlu1 %8136, %v8407_v4   ;;  %380 = vperm.xlu0 %8135, %v8407_v4   ;;  %v202_v23 = vld [vmem:[%s8399_s9 + $0x18] sm:$0xff]  ;;  %v203_v24 = vld [vmem:[%s8399_s9 + $0x20] sm:$0xff]  ;;  %v205_v25 = vld [vmem:[%s8399_s9 + $0x30] sm:$0xff]  ;;  %s10857_s25 = sld [smem:[%s11926_s0 + %s8342_s22]]   ;;  %s8343_s26 = smov 11  }
   0xd   :  { %218 = vst.msk [vmem:[#allocation2 + $0x21] sm:$0xff] %vm193_vm0, %v202_v23  ;;  %219 = vst.msk [vmem:[#allocation2 + $0x29] sm:$0xff] %vm193_vm0, %v203_v24  ;;  %v208_v26 = vld [vmem:[%s8399_s9 + $0x48] sm:$0xff]  ;;  %v211_v27 = vld [vmem:[%s8399_s9 + $0x60] sm:$0xff]  ;;  %s10864_s29 = sld [smem:[%s11926_s0 + %s8343_s26]]   ;;  %s8344_s30 = smov 12  }
   0xe   :  { %221 = vst.msk [vmem:[#allocation2 + $0x39] sm:$0xff] %vm193_vm0, %v205_v25  ;;  %224 = vst.msk [vmem:[#allocation2 + $0x51] sm:$0xff] %vm193_vm0, %v208_v26  ;;  %v8498_v28 = vld [vmem:[%s8388_s6 + $0x28] sm:$0xff]  ;;  %v8504_v29 = vld [vmem:[%s8388_s6 + $0x40] sm:$0xff]  ;;  %s8346_s4 = smov 14   ;;  %s8347_s8 = smov 15  }
   0xf   :  { %227 = vst.msk [vmem:[#allocation2 + $0x69] sm:$0xff] %vm193_vm0, %v211_v27  ;;  %v8510_v30 = vld [vmem:[%s8388_s6 + $0x58] sm:$0xff]  ;;  %v204_v32 = vld [vmem:[%s8399_s9 + $0x28] sm:$0xff]  ;;  %v207_v33 = vld [vmem:[%s8399_s9 + $0x40] sm:$0xff]  ;;  %s7667_s7 = sld [smem:[%s11926_s0 + %s8346_s4]]  }
  0x10   :  { %8137 = vset.pattern.permute.xlu1 %v11939_v8  ;;  %392 = vperm.xlu0 %8135, %v8414_v7   ;;  %v8515_v31 = vld [vmem:[%s8388_s6 + $0x78] sm:$0xff]  ;;  %220 = vst.msk [vmem:[#allocation2 + $0x31] sm:$0xff] %vm193_vm0, %v204_v32  ;;  %223 = vst.msk [vmem:[#allocation2 + $0x49] sm:$0xff] %vm193_vm0, %v207_v33  ;;  %v8540_v35 = vld [vmem:[%s8388_s6 + $0x70] sm:$0xff]  ;;  %s7668_s18 = sld [smem:[%s11926_s0 + %s8347_s8]]  }
  0x11   :  { %734 = vperm.xlu1 %8137, %v8407_v4   ;;  %v210_v34 = vld [vmem:[%s8399_s9 + $0x58] sm:$0xff]  ;;  %v209_v37 = vld [vmem:[%s8399_s9 + $0x50] sm:$0xff]  ;;  %v212_v38 = vld [vmem:[%s8399_s9 + $0x68] sm:$0xff] }
  0x12   :  { %226 = vst.msk [vmem:[#allocation2 + $0x61] sm:$0xff] %vm193_vm0, %v210_v34  ;;  %v206_v36 = vld [vmem:[%s8399_s9 + $0x38] sm:$0xff]  ;;  %225 = vst.msk [vmem:[#allocation2 + $0x59] sm:$0xff] %vm193_vm0, %v209_v37  ;;  %v213_v43 = vld [vmem:[%s8399_s9 + $0x70] sm:$0xff] }
  0x13   :  { %222 = vst.msk [vmem:[#allocation2 + $0x41] sm:$0xff] %vm193_vm0, %v206_v36  ;;  %228 = vst.msk [vmem:[#allocation2 + $0x71] sm:$0xff] %vm193_vm0, %v212_v38  ;;  %v214_v44 = vld [vmem:[%s8399_s9 + $0x78] sm:$0xff]  ;;  %v359_v56 = vld [vmem:[#allocation2 + $0x1] sm:$0xff] }
  0x14   :  { %404 = vperm.xlu0 %8135, %v8422_v9   ;;  %229 = vst.msk [vmem:[#allocation2 + $0x79] sm:$0xff] %vm193_vm0, %v213_v43  ;;  %230 = vst.msk [vmem:[#allocation2 + $0x81] sm:$0xff] %vm193_vm0, %v214_v44  ;;  %v536_v60 = vld [vmem:[#allocation2 + $0x2] sm:$0xff]  ;;  %v8651_v27 = vld [vmem:[#allocation2 + $0xa] sm:$0xff] }
  0x15   :  { %8138 = vset.pattern.permute.xlu1 %v11935_v10  ;;  %v713_v62 = vld [vmem:[#allocation2 + $0x8] sm:$0xff]  ;;  %v8657_v34 = vld [vmem:[#allocation2 + $0x10] sm:$0xff] }
  0x16   :  { %907 = vperm.xlu1 %8138, %v8402_v3   ;;  %v8639_v23 = vld [vmem:[#allocation2 + $0x9] sm:$0xff] }
  0x18   :  { %416 = vperm.xlu0 %8135, %v8427_v11  }
  0x1a   :  { %8139 = vset.pattern.permute.xlu1 %v11931_v14 }
  0x1b   :  { %1084 = vperm.xlu1 %8139, %v8402_v3  }
  0x1c   :  { %428 = vperm.xlu0 %8135, %v8434_v13  }
  0x1f   :  { %1088 = vperm.xlu1 %8139, %v8407_v4  }
  0x20   :  { %8178 = vset.pattern.permute.xlu0 %v11939_v8 }
  0x21   :  { %730 = vperm.xlu0 %8178, %v8402_v3  }
  0x23   :  { %8140 = vset.pattern.permute.xlu1 %v11933_v16 }
  0x24   :  { %1265 = vperm.xlu1 %8140, %v8407_v4  }
  0x25   :  { %742 = vperm.xlu0 %8178, %v8443_v15  }
  0x28   :  { %8141 = vset.pattern.permute.xlu1 %v11937_v19 }
  0x29   :  { %1438 = vperm.xlu1 %8141, %v8402_v3   ;;  %754 = vperm.xlu0 %8178, %v8450_v18  }
  0x2d   :  { %8142 = vset.pattern.permute.xlu1 %v11945_v1  ;;  %766 = vperm.xlu0 %8178, %v8457_v20  }
  0x2e   :  { %384 = vperm.xlu1 %8142, %v8460_v21  }
  0x31   :  { %778 = vperm.xlu0 %8178, %v8466_v22  }
  0x32   :  { %388 = vperm.xlu1 %8142, %v8443_v15  }
  0x35   :  { %8180 = vset.pattern.permute.xlu0 %v11933_v16 }
  0x36   :  { %8143 = vset.pattern.permute.xlu1 %v11949_v0  ;;  %1261 = vperm.xlu0 %8180, %v8402_v3  }
  0x37   :  { %565 = vperm.xlu1 %8143, %v8443_v15  }
  0x3a   :  { %1273 = vperm.xlu0 %8180, %v8443_v15  }
  0x3b   :  { %8144 = vset.pattern.permute.xlu1 %v11939_v8 }
  0x3c   :  { %738 = vperm.xlu1 %8144, %v8460_v21  }
  0x3e   :  { %1285 = vperm.xlu0 %8180, %v8450_v18  }
  0x40   :  { %8145 = vset.pattern.permute.xlu1 %v11935_v10 }
  0x41   :  { %915 = vperm.xlu1 %8145, %v8460_v21  }
  0x42   :  { %1297 = vperm.xlu0 %8180, %v8457_v20  }
  0x45   :  { %919 = vperm.xlu1 %8145, %v8443_v15  }
  0x46   :  { %1309 = vperm.xlu0 %8180, %v8466_v22  }
  0x49   :  { %8146 = vset.pattern.permute.xlu1 %v11931_v14 }
  0x4a   :  { %1096 = vperm.xlu1 %8146, %v8443_v15   ;;  %8184 = vset.pattern.permute.xlu0 %v11949_v0 }
  0x4b   :  { %561 = vperm.xlu0 %8184, %v8460_v21  }
  0x4e   :  { %8147 = vset.pattern.permute.xlu1 %v11933_v16 }
  0x4f   :  { %1269 = vperm.xlu1 %8147, %v8460_v21   ;;  %573 = vperm.xlu0 %8184, %v8498_v28  }
  0x53   :  { %8148 = vset.pattern.permute.xlu1 %v11937_v19  ;;  %585 = vperm.xlu0 %8184, %v8504_v29  }
  0x54   :  { %1446 = vperm.xlu1 %8148, %v8460_v21  }
  0x57   :  { %597 = vperm.xlu0 %8184, %v8510_v30  }
  0x58   :  { %1450 = vperm.xlu1 %8148, %v8443_v15  }
  0x5b   :  { %613 = vperm.xlu0 %8184, %v8515_v31  }
  0x5c   :  { %8149 = vset.pattern.permute.xlu1 %v11945_v1 }
  0x5d   :  { %396 = vperm.xlu1 %8149, %v8498_v28  }
  0x5f   :  { %8190 = vset.pattern.permute.xlu0 %v11935_v10 }
  0x60   :  { %911 = vperm.xlu0 %8190, %v8407_v4  }
  0x61   :  { %8150 = vset.pattern.permute.xlu1 %v11949_v0 }
  0x62   :  { %569 = vperm.xlu1 %8150, %v8414_v7  }
  0x64   :  { %923 = vperm.xlu0 %8190, %v8414_v7  }
  0x66   :  { %8151 = vset.pattern.permute.xlu1 %v11939_v8 }
  0x67   :  { %746 = vperm.xlu1 %8151, %v8414_v7  }
  0x68   :  { %935 = vperm.xlu0 %8190, %v8422_v9  }
  0x6b   :  { %750 = vperm.xlu1 %8151, %v8498_v28  }
  0x6c   :  { %947 = vperm.xlu0 %8190, %v8427_v11  }
  0x6f   :  { %8152 = vset.pattern.permute.xlu1 %v11935_v10 }
  0x70   :  { %927 = vperm.xlu1 %8152, %v8498_v28   ;;  %959 = vperm.xlu0 %8190, %v8434_v13  }
  0x74   :  { %8153 = vset.pattern.permute.xlu1 %v11931_v14  ;;  %963 = vperm.xlu0 %8190, %v8540_v35  }
  0x75   :  { %1100 = vperm.xlu1 %8153, %v8414_v7  }
  0x78   :  { %8192 = vset.pattern.permute.xlu0 %v11931_v14 }
  0x79   :  { %8154 = vset.pattern.permute.xlu1 %v11933_v16  ;;  %1092 = vperm.xlu0 %8192, %v8460_v21  }
  0x7a   :  { %1277 = vperm.xlu1 %8154, %v8414_v7  }
  0x7d   :  { %1104 = vperm.xlu0 %8192, %v8498_v28  }
  0x7e   :  { %1281 = vperm.xlu1 %8154, %v8498_v28  }
  0x81   :  { %1116 = vperm.xlu0 %8192, %v8504_v29  }
  0x82   :  { %8155 = vset.pattern.permute.xlu1 %v11937_v19 }
  0x83   :  { %1458 = vperm.xlu1 %8155, %v8498_v28  }
  0x85   :  { %1128 = vperm.xlu0 %8192, %v8510_v30  }
  0x87   :  { %8156 = vset.pattern.permute.xlu1 %v11945_v1  ;;  %v8562_v39 = vpop.permute.xlu1 %553  ;;  %v8564_v40 = vpop.permute.xlu0 %376 }
  0x88   :  { %12234 = vst [vmem:[#allocation5_spill] sm:$0xff] %v8562_v39  ;;  %12235 = vst [vmem:[#allocation6_spill] sm:$0xff] %v8564_v40  ;;  %400 = vperm.xlu1 %8156, %v8450_v18   ;;  %v439_v57 = vmul.f32 %v8564_v40, %v359_v56  ;;  %v616_v5 = vmul.f32 %v8562_v39, %v536_v60  ;;  %v12296_v40 = vmov 7  }
  0x89   :  { %1144 = vperm.xlu0 %8192, %v8515_v31  }
  0x8b   :  { %v8568_v41 = vpop.permute.xlu1 %557  ;;  %v8570_v42 = vpop.permute.xlu0 %380 }
  0x8c   :  { %12236 = vst [vmem:[#allocation7_spill] sm:$0xff] %v8568_v41  ;;  %12237 = vst [vmem:[#allocation8_spill] sm:$0xff] %v8570_v42  ;;  %8157 = vset.pattern.permute.xlu1 %v11949_v0 }
  0x8d   :  { %577 = vperm.xlu1 %8157, %v8450_v18   ;;  %8195 = vset.pattern.permute.xlu0 %v11937_v19 }
  0x8e   :  { %1442 = vperm.xlu0 %8195, %v8407_v4  }
  0x8f   :  { %v8580_v45 = vpop.permute.xlu0 %392 }
  0x90   :  { %12238 = vst [vmem:[#allocation9_spill] sm:$0xff] %v8580_v45  ;;  %v8582_v46 = vpop.permute.xlu1 %734 }
  0x91   :  { %12239 = vst [vmem:[#allocation10_spill] sm:$0xff] %v8582_v46  ;;  %581 = vperm.xlu1 %8157, %v8422_v9  }
  0x92   :  { %1454 = vperm.xlu0 %8195, %v8414_v7  }
  0x93   :  { %v8586_v47 = vpop.permute.xlu0 %404 }
  0x94   :  { %12240 = vst [vmem:[#allocation11_spill] sm:$0xff] %v8586_v47 }
  0x95   :  { %8158 = vset.pattern.permute.xlu1 %v11939_v8  ;;  %v8589_v48 = vpop.permute.xlu1 %907 }
  0x96   :  { %12241 = vst [vmem:[#allocation12_spill] sm:$0xff] %v8589_v48  ;;  %758 = vperm.xlu1 %8158, %v8422_v9   ;;  %1466 = vperm.xlu0 %8195, %v8422_v9   ;;  %v970_v24 = vmul.f32 %v8589_v48, %v8639_v23 }
  0x97   :  { %v8593_v49 = vpop.permute.xlu0 %416 }
  0x98   :  { %12242 = vst [vmem:[#allocation13_spill] sm:$0xff] %v8593_v49 }
  0x9a   :  { %8159 = vset.pattern.permute.xlu1 %v11935_v10  ;;  %v8596_v50 = vpop.permute.xlu1 %1084  ;;  %1478 = vperm.xlu0 %8195, %v8427_v11  }
  0x9b   :  { %12243 = vst [vmem:[#allocation14_spill] sm:$0xff] %v8596_v50  ;;  %931 = vperm.xlu1 %8159, %v8450_v18   ;;  %v8600_v51 = vpop.permute.xlu0 %428  ;;  %v1147_v32 = vmul.f32 %v8596_v50, %v8651_v27 }
  0x9c   :  { %12244 = vst [vmem:[#allocation15_spill] sm:$0xff] %v8600_v51  ;;  %v8806_v51 = vld [vmem:[#allocation2 + $0x21] sm:$0xff] }
  0x9d   :  { %12309 = vst [vmem:[#allocation73_spill] sm:$0xff] %v8806_v51 }
  0x9e   :  { %v8602_v52 = vpop.permute.xlu1 %1088  ;;  %1490 = vperm.xlu0 %8195, %v8434_v13  }
  0x9f   :  { %12245 = vst [vmem:[#allocation16_spill] sm:$0xff] %v8602_v52  ;;  %8160 = vset.pattern.permute.xlu1 %v11931_v14 }
  0xa0   :  { %1108 = vperm.xlu1 %8160, %v8450_v18   ;;  %v8607_v53 = vpop.permute.xlu0 %730 }
  0xa1   :  { %12246 = vst [vmem:[#allocation17_spill] sm:$0xff] %v8607_v53  ;;  %v793_v6 = vmul.f32 %v8607_v53, %v713_v62  ;;  %v12285_v53 = vmov 4  }
  0xa2   :  { %1494 = vperm.xlu0 %8195, %v8540_v35  }
  0xa3   :  { %v8610_v54 = vpop.permute.xlu1 %1265 }
  0xa4   :  { %12247 = vst [vmem:[#allocation18_spill] sm:$0xff] %v8610_v54  ;;  %1112 = vperm.xlu1 %8160, %v8422_v9   ;;  %v8613_v55 = vpop.permute.xlu0 %742 }
  0xa5   :  { %12248 = vst [vmem:[#allocation19_spill] sm:$0xff] %v8613_v55 }
  0xa6   :  { %8197 = vset.pattern.permute.xlu0 %v11929_v17 }
  0xa7   :  { %249 = vperm.xlu0 %8197, %v8402_v3  }
  0xa8   :  { %8161 = vset.pattern.permute.xlu1 %v11933_v16  ;;  %v8619_v58 = vpop.permute.xlu1 %1438  ;;  %v8621_v59 = vpop.permute.xlu0 %754 }
  0xa9   :  { %12249 = vst [vmem:[#allocation20_spill] sm:$0xff] %v8619_v58  ;;  %12250 = vst [vmem:[#allocation21_spill] sm:$0xff] %v8621_v59  ;;  %1289 = vperm.xlu1 %8161, %v8422_v9  }
  0xab   :  { %471 = vrot.lane.b32.xlu0 %v439_v57, %s8327_s10 }
  0xac   :  { %v8625_v61 = vpop.permute.xlu0 %766 }
  0xad   :  { %12251 = vst [vmem:[#allocation22_spill] sm:$0xff] %v8625_v61  ;;  %8162 = vset.pattern.permute.xlu1 %v11937_v19  ;;  %v8628_v63 = vpop.permute.xlu1 %384 }
  0xae   :  { %12252 = vst [vmem:[#allocation23_spill] sm:$0xff] %v8628_v63  ;;  %1462 = vperm.xlu1 %8162, %v8450_v18  }
  0xaf   :  { %648 = vrot.lane.b32.xlu0 %v616_v5, %s8328_s11 }
  0xb0   :  { %v8634_v9 = vpop.permute.xlu0 %778 }
  0xb1   :  { %12253 = vst [vmem:[#allocation24_spill] sm:$0xff] %v8634_v9  ;;  %v8636_v12 = vpop.permute.xlu1 %388 }
  0xb2   :  { %12254 = vst [vmem:[#allocation25_spill] sm:$0xff] %v8636_v12  ;;  %8163 = vset.pattern.permute.xlu1 %v11945_v1 }
  0xb3   :  { %408 = vperm.xlu1 %8163, %v8504_v29   ;;  %825 = vrot.lane.b32.xlu0 %v793_v6, %s8329_s12 }
  0xb5   :  { %v8645_v25 = vpop.permute.xlu0 %1261 }
  0xb6   :  { %12255 = vst [vmem:[#allocation26_spill] sm:$0xff] %v8645_v25  ;;  %v8647_v26 = vpop.permute.xlu1 %565  ;;  %v1324_v37 = vmul.f32 %v8645_v25, %v8657_v34 }
  0xb7   :  { %12256 = vst [vmem:[#allocation27_spill] sm:$0xff] %v8647_v26  ;;  %412 = vperm.xlu1 %8163, %v8457_v20   ;;  %1002 = vrot.lane.b32.xlu0 %v970_v24, %s8330_s13 }
  0xb9   :  { %v8655_v33 = vpop.permute.xlu0 %1273 }
  0xba   :  { %12257 = vst [vmem:[#allocation28_spill] sm:$0xff] %v8655_v33  ;;  %v8816_v33 = vld [vmem:[#allocation2 + $0x22] sm:$0xff] }
  0xbb   :  { %8164 = vset.pattern.permute.xlu1 %v11949_v0  ;;  %v8660_v36 = vpop.permute.xlu1 %738  ;;  %1179 = vrot.lane.b32.xlu0 %v1147_v32, %s8331_s14 }
  0xbc   :  { %12258 = vst [vmem:[#allocation29_spill] sm:$0xff] %v8660_v36  ;;  %589 = vperm.xlu1 %8164, %v8457_v20  }
  0xbd   :  { %v8666_v38 = vpop.permute.xlu0 %1285 }
  0xbe   :  { %12259 = vst [vmem:[#allocation30_spill] sm:$0xff] %v8666_v38 }
  0xbf   :  { %1356 = vrot.lane.b32.xlu0 %v1324_v37, %s8332_s15 }
  0xc0   :  { %8165 = vset.pattern.permute.xlu1 %v11939_v8  ;;  %v8670_v43 = vpop.permute.xlu1 %915 }
  0xc1   :  { %12260 = vst [vmem:[#allocation31_spill] sm:$0xff] %v8670_v43  ;;  %762 = vperm.xlu1 %8165, %v8504_v29   ;;  %v8673_v44 = vpop.permute.xlu0 %1297 }
  0xc2   :  { %12261 = vst [vmem:[#allocation32_spill] sm:$0xff] %v8673_v44  ;;  %v12292_v44 = vmov 6  }
  0xc3   :  { %269 = vperm.xlu0 %8197, %v8414_v7  }
  0xc4   :  { %v8676_v56 = vpop.permute.xlu1 %919 }
  0xc5   :  { %12262 = vst [vmem:[#allocation33_spill] sm:$0xff] %v8676_v56  ;;  %8166 = vset.pattern.permute.xlu1 %v11935_v10  ;;  %v8679_v57 = vpop.permute.xlu0 %1309 }
  0xc6   :  { %12263 = vst [vmem:[#allocation34_spill] sm:$0xff] %v8679_v57  ;;  %939 = vperm.xlu1 %8166, %v8504_v29   ;;  %v12288_v57 = vmov 5  }
  0xc9   :  { %v8682_v60 = vpop.permute.xlu1 %1096 }
  0xca   :  { %12264 = vst [vmem:[#allocation35_spill] sm:$0xff] %v8682_v60  ;;  %943 = vperm.xlu1 %8166, %v8457_v20   ;;  %v8685_v62 = vpop.permute.xlu0 %561 }
  0xcb   :  { %12265 = vst [vmem:[#allocation36_spill] sm:$0xff] %v8685_v62 }
  0xce   :  { %8167 = vset.pattern.permute.xlu1 %v11931_v14  ;;  %v8688_v5 = vpop.permute.xlu1 %1269  ;;  %v8690_v6 = vpop.permute.xlu0 %573 }
  0xcf   :  { %12266 = vst [vmem:[#allocation37_spill] sm:$0xff] %v8688_v5  ;;  %12267 = vst [vmem:[#allocation38_spill] sm:$0xff] %v8690_v6  ;;  %1120 = vperm.xlu1 %8167, %v8457_v20  }
  0xd2   :  { %v8693_v7 = vpop.permute.xlu0 %585 }
  0xd3   :  { %12268 = vst [vmem:[#allocation39_spill] sm:$0xff] %v8693_v7  ;;  %8168 = vset.pattern.permute.xlu1 %v11933_v16  ;;  %v8696_v24 = vpop.permute.xlu1 %1446 }
  0xd4   :  { %12269 = vst [vmem:[#allocation40_spill] sm:$0xff] %v8696_v24  ;;  %1293 = vperm.xlu1 %8168, %v8504_v29   ;;  %v8798_v24 = vld [vmem:[#allocation2 + $0x20] sm:$0xff] }
  0xd6   :  { %v8699_v32 = vpop.permute.xlu0 %597 }
  0xd7   :  { %12270 = vst [vmem:[#allocation41_spill] sm:$0xff] %v8699_v32  ;;  %v8701_v37 = vpop.permute.xlu1 %1450 }
  0xd8   :  { %12271 = vst [vmem:[#allocation42_spill] sm:$0xff] %v8701_v37  ;;  %8169 = vset.pattern.permute.xlu1 %v11937_v19 }
  0xd9   :  { %1470 = vperm.xlu1 %8169, %v8504_v29  }
  0xda   :  { %v8705_v2 = vpop.permute.xlu0 %613 }
  0xdb   :  { %12272 = vst [vmem:[#allocation43_spill] sm:$0xff] %v8705_v2 }
  0xdc   :  { %v8707_v17 = vpop.permute.xlu1 %396 }
  0xdd   :  { %12273 = vst [vmem:[#allocation44_spill] sm:$0xff] %v8707_v17  ;;  %1474 = vperm.xlu1 %8169, %v8457_v20   ;;  %v12280_v20 = vmov 3  }
  0xdf   :  { %v8710_v14 = vpop.permute.xlu0 %911 }
  0xe0   :  { %12274 = vst [vmem:[#allocation45_spill] sm:$0xff] %v8710_v14 }
  0xe1   :  { %8170 = vset.pattern.permute.xlu1 %v11945_v1  ;;  %v8713_v16 = vpop.permute.xlu1 %569 }
  0xe2   :  { %12275 = vst [vmem:[#allocation46_spill] sm:$0xff] %v8713_v16  ;;  %420 = vperm.xlu1 %8170, %v8510_v30  }
  0xe3   :  { %v8716_v10 = vpop.permute.xlu0 %923 }
  0xe4   :  { %12276 = vst [vmem:[#allocation47_spill] sm:$0xff] %v8716_v10  ;;  %v8772_v10 = vld [vmem:[#allocation2 + $0x19] sm:$0xff] }
  0xe6   :  { %8171 = vset.pattern.permute.xlu1 %v11949_v0  ;;  %v8719_v19 = vpop.permute.xlu1 %746 }
  0xe7   :  { %12277 = vst [vmem:[#allocation48_spill] sm:$0xff] %v8719_v19  ;;  %593 = vperm.xlu1 %8171, %v8427_v11   ;;  %v8722_v8 = vpop.permute.xlu0 %935 }
  0xe8   :  { %12278 = vst [vmem:[#allocation49_spill] sm:$0xff] %v8722_v8 }
  0xea   :  { %v8724_v25 = vpop.permute.xlu1 %750 }
  0xeb   :  { %12279 = vst [vmem:[#allocation50_spill] sm:$0xff] %v8724_v25  ;;  %8172 = vset.pattern.permute.xlu1 %v12280_v20  ;;  %v8727_v50 = vpop.permute.xlu0 %947 }
  0xec   :  { %12281 = vst [vmem:[#allocation51_spill] sm:$0xff] %v8727_v50  ;;  %770 = vperm.xlu1 %8172, %v8427_v11  }
  0xef   :  { %v8730_v1 = vpop.permute.xlu1 %927  ;;  %v8732_v48 = vpop.permute.xlu0 %959 }
  0xf0   :  { %12282 = vst [vmem:[#allocation52_spill] sm:$0xff] %v8730_v1  ;;  %12283 = vst [vmem:[#allocation53_spill] sm:$0xff] %v8732_v48  ;;  %774 = vperm.xlu1 %8172, %v8510_v30   ;;  %v8785_v48 = vld [vmem:[#allocation2 + $0x1a] sm:$0xff] }
  0xf3   :  { %v8735_v0 = vpop.permute.xlu0 %963 }
  0xf4   :  { %12284 = vst [vmem:[#allocation54_spill] sm:$0xff] %v8735_v0  ;;  %8173 = vset.pattern.permute.xlu1 %v12285_v53  ;;  %v8738_v39 = vpop.permute.xlu1 %1100 }
  0xf5   :  { %12286 = vst [vmem:[#allocation55_spill] sm:$0xff] %v8738_v39  ;;  %951 = vperm.xlu1 %8173, %v8510_v30  }
  0xf8   :  { %v8741_v2 = vpop.permute.xlu0 %1092 }
  0xf9   :  { %12287 = vst [vmem:[#allocation56_spill] sm:$0xff] %v8741_v2  ;;  %8174 = vset.pattern.permute.xlu1 %v12288_v57  ;;  %v8744_v9 = vpop.permute.xlu1 %1277 }
  0xfa   :  { %12289 = vst [vmem:[#allocation57_spill] sm:$0xff] %v8744_v9  ;;  %1124 = vperm.xlu1 %8174, %v8427_v11  }
  0xfc   :  { %v8747_v50 = vpop.permute.xlu0 %1104 }
  0xfd   :  { %12290 = vst [vmem:[#allocation58_spill] sm:$0xff] %v8747_v50  ;;  %v8749_v49 = vpop.permute.xlu1 %1281 }
  0xfe   :  { %12291 = vst [vmem:[#allocation59_spill] sm:$0xff] %v8749_v49  ;;  %8175 = vset.pattern.permute.xlu1 %v12292_v44  ;;  %v12299_v49 = vmov 1  }
  0xff   :  { %1301 = vperm.xlu1 %8175, %v8427_v11  }
 0x100   :  { %v8753_v7 = vpop.permute.xlu0 %1116 }
 0x101   :  { %12293 = vst [vmem:[#allocation60_spill] sm:$0xff] %v8753_v7 }
 0x102   :  { %v8755_v38 = vpop.permute.xlu1 %1458 }
 0x103   :  { %12294 = vst [vmem:[#allocation61_spill] sm:$0xff] %v8755_v38  ;;  %1305 = vperm.xlu1 %8175, %v8510_v30  }
 0x104   :  { %v8758_v59 = vpop.permute.xlu0 %1128 }
 0x105   :  { %12295 = vst [vmem:[#allocation62_spill] sm:$0xff] %v8758_v59 }
 0x107   :  { %8176 = vset.pattern.permute.xlu1 %v12296_v40  ;;  %v8761_v0 = vpop.permute.xlu1 %400 }
 0x108   :  { %12297 = vst [vmem:[#allocation63_spill] sm:$0xff] %v8761_v0  ;;  %1482 = vperm.xlu1 %8176, %v8510_v30   ;;  %v8764_v9 = vpop.permute.xlu0 %1144  ;;  %v12303_v0 = vmov 2  }
 0x109   :  { %12298 = vst [vmem:[#allocation64_spill] sm:$0xff] %v8764_v9 }
 0x10c   :  { %8177 = vset.pattern.permute.xlu1 %v12299_v49  ;;  %v8767_v39 = vpop.permute.xlu1 %577 }
 0x10d   :  { %12300 = vst [vmem:[#allocation65_spill] sm:$0xff] %v8767_v39  ;;  %424 = vperm.xlu1 %8177, %v8466_v22   ;;  %v8770_v7 = vpop.permute.xlu0 %1442  ;;  %v442_v39 = vmul.f32 %v8772_v10, %v8636_v12 }
 0x10e   :  { %12301 = vst [vmem:[#allocation66_spill] sm:$0xff] %v8770_v7  ;;  %v1502_v19 = vmul.f32 %v8770_v7, %v8772_v10 }
 0x110   :  { %v8776_v16 = vpop.permute.xlu1 %581  ;;  %1535 = vrot.lane.b32.xlu0 %v1502_v19, %s8333_s16  ;;  %v619_v19 = vmul.f32 %v8647_v26, %v8785_v48 }
 0x111   :  { %12302 = vst [vmem:[#allocation67_spill] sm:$0xff] %v8776_v16  ;;  %8179 = vset.pattern.permute.xlu1 %v12303_v0  ;;  %v8780_v9 = vpop.permute.xlu0 %1454 }
 0x112   :  { %12304 = vst [vmem:[#allocation68_spill] sm:$0xff] %v8780_v9  ;;  %601 = vperm.xlu1 %8179, %v8466_v22  }
 0x114   :  { %477 = vrot.lane.b32.xlu0 %v442_v39, %s8327_s10  ;;  %v796_v39 = vmul.f32 %v8613_v55, %v8798_v24 }
 0x115   :  { %v8788_v45 = vpop.permute.xlu1 %758  ;;  %v8790_v7 = vpop.permute.xlu0 %1466 }
 0x116   :  { %12305 = vst [vmem:[#allocation69_spill] sm:$0xff] %v8788_v45  ;;  %12306 = vst [vmem:[#allocation70_spill] sm:$0xff] %v8790_v7  ;;  %605 = vperm.xlu1 %8179, %v8434_v13  }
 0x118   :  { %654 = vrot.lane.b32.xlu0 %v619_v19, %s8328_s11  ;;  %v973_v19 = vmul.f32 %v8676_v56, %v8806_v51  ;;  %v1984_v56 = vld [vmem:[#allocation2] sm:$0xff]  ;;  %v8831_v51 = vld [vmem:[#allocation2 + $0x29] sm:$0xff] }
 0x119   :  { %v8796_v9 = vpop.permute.xlu0 %1478 }
 0x11a   :  { %12307 = vst [vmem:[#allocation71_spill] sm:$0xff] %v8796_v9  ;;  %8181 = vset.pattern.permute.xlu1 %v12280_v20  ;;  %v8801_v12 = vpop.permute.xlu1 %931 }
 0x11b   :  { %12308 = vst [vmem:[#allocation72_spill] sm:$0xff] %v8801_v12  ;;  %782 = vperm.xlu1 %8181, %v8434_v13  }
 0x11c   :  { %831 = vrot.lane.b32.xlu0 %v796_v39, %s8329_s12  ;;  %v1150_v39 = vmul.f32 %v8682_v60, %v8816_v33 }
 0x11d   :  { %v8809_v26 = vpop.permute.xlu0 %1490 }
 0x11e   :  { %12310 = vst [vmem:[#allocation74_spill] sm:$0xff] %v8809_v26 }
 0x11f   :  { %8182 = vset.pattern.permute.xlu1 %v12285_v53  ;;  %v8814_v9 = vpop.permute.xlu1 %1108 }
 0x120   :  { %12311 = vst [vmem:[#allocation75_spill] sm:$0xff] %v8814_v9  ;;  %955 = vperm.xlu1 %8182, %v8466_v22   ;;  %1008 = vrot.lane.b32.xlu0 %v973_v19, %s8330_s13 }
 0x121   :  { %v8820_v55 = vpop.permute.xlu0 %1494 }
 0x122   :  { %12312 = vst [vmem:[#allocation76_spill] sm:$0xff] %v8820_v55 }
 0x123   :  { %v8824_v12 = vpop.permute.xlu1 %1112 }
 0x124   :  { %12313 = vst [vmem:[#allocation77_spill] sm:$0xff] %v8824_v12  ;;  %8183 = vset.pattern.permute.xlu1 %v12288_v57  ;;  %1185 = vrot.lane.b32.xlu0 %v1150_v39, %s8331_s14  ;;  %v1504_v39 = vmul.f32 %v8701_v37, %v8831_v51  ;;  %v8851_v37 = vld [vmem:[#allocation2 + $0x2a] sm:$0xff] }
 0x125   :  { %1132 = vperm.xlu1 %8183, %v8466_v22  }
 0x126   :  { %v250_v26 = vpop.permute.xlu0 %249 }
 0x127   :  { %v8829_v9 = vmul.f32 %v1984_v56, %v250_v26  ;;  %v444_v56 = vmul.f32 %v8831_v51, %v8707_v17 }
 0x128   :  { %v8833_v19 = vpop.permute.xlu1 %1289  ;;  %279 = vperm.xlu0 %8197, %v8450_v18  }
 0x129   :  { %12314 = vst [vmem:[#allocation78_spill] sm:$0xff] %v8829_v9  ;;  %12315 = vst [vmem:[#allocation79_spill] sm:$0xff] %v8833_v19  ;;  %1136 = vperm.xlu1 %8183, %v8434_v13  }
 0x12a   :  { %343 = vst.msk [vmem:[#allocation3] sm:$0xff] %vm193_vm0, %v8829_v9  ;;  %v472_v60 = vpop.permute.xlu0 %471  ;;  %v621_v9 = vmul.f32 %v8690_v6, %v8851_v37  ;;  %v8869_v6 = vld [vmem:[#allocation2 + $0x31] sm:$0xff] }
 0x12b   :  { %520 = vst.msk [vmem:[#allocation3] sm:$0xff] %vm519_vm2, %v472_v60 }
 0x12c   :  { %1539 = vrot.lane.b32.xlu0 %v1504_v39, %s8333_s16 }
 0x12d   :  { %8185 = vset.pattern.permute.xlu1 %v12292_v44  ;;  %v8844_v26 = vpop.permute.xlu1 %1462 }
 0x12e   :  { %12316 = vst [vmem:[#allocation80_spill] sm:$0xff] %v8844_v26  ;;  %1313 = vperm.xlu1 %8185, %v8434_v13   ;;  %v649_v18 = vpop.permute.xlu0 %648  ;;  %v8860_v13 = vld [vmem:[#allocation2 + $0x30] sm:$0xff] }
 0x12f   :  { %697 = vst.msk [vmem:[#allocation3] sm:$0xff] %vm696_vm3, %v649_v18  ;;  %v798_v17 = vmul.f32 %v8724_v25, %v8860_v13  ;;  %v8878_v25 = vld [vmem:[#allocation2 + $0x32] sm:$0xff] }
 0x130   :  { %481 = vrot.lane.b32.xlu0 %v444_v56, %s8327_s10 }
 0x132   :  { %8186 = vset.pattern.permute.xlu1 %v12296_v40  ;;  %v8854_v60 = vpop.permute.xlu1 %408  ;;  %v826_v39 = vpop.permute.xlu0 %825 }
 0x133   :  { %12317 = vst [vmem:[#allocation81_spill] sm:$0xff] %v8854_v60  ;;  %874 = vst.msk [vmem:[#allocation3] sm:$0xff] %vm873_vm4, %v826_v39  ;;  %1486 = vperm.xlu1 %8186, %v8466_v22  }
 0x134   :  { %658 = vrot.lane.b32.xlu0 %v621_v9, %s8328_s11  ;;  %v975_v9 = vmul.f32 %v8730_v1, %v8869_v6 }
 0x136   :  { %v8863_v18 = vpop.permute.xlu1 %412  ;;  %v1003_v56 = vpop.permute.xlu0 %1002 }
 0x137   :  { %12318 = vst [vmem:[#allocation82_spill] sm:$0xff] %v8863_v18  ;;  %1051 = vst.msk [vmem:[#allocation3] sm:$0xff] %vm1050_vm5, %v1003_v56  ;;  %8187 = vset.pattern.permute.xlu1 %v12299_v49  ;;  %v1152_v49 = vmul.f32 %v8747_v50, %v8878_v25  ;;  %v12320_v56 = vmov 0  }
 0x138   :  { %432 = vperm.xlu1 %8187, %v8540_v35   ;;  %835 = vrot.lane.b32.xlu0 %v798_v17, %s8329_s12 }
 0x13a   :  { %v1180_v39 = vpop.permute.xlu0 %1179 }
 0x13b   :  { %1228 = vst.msk [vmem:[#allocation3] sm:$0xff] %vm1227_vm6, %v1180_v39  ;;  %v8876_v60 = vpop.permute.xlu1 %589  ;;  %v235_v39 = vld [vmem:[#allocation2 + $0x20] sm:$0xff] }
 0x13c   :  { %12319 = vst [vmem:[#allocation83_spill] sm:$0xff] %v8876_v60  ;;  %436 = vperm.xlu1 %8187, %v8515_v31   ;;  %1012 = vrot.lane.b32.xlu0 %v975_v9, %s8330_s13 }
 0x13e   :  { %v1357_v17 = vpop.permute.xlu0 %1356 }
 0x13f   :  { %1405 = vst.msk [vmem:[#allocation3] sm:$0xff] %vm1404_vm7, %v1357_v17  ;;  %v8897_v17 = vld [vmem:[#allocation2 + $0x39] sm:$0xff] }
 0x140   :  { %8188 = vset.pattern.permute.xlu1 %v12320_v56  ;;  %v8886_v1 = vpop.permute.xlu1 %762  ;;  %1189 = vrot.lane.b32.xlu0 %v1152_v49, %s8331_s14  ;;  %v1506_v49 = vmul.f32 %v8755_v38, %v8897_v17  ;;  %v8926_v38 = vld [vmem:[#allocation2 + $0x41] sm:$0xff] }
 0x141   :  { %254 = vperm.xlu1 %8188, %v8407_v4  }
 0x142   :  { %v8890_v26 = vpop.permute.xlu0 %269 }
 0x143   :  { %12321 = vst [vmem:[#allocation84_spill] sm:$0xff] %v8890_v26  ;;  %v331_v9 = vmul.f32 %v8890_v26, %v235_v39 }
 0x144   :  { %289 = vperm.xlu0 %8197, %v8504_v29   ;;  %v8910_v29 = vld [vmem:[#allocation2 + $0x3a] sm:$0xff] }
 0x145   :  { %8189 = vset.pattern.permute.xlu1 %v12303_v0  ;;  %v8895_v50 = vpop.permute.xlu1 %939  ;;  %347 = vst.msk [vmem:[#allocation3 + $0x40] sm:$0xff] %vm193_vm0, %v331_v9  ;;  %v446_v0 = vmul.f32 %v8897_v17, %v8586_v47  ;;  %v623_v9 = vmul.f32 %v8776_v16, %v8910_v29 }
 0x146   :  { %12322 = vst [vmem:[#allocation85_spill] sm:$0xff] %v8895_v50  ;;  %609 = vperm.xlu1 %8189, %v8540_v35  }
 0x148   :  { %1543 = vrot.lane.b32.xlu0 %v1506_v49, %s8333_s16  ;;  %v8919_v49 = vld [vmem:[#allocation2 + $0x40] sm:$0xff] }
 0x149   :  { %v8904_v4 = vpop.permute.xlu1 %943 }
 0x14a   :  { %12323 = vst [vmem:[#allocation86_spill] sm:$0xff] %v8904_v4  ;;  %8191 = vset.pattern.permute.xlu1 %v12280_v20  ;;  %v800_v20 = vmul.f32 %v8788_v45, %v8919_v49 }
 0x14b   :  { %786 = vperm.xlu1 %8191, %v8540_v35  }
 0x14c   :  { %485 = vrot.lane.b32.xlu0 %v446_v0, %s8327_s10  ;;  %v977_v0 = vmul.f32 %v8722_v8, %v8926_v38  ;;  %v12031_v8 = vmov 8  }
 0x14e   :  { %v8913_v39 = vpop.permute.xlu1 %1120 }
 0x14f   :  { %12324 = vst [vmem:[#allocation87_spill] sm:$0xff] %v8913_v39  ;;  %790 = vperm.xlu1 %8191, %v8515_v31  }
 0x150   :  { %662 = vrot.lane.b32.xlu0 %v623_v9, %s8328_s11 }
 0x153   :  { %8193 = vset.pattern.permute.xlu1 %v12285_v53  ;;  %v8924_v47 = vpop.permute.xlu1 %1293  ;;  %v8937_v53 = vld [vmem:[#allocation2 + $0x42] sm:$0xff] }
 0x154   :  { %967 = vperm.xlu1 %8193, %v8515_v31   ;;  %839 = vrot.lane.b32.xlu0 %v800_v20, %s8329_s12  ;;  %v1154_v45 = vmul.f32 %v8824_v12, %v8937_v53  ;;  %v8949_v20 = vld [vmem:[#allocation2 + $0x49] sm:$0xff] }
 0x158   :  { %8194 = vset.pattern.permute.xlu1 %v12288_v57  ;;  %v8933_v9 = vpop.permute.xlu1 %1470  ;;  %1016 = vrot.lane.b32.xlu0 %v977_v0, %s8330_s13  ;;  %v1508_v0 = vmul.f32 %v8790_v7, %v8949_v20  ;;  %v617_v7 = vmul.f32 %v8651_v27, %v8568_v41 }
 0x159   :  { %12325 = vst [vmem:[#allocation88_spill] sm:$0xff] %v8933_v9  ;;  %1140 = vperm.xlu1 %8194, %v8540_v35  }
 0x15c   :  { %v8941_v16 = vpop.permute.xlu1 %1474  ;;  %1193 = vrot.lane.b32.xlu0 %v1154_v45, %s8331_s14 }
 0x15d   :  { %12326 = vst [vmem:[#allocation89_spill] sm:$0xff] %v8941_v16  ;;  %8196 = vset.pattern.permute.xlu1 %v12292_v44  ;;  %v448_v44 = vmul.f32 %v8949_v20, %v8863_v18 }
 0x15e   :  { %1317 = vperm.xlu1 %8196, %v8540_v35  }
 0x160   :  { %299 = vperm.xlu0 %8197, %v8427_v11   ;;  %v8961_v11 = vld [vmem:[#allocation2 + $0x4a] sm:$0xff] }
 0x161   :  { %v8947_v57 = vpop.permute.xlu1 %420  ;;  %v625_v12 = vmul.f32 %v8876_v60, %v8961_v11  ;;  %v8984_v60 = vld [vmem:[#allocation2 + $0x52] sm:$0xff] }
 0x162   :  { %12327 = vst [vmem:[#allocation90_spill] sm:$0xff] %v8947_v57  ;;  %1321 = vperm.xlu1 %8196, %v8515_v31  }
 0x164   :  { %1547 = vrot.lane.b32.xlu0 %v1508_v0, %s8333_s16 }
 0x166   :  { %8198 = vset.pattern.permute.xlu1 %v12296_v40  ;;  %v8956_v45 = vpop.permute.xlu1 %593  ;;  %v8969_v40 = vld [vmem:[#allocation2 + $0x50] sm:$0xff] }
 0x167   :  { %12328 = vst [vmem:[#allocation91_spill] sm:$0xff] %v8956_v45  ;;  %1498 = vperm.xlu1 %8198, %v8515_v31   ;;  %v802_v31 = vmul.f32 %v8625_v61, %v8969_v40 }
 0x168   :  { %489 = vrot.lane.b32.xlu0 %v448_v44, %s8327_s10  ;;  %v8980_v44 = vld [vmem:[#allocation2 + $0x51] sm:$0xff] }
 0x16b   :  { %8199 = vset.pattern.permute.xlu1 %v12031_v8  ;;  %v8967_v0 = vpop.permute.xlu1 %770  ;;  %v979_v8 = vmul.f32 %v8904_v4, %v8980_v44  ;;  %v12333_v4 = vmov 8  }
 0x16c   :  { %12329 = vst [vmem:[#allocation92_spill] sm:$0xff] %v8967_v0  ;;  %1615 = vperm.xlu1 %8199, %v8402_v3   ;;  %666 = vrot.lane.b32.xlu0 %v625_v12, %s8328_s11  ;;  %v1156_v12 = vmul.f32 %v8913_v39, %v8984_v60 }
 0x16f   :  { %v8975_v18 = vpop.permute.xlu1 %774 }
 0x170   :  { %12330 = vst [vmem:[#allocation93_spill] sm:$0xff] %v8975_v18  ;;  %8200 = vset.pattern.permute.xlu1 %v12320_v56  ;;  %843 = vrot.lane.b32.xlu0 %v802_v31, %s8329_s12  ;;  %v440_v31 = vmul.f32 %v8639_v23, %v8570_v42  ;;  %v9042_v42 = vld [vmem:[#allocation2 + $0x60] sm:$0xff] }
 0x171   :  { %259 = vperm.xlu1 %8200, %v8460_v21   ;;  %12338 = vst [vmem:[#allocation100_spill] sm:$0xff] %v9042_v42 }
 0x174   :  { %v8986_v3 = vpop.permute.xlu1 %951  ;;  %1020 = vrot.lane.b32.xlu0 %v979_v8, %s8330_s13  ;;  %v9003_v8 = vld [vmem:[#allocation2 + $0x59] sm:$0xff] }
 0x175   :  { %12331 = vst [vmem:[#allocation94_spill] sm:$0xff] %v8986_v3  ;;  %264 = vperm.xlu1 %8200, %v8443_v15   ;;  %12334 = vst [vmem:[#allocation96_spill] sm:$0xff] %v9003_v8  ;;  %v1510_v23 = vmul.f32 %v8941_v16, %v9003_v8  ;;  %v9026_v16 = vld [vmem:[#allocation2 + $0x5a] sm:$0xff] }
 0x178   :  { %1197 = vrot.lane.b32.xlu0 %v1156_v12, %s8331_s14  ;;  %v9022_v12 = vld [vmem:[#allocation2 + $0x11] sm:$0xff] }
 0x179   :  { %v8995_v61 = vpop.permute.xlu1 %1124  ;;  %473 = vrot.lane.b32.xlu1 %v440_v31, %s8327_s10  ;;  %v971_v31 = vmul.f32 %v8710_v14, %v9022_v12 }
 0x17a   :  { %12332 = vst [vmem:[#allocation95_spill] sm:$0xff] %v8995_v61  ;;  %8201 = vset.pattern.permute.xlu1 %v12333_v4 }
 0x17c   :  { %309 = vperm.xlu0 %8197, %v8466_v22   ;;  %v794_v22 = vmul.f32 %v8657_v34, %v8582_v46  ;;  %v9029_v34 = vld [vmem:[#allocation2 + $0x12] sm:$0xff]  ;;  %v627_v46 = vmul.f32 %v8699_v32, %v9026_v16 }
 0x17d   :  { %650 = vrot.lane.b32.xlu1 %v617_v7, %s8328_s11  ;;  %v450_v7 = vmul.f32 %v9003_v8, %v8947_v57  ;;  %v1148_v14 = vmul.f32 %v8602_v52, %v9029_v34  ;;  %v12364_v8 = vld [vmem:[#allocation46_spill] sm:$0xff] }
 0x17e   :  { %v9005_v39 = vpop.permute.xlu1 %1301 }
 0x17f   :  { %12335 = vst [vmem:[#allocation97_spill] sm:$0xff] %v9005_v39 }
 0x180   :  { %1551 = vrot.lane.b32.xlu0 %v1510_v23, %s8333_s16  ;;  %v1742_v23 = vld [vmem:[%s9012_s20] sm:$0xff] }
 0x181   :  { %827 = vrot.lane.b32.xlu1 %v794_v22, %s8329_s12  ;;  %v1743_v22 = vld [vmem:[%s9012_s20 + $0x8] sm:$0xff] }
 0x182   :  { %v9018_v27 = vpop.permute.xlu1 %1305  ;;  %v9033_v26 = vpop.permute.xlu0 %1535  ;;  %v1776_v57 = vpack.c.bf16 %v1743_v22, %v1742_v23  ;;  %v804_v22 = vmul.f32 %v8975_v18, %v9042_v42  ;;  %v9068_v18 = vld [vmem:[#allocation2 + $0x62] sm:$0xff]  ;;  %v12360_v42 = vld [vmem:[#allocation9_spill] sm:$0xff] }
 0x183   :  { %12336 = vst [vmem:[#allocation98_spill] sm:$0xff] %v9018_v27  ;;  %v1747_v27 = vld [vmem:[%s9012_s20 + $0x28] sm:$0xff]  ;;  %12341 = vst [vmem:[#allocation103_spill] sm:$0xff] %v9068_v18 }
 0x184   :  { %493 = vrot.lane.b32.xlu0 %v450_v7, %s8327_s10  ;;  %1810 = vmatpush1.bf16.msra.mxu0 %v1776_v57  ;;  %v1744_v7 = vld [vmem:[%s9012_s20 + $0x10] sm:$0xff]  ;;  %v1746_v57 = vld [vmem:[%s9012_s20 + $0x20] sm:$0xff] }
 0x185   :  { %1004 = vrot.lane.b32.xlu1 %v971_v31, %s8330_s13  ;;  %1811 = vmatprep.subr.bf16.mxu0 %v12320_v56  ;;  %v1745_v31 = vld [vmem:[%s9012_s20 + $0x18] sm:$0xff] }
 0x186   :  { %v1777_v23 = vpack.c.bf16 %v1745_v31, %v1744_v7  ;;  %v9051_v32 = vpop.permute.xlu0 %477  ;;  %v1778_v7 = vpack.c.bf16 %v1747_v27, %v1746_v57 }
 0x187   :  { %v9038_v41 = vpop.permute.xlu1 %1482 }
 0x188   :  { %12337 = vst [vmem:[#allocation99_spill] sm:$0xff] %v9038_v41  ;;  %670 = vrot.lane.b32.xlu0 %v627_v46, %s8328_s11  ;;  %1812 = vmatpush1.bf16.msra.mxu0 %v1777_v23  ;;  %v9056_v46 = vld [vmem:[#allocation2 + $0x18] sm:$0xff] }
 0x189   :  { %1181 = vrot.lane.b32.xlu1 %v1148_v14, %s8331_s14  ;;  %1813 = vmatprep.subr.bf16.mxu0 %v12320_v56  ;;  %v9062_v14 = vld [vmem:[#allocation2 + $0x61] sm:$0xff]  ;;  %v1325_v23 = vmul.f32 %v8610_v54, %v9056_v46 }
 0x18a   :  { %12340 = vst [vmem:[#allocation102_spill] sm:$0xff] %v9062_v14  ;;  %v981_v31 = vmul.f32 %v8986_v3, %v9062_v14  ;;  %v1158_v3 = vmul.f32 %v8758_v59, %v9068_v18 }
 0x18c   :  { %v9053_v52 = vpop.permute.xlu1 %424  ;;  %847 = vrot.lane.b32.xlu0 %v804_v22, %s8329_s12  ;;  %1814 = vmatpush1.bf16.msra.mxu0 %v1778_v7  ;;  %v1748_v22 = vld [vmem:[%s9012_s20 + $0x30] sm:$0xff]  ;;  %v1750_v7 = vld [vmem:[%s9012_s20 + $0x40] sm:$0xff] }
 0x18d   :  { %12339 = vst [vmem:[#allocation101_spill] sm:$0xff] %v9053_v52  ;;  %1627 = vperm.xlu1 %8201, %v8443_v15   ;;  %1815 = vmatprep.subr.bf16.mxu0 %v12320_v56  ;;  %v1749_v15 = vld [vmem:[%s9012_s20 + $0x38] sm:$0xff]  ;;  %v9074_v52 = vpop.permute.xlu0 %654 }
 0x18e   :  { %v1779_v57 = vpack.c.bf16 %v1749_v15, %v1748_v22  ;;  %v1501_v15 = vmul.f32 %v8619_v58, %v9022_v12 }
 0x190   :  { %1024 = vrot.lane.b32.xlu0 %v981_v31, %s8330_s13  ;;  %1816 = vmatpush1.bf16.msra.mxu0 %v1779_v57  ;;  %v1751_v31 = vld [vmem:[%s9012_s20 + $0x48] sm:$0xff]  ;;  %v1753_v57 = vld [vmem:[%s9012_s20 + $0x58] sm:$0xff] }
 0x191   :  { %v9076_v27 = vpop.permute.xlu1 %601  ;;  %1358 = vrot.lane.b32.xlu1 %v1325_v23, %s8332_s15  ;;  %1817 = vmatprep.subr.bf16.mxu0 %v12320_v56  ;;  %v1780_v23 = vpack.c.bf16 %v1751_v31, %v1750_v7  ;;  %v9089_v22 = vpop.permute.xlu0 %831  ;;  %v441_v7 = vmul.f32 %v9022_v12, %v8628_v63  ;;  %v1755_v31 = vld [vmem:[%s9012_s20 + $0x68] sm:$0xff]  ;;  %v1756_v12 = vld [vmem:[%s9012_s20 + $0x70] sm:$0xff]  ;;  %v1757_v63 = vld [vmem:[%s9012_s20 + $0x78] sm:$0xff] }
 0x192   :  { %12342 = vst [vmem:[#allocation104_spill] sm:$0xff] %v9076_v27  ;;  %8202 = vset.pattern.permute.xlu1 %v12320_v56  ;;  %v9189_v27 = vld [vmem:[#allocation2 + $0x6a] sm:$0xff] }
 0x194   :  { %1201 = vrot.lane.b32.xlu0 %v1158_v3, %s8331_s14  ;;  %1818 = vmatpush1.bf16.msra.mxu0 %v1780_v23  ;;  %v1752_v3 = vld [vmem:[%s9012_s20 + $0x50] sm:$0xff] }
 0x195   :  { %v9086_v54 = vpop.permute.xlu1 %605  ;;  %274 = vperm.xlu1 %8202, %v8498_v28   ;;  %1819 = vmatprep.subr.bf16.mxu0 %v12320_v56  ;;  %v1781_v59 = vpack.c.bf16 %v1753_v57, %v1752_v3  ;;  %v9107_v23 = vpop.permute.xlu0 %1008 }
 0x196   :  { %12343 = vst [vmem:[#allocation105_spill] sm:$0xff] %v9086_v54 }
 0x198   :  { %319 = vperm.xlu0 %8197, %v8540_v35   ;;  %1820 = vmatpush1.bf16.msra.mxu0 %v1781_v59  ;;  %v1754_v35 = vld [vmem:[%s9012_s20 + $0x60] sm:$0xff]  ;;  %v618_v59 = vmul.f32 %v9029_v34, %v8685_v62  ;;  %v8300_v62 = vld [vmem:[%s8388_s6 + $0x38] sm:$0xff] }
 0x199   :  { %1533 = vrot.lane.b32.xlu1 %v1501_v15, %s8333_s16  ;;  %1821 = vmatprep.subr.bf16.mxu0 %v12320_v56  ;;  %v8299_v15 = vld [vmem:[%s8388_s6 + $0x8] sm:$0xff]  ;;  %v1782_v3 = vpack.c.bf16 %v1755_v31, %v1754_v35  ;;  %v9120_v58 = vpop.permute.xlu0 %1185  ;;  %v1758_v31 = vld [vmem:[%s9012_s20 + $0x80] sm:$0xff] }
 0x19a   :  { %v9098_v18 = vpop.permute.xlu1 %782  ;;  %8203 = vset.pattern.permute.xlu1 %v12333_v4 }
 0x19b   :  { %12344 = vst [vmem:[#allocation106_spill] sm:$0xff] %v9098_v18 }
 0x19c   :  { %8212 = vset.pattern.permute.xlu0 %v12333_v4  ;;  %1822 = vmatpush1.bf16.msra.mxu0 %v1782_v3  ;;  %v1759_v3 = vld [vmem:[%s9012_s20 + $0x88] sm:$0xff] }
 0x19d   :  { %1619 = vperm.xlu0 %8212, %v8299_v15   ;;  %475 = vrot.lane.b32.xlu1 %v441_v7, %s8327_s10  ;;  %v1783_v15 = vpack.c.bf16 %v1757_v63, %v1756_v12  ;;  %v795_v7 = vmul.f32 %v9056_v46, %v8660_v36  ;;  %v237_v63 = vld [vmem:[#allocation2 + $0x30] sm:$0xff]  ;;  %v972_v12 = vmul.f32 %v8772_v10, %v8670_v43 }
 0x19e   :  { %1823 = vmatprep.subr.bf16.mxu0 %v12320_v56  ;;  %v1149_v10 = vmul.f32 %v8741_v2, %v8785_v48  ;;  %v9170_v2 = vld [vmem:[#allocation2 + $0x28] sm:$0xff] }
 0x19f   :  { %v9111_v57 = vpop.permute.xlu1 %955 }
 0x1a0   :  { %12345 = vst [vmem:[#allocation107_spill] sm:$0xff] %v9111_v57  ;;  %1824 = vmatpush1.bf16.msra.mxu0 %v1783_v15 }
 0x1a1   :  { %1623 = vperm.xlu0 %8212, %v8460_v21   ;;  %652 = vrot.lane.b32.xlu1 %v618_v59, %s8328_s11  ;;  %v1784_v21 = vpack.c.bf16 %v1759_v3, %v1758_v31  ;;  %v9149_v31 = vld [vmem:[%s8388_s6 + $0x48] sm:$0xff] }
 0x1a2   :  { %1825 = vmatprep.subr.bf16.mxu0 %v12320_v56 }
 0x1a4   :  { %v9124_v35 = vpop.permute.xlu1 %1132  ;;  %1826 = vmatpush1.bf16.msra.mxu0 %v1784_v21  ;;  %v8302_v21 = vld [vmem:[%s8388_s6 + $0x20] sm:$0xff] }
 0x1a5   :  { %12346 = vst [vmem:[#allocation108_spill] sm:$0xff] %v9124_v35  ;;  %1635 = vperm.xlu0 %8212, %v8498_v28   ;;  %829 = vrot.lane.b32.xlu1 %v795_v7, %s8329_s12  ;;  %v12355_v35 = vld [vmem:[#allocation15_spill] sm:$0xff] }
 0x1a6   :  { %4117 = vmatprep.subr.bf16.mxu0 %v12320_v56 }
 0x1a7   :  { %v9131_v59 = vpop.permute.xlu0 %279 }
 0x1a8   :  { %12347 = vst [vmem:[#allocation109_spill] sm:$0xff] %v9131_v59  ;;  %v9135_v15 = vpop.permute.xlu1 %1136  ;;  %v333_v36 = vmul.f32 %v9131_v59, %v237_v63  ;;  %v9164_v59 = vld [vmem:[%s8388_s6 + $0x68] sm:$0xff] }
 0x1a9   :  { %12348 = vst [vmem:[#allocation110_spill] sm:$0xff] %v9135_v15  ;;  %1643 = vperm.xlu0 %8212, %v8300_v62   ;;  %1006 = vrot.lane.b32.xlu1 %v972_v12, %s8330_s13  ;;  %v1326_v12 = vmul.f32 %v8688_v5, %v8798_v24  ;;  %v12353_v24 = vld [vmem:[#allocation28_spill] sm:$0xff] }
 0x1aa   :  { %349 = vst.msk [vmem:[#allocation3 + $0x60] sm:$0xff] %vm193_vm0, %v333_v36  ;;  %v1327_v5 = vmul.f32 %v12353_v24, %v9170_v2  ;;  %v12356_v24 = vld [vmem:[#allocation73_spill] sm:$0xff] }
 0x1ab   :  { %v9142_v28 = vpop.permute.xlu0 %1539 }
 0x1ad   :  { %v9146_v7 = vpop.permute.xlu1 %1313  ;;  %1651 = vperm.xlu0 %8212, %v9149_v31   ;;  %1183 = vrot.lane.b32.xlu1 %v1149_v10, %s8331_s14  ;;  %v9168_v10 = vld [vmem:[#allocation2 + $0x69] sm:$0xff] }
 0x1ae   :  { %12349 = vst [vmem:[#allocation111_spill] sm:$0xff] %v9146_v7  ;;  %12351 = vst [vmem:[#allocation113_spill] sm:$0xff] %v9168_v10  ;;  %v1512_v43 = vmul.f32 %v9038_v41, %v9168_v10  ;;  %v452_v57 = vmul.f32 %v9168_v10, %v12355_v35  ;;  %v232_v41 = vld [vmem:[#allocation2 + $0x8] sm:$0xff]  ;;  %v239_v10 = vld [vmem:[#allocation2 + $0x40] sm:$0xff] }
 0x1af   :  { %v9153_v3 = vpop.permute.xlu0 %481 }
 0x1b1   :  { %1659 = vperm.xlu0 %8212, %v8510_v30   ;;  %1631 = vperm.xlu1 %8203, %v8302_v21  }
 0x1b2   :  { %v9157_v36 = vpop.permute.xlu1 %1486 }
 0x1b3   :  { %12350 = vst [vmem:[#allocation112_spill] sm:$0xff] %v9157_v36  ;;  %v9159_v63 = vpop.permute.xlu0 %658 }
 0x1b5   :  { %1667 = vperm.xlu0 %8212, %v9164_v59   ;;  %1360 = vrot.lane.b32.xlu1 %v1326_v12, %s8332_s15 }
 0x1b6   :  { %8204 = vset.pattern.permute.xlu1 %v12320_v56 }
 0x1b7   :  { %v9173_v30 = vpop.permute.xlu1 %432  ;;  %v9175_v21 = vpop.permute.xlu0 %835 }
 0x1b8   :  { %12352 = vst [vmem:[#allocation114_spill] sm:$0xff] %v9173_v30 }
 0x1b9   :  { %1555 = vrot.lane.b32.xlu0 %v1512_v43, %s8333_s16  ;;  %1362 = vrot.lane.b32.xlu1 %v1327_v5, %s8332_s15  ;;  %v629_v43 = vmul.f32 %v9086_v54, %v9189_v27  ;;  %v12357_v5 = vld [vmem:[#allocation40_spill] sm:$0xff] }
 0x1ba   :  { %v1503_v39 = vmul.f32 %v12357_v5, %v12356_v24  ;;  %v443_v5 = vmul.f32 %v12356_v24, %v12360_v42  ;;  %v620_v24 = vmul.f32 %v8816_v33, %v12364_v8  ;;  %v9242_v42 = vld [vmem:[%s8388_s6 + $0x78] sm:$0xff] }
 0x1bb   :  { %v9183_v12 = vpop.permute.xlu1 %436  ;;  %v9185_v7 = vpop.permute.xlu0 %1012  ;;  %12369 = vst [vmem:[#allocation121_spill] sm:$0xff] %v9242_v42 }
 0x1bc   :  { %12354 = vst [vmem:[#allocation115_spill] sm:$0xff] %v9183_v12 }
 0x1bd   :  { %497 = vrot.lane.b32.xlu0 %v452_v57, %s8327_s10  ;;  %284 = vperm.xlu1 %8204, %v8300_v62   ;;  %v9203_v57 = vld [vmem:[#allocation2 + $0x70] sm:$0xff] }
 0x1be   :  { %v806_v54 = vmul.f32 %v9098_v18, %v9203_v57  ;;  %v12363_v18 = vld [vmem:[#allocation53_spill] sm:$0xff] }
 0x1bf   :  { %v9192_v14 = vpop.permute.xlu0 %1189 }
 0x1c0   :  { %v9198_v12 = vpop.permute.xlu1 %254 }
 0x1c1   :  { %12358 = vst [vmem:[#allocation73_spill] sm:$0xff] %v9198_v12  ;;  %674 = vrot.lane.b32.xlu0 %v629_v43, %s8328_s11  ;;  %1537 = vrot.lane.b32.xlu1 %v1503_v39, %s8333_s16  ;;  %v328_v35 = vmul.f32 %v9198_v12, %v232_v41  ;;  %v903_v43 = vld [vmem:[#allocation2 + $0x71] sm:$0xff] }
 0x1c2   :  { %8205 = vset.pattern.permute.xlu1 %v12333_v4  ;;  %v983_v12 = vmul.f32 %v12363_v18, %v903_v43 }
 0x1c3   :  { %v9206_v62 = vpop.permute.xlu0 %289  ;;  %344 = vst.msk [vmem:[#allocation3 + $0x10] sm:$0xff] %vm193_vm0, %v328_v35  ;;  %v1080_v35 = vld [vmem:[#allocation2 + $0x72] sm:$0xff] }
 0x1c4   :  { %12359 = vst [vmem:[#allocation116_spill] sm:$0xff] %v9206_v62  ;;  %v335_v39 = vmul.f32 %v9206_v62, %v239_v10 }
 0x1c5   :  { %v9214_v61 = vpop.permute.xlu1 %609  ;;  %851 = vrot.lane.b32.xlu0 %v806_v54, %s8329_s12  ;;  %479 = vrot.lane.b32.xlu1 %v443_v5, %s8327_s10  ;;  %v1160_v5 = vmul.f32 %v9135_v15, %v1080_v35 }
 0x1c6   :  { %12361 = vst [vmem:[#allocation117_spill] sm:$0xff] %v9214_v61  ;;  %351 = vst.msk [vmem:[#allocation3 + $0x80] sm:$0xff] %vm193_vm0, %v335_v39  ;;  %v12366_v39 = vld [vmem:[#allocation48_spill] sm:$0xff] }
 0x1c7   :  { %v9219_v41 = vpop.permute.xlu0 %1543  ;;  %v797_v62 = vmul.f32 %v9170_v2, %v12366_v39 }
 0x1c8   :  { %12362 = vst [vmem:[#allocation118_spill] sm:$0xff] %v9219_v41 }
 0x1c9   :  { %1028 = vrot.lane.b32.xlu0 %v983_v12, %s8330_s13  ;;  %656 = vrot.lane.b32.xlu1 %v620_v24, %s8328_s11  ;;  %v12368_v12 = vld [vmem:[#allocation47_spill] sm:$0xff] }
 0x1ca   :  { %v9226_v10 = vpop.permute.xlu1 %786  ;;  %v974_v24 = vmul.f32 %v8831_v51, %v12368_v12  ;;  %v453_v12 = vmul.f32 %v903_v43, %v9173_v30  ;;  %v9273_v30 = vld [vmem:[#allocation2 + $0x38] sm:$0xff] }
 0x1cb   :  { %12365 = vst [vmem:[#allocation119_spill] sm:$0xff] %v9226_v10  ;;  %v9228_v54 = vpop.permute.xlu0 %485 }
 0x1cd   :  { %1205 = vrot.lane.b32.xlu0 %v1160_v5, %s8331_s14  ;;  %833 = vrot.lane.b32.xlu1 %v797_v62, %s8329_s12  ;;  %v1513_v62 = vmul.f32 %v9157_v36, %v903_v43  ;;  %v12371_v5 = vld [vmem:[#allocation55_spill] sm:$0xff]  ;;  %v630_v36 = vmul.f32 %v1080_v35, %v9214_v61  ;;  %v9271_v43 = vld [vmem:[#allocation2 + $0x78] sm:$0xff] }
 0x1ce   :  { %v9235_v18 = vpop.permute.xlu1 %790  ;;  %12376 = vst [vmem:[#allocation126_spill] sm:$0xff] %v9271_v43  ;;  %v807_v35 = vmul.f32 %v9226_v10, %v9271_v43  ;;  %v9282_v61 = vld [vmem:[#allocation2 + $0x79] sm:$0xff] }
 0x1cf   :  { %12367 = vst [vmem:[#allocation120_spill] sm:$0xff] %v9235_v18  ;;  %v9237_v8 = vpop.permute.xlu0 %662  ;;  %v1151_v18 = vmul.f32 %v12371_v5, %v8851_v37  ;;  %v12374_v5 = vld [vmem:[#allocation57_spill] sm:$0xff]  ;;  %12379 = vst [vmem:[#allocation128_spill] sm:$0xff] %v9282_v61 }
 0x1d1   :  { %1675 = vperm.xlu0 %8212, %v9242_v42   ;;  %1010 = vrot.lane.b32.xlu1 %v974_v24, %s8330_s13  ;;  %v8305_v24 = vld [vmem:[%s8388_s6 + $0x30] sm:$0xff]  ;;  %v1328_v42 = vmul.f32 %v12374_v5, %v8860_v13 }
 0x1d2   :  { %v12378_v13 = vld [vmem:[#allocation59_spill] sm:$0xff] }
 0x1d3   :  { %v9246_v15 = vpop.permute.xlu1 %967  ;;  %v9248_v39 = vpop.permute.xlu0 %839 }
 0x1d4   :  { %12370 = vst [vmem:[#allocation122_spill] sm:$0xff] %v9246_v15 }
 0x1d5   :  { %1557 = vrot.lane.b32.xlu0 %v1513_v62, %s8333_s16  ;;  %1187 = vrot.lane.b32.xlu1 %v1151_v18, %s8331_s14  ;;  %v241_v18 = vld [vmem:[#allocation2 + $0x50] sm:$0xff] }
 0x1d7   :  { %v9255_v51 = vpop.permute.xlu0 %1016 }
 0x1d8   :  { %v9258_v41 = vpop.permute.xlu1 %1140 }
 0x1d9   :  { %12372 = vst [vmem:[#allocation123_spill] sm:$0xff] %v9258_v41  ;;  %499 = vrot.lane.b32.xlu0 %v453_v12, %s8327_s10  ;;  %1639 = vperm.xlu1 %8205, %v8305_v24   ;;  %v1329_v24 = vmul.f32 %v12378_v13, %v9273_v30 }
 0x1db   :  { %v9262_v15 = vpop.permute.xlu0 %1193 }
 0x1dc   :  { %12373 = vst [vmem:[#allocation124_spill] sm:$0xff] %v9262_v15  ;;  %v12382_v15 = vld [vmem:[#allocation54_spill] sm:$0xff] }
 0x1dd   :  { %v9267_v62 = vpop.permute.xlu1 %1317  ;;  %676 = vrot.lane.b32.xlu0 %v630_v36, %s8328_s11  ;;  %1364 = vrot.lane.b32.xlu1 %v1328_v42, %s8332_s15  ;;  %v984_v10 = vmul.f32 %v12382_v15, %v9282_v61  ;;  %v9308_v15 = vld [vmem:[#allocation2 + $0x80] sm:$0xff] }
 0x1de   :  { %12375 = vst [vmem:[#allocation125_spill] sm:$0xff] %v9267_v62  ;;  %8206 = vset.pattern.permute.xlu1 %v12320_v56  ;;  %12385 = vst [vmem:[#allocation132_spill] sm:$0xff] %v9308_v15  ;;  %v12391_v61 = vld [vmem:[#allocation21_spill] sm:$0xff] }
 0x1df   :  { %v9276_v12 = vpop.permute.xlu0 %299  ;;  %v799_v43 = vmul.f32 %v9273_v30, %v12391_v61 }
 0x1e0   :  { %12377 = vst [vmem:[#allocation127_spill] sm:$0xff] %v9276_v12  ;;  %v337_v36 = vmul.f32 %v9276_v12, %v241_v18  ;;  %v9298_v18 = vld [vmem:[#allocation2 + $0x7a] sm:$0xff] }
 0x1e1   :  { %v9285_v42 = vpop.permute.xlu1 %1321  ;;  %853 = vrot.lane.b32.xlu0 %v807_v35, %s8329_s12  ;;  %1366 = vrot.lane.b32.xlu1 %v1329_v24, %s8332_s15  ;;  %v1161_v35 = vmul.f32 %v9258_v41, %v9298_v18  ;;  %v12384_v24 = vld [vmem:[#allocation68_spill] sm:$0xff] }
 0x1e2   :  { %12380 = vst [vmem:[#allocation129_spill] sm:$0xff] %v9285_v42  ;;  %353 = vst.msk [vmem:[#allocation3 + $0xa0] sm:$0xff] %vm193_vm0, %v337_v36  ;;  %v1505_v36 = vmul.f32 %v12384_v24, %v8869_v6  ;;  %v12387_v42 = vld [vmem:[#allocation63_spill] sm:$0xff] }
 0x1e3   :  { %v9290_v5 = vpop.permute.xlu0 %1547  ;;  %v445_v41 = vmul.f32 %v8869_v6, %v12387_v42 }
 0x1e4   :  { %12381 = vst [vmem:[#allocation130_spill] sm:$0xff] %v9290_v5 }
 0x1e5   :  { %1030 = vrot.lane.b32.xlu0 %v984_v10, %s8330_s13  ;;  %294 = vperm.xlu1 %8206, %v9149_v31  }
 0x1e6   :  { %v9296_v13 = vpop.permute.xlu1 %1498 }
 0x1e7   :  { %12383 = vst [vmem:[#allocation131_spill] sm:$0xff] %v9296_v13  ;;  %v9300_v12 = vpop.permute.xlu0 %489  ;;  %v1338_v13 = vmul.f32 %v9267_v62, %v9308_v15  ;;  %v12388_v15 = vld [vmem:[#allocation65_spill] sm:$0xff] }
 0x1e8   :  { %v622_v6 = vmul.f32 %v8878_v25, %v12388_v15 }
 0x1e9   :  { %1207 = vrot.lane.b32.xlu0 %v1161_v35, %s8331_s14  ;;  %1541 = vrot.lane.b32.xlu1 %v1505_v36, %s8333_s16  ;;  %v9321_v35 = vld [vmem:[#allocation2 + $0x81] sm:$0xff]  ;;  %v233_v36 = vld [vmem:[#allocation2 + $0x10] sm:$0xff] }
 0x1ea   :  { %8207 = vset.pattern.permute.xlu1 %v12333_v4  ;;  %v1515_v62 = vmul.f32 %v8820_v55, %v9321_v35 }
 0x1eb   :  { %v9311_v31 = vpop.permute.xlu1 %1615  ;;  %v9313_v10 = vpop.permute.xlu0 %666 }
 0x1ec   :  { %12386 = vst [vmem:[#allocation133_spill] sm:$0xff] %v9311_v31  ;;  %v1678_v24 = vmul.f32 %v9311_v31, %v9029_v34  ;;  %v2032_v34 = vld [vmem:[#allocation2 + $0x1] sm:$0xff] }
 0x1ed   :  { %1384 = vrot.lane.b32.xlu0 %v1338_v13, %s8332_s15  ;;  %483 = vrot.lane.b32.xlu1 %v445_v41, %s8327_s10 }
 0x1ee   :  { %1694 = vst.msk [vmem:[#allocation3 + $0x8] sm:$0xff] %vm193_vm0, %v1678_v24  ;;  %v12390_v24 = vld [vmem:[#allocation6_spill] sm:$0xff] }
 0x1ef   :  { %v9326_v5 = vpop.permute.xlu0 %843  ;;  %v2048_v31 = vmul.f32 %v2032_v34, %v12390_v24  ;;  %v12398_v24 = vld [vmem:[#allocation80_spill] sm:$0xff] }
 0x1f0   :  { %v9332_v42 = vpop.permute.xlu1 %259 }
 0x1f1   :  { %12389 = vst [vmem:[#allocation134_spill] sm:$0xff] %v9332_v42  ;;  %1561 = vrot.lane.b32.xlu0 %v1515_v62, %s8333_s16  ;;  %660 = vrot.lane.b32.xlu1 %v622_v6, %s8328_s11  ;;  %v329_v41 = vmul.f32 %v9332_v42, %v233_v36  ;;  %v12393_v36 = vld [vmem:[#allocation72_spill] sm:$0xff] }
 0x1f2   :  { %v976_v6 = vmul.f32 %v8897_v17, %v12393_v36 }
 0x1f3   :  { %v9337_v13 = vpop.permute.xlu0 %1020  ;;  %345 = vst.msk [vmem:[#allocation3 + $0x20] sm:$0xff] %vm193_vm0, %v329_v41 }
 0x1f4   :  { %v9343_v55 = vpop.permute.xlu1 %264 }
 0x1f5   :  { %12392 = vst [vmem:[#allocation21_spill] sm:$0xff] %v9343_v55  ;;  %v330_v15 = vmul.f32 %v9056_v46, %v9343_v55  ;;  %2080 = vrot.lane.b32.xlu0 %v2048_v31, %s8327_s10  ;;  %837 = vrot.lane.b32.xlu1 %v799_v43, %s8329_s12  ;;  %v243_v46 = vld [vmem:[#allocation2 + $0x60] sm:$0xff] }
 0x1f6   :  { %v8306_v31 = vld [vmem:[%s8388_s6 + $0x40] sm:$0xff] }
 0x1f7   :  { %346 = vst.msk [vmem:[#allocation3 + $0x30] sm:$0xff] %vm193_vm0, %v330_v15  ;;  %v9350_v62 = vpop.permute.xlu0 %1197 }
 0x1f8   :  { %523 = vst.msk [vmem:[#allocation3 + $0x30] sm:$0xff] %vm519_vm2, %v9051_v32  ;;  %v474_v34 = vpop.permute.xlu1 %473  ;;  %v12395_v32 = vld [vmem:[#allocation75_spill] sm:$0xff] }
 0x1f9   :  { %700 = vst.msk [vmem:[#allocation3 + $0x30] sm:$0xff] %vm696_vm3, %v9074_v52  ;;  %1014 = vrot.lane.b32.xlu1 %v976_v6, %s8330_s13  ;;  %v1153_v15 = vmul.f32 %v12395_v32, %v8910_v29 }
 0x1fa   :  { %521 = vst.msk [vmem:[#allocation3 + $0x10] sm:$0xff] %vm519_vm2, %v474_v34 }
 0x1fb   :  { %877 = vst.msk [vmem:[#allocation3 + $0x30] sm:$0xff] %vm873_vm4, %v9089_v22  ;;  %v9364_v17 = vpop.permute.xlu0 %309 }
 0x1fc   :  { %1054 = vst.msk [vmem:[#allocation3 + $0x30] sm:$0xff] %vm1050_vm5, %v9107_v23  ;;  %12394 = vst [vmem:[#allocation135_spill] sm:$0xff] %v9364_v17  ;;  %v651_v52 = vpop.permute.xlu1 %650  ;;  %v339_v43 = vmul.f32 %v9364_v17, %v243_v46  ;;  %v9382_v46 = vld [vmem:[#allocation2 + $0x48] sm:$0xff]  ;;  %v1507_v17 = vmul.f32 %v12398_v24, %v8926_v38 }
 0x1fd   :  { %1231 = vst.msk [vmem:[#allocation3 + $0x30] sm:$0xff] %vm1227_vm6, %v9120_v58  ;;  %1191 = vrot.lane.b32.xlu1 %v1153_v15, %s8331_s14  ;;  %v12396_v58 = vld [vmem:[#allocation30_spill] sm:$0xff] }
 0x1fe   :  { %698 = vst.msk [vmem:[#allocation3 + $0x10] sm:$0xff] %vm696_vm3, %v651_v52  ;;  %v1330_v6 = vmul.f32 %v12396_v58, %v8919_v49  ;;  %v1331_v52 = vmul.f32 %v8833_v19, %v9382_v46 }
 0x1ff   :  { %355 = vst.msk [vmem:[#allocation3 + $0xc0] sm:$0xff] %vm193_vm0, %v339_v43  ;;  %v9374_v22 = vpop.permute.xlu0 %1551 }
 0x200   :  { %v828_v23 = vpop.permute.xlu1 %827 }
 0x201   :  { %875 = vst.msk [vmem:[#allocation3 + $0x10] sm:$0xff] %vm873_vm4, %v828_v23  ;;  %1647 = vperm.xlu1 %8207, %v8306_v31  }
 0x203   :  { %v9378_v41 = vpop.permute.xlu0 %493 }
 0x204   :  { %v1005_v34 = vpop.permute.xlu1 %1004 }
 0x205   :  { %1052 = vst.msk [vmem:[#allocation3 + $0x10] sm:$0xff] %vm1050_vm5, %v1005_v34  ;;  %1368 = vrot.lane.b32.xlu1 %v1330_v6, %s8332_s15  ;;  %v8307_v6 = vld [vmem:[%s8388_s6 + $0x58] sm:$0xff] }
 0x206   :  { %8208 = vset.pattern.permute.xlu1 %v12320_v56 }
 0x207   :  { %v9387_v15 = vpop.permute.xlu0 %670 }
 0x208   :  { %v1182_v43 = vpop.permute.xlu1 %1181 }
 0x209   :  { %1229 = vst.msk [vmem:[#allocation3 + $0x10] sm:$0xff] %vm1227_vm6, %v1182_v43  ;;  %1370 = vrot.lane.b32.xlu1 %v1331_v52, %s8332_s15  ;;  %v12399_v52 = vld [vmem:[#allocation81_spill] sm:$0xff] }
 0x20b   :  { %v9393_v49 = vpop.permute.xlu0 %847 }
 0x20c   :  { %v9395_v23 = vpop.permute.xlu1 %1627 }
 0x20d   :  { %12397 = vst [vmem:[#allocation136_spill] sm:$0xff] %v9395_v23  ;;  %v1681_v31 = vmul.f32 %v9395_v23, %v8851_v37  ;;  %304 = vperm.xlu1 %8208, %v8307_v6  }
 0x20f   :  { %1697 = vst.msk [vmem:[#allocation3 + $0x38] sm:$0xff] %vm193_vm0, %v1681_v31  ;;  %v9401_v34 = vpop.permute.xlu0 %1024  ;;  %v447_v31 = vmul.f32 %v8926_v38, %v12399_v52 }
 0x210   :  { %v1359_v43 = vpop.permute.xlu1 %1358 }
 0x211   :  { %1406 = vst.msk [vmem:[#allocation3 + $0x10] sm:$0xff] %vm1404_vm7, %v1359_v43  ;;  %1545 = vrot.lane.b32.xlu1 %v1507_v17, %s8333_s16  ;;  %v12402_v43 = vld [vmem:[#allocation39_spill] sm:$0xff] }
 0x212   :  { %1583 = vst.msk [vmem:[#allocation3 + $0x10] sm:$0xff] %vm1581_vm8, %v9033_v26  ;;  %8209 = vset.pattern.permute.xlu1 %v12333_v4  ;;  %v624_v26 = vmul.f32 %v8937_v53, %v12402_v43 }
 0x213   :  { %v9410_v37 = vpop.permute.xlu0 %1201 }
 0x214   :  { %v9414_v6 = vpop.permute.xlu1 %274 }
 0x215   :  { %12400 = vst [vmem:[#allocation137_spill] sm:$0xff] %v9414_v6  ;;  %v332_v19 = vmul.f32 %v9170_v2, %v9414_v6  ;;  %487 = vrot.lane.b32.xlu1 %v447_v31, %s8327_s10  ;;  %v801_v2 = vmul.f32 %v9382_v46, %v8886_v1  ;;  %v12404_v31 = vld [vmem:[#allocation60_spill] sm:$0xff] }
 0x217   :  { %348 = vst.msk [vmem:[#allocation3 + $0x50] sm:$0xff] %vm193_vm0, %v332_v19  ;;  %v9420_v17 = vpop.permute.xlu0 %319 }
 0x218   :  { %12401 = vst [vmem:[#allocation138_spill] sm:$0xff] %v9420_v17  ;;  %525 = vst.msk [vmem:[#allocation3 + $0x50] sm:$0xff] %vm519_vm2, %v9153_v3  ;;  %v1534_v24 = vpop.permute.xlu1 %1533  ;;  %v341_v38 = vmul.f32 %v9203_v57, %v9420_v17 }
 0x219   :  { %702 = vst.msk [vmem:[#allocation3 + $0x50] sm:$0xff] %vm696_vm3, %v9159_v63  ;;  %664 = vrot.lane.b32.xlu1 %v624_v26, %s8328_s11  ;;  %v1155_v26 = vmul.f32 %v12404_v31, %v8961_v11 }
 0x21a   :  { %1582 = vst.msk [vmem:[#allocation3] sm:$0xff] %vm1581_vm8, %v1534_v24 }
 0x21b   :  { %879 = vst.msk [vmem:[#allocation3 + $0x50] sm:$0xff] %vm873_vm4, %v9175_v21 }
 0x21c   :  { %357 = vst.msk [vmem:[#allocation3 + $0xe0] sm:$0xff] %vm193_vm0, %v341_v38  ;;  %v9441_v19 = vpop.permute.xlu0 %1619  ;;  %v476_v53 = vpop.permute.xlu1 %475 }
 0x21d   :  { %1056 = vst.msk [vmem:[#allocation3 + $0x50] sm:$0xff] %vm1050_vm5, %v9185_v7  ;;  %v1679_v3 = vmul.f32 %v9441_v19, %v8785_v48  ;;  %841 = vrot.lane.b32.xlu1 %v801_v2, %s8329_s12  ;;  %v978_v7 = vmul.f32 %v8949_v20, %v8895_v50  ;;  %v12403_v48 = vld [vmem:[#allocation78_spill] sm:$0xff] }
 0x21e   :  { %1233 = vst.msk [vmem:[#allocation3 + $0x50] sm:$0xff] %vm1227_vm6, %v9192_v14 }
 0x21f   :  { %522 = vst.msk [vmem:[#allocation3 + $0x20] sm:$0xff] %vm519_vm2, %v476_v53 }
 0x220   :  { %1695 = vst.msk [vmem:[#allocation3 + $0x18] sm:$0xff] %vm193_vm0, %v1679_v3  ;;  %v9450_v63 = vpop.permute.xlu0 %1623  ;;  %v653_v21 = vpop.permute.xlu1 %652 }
 0x221   :  { %v1710_v24 = vld [vmem:[#allocation3] sm:$0xff]  ;;  %v1680_v14 = vmul.f32 %v9450_v63, %v8816_v33  ;;  %699 = vst.msk [vmem:[#allocation3 + $0x20] sm:$0xff] %vm696_vm3, %v653_v21  ;;  %1018 = vrot.lane.b32.xlu1 %v978_v7, %s8330_s13  ;;  %v1711_v33 = vld [vmem:[#allocation3 + $0x8] sm:$0xff]  ;;  %v1712_v7 = vld [vmem:[#allocation3 + $0x10] sm:$0xff] }
 0x222   :  { %2016 = vst.msk [vmem:[#allocation3] sm:$0xff] %vm193_vm0, %v12403_v48  ;;  %v1760_v17 = vpack.c.bf16 %v1712_v7, %v1710_v24  ;;  %v9480_v7 = vld [vmem:[#allocation2 + $0x58] sm:$0xff] }
 0x223   :  { %1696 = vst.msk [vmem:[#allocation3 + $0x28] sm:$0xff] %vm193_vm0, %v1680_v14 }
 0x224   :  { %v9461_v20 = vpop.permute.xlu0 %1635  ;;  %v830_v38 = vpop.permute.xlu1 %829 }
 0x225   :  { %v1683_v2 = vmul.f32 %v9461_v20, %v8910_v29  ;;  %876 = vst.msk [vmem:[#allocation3 + $0x20] sm:$0xff] %vm873_vm4, %v830_v38  ;;  %1195 = vrot.lane.b32.xlu1 %v1155_v26, %s8331_s14  ;;  %v8308_v29 = vld [vmem:[%s8388_s6 + $0x50] sm:$0xff] }
 0x226   :  { %v1717_v38 = vld [vmem:[#allocation3 + $0x38] sm:$0xff] }
 0x227   :  { %v1713_v53 = vld [vmem:[#allocation3 + $0x18] sm:$0xff]  ;;  %1699 = vst.msk [vmem:[#allocation3 + $0x58] sm:$0xff] %vm193_vm0, %v1683_v2  ;;  %v1332_v2 = vmul.f32 %v8924_v47, %v8969_v40 }
 0x228   :  { %v1761_v3 = vpack.c.bf16 %v1713_v53, %v1711_v33  ;;  %v9468_v21 = vpop.permute.xlu0 %1643  ;;  %v1007_v14 = vpop.permute.xlu1 %1006  ;;  %v12406_v40 = vld [vmem:[#allocation32_spill] sm:$0xff] }
 0x229   :  { %v1685_v31 = vmul.f32 %v9468_v21, %v8961_v11  ;;  %1053 = vst.msk [vmem:[#allocation3 + $0x20] sm:$0xff] %vm1050_vm5, %v1007_v14  ;;  %1655 = vperm.xlu1 %8209, %v8308_v29  }
 0x22a   :  { %7696 = vmatprep.mubr.msk.bf16.mxu0 %vm193_vm0, %v1761_v3  ;;  %v1715_v26 = vld [vmem:[#allocation3 + $0x28] sm:$0xff] }
 0x22b   :  { %1842 = vmatmul.mubr.bf16.vlgmr.msra.gmra.mrb[0].mxu0 %v1760_v17  ;;  %1701 = vst.msk [vmem:[#allocation3 + $0x78] sm:$0xff] %vm193_vm0, %v1685_v31  ;;  %v1763_v33 = vpack.c.bf16 %v1717_v38, %v1715_v26  ;;  %v1333_v17 = vmul.f32 %v12406_v40, %v9480_v7 }
 0x22c   :  { %v9478_v53 = vpop.permute.xlu0 %1651  ;;  %v1184_v24 = vpop.permute.xlu1 %1183 }
 0x22d   :  { %12405 = vst [vmem:[#allocation139_spill] sm:$0xff] %v9478_v53  ;;  %v1687_v11 = vmul.f32 %v9478_v53, %v9026_v16  ;;  %1230 = vst.msk [vmem:[#allocation3 + $0x20] sm:$0xff] %vm1227_vm6, %v1184_v24  ;;  %1372 = vrot.lane.b32.xlu1 %v1332_v2, %s8332_s15  ;;  %7697 = vmatprep.mubr.msk.bf16.mxu0 %vm193_vm0, %v1763_v33 }
 0x22e   :  { %8210 = vset.pattern.permute.xlu1 %v12320_v56 }
 0x22f   :  { %1703 = vst.msk [vmem:[#allocation3 + $0x98] sm:$0xff] %vm193_vm0, %v1687_v11  ;;  %v12410_v11 = vld [vmem:[#allocation13_spill] sm:$0xff] }
 0x230   :  { %v9491_v31 = vpop.permute.xlu0 %1659  ;;  %v9493_v3 = vpop.permute.xlu1 %1631 }
 0x231   :  { %12407 = vst [vmem:[#allocation140_spill] sm:$0xff] %v9491_v31  ;;  %12408 = vst [vmem:[#allocation141_spill] sm:$0xff] %v9493_v3  ;;  %v1689_v14 = vmul.f32 %v9491_v31, %v9189_v27  ;;  %v1682_v29 = vmul.f32 %v9493_v3, %v8878_v25  ;;  %1374 = vrot.lane.b32.xlu1 %v1333_v17, %s8332_s15  ;;  %v1509_v25 = vmul.f32 %v8933_v9, %v8980_v44 }
 0x233   :  { %1705 = vst.msk [vmem:[#allocation3 + $0xb8] sm:$0xff] %vm193_vm0, %v1689_v14  ;;  %1698 = vst.msk [vmem:[#allocation3 + $0x48] sm:$0xff] %vm193_vm0, %v1682_v29 }
 0x234   :  { %v9502_v26 = vpop.permute.xlu0 %1667  ;;  %v1361_v38 = vpop.permute.xlu1 %1360 }
 0x235   :  { %12409 = vst [vmem:[#allocation142_spill] sm:$0xff] %v9502_v26  ;;  %v1691_v2 = vmul.f32 %v9502_v26, %v9298_v18  ;;  %1407 = vst.msk [vmem:[#allocation3 + $0x20] sm:$0xff] %vm1404_vm7, %v1361_v38  ;;  %314 = vperm.xlu1 %8210, %v9164_v59   ;;  %v449_v59 = vmul.f32 %v8980_v44, %v12410_v11  ;;  %v626_v38 = vmul.f32 %v8984_v60, %v8956_v45 }
 0x236   :  { %v803_v60 = vmul.f32 %v9480_v7, %v8967_v0 }
 0x237   :  { %1707 = vst.msk [vmem:[#allocation3 + $0xd8] sm:$0xff] %vm193_vm0, %v1691_v2 }
 0x238   :  { %v9511_v33 = vpop.permute.xlu0 %1555  ;;  %v1363_v24 = vpop.permute.xlu1 %1362 }
 0x239   :  { %1408 = vst.msk [vmem:[#allocation3 + $0x30] sm:$0xff] %vm1404_vm7, %v1363_v24  ;;  %1549 = vrot.lane.b32.xlu1 %v1509_v25, %s8333_s16  ;;  %v12413_v25 = vld [vmem:[#allocation96_spill] sm:$0xff] }
 0x23a   :  { %1585 = vst.msk [vmem:[#allocation3 + $0x30] sm:$0xff] %vm1581_vm8, %v9142_v28  ;;  %8211 = vset.pattern.permute.xlu1 %v12333_v4 }
 0x23c   :  { %v9520_v17 = vpop.permute.xlu0 %497  ;;  %v9522_v14 = vpop.permute.xlu1 %284 }
 0x23d   :  { %v334_v29 = vmul.f32 %v9273_v30, %v9522_v14  ;;  %491 = vrot.lane.b32.xlu1 %v449_v59, %s8327_s10  ;;  %v12411_v30 = vld [vmem:[#allocation124_spill] sm:$0xff] }
 0x23e   :  { %v1721_v59 = vld [vmem:[#allocation3 + $0x58] sm:$0xff] }
 0x23f   :  { %350 = vst.msk [vmem:[#allocation3 + $0x70] sm:$0xff] %vm193_vm0, %v334_v29 }
 0x240   :  { %527 = vst.msk [vmem:[#allocation3 + $0x70] sm:$0xff] %vm519_vm2, %v9228_v54  ;;  %v9532_v28 = vpop.permute.xlu0 %674  ;;  %v1538_v44 = vpop.permute.xlu1 %1537 }
 0x241   :  { %704 = vst.msk [vmem:[#allocation3 + $0x70] sm:$0xff] %vm696_vm3, %v9237_v8  ;;  %668 = vrot.lane.b32.xlu1 %v626_v38, %s8328_s11  ;;  %v12412_v8 = vld [vmem:[#allocation51_spill] sm:$0xff] }
 0x242   :  { %1584 = vst.msk [vmem:[#allocation3 + $0x20] sm:$0xff] %vm1581_vm8, %v1538_v44  ;;  %v980_v24 = vmul.f32 %v12413_v25, %v12412_v8  ;;  %v1716_v44 = vld [vmem:[#allocation3 + $0x30] sm:$0xff] }
 0x243   :  { %881 = vst.msk [vmem:[#allocation3 + $0x70] sm:$0xff] %vm873_vm4, %v9248_v39  ;;  %v1719_v39 = vld [vmem:[#allocation3 + $0x48] sm:$0xff]  ;;  %v1613_v8 = vld [vmem:[#allocation2 + $0x8a] sm:$0xff] }
 0x244   :  { %1058 = vst.msk [vmem:[#allocation3 + $0x70] sm:$0xff] %vm1050_vm5, %v9255_v51  ;;  %v9546_v54 = vpop.permute.xlu0 %851  ;;  %v480_v2 = vpop.permute.xlu1 %479  ;;  %v1765_v26 = vpack.c.bf16 %v1721_v59, %v1719_v39  ;;  %v12416_v39 = vld [vmem:[#allocation97_spill] sm:$0xff] }
 0x245   :  { %1235 = vst.msk [vmem:[#allocation3 + $0x70] sm:$0xff] %vm1227_vm6, %v12411_v30  ;;  %845 = vrot.lane.b32.xlu1 %v803_v60, %s8329_s12  ;;  %v12414_v60 = vld [vmem:[#allocation95_spill] sm:$0xff] }
 0x246   :  { %524 = vst.msk [vmem:[#allocation3 + $0x40] sm:$0xff] %vm519_vm2, %v480_v2  ;;  %v1157_v2 = vmul.f32 %v12414_v60, %v9026_v16  ;;  %v12415_v16 = vld [vmem:[#allocation100_spill] sm:$0xff] }
 0x247   :  { %v1334_v59 = vmul.f32 %v12416_v39, %v12415_v16 }
 0x248   :  { %v9552_v29 = vpop.permute.xlu0 %1028  ;;  %v657_v51 = vpop.permute.xlu1 %656 }
 0x249   :  { %v1714_v38 = vld [vmem:[#allocation3 + $0x20] sm:$0xff]  ;;  %701 = vst.msk [vmem:[#allocation3 + $0x40] sm:$0xff] %vm696_vm3, %v657_v51  ;;  %1022 = vrot.lane.b32.xlu1 %v980_v24, %s8330_s13  ;;  %v8309_v24 = vld [vmem:[%s8388_s6 + $0x60] sm:$0xff] }
 0x24a   :  { %v1762_v30 = vpack.c.bf16 %v1716_v44, %v1714_v38  ;;  %v1604_v44 = vld [vmem:[#allocation2 + $0x42] sm:$0xff] }
 0x24c   :  { %1850 = vmatmul.mubr.bf16.gmra.mrb[4].mxu0 %v1762_v30  ;;  %v9558_v31 = vpop.permute.xlu0 %1205  ;;  %v834_v25 = vpop.permute.xlu1 %833  ;;  %v9572_v30 = vld [vmem:[#allocation2 + $0x68] sm:$0xff] }
 0x24d   :  { %7698 = vmatprep.mubr.msk.bf16.mxu0 %vm193_vm0, %v1765_v26  ;;  %878 = vst.msk [vmem:[#allocation3 + $0x40] sm:$0xff] %vm873_vm4, %v834_v25  ;;  %1199 = vrot.lane.b32.xlu1 %v1157_v2, %s8331_s14 }
 0x250   :  { %v1676_v51 = vpop.permute.xlu0 %1675  ;;  %v1011_v53 = vpop.permute.xlu1 %1010 }
 0x251   :  { %v1693_v0 = vmul.f32 %v1676_v51, %v1613_v8  ;;  %1055 = vst.msk [vmem:[#allocation3 + $0x40] sm:$0xff] %vm1050_vm5, %v1011_v53  ;;  %1663 = vperm.xlu1 %8211, %v8309_v24   ;;  %v12417_v53 = vld [vmem:[#allocation98_spill] sm:$0xff] }
 0x252   :  { %v1335_v8 = vmul.f32 %v12417_v53, %v9572_v30  ;;  %v12419_v53 = vld [vmem:[#allocation102_spill] sm:$0xff] }
 0x253   :  { %1709 = vst.msk [vmem:[#allocation3 + $0xf8] sm:$0xff] %vm193_vm0, %v1693_v0 }
 0x254   :  { %v9568_v38 = vpop.permute.xlu0 %1557  ;;  %v1188_v26 = vpop.permute.xlu1 %1187 }
 0x255   :  { %1232 = vst.msk [vmem:[#allocation3 + $0x40] sm:$0xff] %vm1227_vm6, %v1188_v26  ;;  %1376 = vrot.lane.b32.xlu1 %v1334_v59, %s8332_s15  ;;  %v12418_v26 = vld [vmem:[#allocation121_spill] sm:$0xff] }
 0x256   :  { %8213 = vset.pattern.permute.xlu1 %v12320_v56 }
 0x258   :  { %v500_v2 = vpop.permute.xlu0 %499  ;;  %v9577_v25 = vpop.permute.xlu1 %1639 }
 0x259   :  { %534 = vst.msk [vmem:[#allocation3 + $0xe0] sm:$0xff] %vm519_vm2, %v500_v2  ;;  %v1684_v51 = vmul.f32 %v9577_v25, %v1604_v44  ;;  %1378 = vrot.lane.b32.xlu1 %v1335_v8, %s8332_s15  ;;  %v12420_v2 = vld [vmem:[#allocation71_spill] sm:$0xff]  ;;  %v12421_v8 = vld [vmem:[#allocation118_spill] sm:$0xff] }
 0x25a   :  { %v9582_v24 = vld [vmem:[#allocation3 + $0xf8] sm:$0xff]  ;;  %v1511_v39 = vmul.f32 %v12420_v2, %v12419_v53 }
 0x25b   :  { %1700 = vst.msk [vmem:[#allocation3 + $0x68] sm:$0xff] %vm193_vm0, %v1684_v51  ;;  %2863 = vst.msk [vmem:[#allocation3 + $0xf8] sm:$0xff] %vm193_vm0, %v1693_v0 }
 0x25c   :  { %v677_v16 = vpop.permute.xlu0 %676  ;;  %v1365_v59 = vpop.permute.xlu1 %1364 }
 0x25d   :  { %711 = vst.msk [vmem:[#allocation3 + $0xe0] sm:$0xff] %vm696_vm3, %v677_v16  ;;  %324 = vperm.xlu1 %8213, %v12418_v26   ;;  %v12423_v16 = vld [vmem:[#allocation101_spill] sm:$0xff] }
 0x25e   :  { %1409 = vst.msk [vmem:[#allocation3 + $0x40] sm:$0xff] %vm1404_vm7, %v1365_v59  ;;  %v451_v59 = vmul.f32 %v12419_v53, %v12423_v16 }
 0x260   :  { %v854_v44 = vpop.permute.xlu0 %853  ;;  %v1367_v60 = vpop.permute.xlu1 %1366 }
 0x261   :  { %888 = vst.msk [vmem:[#allocation3 + $0xe0] sm:$0xff] %vm873_vm4, %v854_v44  ;;  %1553 = vrot.lane.b32.xlu1 %v1511_v39, %s8333_s16  ;;  %v12426_v39 = vld [vmem:[#allocation103_spill] sm:$0xff] }
 0x262   :  { %1410 = vst.msk [vmem:[#allocation3 + $0x50] sm:$0xff] %vm1404_vm7, %v1367_v60  ;;  %8214 = vset.pattern.permute.xlu1 %v12333_v4  ;;  %v9597_v51 = vld [vmem:[#allocation3 + $0xf8] sm:$0xff] }
 0x263   :  { %1587 = vst.msk [vmem:[#allocation3 + $0x50] sm:$0xff] %vm1581_vm8, %v12421_v8  ;;  %12422 = vst [vmem:[#allocation124_spill] sm:$0xff] %v9597_v51  ;;  %v12425_v4 = vld [vmem:[#allocation104_spill] sm:$0xff] }
 0x264   :  { %4017 = vst.msk [vmem:[#allocation3 + $0xf8] sm:$0xff] %vm193_vm0, %v1693_v0  ;;  %v1031_v26 = vpop.permute.xlu0 %1030  ;;  %v9602_v2 = vpop.permute.xlu1 %294  ;;  %v628_v44 = vmul.f32 %v12426_v39, %v12425_v4 }
 0x265   :  { %12424 = vst [vmem:[#allocation96_spill] sm:$0xff] %v9602_v2  ;;  %1065 = vst.msk [vmem:[#allocation3 + $0xe0] sm:$0xff] %vm1050_vm5, %v1031_v26  ;;  %v336_v60 = vmul.f32 %v9382_v46, %v9602_v2  ;;  %495 = vrot.lane.b32.xlu1 %v451_v59, %s8327_s10 }
 0x267   :  { %352 = vst.msk [vmem:[#allocation3 + $0x90] sm:$0xff] %vm193_vm0, %v336_v60  ;;  %v12430_v60 = vld [vmem:[#allocation113_spill] sm:$0xff] }
 0x268   :  { %529 = vst.msk [vmem:[#allocation3 + $0x90] sm:$0xff] %vm519_vm2, %v9300_v12  ;;  %v1208_v53 = vpop.permute.xlu0 %1207  ;;  %v1542_v8 = vpop.permute.xlu1 %1541  ;;  %v12428_v12 = vld [vmem:[#allocation24_spill] sm:$0xff] }
 0x269   :  { %706 = vst.msk [vmem:[#allocation3 + $0x90] sm:$0xff] %vm696_vm3, %v9313_v10  ;;  %672 = vrot.lane.b32.xlu1 %v628_v44, %s8328_s11  ;;  %v805_v59 = vmul.f32 %v9572_v30, %v12428_v12  ;;  %v1725_v44 = vld [vmem:[#allocation3 + $0x78] sm:$0xff] }
 0x26a   :  { %1242 = vst.msk [vmem:[#allocation3 + $0xe0] sm:$0xff] %vm1227_vm6, %v1208_v53 }
 0x26b   :  { %1586 = vst.msk [vmem:[#allocation3 + $0x40] sm:$0xff] %vm1581_vm8, %v1542_v8  ;;  %v9620_v46 = vld [vmem:[#allocation3 + $0xf8] sm:$0xff] }
 0x26c   :  { %883 = vst.msk [vmem:[#allocation3 + $0x90] sm:$0xff] %vm873_vm4, %v9326_v5  ;;  %12427 = vst [vmem:[#allocation100_spill] sm:$0xff] %v9620_v46  ;;  %v1385_v10 = vpop.permute.xlu0 %1384  ;;  %v484_v26 = vpop.permute.xlu1 %483  ;;  %v12429_v5 = vld [vmem:[#allocation107_spill] sm:$0xff] }
 0x26d   :  { %1060 = vst.msk [vmem:[#allocation3 + $0x90] sm:$0xff] %vm1050_vm5, %v9337_v13  ;;  %849 = vrot.lane.b32.xlu1 %v805_v59, %s8329_s12  ;;  %v982_v39 = vmul.f32 %v12430_v60, %v12429_v5  ;;  %v1723_v13 = vld [vmem:[#allocation3 + $0x68] sm:$0xff]  ;;  %v12431_v59 = vld [vmem:[#allocation108_spill] sm:$0xff] }
 0x26e   :  { %5187 = vst.msk [vmem:[#allocation3 + $0xf8] sm:$0xff] %vm193_vm0, %v1693_v0  ;;  %v1720_v0 = vld [vmem:[#allocation3 + $0x50] sm:$0xff] }
 0x26f   :  { %1237 = vst.msk [vmem:[#allocation3 + $0x90] sm:$0xff] %vm1227_vm6, %v9350_v62 }
 0x270   :  { %1419 = vst.msk [vmem:[#allocation3 + $0xe0] sm:$0xff] %vm1404_vm7, %v1385_v10  ;;  %v1562_v53 = vpop.permute.xlu0 %1561  ;;  %v661_v8 = vpop.permute.xlu1 %660  ;;  %v1767_v10 = vpack.c.bf16 %v1725_v44, %v1723_v13 }
 0x271   :  { %526 = vst.msk [vmem:[#allocation3 + $0x60] sm:$0xff] %vm519_vm2, %v484_v26  ;;  %1026 = vrot.lane.b32.xlu1 %v982_v39, %s8330_s13  ;;  %v1159_v26 = vmul.f32 %v12431_v59, %v9189_v27  ;;  %v8310_v39 = vld [vmem:[%s8388_s6 + $0x70] sm:$0xff]  ;;  %s10342_s6 = sld [smem:[%s11926_s0 + %s8339_s3]]  }
 0x272   :  { %v1718_v46 = vld [vmem:[#allocation3 + $0x40] sm:$0xff]  ;;  %1596 = vst.msk [vmem:[#allocation3 + $0xe0] sm:$0xff] %vm1581_vm8, %v1562_v53  ;;  %s10910_s3 = sld [smem:[%s11926_s0 + %s8344_s30]]   ;;  %s8366_s30 = smov 33  }
 0x273   :  { %703 = vst.msk [vmem:[#allocation3 + $0x60] sm:$0xff] %vm696_vm3, %v661_v8  ;;  %v1764_v62 = vpack.c.bf16 %v1720_v0, %v1718_v46  ;;  %v12432_v46 = vld [vmem:[#allocation34_spill] sm:$0xff]  ;;  %v1606_v27 = vld [vmem:[#allocation2 + $0x52] sm:$0xff]  ;;  %v12434_v0 = vld [vmem:[#allocation111_spill] sm:$0xff] }
 0x274   :  { %v2081_v60 = vpop.permute.xlu0 %2080  ;;  %v838_v51 = vpop.permute.xlu1 %837  ;;  %v1336_v13 = vmul.f32 %v12432_v46, %v9203_v57  ;;  %v12433_v8 = vld [vmem:[#allocation126_spill] sm:$0xff] }
 0x275   :  { %1858 = vmatmul.mubr.bf16.gmra.mrb[8].mxu0 %v1764_v62  ;;  %2128 = vst.msk [vmem:[#allocation3] sm:$0xff] %vm519_vm2, %v2081_v60  ;;  %1203 = vrot.lane.b32.xlu1 %v1159_v26, %s8331_s14  ;;  %v1337_v62 = vmul.f32 %v12434_v0, %v12433_v8  ;;  %v12435_v26 = vld [vmem:[#allocation128_spill] sm:$0xff]  ;;  %v12436_v60 = vld [vmem:[#allocation74_spill] sm:$0xff]  ;;  %v12439_v8 = vld [vmem:[#allocation43_spill] sm:$0xff] }
 0x276   :  { %7699 = vmatprep.mubr.msk.bf16.mxu0 %vm193_vm0, %v1767_v10  ;;  %880 = vst.msk [vmem:[#allocation3 + $0x60] sm:$0xff] %vm873_vm4, %v838_v51  ;;  %v1514_v57 = vmul.f32 %v12436_v60, %v12435_v26 }
 0x278   :  { %v1015_v53 = vpop.permute.xlu1 %1014 }
 0x279   :  { %1057 = vst.msk [vmem:[#allocation3 + $0x60] sm:$0xff] %vm1050_vm5, %v1015_v53  ;;  %1671 = vperm.xlu1 %8214, %v8310_v39   ;;  %v12437_v39 = vld [vmem:[#allocation115_spill] sm:$0xff] }
 0x27c   :  { %v1192_v44 = vpop.permute.xlu1 %1191 }
 0x27d   :  { %1234 = vst.msk [vmem:[#allocation3 + $0x60] sm:$0xff] %vm1227_vm6, %v1192_v44  ;;  %1380 = vrot.lane.b32.xlu1 %v1336_v13, %s8332_s15  ;;  %v454_v13 = vmul.f32 %v12435_v26, %v12437_v39  ;;  %v12441_v26 = vld [vmem:[#allocation120_spill] sm:$0xff] }
 0x280   :  { %v9651_v51 = vpop.permute.xlu1 %1647 }
 0x281   :  { %v1686_v10 = vmul.f32 %v9651_v51, %v1606_v27  ;;  %1382 = vrot.lane.b32.xlu1 %v1337_v62, %s8332_s15  ;;  %v12438_v27 = vld [vmem:[#allocation130_spill] sm:$0xff]  ;;  %v631_v62 = vmul.f32 %v9298_v18, %v12439_v8 }
 0x282   :  { %v12443_v18 = vld [vmem:[#allocation122_spill] sm:$0xff] }
 0x283   :  { %1702 = vst.msk [vmem:[#allocation3 + $0x88] sm:$0xff] %vm193_vm0, %v1686_v10 }
 0x284   :  { %v1369_v53 = vpop.permute.xlu1 %1368 }
 0x285   :  { %1411 = vst.msk [vmem:[#allocation3 + $0x60] sm:$0xff] %vm1404_vm7, %v1369_v53  ;;  %1559 = vrot.lane.b32.xlu1 %v1514_v57, %s8333_s16  ;;  %v12442_v57 = vld [vmem:[#allocation132_spill] sm:$0xff] }
 0x288   :  { %v1371_v44 = vpop.permute.xlu1 %1370 }
 0x289   :  { %1412 = vst.msk [vmem:[#allocation3 + $0x70] sm:$0xff] %vm1404_vm7, %v1371_v44  ;;  %501 = vrot.lane.b32.xlu1 %v454_v13, %s8327_s10  ;;  %v808_v44 = vmul.f32 %v12442_v57, %v12441_v26 }
 0x28a   :  { %1589 = vst.msk [vmem:[#allocation3 + $0x70] sm:$0xff] %vm1581_vm8, %v12438_v27  ;;  %v9690_v27 = vld [vmem:[#allocation2 + $0x82] sm:$0xff] }
 0x28c   :  { %v9668_v10 = vpop.permute.xlu1 %304 }
 0x28d   :  { %12440 = vst [vmem:[#allocation121_spill] sm:$0xff] %v9668_v10  ;;  %v338_v53 = vmul.f32 %v9480_v7, %v9668_v10  ;;  %678 = vrot.lane.b32.xlu1 %v631_v62, %s8328_s11  ;;  %v985_v7 = vmul.f32 %v9321_v35, %v12443_v18  ;;  %v12445_v18 = vld [vmem:[#allocation129_spill] sm:$0xff] }
 0x28f   :  { %354 = vst.msk [vmem:[#allocation3 + $0xb0] sm:$0xff] %vm193_vm0, %v338_v53 }
 0x290   :  { %531 = vst.msk [vmem:[#allocation3 + $0xb0] sm:$0xff] %vm519_vm2, %v9378_v41  ;;  %v1546_v13 = vpop.permute.xlu1 %1545 }
 0x291   :  { %708 = vst.msk [vmem:[#allocation3 + $0xb0] sm:$0xff] %vm696_vm3, %v9387_v15  ;;  %855 = vrot.lane.b32.xlu1 %v808_v44, %s8329_s12  ;;  %v12444_v15 = vld [vmem:[#allocation64_spill] sm:$0xff]  ;;  %v1259_v44 = vld [vmem:[#allocation2 + $0x88] sm:$0xff] }
 0x292   :  { %1588 = vst.msk [vmem:[#allocation3 + $0x60] sm:$0xff] %vm1581_vm8, %v1546_v13  ;;  %v1162_v62 = vmul.f32 %v12444_v15, %v9690_v27  ;;  %v12446_v15 = vld [vmem:[#allocation131_spill] sm:$0xff] }
 0x293   :  { %885 = vst.msk [vmem:[#allocation3 + $0xb0] sm:$0xff] %vm873_vm4, %v9393_v49  ;;  %v1727_v49 = vld [vmem:[#allocation3 + $0x88] sm:$0xff] }
 0x294   :  { %1062 = vst.msk [vmem:[#allocation3 + $0xb0] sm:$0xff] %vm1050_vm5, %v9401_v34  ;;  %v488_v41 = vpop.permute.xlu1 %487  ;;  %v1724_v34 = vld [vmem:[#allocation3 + $0x70] sm:$0xff] }
 0x295   :  { %1239 = vst.msk [vmem:[#allocation3 + $0xb0] sm:$0xff] %vm1227_vm6, %v9410_v37  ;;  %1032 = vrot.lane.b32.xlu1 %v985_v7, %s8330_s13  ;;  %v1729_v37 = vld [vmem:[#allocation3 + $0x98] sm:$0xff] }
 0x296   :  { %528 = vst.msk [vmem:[#allocation3 + $0x80] sm:$0xff] %vm519_vm2, %v488_v41  ;;  %v1769_v13 = vpack.c.bf16 %v1729_v37, %v1727_v49  ;;  %v1339_v41 = vmul.f32 %v12445_v18, %v1259_v44  ;;  %v1436_v7 = vld [vmem:[#allocation2 + $0x89] sm:$0xff] }
 0x297   :  { %v1516_v8 = vmul.f32 %v12446_v15, %v1436_v7  ;;  %v1608_v49 = vld [vmem:[#allocation2 + $0x62] sm:$0xff]  ;;  %v1610_v7 = vld [vmem:[#allocation2 + $0x72] sm:$0xff] }
 0x298   :  { %v665_v53 = vpop.permute.xlu1 %664 }
 0x299   :  { %v1722_v57 = vld [vmem:[#allocation3 + $0x60] sm:$0xff]  ;;  %705 = vst.msk [vmem:[#allocation3 + $0x80] sm:$0xff] %vm696_vm3, %v665_v53  ;;  %1209 = vrot.lane.b32.xlu1 %v1162_v62, %s8331_s14 }
 0x29a   :  { %v1766_v35 = vpack.c.bf16 %v1724_v34, %v1722_v57 }
 0x29c   :  { %1866 = vmatmul.mubr.bf16.gmra.mrb[12].mxu0 %v1766_v35  ;;  %v842_v26 = vpop.permute.xlu1 %841 }
 0x29d   :  { %7700 = vmatprep.mubr.msk.bf16.mxu0 %vm193_vm0, %v1769_v13  ;;  %882 = vst.msk [vmem:[#allocation3 + $0x80] sm:$0xff] %vm873_vm4, %v842_v26  ;;  %1386 = vrot.lane.b32.xlu1 %v1339_v41, %s8332_s15  ;;  %v1733_v13 = vld [vmem:[#allocation3 + $0xb8] sm:$0xff] }
 0x2a0   :  { %v1019_v39 = vpop.permute.xlu1 %1018 }
 0x2a1   :  { %1059 = vst.msk [vmem:[#allocation3 + $0x80] sm:$0xff] %vm1050_vm5, %v1019_v39  ;;  %1563 = vrot.lane.b32.xlu1 %v1516_v8, %s8333_s16 }
 0x2a4   :  { %v1196_v62 = vpop.permute.xlu1 %1195 }
 0x2a5   :  { %1236 = vst.msk [vmem:[#allocation3 + $0x80] sm:$0xff] %vm1227_vm6, %v1196_v62 }
 0x2a8   :  { %v9706_v53 = vpop.permute.xlu1 %1655 }
 0x2a9   :  { %12447 = vst [vmem:[#allocation102_spill] sm:$0xff] %v9706_v53  ;;  %v1688_v57 = vmul.f32 %v9706_v53, %v1608_v49 }
 0x2ab   :  { %1704 = vst.msk [vmem:[#allocation3 + $0xa8] sm:$0xff] %vm193_vm0, %v1688_v57 }
 0x2ac   :  { %v1373_v26 = vpop.permute.xlu1 %1372 }
 0x2ad   :  { %1413 = vst.msk [vmem:[#allocation3 + $0x80] sm:$0xff] %vm1404_vm7, %v1373_v26 }
 0x2b0   :  { %v1375_v34 = vpop.permute.xlu1 %1374 }
 0x2b1   :  { %1414 = vst.msk [vmem:[#allocation3 + $0x90] sm:$0xff] %vm1404_vm7, %v1375_v34  ;;  %v246_v34 = vld [vmem:[#allocation2 + $0x78] sm:$0xff] }
 0x2b2   :  { %1591 = vst.msk [vmem:[#allocation3 + $0x90] sm:$0xff] %vm1581_vm8, %v9374_v22 }
 0x2b4   :  { %v9714_v39 = vpop.permute.xlu1 %314 }
 0x2b5   :  { %12448 = vst [vmem:[#allocation118_spill] sm:$0xff] %v9714_v39  ;;  %v340_v8 = vmul.f32 %v9572_v30, %v9714_v39  ;;  %v1731_v30 = vld [vmem:[#allocation3 + $0xa8] sm:$0xff] }
 0x2b6   :  { %v1771_v41 = vpack.c.bf16 %v1733_v13, %v1731_v30  ;;  %v1737_v13 = vld [vmem:[#allocation3 + $0xd8] sm:$0xff] }
 0x2b7   :  { %356 = vst.msk [vmem:[#allocation3 + $0xd0] sm:$0xff] %vm193_vm0, %v340_v8 }
 0x2b8   :  { %533 = vst.msk [vmem:[#allocation3 + $0xd0] sm:$0xff] %vm519_vm2, %v9520_v17  ;;  %v1550_v44 = vpop.permute.xlu1 %1549 }
 0x2b9   :  { %710 = vst.msk [vmem:[#allocation3 + $0xd0] sm:$0xff] %vm696_vm3, %v9532_v28  ;;  %v1728_v37 = vld [vmem:[#allocation3 + $0x90] sm:$0xff] }
 0x2ba   :  { %1590 = vst.msk [vmem:[#allocation3 + $0x80] sm:$0xff] %vm1581_vm8, %v1550_v44 }
 0x2bb   :  { %887 = vst.msk [vmem:[#allocation3 + $0xd0] sm:$0xff] %vm873_vm4, %v9546_v54 }
 0x2bc   :  { %1064 = vst.msk [vmem:[#allocation3 + $0xd0] sm:$0xff] %vm1050_vm5, %v9552_v29  ;;  %v492_v22 = vpop.permute.xlu1 %491 }
 0x2bd   :  { %1241 = vst.msk [vmem:[#allocation3 + $0xd0] sm:$0xff] %vm1227_vm6, %v9558_v31 }
 0x2be   :  { %530 = vst.msk [vmem:[#allocation3 + $0xa0] sm:$0xff] %vm519_vm2, %v492_v22 }
 0x2c0   :  { %v669_v17 = vpop.permute.xlu1 %668 }
 0x2c1   :  { %v1726_v35 = vld [vmem:[#allocation3 + $0x80] sm:$0xff]  ;;  %707 = vst.msk [vmem:[#allocation3 + $0xa0] sm:$0xff] %vm696_vm3, %v669_v17 }
 0x2c2   :  { %v1768_v28 = vpack.c.bf16 %v1728_v37, %v1726_v35 }
 0x2c4   :  { %1874 = vmatmul.mubr.bf16.gmra.mrb[16].mxu0 %v1768_v28  ;;  %v846_v54 = vpop.permute.xlu1 %845 }
 0x2c5   :  { %7701 = vmatprep.mubr.msk.bf16.mxu0 %vm193_vm0, %v1771_v41  ;;  %884 = vst.msk [vmem:[#allocation3 + $0xa0] sm:$0xff] %vm873_vm4, %v846_v54 }
 0x2c8   :  { %v1023_v29 = vpop.permute.xlu1 %1022 }
 0x2c9   :  { %1061 = vst.msk [vmem:[#allocation3 + $0xa0] sm:$0xff] %vm1050_vm5, %v1023_v29 }
 0x2cc   :  { %v1200_v31 = vpop.permute.xlu1 %1199 }
 0x2cd   :  { %1238 = vst.msk [vmem:[#allocation3 + $0xa0] sm:$0xff] %vm1227_vm6, %v1200_v31 }
 0x2d0   :  { %v9736_v62 = vpop.permute.xlu1 %1663 }
 0x2d1   :  { %12449 = vst [vmem:[#allocation101_spill] sm:$0xff] %v9736_v62  ;;  %v1690_v49 = vmul.f32 %v9736_v62, %v1610_v7 }
 0x2d3   :  { %1706 = vst.msk [vmem:[#allocation3 + $0xc8] sm:$0xff] %vm193_vm0, %v1690_v49 }
 0x2d4   :  { %v1377_v57 = vpop.permute.xlu1 %1376 }
 0x2d5   :  { %1415 = vst.msk [vmem:[#allocation3 + $0xa0] sm:$0xff] %vm1404_vm7, %v1377_v57  ;;  %v9771_v57 = vld [vmem:[%s9757_s24] ss:$0 sm:$0xff] }
 0x2d8   :  { %v1379_v26 = vpop.permute.xlu1 %1378 }
 0x2d9   :  { %1416 = vst.msk [vmem:[#allocation3 + $0xb0] sm:$0xff] %vm1404_vm7, %v1379_v26 }
 0x2da   :  { %1593 = vst.msk [vmem:[#allocation3 + $0xb0] sm:$0xff] %vm1581_vm8, %v9511_v33  ;;  %v1735_v17 = vld [vmem:[#allocation3 + $0xc8] sm:$0xff] }
 0x2db   :  { %v1773_v41 = vpack.c.bf16 %v1737_v13, %v1735_v17 }
 0x2dc   :  { %v9744_v8 = vpop.permute.xlu1 %324 }
 0x2dd   :  { %12450 = vst [vmem:[#allocation103_spill] sm:$0xff] %v9744_v8  ;;  %v342_v44 = vmul.f32 %v9744_v8, %v246_v34 }
 0x2df   :  { %358 = vst.msk [vmem:[#allocation3 + $0xf0] sm:$0xff] %vm193_vm0, %v342_v44  ;;  %v9775_v44 = vld [vmem:[%s9763_s28] ss:$0 sm:$0xff] }
 0x2e0   :  { %v1554_v22 = vpop.permute.xlu1 %1553 }
 0x2e1   :  { %1592 = vst.msk [vmem:[#allocation3 + $0xa0] sm:$0xff] %vm1581_vm8, %v1554_v22  ;;  %v1732_v28 = vld [vmem:[#allocation3 + $0xb0] sm:$0xff] }
 0x2e4   :  { %v496_v30 = vpop.permute.xlu1 %495 }
 0x2e5   :  { %532 = vst.msk [vmem:[#allocation3 + $0xc0] sm:$0xff] %vm519_vm2, %v496_v30 }
 0x2e8   :  { %v673_v35 = vpop.permute.xlu1 %672  ;;  %v1730_v37 = vld [vmem:[#allocation3 + $0xa0] sm:$0xff] }
 0x2e9   :  { %709 = vst.msk [vmem:[#allocation3 + $0xc0] sm:$0xff] %vm696_vm3, %v673_v35  ;;  %v1770_v33 = vpack.c.bf16 %v1732_v28, %v1730_v37 }
 0x2eb   :  { %1882 = vmatmul.mubr.bf16.gmra.mrb[20].mxu0 %v1770_v33 }
 0x2ec   :  { %v850_v54 = vpop.permute.xlu1 %849  ;;  %7702 = vmatprep.mubr.msk.bf16.mxu0 %vm193_vm0, %v1773_v41 }
 0x2ed   :  { %886 = vst.msk [vmem:[#allocation3 + $0xc0] sm:$0xff] %vm873_vm4, %v850_v54 }
 0x2f0   :  { %v1027_v29 = vpop.permute.xlu1 %1026 }
 0x2f1   :  { %1063 = vst.msk [vmem:[#allocation3 + $0xc0] sm:$0xff] %vm1050_vm5, %v1027_v29 }
 0x2f4   :  { %v1204_v31 = vpop.permute.xlu1 %1203 }
 0x2f5   :  { %1240 = vst.msk [vmem:[#allocation3 + $0xc0] sm:$0xff] %vm1227_vm6, %v1204_v31 }
 0x2f8   :  { %v9765_v7 = vpop.permute.xlu1 %1671 }
 0x2f9   :  { %12451 = vst [vmem:[#allocation113_spill] sm:$0xff] %v9765_v7  ;;  %v1692_v49 = vmul.f32 %v9765_v7, %v9690_v27 }
 0x2fb   :  { %1708 = vst.msk [vmem:[#allocation3 + $0xe8] sm:$0xff] %vm193_vm0, %v1692_v49 }
 0x2fc   :  { %v1381_v26 = vpop.permute.xlu1 %1380 }
 0x2fd   :  { %1417 = vst.msk [vmem:[#allocation3 + $0xc0] sm:$0xff] %vm1404_vm7, %v1381_v26 }
 0x2fe   :  { %v1843_v34 = vpop.f32.mrb[0].mxu0  ;;  %1594 = vst.msk [vmem:[#allocation3 + $0xc0] sm:$0xff] %vm1581_vm8, %v9568_v38 }
 0x2ff   :  { %v1913_v22 = vmul.f32 %v9771_v57, %v1843_v34  ;;  %v1845_v30 = vpop.f32.mrb[1].mxu0 }
 0x300   :  { %v1846_v17 = vpop.f32.mrb[2].mxu0  ;;  %v1383_v37 = vpop.permute.xlu1 %1382 }
 0x301   :  { %v9781_v35 = vadd.f32 %v9775_v44, %v1913_v22  ;;  %v1914_v27 = vmul.f32 %v9771_v57, %v1846_v17  ;;  %v1848_v28 = vpop.f32.mrb[3].mxu0  ;;  %1418 = vst.msk [vmem:[#allocation3 + $0xd0] sm:$0xff] %vm1404_vm7, %v1383_v37  ;;  %v12454_v22 = vld [vmem:[#allocation5_spill] sm:$0xff]  ;;  %v12455_v17 = vld [vmem:[#allocation8_spill] sm:$0xff] }
 0x302   :  { %v1739_v29 = vld [vmem:[#allocation3 + $0xe8] sm:$0xff] }
 0x303   :  { %12452 = vst [vmem:[#allocation34_spill] sm:$0xff] %v9781_v35  ;;  %v12154_v33 = vmax.f32 %v9781_v35, 0.0  ;;  %v9787_v13 = vadd.f32 %v9775_v44, %v1914_v27  ;;  %v1775_v35 = vpack.c.bf16 %v9582_v24, %v1739_v29  ;;  %v12460_v29 = vld [vmem:[#allocation10_spill] sm:$0xff] }
 0x304   :  { %v1560_v41 = vpop.permute.xlu1 %1559 }
 0x305   :  { %12453 = vst [vmem:[#allocation126_spill] sm:$0xff] %v9787_v13  ;;  %1968 = vst.msk [vmem:[#allocation2 + $0x9] sm:$0xff] %vm193_vm0, %v12154_v33  ;;  %v12153_v38 = vmax.f32 %v9787_v13, 0.0  ;;  %v1734_v37 = vld [vmem:[#allocation3 + $0xc0] sm:$0xff] }
 0x306   :  { %1595 = vst.msk [vmem:[#allocation3 + $0xd0] sm:$0xff] %vm1581_vm8, %v1560_v41  ;;  %v12456_v33 = vld [vmem:[#allocation73_spill] sm:$0xff] }
 0x307   :  { %1969 = vst.msk [vmem:[#allocation2 + $0x11] sm:$0xff] %vm193_vm0, %v12153_v38 }
 0x308   :  { %v502_v54 = vpop.permute.xlu1 %501 }
 0x309   :  { %535 = vst.msk [vmem:[#allocation3 + $0xf0] sm:$0xff] %vm519_vm2, %v502_v54 }
 0x30c   :  { %v2144_v31 = vld [vmem:[#allocation2 + $0x2] sm:$0xff]  ;;  %v679_v34 = vpop.permute.xlu1 %678 }
 0x30d   :  { %v2033_v49 = vld [vmem:[#allocation2 + $0x9] sm:$0xff]  ;;  %v2160_v30 = vmul.f32 %v2144_v31, %v12454_v22  ;;  %712 = vst.msk [vmem:[#allocation3 + $0xf0] sm:$0xff] %vm696_vm3, %v679_v34  ;;  %v2896_v22 = vld [vmem:[%s9801_s2] sm:$0xff] }
 0x30e   :  { %v2256_v26 = vld [vmem:[#allocation2 + $0x8] sm:$0xff]  ;;  %v2049_v27 = vmul.f32 %v2033_v49, %v12455_v17  ;;  %v2257_v38 = vld [vmem:[#allocation2 + $0x10] sm:$0xff]  ;;  %v12457_v17 = vld [vmem:[#allocation17_spill] sm:$0xff] }
 0x30f   :  { %v1736_v28 = vld [vmem:[#allocation3 + $0xd0] sm:$0xff]  ;;  %v2001_v13 = vmul.f32 %v2256_v26, %v12456_v33  ;;  %2192 = vrot.lane.b32.xlu0 %v2160_v30, %s8328_s11  ;;  %v2272_v34 = vmul.f32 %v2256_v26, %v12457_v17  ;;  %v2002_v30 = vmul.f32 %v2257_v38, %v9332_v42  ;;  %v2273_v26 = vmul.f32 %v2257_v38, %v12460_v29  ;;  %v2899_v42 = vld [vmem:[%s9801_s2 + $0x18] sm:$0xff] }
 0x310   :  { %v1772_v41 = vpack.c.bf16 %v1736_v28, %v1734_v37  ;;  %v2145_v54 = vld [vmem:[#allocation2 + $0xa] sm:$0xff]  ;;  %2082 = vrot.lane.b32.xlu1 %v2049_v27, %s8327_s10  ;;  %v856_v31 = vpop.permute.xlu1 %855 }
 0x311   :  { %2017 = vst.msk [vmem:[#allocation3 + $0x10] sm:$0xff] %vm193_vm0, %v2001_v13  ;;  %v12458_v37 = vld [vmem:[#allocation7_spill] sm:$0xff]  ;;  %2018 = vst.msk [vmem:[#allocation3 + $0x20] sm:$0xff] %vm193_vm0, %v2002_v30 }
 0x312   :  { %1890 = vmatmul.mubr.bf16.gmra.mrb[24].mxu0 %v1772_v41  ;;  %v2161_v28 = vmul.f32 %v2145_v54, %v12458_v37  ;;  %v2897_v33 = vld [vmem:[%s9801_s2 + $0x8] sm:$0xff]  ;;  %889 = vst.msk [vmem:[#allocation3 + $0xf0] sm:$0xff] %vm873_vm4, %v856_v31  ;;  %v2898_v41 = vld [vmem:[%s9801_s2 + $0x10] sm:$0xff] }
 0x313   :  { %7703 = vmatprep.mubr.msk.bf16.mxu0 %vm193_vm0, %v1775_v35  ;;  %v2930_v27 = vpack.c.bf16 %v2897_v33, %v2896_v22  ;;  %2304 = vrot.lane.b32.xlu0 %v2272_v34, %s8329_s12  ;;  %v12459_v35 = vld [vmem:[#allocation12_spill] sm:$0xff]  ;;  %v2931_v22 = vpack.c.bf16 %v2899_v42, %v2898_v41  ;;  %v2901_v29 = vld [vmem:[%s9801_s2 + $0x28] sm:$0xff] }
 0x314   :  { %2194 = vrot.lane.b32.xlu1 %v2161_v28, %s8328_s11  ;;  %v1033_v24 = vpop.permute.xlu1 %1032  ;;  %v2384_v13 = vmul.f32 %v2033_v49, %v12459_v35  ;;  %v2369_v33 = vld [vmem:[#allocation2 + $0x11] sm:$0xff]  ;;  %v12461_v49 = vld [vmem:[#allocation14_spill] sm:$0xff]  ;;  %v12462_v28 = vld [vmem:[#allocation45_spill] sm:$0xff] }
 0x315   :  { %2964 = vmatpush1.bf16.msra.mxu1 %v2930_v27  ;;  %1066 = vst.msk [vmem:[#allocation3 + $0xf0] sm:$0xff] %vm1050_vm5, %v1033_v24  ;;  %v2496_v34 = vmul.f32 %v2145_v54, %v12461_v49  ;;  %v2385_v30 = vmul.f32 %v2369_v33, %v12462_v28  ;;  %v2900_v27 = vld [vmem:[%s9801_s2 + $0x20] sm:$0xff]  ;;  %v2902_v54 = vld [vmem:[%s9801_s2 + $0x30] sm:$0xff]  ;;  %v2903_v41 = vld [vmem:[%s9801_s2 + $0x38] sm:$0xff] }
 0x316   :  { %2965 = vmatprep.subr.bf16.mxu1 %v12320_v56  ;;  %v2932_v24 = vpack.c.bf16 %v2901_v29, %v2900_v27  ;;  %v2905_v27 = vld [vmem:[%s9801_s2 + $0x48] sm:$0xff]  ;;  %v12470_v35 = vld [vmem:[#allocation133_spill] sm:$0xff] }
 0x317   :  { %2416 = vrot.lane.b32.xlu0 %v2384_v13, %s8330_s13  ;;  %v12463_v13 = vld [vmem:[#allocation26_spill] sm:$0xff] }
 0x318   :  { %2306 = vrot.lane.b32.xlu1 %v2273_v26, %s8329_s12  ;;  %v1210_v31 = vpop.permute.xlu1 %1209  ;;  %v2608_v26 = vmul.f32 %v2257_v38, %v12463_v13  ;;  %v12464_v13 = vld [vmem:[#allocation20_spill] sm:$0xff] }
 0x319   :  { %2966 = vmatpush1.bf16.msra.mxu1 %v2931_v22  ;;  %1243 = vst.msk [vmem:[#allocation3 + $0xf0] sm:$0xff] %vm1227_vm6, %v1210_v31  ;;  %v2933_v22 = vpack.c.bf16 %v2903_v41, %v2902_v54  ;;  %v2720_v28 = vmul.f32 %v2369_v33, %v12464_v13  ;;  %v2906_v41 = vld [vmem:[%s9801_s2 + $0x50] sm:$0xff] }
 0x31a   :  { %2967 = vmatprep.subr.bf16.mxu1 %v12320_v56 }
 0x31b   :  { %2528 = vrot.lane.b32.xlu0 %v2496_v34, %s8331_s14 }
 0x31c   :  { %2418 = vrot.lane.b32.xlu1 %v2385_v30, %s8330_s13  ;;  %v1387_v42 = vpop.permute.xlu1 %1386  ;;  %v2904_v30 = vld [vmem:[%s9801_s2 + $0x40] sm:$0xff] }
 0x31d   :  { %2968 = vmatpush1.bf16.msra.mxu1 %v2932_v24  ;;  %1420 = vst.msk [vmem:[#allocation3 + $0xf0] sm:$0xff] %vm1404_vm7, %v1387_v42  ;;  %v2934_v49 = vpack.c.bf16 %v2905_v27, %v2904_v30 }
 0x31e   :  { %2969 = vmatprep.subr.bf16.mxu1 %v12320_v56 }
 0x31f   :  { %2640 = vrot.lane.b32.xlu0 %v2608_v26, %s8332_s15  ;;  %v1851_v29 = vpop.f32.mrb[4].mxu0 }
 0x320   :  { %v1915_v31 = vmul.f32 %v9771_v57, %v1851_v29  ;;  %v1853_v34 = vpop.f32.mrb[5].mxu0  ;;  %v1564_v24 = vpop.permute.xlu1 %1563 }
 0x321   :  { %2970 = vmatpush1.bf16.msra.mxu1 %v2933_v22  ;;  %v1854_v38 = vpop.f32.mrb[6].mxu0  ;;  %1597 = vst.msk [vmem:[#allocation3 + $0xf0] sm:$0xff] %vm1581_vm8, %v1564_v24  ;;  %v2907_v22 = vld [vmem:[%s9801_s2 + $0x58] sm:$0xff]  ;;  %v2909_v24 = vld [vmem:[%s9801_s2 + $0x68] sm:$0xff] }
 0x322   :  { %2971 = vmatprep.subr.bf16.mxu1 %v12320_v56  ;;  %v9849_v42 = vadd.f32 %v9775_v44, %v1915_v31  ;;  %v1916_v26 = vmul.f32 %v9771_v57, %v1854_v38  ;;  %v1856_v54 = vpop.f32.mrb[7].mxu0  ;;  %v2935_v30 = vpack.c.bf16 %v2907_v22, %v2906_v41  ;;  %v12467_v31 = vld [vmem:[#allocation23_spill] sm:$0xff]  ;;  %v2911_v22 = vld [vmem:[%s9801_s2 + $0x78] sm:$0xff] }
 0x323   :  { %2752 = vrot.lane.b32.xlu0 %v2720_v28, %s8333_s16  ;;  %v2050_v27 = vmul.f32 %v2369_v33, %v12467_v31  ;;  %v1738_v33 = vld [vmem:[#allocation3 + $0xe0] sm:$0xff]  ;;  %v2910_v41 = vld [vmem:[%s9801_s2 + $0x70] sm:$0xff] }
 0x324   :  { %12465 = vst [vmem:[#allocation111_spill] sm:$0xff] %v9849_v42  ;;  %v12159_v29 = vmax.f32 %v9849_v42, 0.0  ;;  %v9858_v34 = vadd.f32 %v9775_v44, %v1916_v26 }
 0x325   :  { %2972 = vmatpush1.bf16.msra.mxu1 %v2934_v49  ;;  %v2908_v49 = vld [vmem:[%s9801_s2 + $0x60] sm:$0xff] }
 0x326   :  { %12466 = vst [vmem:[#allocation128_spill] sm:$0xff] %v9858_v34  ;;  %2973 = vmatprep.subr.bf16.mxu1 %v12320_v56  ;;  %1970 = vst.msk [vmem:[#allocation2 + $0x19] sm:$0xff] %vm193_vm0, %v12159_v29  ;;  %v12160_v28 = vmax.f32 %v9858_v34, 0.0  ;;  %v2936_v26 = vpack.c.bf16 %v2909_v24, %v2908_v49  ;;  %v2937_v29 = vpack.c.bf16 %v2911_v22, %v2910_v41  ;;  %v12469_v34 = vld [vmem:[#allocation36_spill] sm:$0xff]  ;;  %v12472_v41 = vld [vmem:[#allocation29_spill] sm:$0xff] }
 0x327   :  { %2084 = vrot.lane.b32.xlu0 %v2050_v27, %s8327_s10 }
 0x328   :  { %1971 = vst.msk [vmem:[#allocation2 + $0x21] sm:$0xff] %vm193_vm0, %v12160_v28  ;;  %v1740_v38 = vld [vmem:[#allocation3 + $0xf0] sm:$0xff]  ;;  %v12468_v28 = vld [vmem:[#allocation16_spill] sm:$0xff] }
 0x329   :  { %2974 = vmatpush1.bf16.msra.mxu1 %v2935_v30  ;;  %v1774_v54 = vpack.c.bf16 %v1740_v38, %v1738_v33  ;;  %v2912_v33 = vld [vmem:[%s9801_s2 + $0x80] sm:$0xff]  ;;  %v2913_v38 = vld [vmem:[%s9801_s2 + $0x88] sm:$0xff] }
 0x32a   :  { %2975 = vmatprep.subr.bf16.mxu1 %v12320_v56 }
 0x32b   :  { %1898 = vmatmul.mubr.bf16.gmra.mrb[28].mxu0 %v1774_v54 }
 0x32d   :  { %2976 = vmatpush1.bf16.msra.mxu1 %v2936_v26  ;;  %v2481_v27 = vld [vmem:[#allocation2 + $0x12] sm:$0xff]  ;;  %v12471_v26 = vld [vmem:[#allocation18_spill] sm:$0xff] }
 0x32e   :  { %2977 = vmatprep.subr.bf16.mxu1 %v12320_v56  ;;  %v2497_v30 = vmul.f32 %v2481_v27, %v12468_v28  ;;  %v2162_v42 = vmul.f32 %v2481_v27, %v12469_v34  ;;  %v2593_v31 = vld [vmem:[#allocation2 + $0x18] sm:$0xff]  ;;  %v2832_v37 = vmul.f32 %v2481_v27, %v12470_v35 }
 0x32f   :  { %v2817_v13 = vld [vmem:[#allocation2 + $0x1a] sm:$0xff]  ;;  %v2609_v54 = vmul.f32 %v2593_v31, %v12471_v26  ;;  %v2274_v22 = vmul.f32 %v2593_v31, %v12472_v41  ;;  %v2003_v27 = vmul.f32 %v2593_v31, %v9343_v55  ;;  %v12473_v35 = vld [vmem:[#allocation84_spill] sm:$0xff] }
 0x330   :  { %v2594_v49 = vld [vmem:[#allocation2 + $0x20] sm:$0xff]  ;;  %2530 = vrot.lane.b32.xlu1 %v2497_v30, %s8331_s14  ;;  %2196 = vrot.lane.b32.xlu0 %v2162_v42, %s8328_s11  ;;  %v2833_v24 = vmul.f32 %v2817_v13, %v9441_v19  ;;  %2848 = vst.msk [vmem:[#allocation3 + $0x8] sm:$0xff] %vm193_vm0, %v2832_v37  ;;  %v2938_v30 = vpack.c.bf16 %v2913_v38, %v2912_v33 }
 0x331   :  { %2978 = vmatpush1.bf16.msra.mxu1 %v2937_v29  ;;  %v2004_v42 = vmul.f32 %v2594_v49, %v12473_v35  ;;  %v2705_v28 = vld [vmem:[#allocation2 + $0x19] sm:$0xff]  ;;  %2019 = vst.msk [vmem:[#allocation3 + $0x30] sm:$0xff] %vm193_vm0, %v2003_v27  ;;  %v12474_v37 = vld [vmem:[#allocation66_spill] sm:$0xff]  ;;  %v12477_v35 = vld [vmem:[#allocation56_spill] sm:$0xff] }
 0x332   :  { %2849 = vst.msk [vmem:[#allocation3 + $0x18] sm:$0xff] %vm193_vm0, %v2833_v24  ;;  %2979 = vmatprep.subr.bf16.mxu1 %v12320_v56  ;;  %v2721_v29 = vmul.f32 %v2705_v28, %v12474_v37  ;;  %v12475_v24 = vld [vmem:[#allocation31_spill] sm:$0xff]  ;;  %v12476_v38 = vld [vmem:[#allocation25_spill] sm:$0xff]  ;;  %v2498_v27 = vmul.f32 %v2817_v13, %v12477_v35 }
 0x333   :  { %2020 = vst.msk [vmem:[#allocation3 + $0x40] sm:$0xff] %vm193_vm0, %v2004_v42  ;;  %v2386_v26 = vmul.f32 %v2705_v28, %v12475_v24  ;;  %v12479_v37 = vld [vmem:[#allocation37_spill] sm:$0xff] }
 0x334   :  { %2642 = vrot.lane.b32.xlu1 %v2609_v54, %s8332_s15  ;;  %2308 = vrot.lane.b32.xlu0 %v2274_v22, %s8329_s12  ;;  %v2051_v54 = vmul.f32 %v2705_v28, %v12476_v38  ;;  %v2610_v24 = vmul.f32 %v2594_v49, %v12479_v37  ;;  %v12483_v38 = vld [vmem:[#allocation9_spill] sm:$0xff] }
 0x335   :  { %2980 = vmatpush1.bf16.msra.mxu1 %v2938_v30  ;;  %v12478_v30 = vld [vmem:[#allocation27_spill] sm:$0xff] }
 0x336   :  { %5287 = vmatprep.subr.bf16.mxu1 %v12320_v56  ;;  %v2163_v42 = vmul.f32 %v2817_v13, %v12478_v30 }
 0x337   :  { %v2865_v31 = vld [vmem:[#allocation3 + $0x8] sm:$0xff] }
 0x338   :  { %2754 = vrot.lane.b32.xlu1 %v2721_v29, %s8333_s16  ;;  %2420 = vrot.lane.b32.xlu0 %v2386_v26, %s8330_s13  ;;  %v2706_v26 = vld [vmem:[#allocation2 + $0x21] sm:$0xff]  ;;  %v12480_v29 = vld [vmem:[#allocation19_spill] sm:$0xff] }
 0x339   :  { %v2867_v33 = vld [vmem:[#allocation3 + $0x18] sm:$0xff]  ;;  %v2275_v28 = vmul.f32 %v2594_v49, %v12480_v29  ;;  %v2052_v13 = vmul.f32 %v2706_v26, %v12483_v38 }
 0x33a   :  { %v2915_v22 = vpack.c.bf16 %v2867_v33, %v2865_v31  ;;  %v12481_v31 = vld [vmem:[#allocation40_spill] sm:$0xff] }
 0x33b   :  { %v2722_v33 = vmul.f32 %v2706_v26, %v12481_v31 }
 0x33c   :  { %2086 = vrot.lane.b32.xlu1 %v2051_v54, %s8327_s10  ;;  %7706 = vmatprep.mubr.msk.bf16.mxu1 %vm193_vm0, %v2915_v22  ;;  %v12482_v54 = vld [vmem:[#allocation33_spill] sm:$0xff] }
 0x33d   :  { %2532 = vrot.lane.b32.xlu0 %v2498_v27, %s8331_s14  ;;  %v2387_v22 = vmul.f32 %v2706_v26, %v12482_v54 }
 0x340   :  { %2198 = vrot.lane.b32.xlu1 %v2163_v42, %s8328_s11 }
 0x341   :  { %2644 = vrot.lane.b32.xlu0 %v2610_v24, %s8332_s15 }
 0x344   :  { %2310 = vrot.lane.b32.xlu1 %v2275_v28, %s8329_s12 }
 0x345   :  { %2756 = vrot.lane.b32.xlu0 %v2722_v33, %s8333_s16 }
 0x348   :  { %v1859_v27 = vpop.f32.mrb[8].mxu0  ;;  %2422 = vrot.lane.b32.xlu1 %v2387_v22, %s8330_s13  ;;  %v12486_v22 = vld [vmem:[#allocation35_spill] sm:$0xff] }
 0x349   :  { %v1917_v30 = vmul.f32 %v9771_v57, %v1859_v27  ;;  %v1861_v42 = vpop.f32.mrb[9].mxu0  ;;  %2088 = vrot.lane.b32.xlu0 %v2052_v13, %s8327_s10  ;;  %v12487_v13 = vld [vmem:[#allocation46_spill] sm:$0xff] }
 0x34a   :  { %v1862_v24 = vpop.f32.mrb[10].mxu0 }
 0x34b   :  { %v9919_v49 = vadd.f32 %v9775_v44, %v1917_v30  ;;  %v1918_v28 = vmul.f32 %v9771_v57, %v1862_v24  ;;  %v1864_v29 = vpop.f32.mrb[11].mxu0 }
 0x34d   :  { %12484 = vst [vmem:[#allocation130_spill] sm:$0xff] %v9919_v49  ;;  %v12163_v33 = vmax.f32 %v9919_v49, 0.0  ;;  %v9924_v54 = vadd.f32 %v9775_v44, %v1918_v28 }
 0x34f   :  { %12485 = vst [vmem:[#allocation132_spill] sm:$0xff] %v9924_v54  ;;  %1972 = vst.msk [vmem:[#allocation2 + $0x29] sm:$0xff] %vm193_vm0, %v12163_v33  ;;  %v12166_v26 = vmax.f32 %v9924_v54, 0.0  ;;  %v12488_v33 = vld [vmem:[#allocation28_spill] sm:$0xff] }
 0x350   :  { %v12489_v54 = vld [vmem:[#allocation48_spill] sm:$0xff] }
 0x351   :  { %1973 = vst.msk [vmem:[#allocation2 + $0x31] sm:$0xff] %vm193_vm0, %v12166_v26 }
 0x356   :  { %v2483_v30 = vld [vmem:[#allocation2 + $0x22] sm:$0xff] }
 0x357   :  { %v2499_v27 = vmul.f32 %v2483_v30, %v12486_v22  ;;  %v2164_v29 = vmul.f32 %v2483_v30, %v12487_v13  ;;  %v2595_v42 = vld [vmem:[#allocation2 + $0x28] sm:$0xff]  ;;  %v2834_v28 = vmul.f32 %v2483_v30, %v9450_v63  ;;  %v12490_v13 = vld [vmem:[#allocation109_spill] sm:$0xff] }
 0x358   :  { %v2484_v24 = vld [vmem:[#allocation2 + $0x2a] sm:$0xff]  ;;  %v2611_v49 = vmul.f32 %v2595_v42, %v12488_v33  ;;  %v2276_v26 = vmul.f32 %v2595_v42, %v12489_v54  ;;  %v2005_v22 = vmul.f32 %v2595_v42, %v9414_v6  ;;  %v12491_v30 = vld [vmem:[#allocation42_spill] sm:$0xff] }
 0x359   :  { %v2596_v38 = vld [vmem:[#allocation2 + $0x30] sm:$0xff]  ;;  %2534 = vrot.lane.b32.xlu1 %v2499_v27, %s8331_s14  ;;  %2200 = vrot.lane.b32.xlu0 %v2164_v29, %s8328_s11  ;;  %2850 = vst.msk [vmem:[#allocation3 + $0x28] sm:$0xff] %vm193_vm0, %v2834_v28  ;;  %v2835_v31 = vmul.f32 %v2484_v24, %v9395_v23 }
 0x35a   :  { %v2006_v37 = vmul.f32 %v2596_v38, %v12490_v13  ;;  %v2707_v35 = vld [vmem:[#allocation2 + $0x29] sm:$0xff]  ;;  %2021 = vst.msk [vmem:[#allocation3 + $0x50] sm:$0xff] %vm193_vm0, %v2005_v22  ;;  %v12493_v42 = vld [vmem:[#allocation44_spill] sm:$0xff]  ;;  %v12496_v22 = vld [vmem:[#allocation38_spill] sm:$0xff] }
 0x35b   :  { %2851 = vst.msk [vmem:[#allocation3 + $0x38] sm:$0xff] %vm193_vm0, %v2835_v31  ;;  %v2723_v27 = vmul.f32 %v2707_v35, %v12491_v30  ;;  %v12492_v29 = vld [vmem:[#allocation47_spill] sm:$0xff]  ;;  %v2053_v13 = vmul.f32 %v2707_v35, %v12493_v42  ;;  %v12495_v31 = vld [vmem:[#allocation57_spill] sm:$0xff]  ;;  %v2708_v23 = vld [vmem:[#allocation2 + $0x31] sm:$0xff] }
 0x35c   :  { %2022 = vst.msk [vmem:[#allocation3 + $0x60] sm:$0xff] %vm193_vm0, %v2006_v37  ;;  %v2388_v28 = vmul.f32 %v2707_v35, %v12492_v29  ;;  %v12494_v6 = vld [vmem:[#allocation55_spill] sm:$0xff]  ;;  %v2165_v37 = vmul.f32 %v2484_v24, %v12496_v22  ;;  %v12499_v35 = vld [vmem:[#allocation52_spill] sm:$0xff] }
 0x35d   :  { %2646 = vrot.lane.b32.xlu1 %v2611_v49, %s8332_s15  ;;  %2312 = vrot.lane.b32.xlu0 %v2276_v26, %s8329_s12  ;;  %v2500_v49 = vmul.f32 %v2484_v24, %v12494_v6  ;;  %v2612_v26 = vmul.f32 %v2596_v38, %v12495_v31 }
 0x361   :  { %2758 = vrot.lane.b32.xlu1 %v2723_v27, %s8333_s16  ;;  %2424 = vrot.lane.b32.xlu0 %v2388_v28, %s8330_s13  ;;  %v12497_v27 = vld [vmem:[#allocation68_spill] sm:$0xff]  ;;  %v12498_v28 = vld [vmem:[#allocation50_spill] sm:$0xff] }
 0x362   :  { %v2724_v30 = vmul.f32 %v2708_v23, %v12497_v27  ;;  %v2277_v29 = vmul.f32 %v2596_v38, %v12498_v28  ;;  %v12505_v28 = vld [vmem:[#allocation59_spill] sm:$0xff] }
 0x365   :  { %2090 = vrot.lane.b32.xlu1 %v2053_v13, %s8327_s10  ;;  %2536 = vrot.lane.b32.xlu0 %v2500_v49, %s8331_s14  ;;  %v2389_v13 = vmul.f32 %v2708_v23, %v12499_v35  ;;  %v12500_v49 = vld [vmem:[#allocation63_spill] sm:$0xff] }
 0x366   :  { %v2054_v42 = vmul.f32 %v2708_v23, %v12500_v49 }
 0x369   :  { %2648 = vrot.lane.b32.xlu0 %v2612_v26, %s8332_s15  ;;  %2202 = vrot.lane.b32.xlu1 %v2165_v37, %s8328_s11 }
 0x36d   :  { %2760 = vrot.lane.b32.xlu0 %v2724_v30, %s8333_s16  ;;  %2314 = vrot.lane.b32.xlu1 %v2277_v29, %s8329_s12 }
 0x36f   :  { %v1867_v31 = vpop.f32.mrb[12].mxu0 }
 0x370   :  { %v1919_v24 = vmul.f32 %v9771_v57, %v1867_v31  ;;  %v1869_v26 = vpop.f32.mrb[13].mxu0  ;;  %v12503_v31 = vld [vmem:[#allocation58_spill] sm:$0xff] }
 0x371   :  { %2426 = vrot.lane.b32.xlu1 %v2389_v13, %s8330_s13  ;;  %2092 = vrot.lane.b32.xlu0 %v2054_v42, %s8327_s10  ;;  %v1870_v37 = vpop.f32.mrb[14].mxu0 }
 0x372   :  { %v9971_v27 = vadd.f32 %v9775_v44, %v1919_v24  ;;  %v1920_v38 = vmul.f32 %v9771_v57, %v1870_v37  ;;  %v1872_v30 = vpop.f32.mrb[15].mxu0  ;;  %v12504_v24 = vld [vmem:[#allocation65_spill] sm:$0xff] }
 0x374   :  { %12501 = vst [vmem:[#allocation29_spill] sm:$0xff] %v9971_v27  ;;  %v12171_v29 = vmax.f32 %v9971_v27, 0.0  ;;  %v9976_v35 = vadd.f32 %v9775_v44, %v1920_v38 }
 0x376   :  { %12502 = vst [vmem:[#allocation28_spill] sm:$0xff] %v9976_v35  ;;  %1974 = vst.msk [vmem:[#allocation2 + $0x39] sm:$0xff] %vm193_vm0, %v12171_v29  ;;  %v12174_v23 = vmax.f32 %v9976_v35, 0.0 }
 0x378   :  { %1975 = vst.msk [vmem:[#allocation2 + $0x41] sm:$0xff] %vm193_vm0, %v12174_v23 }
 0x37d   :  { %v2485_v42 = vld [vmem:[#allocation2 + $0x32] sm:$0xff] }
 0x37e   :  { %v2501_v13 = vmul.f32 %v2485_v42, %v12503_v31  ;;  %v2166_v26 = vmul.f32 %v2485_v42, %v12504_v24  ;;  %v2597_v37 = vld [vmem:[#allocation2 + $0x38] sm:$0xff]  ;;  %v2836_v38 = vmul.f32 %v2485_v42, %v9493_v3 }
 0x37f   :  { %v2486_v30 = vld [vmem:[#allocation2 + $0x3a] sm:$0xff]  ;;  %v2613_v35 = vmul.f32 %v2597_v37, %v12505_v28  ;;  %v2278_v23 = vmul.f32 %v2597_v37, %v12391_v61  ;;  %v2007_v42 = vmul.f32 %v2597_v37, %v9522_v14  ;;  %v12506_v3 = vld [vmem:[#allocation116_spill] sm:$0xff] }
 0x380   :  { %v2598_v49 = vld [vmem:[#allocation2 + $0x40] sm:$0xff]  ;;  %2538 = vrot.lane.b32.xlu1 %v2501_v13, %s8331_s14  ;;  %2204 = vrot.lane.b32.xlu0 %v2166_v26, %s8328_s11  ;;  %2852 = vst.msk [vmem:[#allocation3 + $0x48] sm:$0xff] %vm193_vm0, %v2836_v38  ;;  %v2837_v31 = vmul.f32 %v2486_v30, %v9461_v20 }
 0x381   :  { %v2193_v29 = vpop.permute.xlu0 %2192  ;;  %v2008_v13 = vmul.f32 %v2598_v49, %v12506_v3  ;;  %v2709_v24 = vld [vmem:[#allocation2 + $0x39] sm:$0xff]  ;;  %2023 = vst.msk [vmem:[#allocation3 + $0x70] sm:$0xff] %vm193_vm0, %v2007_v42 }
 0x382   :  { %v2083_v27 = vpop.permute.xlu1 %2082  ;;  %2240 = vst.msk [vmem:[#allocation3] sm:$0xff] %vm696_vm3, %v2193_v29  ;;  %v12507_v26 = vld [vmem:[#allocation61_spill] sm:$0xff]  ;;  %v2390_v38 = vmul.f32 %v2709_v24, %v12393_v36 }
 0x383   :  { %2129 = vst.msk [vmem:[#allocation3 + $0x10] sm:$0xff] %vm519_vm2, %v2083_v27  ;;  %v2725_v37 = vmul.f32 %v2709_v24, %v12507_v26  ;;  %v2710_v26 = vld [vmem:[#allocation2 + $0x41] sm:$0xff] }
 0x384   :  { %2650 = vrot.lane.b32.xlu1 %v2613_v35, %s8332_s15  ;;  %2316 = vrot.lane.b32.xlu0 %v2278_v23, %s8329_s12  ;;  %2853 = vst.msk [vmem:[#allocation3 + $0x58] sm:$0xff] %vm193_vm0, %v2837_v31  ;;  %2024 = vst.msk [vmem:[#allocation3 + $0x80] sm:$0xff] %vm193_vm0, %v2008_v13  ;;  %v12508_v31 = vld [vmem:[#allocation11_spill] sm:$0xff]  ;;  %v2502_v13 = vmul.f32 %v2486_v30, %v12395_v32 }
 0x385   :  { %v2305_v27 = vpop.permute.xlu0 %2304  ;;  %v2055_v42 = vmul.f32 %v2709_v24, %v12508_v31 }
 0x386   :  { %v2195_v29 = vpop.permute.xlu1 %2194  ;;  %2352 = vst.msk [vmem:[#allocation3] sm:$0xff] %vm873_vm4, %v2305_v27 }
 0x387   :  { %2241 = vst.msk [vmem:[#allocation3 + $0x10] sm:$0xff] %vm696_vm3, %v2195_v29 }
 0x388   :  { %2762 = vrot.lane.b32.xlu1 %v2725_v37, %s8333_s16  ;;  %2428 = vrot.lane.b32.xlu0 %v2390_v38, %s8330_s13  ;;  %v2614_v37 = vmul.f32 %v2598_v49, %v12396_v58  ;;  %v12509_v38 = vld [vmem:[#allocation67_spill] sm:$0xff] }
 0x389   :  { %v2417_v35 = vpop.permute.xlu0 %2416 }
 0x38a   :  { %v2307_v23 = vpop.permute.xlu1 %2306  ;;  %2464 = vst.msk [vmem:[#allocation3] sm:$0xff] %vm1050_vm5, %v2417_v35  ;;  %v2167_v35 = vmul.f32 %v2486_v30, %v12509_v38  ;;  %v12512_v30 = vld [vmem:[#allocation49_spill] sm:$0xff] }
 0x38b   :  { %2353 = vst.msk [vmem:[#allocation3 + $0x10] sm:$0xff] %vm873_vm4, %v2307_v23  ;;  %v12510_v23 = vld [vmem:[#allocation80_spill] sm:$0xff] }
 0x38c   :  { %2094 = vrot.lane.b32.xlu1 %v2055_v42, %s8327_s10  ;;  %2540 = vrot.lane.b32.xlu0 %v2502_v13, %s8331_s14  ;;  %v2726_v42 = vmul.f32 %v2710_v26, %v12510_v23  ;;  %v12511_v13 = vld [vmem:[#allocation69_spill] sm:$0xff]  ;;  %v12517_v23 = vld [vmem:[#allocation127_spill] sm:$0xff] }
 0x38d   :  { %v2529_v27 = vpop.permute.xlu0 %2528  ;;  %v2279_v31 = vmul.f32 %v2598_v49, %v12511_v13 }
 0x38e   :  { %v2419_v29 = vpop.permute.xlu1 %2418  ;;  %2576 = vst.msk [vmem:[#allocation3] sm:$0xff] %vm1227_vm6, %v2529_v27 }
 0x38f   :  { %2465 = vst.msk [vmem:[#allocation3 + $0x10] sm:$0xff] %vm1050_vm5, %v2419_v29  ;;  %v2391_v29 = vmul.f32 %v2710_v26, %v12512_v30 }
 0x390   :  { %2652 = vrot.lane.b32.xlu0 %v2614_v37, %s8332_s15  ;;  %2206 = vrot.lane.b32.xlu1 %v2167_v35, %s8328_s11  ;;  %v2056_v37 = vmul.f32 %v2710_v26, %v12399_v52 }
 0x391   :  { %v2641_v24 = vpop.permute.xlu0 %2640 }
 0x392   :  { %2688 = vst.msk [vmem:[#allocation3] sm:$0xff] %vm1404_vm7, %v2641_v24 }
 0x394   :  { %2764 = vrot.lane.b32.xlu0 %v2726_v42, %s8333_s16  ;;  %2318 = vrot.lane.b32.xlu1 %v2279_v31, %s8329_s12 }
 0x395   :  { %v2753_v27 = vpop.permute.xlu0 %2752 }
 0x396   :  { %2800 = vst.msk [vmem:[#allocation3] sm:$0xff] %vm1581_vm8, %v2753_v27 }
 0x397   :  { %v1875_v38 = vpop.f32.mrb[16].mxu0 }
 0x398   :  { %v1921_v35 = vmul.f32 %v9771_v57, %v1875_v38  ;;  %2430 = vrot.lane.b32.xlu1 %v2391_v29, %s8330_s13  ;;  %2096 = vrot.lane.b32.xlu0 %v2056_v37, %s8327_s10  ;;  %v1877_v24 = vpop.f32.mrb[17].mxu0 }
 0x399   :  { %v2085_v49 = vpop.permute.xlu0 %2084  ;;  %v1878_v13 = vpop.f32.mrb[18].mxu0 }
 0x39a   :  { %v10033_v42 = vadd.f32 %v9775_v44, %v1921_v35  ;;  %2130 = vst.msk [vmem:[#allocation3 + $0x20] sm:$0xff] %vm519_vm2, %v2085_v49  ;;  %v1922_v31 = vmul.f32 %v9771_v57, %v1878_v13  ;;  %v1880_v27 = vpop.f32.mrb[19].mxu0 }
 0x39c   :  { %12513 = vst [vmem:[#allocation48_spill] sm:$0xff] %v10033_v42  ;;  %v12177_v26 = vmax.f32 %v10033_v42, 0.0  ;;  %v10039_v30 = vadd.f32 %v9775_v44, %v1922_v31  ;;  %v12515_v31 = vld [vmem:[#allocation77_spill] sm:$0xff] }
 0x39d   :  { %v2864_v38 = vld [vmem:[#allocation3] sm:$0xff] }
 0x39e   :  { %12514 = vst [vmem:[#allocation59_spill] sm:$0xff] %v10039_v30  ;;  %1976 = vst.msk [vmem:[#allocation2 + $0x49] sm:$0xff] %vm193_vm0, %v12177_v26  ;;  %v12180_v29 = vmax.f32 %v10039_v30, 0.0 }
 0x39f   :  { %3170 = vst.msk [vmem:[#allocation3] sm:$0xff] %vm193_vm0, %v12403_v48 }
 0x3a0   :  { %1977 = vst.msk [vmem:[#allocation2 + $0x51] sm:$0xff] %vm193_vm0, %v12180_v29 }
 0x3a2   :  { %v2531_v13 = vpop.permute.xlu1 %2530  ;;  %v2197_v37 = vpop.permute.xlu0 %2196 }
 0x3a3   :  { %2577 = vst.msk [vmem:[#allocation3 + $0x10] sm:$0xff] %vm1227_vm6, %v2531_v13  ;;  %v12516_v13 = vld [vmem:[#allocation79_spill] sm:$0xff] }
 0x3a4   :  { %2242 = vst.msk [vmem:[#allocation3 + $0x20] sm:$0xff] %vm696_vm3, %v2197_v37 }
 0x3a5   :  { %v2487_v35 = vld [vmem:[#allocation2 + $0x42] sm:$0xff] }
 0x3a6   :  { %v2643_v24 = vpop.permute.xlu1 %2642  ;;  %v2309_v49 = vpop.permute.xlu0 %2308  ;;  %v2503_v27 = vmul.f32 %v2487_v35, %v12515_v31  ;;  %v2168_v26 = vmul.f32 %v2487_v35, %v12402_v43  ;;  %v2599_v42 = vld [vmem:[#allocation2 + $0x48] sm:$0xff]  ;;  %v2838_v48 = vmul.f32 %v2487_v35, %v9577_v25 }
 0x3a7   :  { %2689 = vst.msk [vmem:[#allocation3 + $0x10] sm:$0xff] %vm1404_vm7, %v2643_v24  ;;  %v2488_v30 = vld [vmem:[#allocation2 + $0x4a] sm:$0xff]  ;;  %v2615_v37 = vmul.f32 %v2599_v42, %v12516_v13  ;;  %v2280_v43 = vmul.f32 %v2599_v42, %v8886_v1 }
 0x3a8   :  { %2354 = vst.msk [vmem:[#allocation3 + $0x20] sm:$0xff] %vm873_vm4, %v2309_v49  ;;  %v2600_v29 = vld [vmem:[#allocation2 + $0x50] sm:$0xff]  ;;  %2542 = vrot.lane.b32.xlu1 %v2503_v27, %s8331_s14  ;;  %2208 = vrot.lane.b32.xlu0 %v2168_v26, %s8328_s11  ;;  %v2839_v24 = vmul.f32 %v2488_v30, %v9468_v21  ;;  %v2009_v49 = vmul.f32 %v2599_v42, %v9602_v2  ;;  %v12518_v26 = vld [vmem:[#allocation70_spill] sm:$0xff] }
 0x3a9   :  { %2854 = vst.msk [vmem:[#allocation3 + $0x68] sm:$0xff] %vm193_vm0, %v2838_v48  ;;  %v2010_v58 = vmul.f32 %v2600_v29, %v12517_v23  ;;  %v2711_v35 = vld [vmem:[#allocation2 + $0x49] sm:$0xff] }
 0x3aa   :  { %v2755_v31 = vpop.permute.xlu1 %2754  ;;  %v2421_v52 = vpop.permute.xlu0 %2420  ;;  %2855 = vst.msk [vmem:[#allocation3 + $0x78] sm:$0xff] %vm193_vm0, %v2839_v24  ;;  %2025 = vst.msk [vmem:[#allocation3 + $0x90] sm:$0xff] %vm193_vm0, %v2009_v49  ;;  %v2727_v42 = vmul.f32 %v2711_v35, %v12518_v26  ;;  %v2392_v27 = vmul.f32 %v2711_v35, %v8895_v50  ;;  %v12520_v49 = vld [vmem:[#allocation60_spill] sm:$0xff]  ;;  %v2869_v50 = vld [vmem:[#allocation3 + $0x28] sm:$0xff] }
 0x3ab   :  { %2801 = vst.msk [vmem:[#allocation3 + $0x10] sm:$0xff] %vm1581_vm8, %v2755_v31 }
 0x3ac   :  { %2466 = vst.msk [vmem:[#allocation3 + $0x20] sm:$0xff] %vm1050_vm5, %v2421_v52  ;;  %2654 = vrot.lane.b32.xlu1 %v2615_v37, %s8332_s15  ;;  %2320 = vrot.lane.b32.xlu0 %v2280_v43, %s8329_s12  ;;  %v2871_v52 = vld [vmem:[#allocation3 + $0x38] sm:$0xff]  ;;  %v12519_v37 = vld [vmem:[#allocation82_spill] sm:$0xff] }
 0x3ad   :  { %2026 = vst.msk [vmem:[#allocation3 + $0xa0] sm:$0xff] %vm193_vm0, %v2010_v58  ;;  %v2057_v24 = vmul.f32 %v2711_v35, %v12519_v37  ;;  %v2504_v58 = vmul.f32 %v2488_v30, %v12520_v49  ;;  %v2616_v35 = vmul.f32 %v2600_v29, %v8924_v47 }
 0x3ae   :  { %v2087_v48 = vpop.permute.xlu1 %2086 }
 0x3af   :  { %2131 = vst.msk [vmem:[#allocation3 + $0x30] sm:$0xff] %vm519_vm2, %v2087_v48  ;;  %v2533_v31 = vpop.permute.xlu0 %2532  ;;  %v2917_v48 = vpack.c.bf16 %v2871_v52, %v2869_v50 }
 0x3b0   :  { %2578 = vst.msk [vmem:[#allocation3 + $0x20] sm:$0xff] %vm1227_vm6, %v2533_v31  ;;  %2766 = vrot.lane.b32.xlu1 %v2727_v42, %s8333_s16  ;;  %2432 = vrot.lane.b32.xlu0 %v2392_v27, %s8330_s13  ;;  %v12521_v27 = vld [vmem:[#allocation83_spill] sm:$0xff] }
 0x3b1   :  { %v2169_v31 = vmul.f32 %v2488_v30, %v12521_v27  ;;  %v12523_v30 = vld [vmem:[#allocation86_spill] sm:$0xff] }
 0x3b2   :  { %v2199_v43 = vpop.permute.xlu1 %2198  ;;  %v2866_v23 = vld [vmem:[#allocation3 + $0x10] sm:$0xff] }
 0x3b3   :  { %v2645_v2 = vpop.permute.xlu0 %2644  ;;  %2243 = vst.msk [vmem:[#allocation3 + $0x30] sm:$0xff] %vm696_vm3, %v2199_v43  ;;  %v2914_v26 = vpack.c.bf16 %v2866_v23, %v2864_v38  ;;  %v2712_v23 = vld [vmem:[#allocation2 + $0x51] sm:$0xff]  ;;  %v12522_v38 = vld [vmem:[#allocation22_spill] sm:$0xff] }
 0x3b4   :  { %2690 = vst.msk [vmem:[#allocation3 + $0x20] sm:$0xff] %vm1404_vm7, %v2645_v2  ;;  %2098 = vrot.lane.b32.xlu1 %v2057_v24, %s8327_s10  ;;  %2544 = vrot.lane.b32.xlu0 %v2504_v58, %s8331_s14  ;;  %v2728_v50 = vmul.f32 %v2712_v23, %v8933_v9  ;;  %v2393_v43 = vmul.f32 %v2712_v23, %v12523_v30  ;;  %v12529_v30 = vld [vmem:[#allocation135_spill] sm:$0xff] }
 0x3b5   :  { %2996 = vmatmul.mubr.bf16.vlgmr.msra.gmra.mrb[0].mxu1 %v2914_v26  ;;  %v2281_v26 = vmul.f32 %v2600_v29, %v12522_v38 }
 0x3b6   :  { %v2311_v42 = vpop.permute.xlu1 %2310  ;;  %7707 = vmatprep.mubr.msk.bf16.mxu1 %vm193_vm0, %v2917_v48 }
 0x3b7   :  { %v2757_v37 = vpop.permute.xlu0 %2756  ;;  %2355 = vst.msk [vmem:[#allocation3 + $0x30] sm:$0xff] %vm873_vm4, %v2311_v42 }
 0x3b8   :  { %2802 = vst.msk [vmem:[#allocation3 + $0x20] sm:$0xff] %vm1581_vm8, %v2757_v37  ;;  %2656 = vrot.lane.b32.xlu0 %v2616_v35, %s8332_s15  ;;  %2210 = vrot.lane.b32.xlu1 %v2169_v31, %s8328_s11  ;;  %v2058_v37 = vmul.f32 %v2712_v23, %v12410_v11 }
 0x3ba   :  { %v2423_v2 = vpop.permute.xlu1 %2422 }
 0x3bb   :  { %2467 = vst.msk [vmem:[#allocation3 + $0x30] sm:$0xff] %vm1050_vm5, %v2423_v2  ;;  %v2089_v52 = vpop.permute.xlu0 %2088 }
 0x3bc   :  { %2132 = vst.msk [vmem:[#allocation3 + $0x40] sm:$0xff] %vm519_vm2, %v2089_v52  ;;  %2768 = vrot.lane.b32.xlu0 %v2728_v50, %s8333_s16  ;;  %2322 = vrot.lane.b32.xlu1 %v2281_v26, %s8329_s12 }
 0x3be   :  { %v1883_v24 = vpop.f32.mrb[20].mxu0 }
 0x3bf   :  { %v1923_v58 = vmul.f32 %v9771_v57, %v1883_v24  ;;  %v1885_v29 = vpop.f32.mrb[21].mxu0 }
 0x3c0   :  { %2434 = vrot.lane.b32.xlu1 %v2393_v43, %s8330_s13  ;;  %2100 = vrot.lane.b32.xlu0 %v2058_v37, %s8327_s10  ;;  %v1886_v48 = vpop.f32.mrb[22].mxu0 }
 0x3c1   :  { %v10103_v42 = vadd.f32 %v9775_v44, %v1923_v58  ;;  %v1924_v35 = vmul.f32 %v9771_v57, %v1886_v48  ;;  %v1888_v31 = vpop.f32.mrb[23].mxu0  ;;  %v12526_v58 = vld [vmem:[#allocation87_spill] sm:$0xff] }
 0x3c3   :  { %12524 = vst [vmem:[#allocation79_spill] sm:$0xff] %v10103_v42  ;;  %v12190_v2 = vmax.f32 %v10103_v42, 0.0  ;;  %v10108_v50 = vadd.f32 %v9775_v44, %v1924_v35  ;;  %v12527_v42 = vld [vmem:[#allocation92_spill] sm:$0xff] }
 0x3c5   :  { %12525 = vst [vmem:[#allocation60_spill] sm:$0xff] %v10108_v50  ;;  %1978 = vst.msk [vmem:[#allocation2 + $0x59] sm:$0xff] %vm193_vm0, %v12190_v2  ;;  %v12189_v23 = vmax.f32 %v10108_v50, 0.0 }
 0x3c7   :  { %1979 = vst.msk [vmem:[#allocation2 + $0x61] sm:$0xff] %vm193_vm0, %v12189_v23 }
 0x3cb   :  { %v2535_v26 = vpop.permute.xlu1 %2534  ;;  %v2201_v52 = vpop.permute.xlu0 %2200 }
 0x3cc   :  { %2579 = vst.msk [vmem:[#allocation3 + $0x30] sm:$0xff] %vm1227_vm6, %v2535_v26  ;;  %v2489_v43 = vld [vmem:[#allocation2 + $0x52] sm:$0xff] }
 0x3cd   :  { %2244 = vst.msk [vmem:[#allocation3 + $0x40] sm:$0xff] %vm696_vm3, %v2201_v52  ;;  %v2505_v29 = vmul.f32 %v2489_v43, %v12526_v58  ;;  %v2170_v48 = vmul.f32 %v2489_v43, %v8956_v45  ;;  %v2601_v35 = vld [vmem:[#allocation2 + $0x58] sm:$0xff]  ;;  %v2840_v2 = vmul.f32 %v2489_v43, %v9651_v51  ;;  %v12528_v45 = vld [vmem:[#allocation139_spill] sm:$0xff] }
 0x3ce   :  { %v2490_v31 = vld [vmem:[#allocation2 + $0x5a] sm:$0xff]  ;;  %v2617_v26 = vmul.f32 %v2601_v35, %v12406_v40  ;;  %v2282_v58 = vmul.f32 %v2601_v35, %v12527_v42 }
 0x3cf   :  { %v2647_v37 = vpop.permute.xlu1 %2646  ;;  %v2313_v24 = vpop.permute.xlu0 %2312  ;;  %v2602_v23 = vld [vmem:[#allocation2 + $0x60] sm:$0xff]  ;;  %2546 = vrot.lane.b32.xlu1 %v2505_v29, %s8331_s14  ;;  %2212 = vrot.lane.b32.xlu0 %v2170_v48, %s8328_s11  ;;  %2856 = vst.msk [vmem:[#allocation3 + $0x88] sm:$0xff] %vm193_vm0, %v2840_v2 }
 0x3d0   :  { %2691 = vst.msk [vmem:[#allocation3 + $0x30] sm:$0xff] %vm1404_vm7, %v2647_v37  ;;  %v2841_v37 = vmul.f32 %v2490_v31, %v12528_v45  ;;  %v2012_v11 = vmul.f32 %v2602_v23, %v12529_v30  ;;  %v2713_v43 = vld [vmem:[#allocation2 + $0x59] sm:$0xff]  ;;  %v12531_v30 = vld [vmem:[#allocation51_spill] sm:$0xff] }
 0x3d1   :  { %2356 = vst.msk [vmem:[#allocation3 + $0x40] sm:$0xff] %vm873_vm4, %v2313_v24  ;;  %v2011_v24 = vmul.f32 %v2601_v35, %v9668_v10  ;;  %v12530_v48 = vld [vmem:[#allocation89_spill] sm:$0xff]  ;;  %v2394_v10 = vmul.f32 %v2713_v43, %v12531_v30 }
 0x3d2   :  { %2857 = vst.msk [vmem:[#allocation3 + $0x98] sm:$0xff] %vm193_vm0, %v2841_v37  ;;  %2028 = vst.msk [vmem:[#allocation3 + $0xc0] sm:$0xff] %vm193_vm0, %v2012_v11  ;;  %v2729_v35 = vmul.f32 %v2713_v43, %v12530_v48  ;;  %v12533_v11 = vld [vmem:[#allocation95_spill] sm:$0xff]  ;;  %v2868_v45 = vld [vmem:[#allocation3 + $0x20] sm:$0xff] }
 0x3d3   :  { %v2759_v52 = vpop.permute.xlu1 %2758  ;;  %v2425_v50 = vpop.permute.xlu0 %2424  ;;  %2658 = vrot.lane.b32.xlu1 %v2617_v26, %s8332_s15  ;;  %2324 = vrot.lane.b32.xlu0 %v2282_v58, %s8329_s12  ;;  %2027 = vst.msk [vmem:[#allocation3 + $0xb0] sm:$0xff] %vm193_vm0, %v2011_v24  ;;  %v2506_v24 = vmul.f32 %v2490_v31, %v12533_v11  ;;  %v2873_v48 = vld [vmem:[#allocation3 + $0x48] sm:$0xff] }
 0x3d4   :  { %2803 = vst.msk [vmem:[#allocation3 + $0x30] sm:$0xff] %vm1581_vm8, %v2759_v52  ;;  %v12532_v52 = vld [vmem:[#allocation90_spill] sm:$0xff]  ;;  %v12535_v11 = vld [vmem:[#allocation41_spill] sm:$0xff] }
 0x3d5   :  { %2468 = vst.msk [vmem:[#allocation3 + $0x40] sm:$0xff] %vm1050_vm5, %v2425_v50  ;;  %v2875_v50 = vld [vmem:[#allocation3 + $0x58] sm:$0xff]  ;;  %v2059_v37 = vmul.f32 %v2713_v43, %v12532_v52  ;;  %v12534_v43 = vld [vmem:[#allocation97_spill] sm:$0xff]  ;;  %v2171_v30 = vmul.f32 %v2490_v31, %v12535_v11 }
 0x3d6   :  { %v2618_v52 = vmul.f32 %v2602_v23, %v12534_v43 }
 0x3d7   :  { %v2091_v2 = vpop.permute.xlu1 %2090  ;;  %v2537_v29 = vpop.permute.xlu0 %2536  ;;  %2770 = vrot.lane.b32.xlu1 %v2729_v35, %s8333_s16  ;;  %2436 = vrot.lane.b32.xlu0 %v2394_v10, %s8330_s13  ;;  %v2919_v10 = vpack.c.bf16 %v2875_v50, %v2873_v48  ;;  %v12536_v50 = vld [vmem:[#allocation71_spill] sm:$0xff] }
 0x3d8   :  { %2133 = vst.msk [vmem:[#allocation3 + $0x50] sm:$0xff] %vm519_vm2, %v2091_v2 }
 0x3d9   :  { %2580 = vst.msk [vmem:[#allocation3 + $0x40] sm:$0xff] %vm1227_vm6, %v2537_v29 }
 0x3db   :  { %v2649_v58 = vpop.permute.xlu0 %2648  ;;  %v2203_v26 = vpop.permute.xlu1 %2202  ;;  %v2870_v40 = vld [vmem:[#allocation3 + $0x30] sm:$0xff]  ;;  %2102 = vrot.lane.b32.xlu1 %v2059_v37, %s8327_s10  ;;  %2548 = vrot.lane.b32.xlu0 %v2506_v24, %s8331_s14 }
 0x3dc   :  { %2692 = vst.msk [vmem:[#allocation3 + $0x40] sm:$0xff] %vm1404_vm7, %v2649_v58  ;;  %v2916_v2 = vpack.c.bf16 %v2870_v40, %v2868_v45  ;;  %v2714_v45 = vld [vmem:[#allocation2 + $0x61] sm:$0xff] }
 0x3dd   :  { %2245 = vst.msk [vmem:[#allocation3 + $0x50] sm:$0xff] %vm696_vm3, %v2203_v26  ;;  %v2730_v58 = vmul.f32 %v2714_v45, %v12536_v50  ;;  %v12537_v26 = vld [vmem:[#allocation93_spill] sm:$0xff] }
 0x3de   :  { %3004 = vmatmul.mubr.bf16.gmra.mrb[4].mxu1 %v2916_v2  ;;  %v2283_v37 = vmul.f32 %v2602_v23, %v12537_v26  ;;  %v12539_v23 = vld [vmem:[#allocation94_spill] sm:$0xff] }
 0x3df   :  { %v2761_v29 = vpop.permute.xlu0 %2760  ;;  %v2315_v35 = vpop.permute.xlu1 %2314  ;;  %7708 = vmatprep.mubr.msk.bf16.mxu1 %vm193_vm0, %v2919_v10  ;;  %2660 = vrot.lane.b32.xlu0 %v2618_v52, %s8332_s15 }
 0x3e0   :  { %2804 = vst.msk [vmem:[#allocation3 + $0x40] sm:$0xff] %vm1581_vm8, %v2761_v29  ;;  %2214 = vrot.lane.b32.xlu1 %v2171_v30, %s8328_s11 }
 0x3e1   :  { %2357 = vst.msk [vmem:[#allocation3 + $0x50] sm:$0xff] %vm873_vm4, %v2315_v35  ;;  %v2395_v35 = vmul.f32 %v2714_v45, %v12539_v23 }
 0x3e3   :  { %v2427_v40 = vpop.permute.xlu1 %2426  ;;  %v2093_v48 = vpop.permute.xlu0 %2092  ;;  %2772 = vrot.lane.b32.xlu0 %v2730_v58, %s8333_s16 }
 0x3e4   :  { %2469 = vst.msk [vmem:[#allocation3 + $0x50] sm:$0xff] %vm1050_vm5, %v2427_v40  ;;  %2326 = vrot.lane.b32.xlu1 %v2283_v37, %s8329_s12  ;;  %v2060_v40 = vmul.f32 %v2714_v45, %v12423_v16 }
 0x3e5   :  { %2134 = vst.msk [vmem:[#allocation3 + $0x60] sm:$0xff] %vm519_vm2, %v2093_v48  ;;  %v1891_v31 = vpop.f32.mrb[24].mxu0 }
 0x3e6   :  { %v1925_v24 = vmul.f32 %v9771_v57, %v1891_v31  ;;  %v1893_v52 = vpop.f32.mrb[25].mxu0 }
 0x3e7   :  { %v1894_v2 = vpop.f32.mrb[26].mxu0  ;;  %2104 = vrot.lane.b32.xlu0 %v2060_v40, %s8327_s10  ;;  %v12542_v40 = vld [vmem:[#allocation98_spill] sm:$0xff] }
 0x3e8   :  { %v10166_v30 = vadd.f32 %v9775_v44, %v1925_v24  ;;  %v1926_v10 = vmul.f32 %v9771_v57, %v1894_v2  ;;  %v1896_v29 = vpop.f32.mrb[27].mxu0  ;;  %2438 = vrot.lane.b32.xlu1 %v2395_v35, %s8330_s13  ;;  %v12541_v24 = vld [vmem:[#allocation62_spill] sm:$0xff] }
 0x3ea   :  { %12538 = vst [vmem:[#allocation97_spill] sm:$0xff] %v10166_v30  ;;  %v12200_v48 = vmax.f32 %v10166_v30, 0.0  ;;  %v10173_v31 = vadd.f32 %v9775_v44, %v1926_v10 }
 0x3ec   :  { %12540 = vst [vmem:[#allocation41_spill] sm:$0xff] %v10173_v31  ;;  %1980 = vst.msk [vmem:[#allocation2 + $0x69] sm:$0xff] %vm193_vm0, %v12200_v48  ;;  %v12199_v57 = vmax.f32 %v10173_v31, 0.0 }
 0x3ee   :  { %1981 = vst.msk [vmem:[#allocation2 + $0x71] sm:$0xff] %vm193_vm0, %v12199_v57 }
 0x3f2   :  { %v2539_v58 = vpop.permute.xlu1 %2538  ;;  %v2205_v37 = vpop.permute.xlu0 %2204 }
 0x3f3   :  { %v2491_v45 = vld [vmem:[#allocation2 + $0x62] sm:$0xff]  ;;  %2581 = vst.msk [vmem:[#allocation3 + $0x50] sm:$0xff] %vm1227_vm6, %v2539_v58  ;;  %v12543_v58 = vld [vmem:[#allocation140_spill] sm:$0xff] }
 0x3f4   :  { %v2507_v44 = vmul.f32 %v2491_v45, %v12541_v24  ;;  %v2172_v52 = vmul.f32 %v2491_v45, %v12425_v4  ;;  %v2603_v2 = vld [vmem:[#allocation2 + $0x68] sm:$0xff]  ;;  %2246 = vst.msk [vmem:[#allocation3 + $0x60] sm:$0xff] %vm696_vm3, %v2205_v37  ;;  %v2842_v35 = vmul.f32 %v2491_v45, %v9706_v53 }
 0x3f5   :  { %v2492_v10 = vld [vmem:[#allocation2 + $0x6a] sm:$0xff]  ;;  %v2619_v57 = vmul.f32 %v2603_v2, %v12542_v40  ;;  %v2284_v30 = vmul.f32 %v2603_v2, %v12428_v12  ;;  %v2013_v37 = vmul.f32 %v2603_v2, %v9714_v39  ;;  %v12544_v4 = vld [vmem:[#allocation138_spill] sm:$0xff] }
 0x3f6   :  { %v10188_v29 = vld [vmem:[#allocation2 + $0x70] sm:$0xff]  ;;  %2550 = vrot.lane.b32.xlu1 %v2507_v44, %s8331_s14  ;;  %2216 = vrot.lane.b32.xlu0 %v2172_v52, %s8328_s11  ;;  %2858 = vst.msk [vmem:[#allocation3 + $0xa8] sm:$0xff] %vm193_vm0, %v2842_v35  ;;  %v2651_v48 = vpop.permute.xlu1 %2650  ;;  %v2317_v31 = vpop.permute.xlu0 %2316  ;;  %v2843_v24 = vmul.f32 %v2492_v10, %v12543_v58  ;;  %v2872_v58 = vld [vmem:[#allocation3 + $0x40] sm:$0xff] }
 0x3f7   :  { %v2014_v23 = vmul.f32 %v10188_v29, %v12544_v4  ;;  %2693 = vst.msk [vmem:[#allocation3 + $0x50] sm:$0xff] %vm1404_vm7, %v2651_v48  ;;  %v2715_v45 = vld [vmem:[#allocation2 + $0x69] sm:$0xff]  ;;  %v2716_v40 = vld [vmem:[#allocation2 + $0x71] sm:$0xff] }
 0x3f8   :  { %2358 = vst.msk [vmem:[#allocation3 + $0x60] sm:$0xff] %vm873_vm4, %v2317_v31  ;;  %v12545_v2 = vld [vmem:[#allocation99_spill] sm:$0xff]  ;;  %v2396_v48 = vmul.f32 %v2715_v45, %v12429_v5  ;;  %v8312_v5 = vld [vmem:[%s9763_s28] ss:$0 sm:$0xff] }
 0x3f9   :  { %2859 = vst.msk [vmem:[#allocation3 + $0xb8] sm:$0xff] %vm193_vm0, %v2843_v24  ;;  %2029 = vst.msk [vmem:[#allocation3 + $0xd0] sm:$0xff] %vm193_vm0, %v2013_v37  ;;  %v2731_v35 = vmul.f32 %v2715_v45, %v12545_v2  ;;  %v2508_v24 = vmul.f32 %v2492_v10, %v12431_v59  ;;  %v8311_v2 = vld [vmem:[%s9757_s24] ss:$0 sm:$0xff] }
 0x3fa   :  { %2662 = vrot.lane.b32.xlu1 %v2619_v57, %s8332_s15  ;;  %2328 = vrot.lane.b32.xlu0 %v2284_v30, %s8329_s12  ;;  %2030 = vst.msk [vmem:[#allocation3 + $0xe0] sm:$0xff] %vm193_vm0, %v2014_v23  ;;  %v2763_v44 = vpop.permute.xlu1 %2762  ;;  %v2429_v52 = vpop.permute.xlu0 %2428  ;;  %v12546_v57 = vld [vmem:[#allocation15_spill] sm:$0xff] }
 0x3fb   :  { %2805 = vst.msk [vmem:[#allocation3 + $0x50] sm:$0xff] %vm1581_vm8, %v2763_v44  ;;  %v2061_v23 = vmul.f32 %v2715_v45, %v12546_v57 }
 0x3fc   :  { %2470 = vst.msk [vmem:[#allocation3 + $0x60] sm:$0xff] %vm1050_vm5, %v2429_v52 }
 0x3fe   :  { %2774 = vrot.lane.b32.xlu1 %v2731_v35, %s8333_s16  ;;  %2440 = vrot.lane.b32.xlu0 %v2396_v48, %s8330_s13  ;;  %v2095_v30 = vpop.permute.xlu1 %2094  ;;  %v2541_v31 = vpop.permute.xlu0 %2540  ;;  %v2879_v48 = vld [vmem:[#allocation3 + $0x78] sm:$0xff] }
 0x3ff   :  { %2135 = vst.msk [vmem:[#allocation3 + $0x70] sm:$0xff] %vm519_vm2, %v2095_v30  ;;  %v1899_v37 = vpop.f32.mrb[28].mxu0  ;;  %v2620_v30 = vmul.f32 %v10188_v29, %v12432_v46 }
 0x400   :  { %2582 = vst.msk [vmem:[#allocation3 + $0x60] sm:$0xff] %vm1227_vm6, %v2541_v31  ;;  %v1927_v44 = vmul.f32 %v8311_v2, %v1899_v37  ;;  %v1901_v52 = vpop.f32.mrb[29].mxu0  ;;  %v12548_v31 = vld [vmem:[#allocation105_spill] sm:$0xff] }
 0x401   :  { %v1902_v35 = vpop.f32.mrb[30].mxu0  ;;  %v2173_v39 = vmul.f32 %v2492_v10, %v12548_v31  ;;  %v2877_v52 = vld [vmem:[#allocation3 + $0x68] sm:$0xff] }
 0x402   :  { %2106 = vrot.lane.b32.xlu1 %v2061_v23, %s8327_s10  ;;  %2552 = vrot.lane.b32.xlu0 %v2508_v24, %s8331_s14  ;;  %v10221_v4 = vadd.f32 %v8312_v5, %v1927_v44  ;;  %v1928_v45 = vmul.f32 %v8311_v2, %v1902_v35  ;;  %v2653_v57 = vpop.permute.xlu0 %2652  ;;  %v2207_v59 = vpop.permute.xlu1 %2206  ;;  %v2874_v37 = vld [vmem:[#allocation3 + $0x50] sm:$0xff]  ;;  %v2921_v35 = vpack.c.bf16 %v2879_v48, %v2877_v52 }
 0x403   :  { %2694 = vst.msk [vmem:[#allocation3 + $0x60] sm:$0xff] %vm1404_vm7, %v2653_v57  ;;  %v1904_v23 = vpop.f32.mrb[31].mxu0  ;;  %v2918_v24 = vpack.c.bf16 %v2874_v37, %v2872_v58  ;;  %v12550_v57 = vld [vmem:[#allocation112_spill] sm:$0xff] }
 0x404   :  { %12547 = vst [vmem:[#allocation71_spill] sm:$0xff] %v10221_v4  ;;  %2247 = vst.msk [vmem:[#allocation3 + $0x70] sm:$0xff] %vm696_vm3, %v2207_v59  ;;  %v12209_v44 = vmax.f32 %v10221_v4, 0.0  ;;  %v10229_v2 = vadd.f32 %v8312_v5, %v1928_v45  ;;  %v2732_v37 = vmul.f32 %v2716_v40, %v12550_v57  ;;  %v12551_v5 = vld [vmem:[#allocation106_spill] sm:$0xff] }
 0x405   :  { %3012 = vmatmul.mubr.bf16.gmra.mrb[8].mxu1 %v2918_v24  ;;  %v2285_v45 = vmul.f32 %v10188_v29, %v12551_v5  ;;  %v12553_v24 = vld [vmem:[#allocation114_spill] sm:$0xff] }
 0x406   :  { %12549 = vst [vmem:[#allocation93_spill] sm:$0xff] %v10229_v2  ;;  %2664 = vrot.lane.b32.xlu0 %v2620_v30, %s8332_s15  ;;  %2218 = vrot.lane.b32.xlu1 %v2173_v39, %s8328_s11  ;;  %1982 = vst.msk [vmem:[#allocation2 + $0x79] sm:$0xff] %vm193_vm0, %v12209_v44  ;;  %v12208_v59 = vmax.f32 %v10229_v2, 0.0  ;;  %v2765_v10 = vpop.permute.xlu0 %2764  ;;  %v2319_v58 = vpop.permute.xlu1 %2318  ;;  %v12552_v30 = vld [vmem:[#allocation53_spill] sm:$0xff]  ;;  %v2062_v52 = vmul.f32 %v2716_v40, %v12553_v24 }
 0x407   :  { %7709 = vmatprep.mubr.msk.bf16.mxu1 %vm193_vm0, %v2921_v35  ;;  %2806 = vst.msk [vmem:[#allocation3 + $0x60] sm:$0xff] %vm1581_vm8, %v2765_v10  ;;  %v2397_v23 = vmul.f32 %v2716_v40, %v12552_v30  ;;  %v12554_v35 = vld [vmem:[#allocation110_spill] sm:$0xff] }
 0x408   :  { %2359 = vst.msk [vmem:[#allocation3 + $0x70] sm:$0xff] %vm873_vm4, %v2319_v58  ;;  %v12555_v58 = vld [vmem:[#allocation117_spill] sm:$0xff] }
 0x409   :  { %1983 = vst.msk [vmem:[#allocation2 + $0x81] sm:$0xff] %vm193_vm0, %v12208_v59 }
 0x40a   :  { %2776 = vrot.lane.b32.xlu0 %v2732_v37, %s8333_s16  ;;  %2330 = vrot.lane.b32.xlu1 %v2285_v45, %s8329_s12  ;;  %v2431_v39 = vpop.permute.xlu1 %2430  ;;  %v2097_v48 = vpop.permute.xlu0 %2096 }
 0x40b   :  { %2471 = vst.msk [vmem:[#allocation3 + $0x70] sm:$0xff] %vm1050_vm5, %v2431_v39 }
 0x40c   :  { %2136 = vst.msk [vmem:[#allocation3 + $0x80] sm:$0xff] %vm519_vm2, %v2097_v48  ;;  %v12556_v48 = vld [vmem:[#allocation119_spill] sm:$0xff] }
 0x40d   :  { %v2493_v29 = vld [vmem:[#allocation2 + $0x72] sm:$0xff] }
 0x40e   :  { %2442 = vrot.lane.b32.xlu1 %v2397_v23, %s8330_s13  ;;  %2108 = vrot.lane.b32.xlu0 %v2062_v52, %s8327_s10  ;;  %v2509_v10 = vmul.f32 %v2493_v29, %v12554_v35  ;;  %v2174_v37 = vmul.f32 %v2493_v29, %v12555_v58  ;;  %v2605_v45 = vld [vmem:[#allocation2 + $0x78] sm:$0xff]  ;;  %v2844_v44 = vmul.f32 %v2493_v29, %v9736_v62  ;;  %v12557_v52 = vld [vmem:[#allocation142_spill] sm:$0xff] }
 0x40f   :  { %v2621_v39 = vmul.f32 %v2605_v45, %v12434_v0  ;;  %v2286_v23 = vmul.f32 %v2605_v45, %v12556_v48  ;;  %v2015_v4 = vmul.f32 %v2605_v45, %v9744_v8  ;;  %v2717_v35 = vld [vmem:[#allocation2 + $0x79] sm:$0xff]  ;;  %v12558_v29 = vld [vmem:[#allocation54_spill] sm:$0xff]  ;;  %v12560_v8 = vld [vmem:[#allocation123_spill] sm:$0xff] }
 0x410   :  { %v2494_v59 = vld [vmem:[#allocation2 + $0x7a] sm:$0xff]  ;;  %v2495_v40 = vld [vmem:[#allocation2 + $0x82] sm:$0xff]  ;;  %2860 = vst.msk [vmem:[#allocation3 + $0xc8] sm:$0xff] %vm193_vm0, %v2844_v44  ;;  %v2733_v44 = vmul.f32 %v2717_v35, %v12436_v60 }
 0x411   :  { %v2845_v2 = vmul.f32 %v2494_v59, %v12557_v52  ;;  %v2846_v58 = vmul.f32 %v2495_v40, %v9765_v7  ;;  %2031 = vst.msk [vmem:[#allocation3 + $0xf0] sm:$0xff] %vm193_vm0, %v2015_v4  ;;  %v12559_v7 = vld [vmem:[#allocation115_spill] sm:$0xff]  ;;  %v2606_v4 = vld [vmem:[#allocation2 + $0x80] sm:$0xff] }
 0x412   :  { %2554 = vrot.lane.b32.xlu1 %v2509_v10, %s8331_s14  ;;  %2220 = vrot.lane.b32.xlu0 %v2174_v37, %s8328_s11  ;;  %v2398_v10 = vmul.f32 %v2717_v35, %v12558_v29 }
 0x413   :  { %2861 = vst.msk [vmem:[#allocation3 + $0xd8] sm:$0xff] %vm193_vm0, %v2845_v2  ;;  %2862 = vst.msk [vmem:[#allocation3 + $0xe8] sm:$0xff] %vm193_vm0, %v2846_v58 }
 0x416   :  { %2666 = vrot.lane.b32.xlu1 %v2621_v39, %s8332_s15  ;;  %2332 = vrot.lane.b32.xlu0 %v2286_v23, %s8329_s12  ;;  %v2063_v39 = vmul.f32 %v2717_v35, %v12559_v7  ;;  %v2510_v23 = vmul.f32 %v2494_v59, %v12560_v8  ;;  %v2718_v35 = vld [vmem:[#allocation2 + $0x81] sm:$0xff] }
 0x41a   :  { %2778 = vrot.lane.b32.xlu1 %v2733_v44, %s8333_s16  ;;  %2444 = vrot.lane.b32.xlu0 %v2398_v10, %s8330_s13  ;;  %v2543_v37 = vpop.permute.xlu1 %2542  ;;  %v2209_v45 = vpop.permute.xlu0 %2208  ;;  %v12561_v44 = vld [vmem:[#allocation125_spill] sm:$0xff]  ;;  %v12562_v10 = vld [vmem:[#allocation43_spill] sm:$0xff] }
 0x41b   :  { %2583 = vst.msk [vmem:[#allocation3 + $0x70] sm:$0xff] %vm1227_vm6, %v2543_v37  ;;  %v2622_v29 = vmul.f32 %v2606_v4, %v12561_v44  ;;  %v2175_v60 = vmul.f32 %v2494_v59, %v12562_v10  ;;  %v3186_v59 = vld [vmem:[#allocation2 + $0x1] sm:$0xff] }
 0x41c   :  { %2248 = vst.msk [vmem:[#allocation3 + $0x80] sm:$0xff] %vm696_vm3, %v2209_v45 }
 0x41e   :  { %2110 = vrot.lane.b32.xlu1 %v2063_v39, %s8327_s10  ;;  %2556 = vrot.lane.b32.xlu0 %v2510_v23, %s8331_s14  ;;  %v2655_v2 = vpop.permute.xlu1 %2654  ;;  %v2321_v58 = vpop.permute.xlu0 %2320  ;;  %v12563_v39 = vld [vmem:[#allocation76_spill] sm:$0xff] }
 0x41f   :  { %2695 = vst.msk [vmem:[#allocation3 + $0x70] sm:$0xff] %vm1404_vm7, %v2655_v2  ;;  %v2734_v7 = vmul.f32 %v2718_v35, %v12563_v39  ;;  %v12564_v23 = vld [vmem:[#allocation120_spill] sm:$0xff] }
 0x420   :  { %2360 = vst.msk [vmem:[#allocation3 + $0x80] sm:$0xff] %vm873_vm4, %v2321_v58  ;;  %v2287_v8 = vmul.f32 %v2606_v4, %v12564_v23  ;;  %v2883_v4 = vld [vmem:[#allocation3 + $0x98] sm:$0xff] }
 0x422   :  { %2668 = vrot.lane.b32.xlu0 %v2622_v29, %s8332_s15  ;;  %2222 = vrot.lane.b32.xlu1 %v2175_v60, %s8328_s11  ;;  %v2767_v37 = vpop.permute.xlu1 %2766  ;;  %v2433_v45 = vpop.permute.xlu0 %2432  ;;  %v12565_v29 = vld [vmem:[#allocation6_spill] sm:$0xff] }
 0x423   :  { %2807 = vst.msk [vmem:[#allocation3 + $0x70] sm:$0xff] %vm1581_vm8, %v2767_v37  ;;  %v3202_v10 = vmul.f32 %v3186_v59, %v12565_v29  ;;  %v12566_v60 = vld [vmem:[#allocation122_spill] sm:$0xff]  ;;  %v12570_v29 = vld [vmem:[#allocation8_spill] sm:$0xff] }
 0x424   :  { %2472 = vst.msk [vmem:[#allocation3 + $0x80] sm:$0xff] %vm1050_vm5, %v2433_v45  ;;  %v2399_v44 = vmul.f32 %v2718_v35, %v12566_v60  ;;  %v2881_v59 = vld [vmem:[#allocation3 + $0x88] sm:$0xff] }
 0x426   :  { %2780 = vrot.lane.b32.xlu0 %v2734_v7, %s8333_s16  ;;  %2334 = vrot.lane.b32.xlu1 %v2287_v8, %s8329_s12  ;;  %v2099_v2 = vpop.permute.xlu1 %2098  ;;  %v2545_v58 = vpop.permute.xlu0 %2544  ;;  %v12567_v7 = vld [vmem:[#allocation64_spill] sm:$0xff] }
 0x427   :  { %2137 = vst.msk [vmem:[#allocation3 + $0x90] sm:$0xff] %vm519_vm2, %v2099_v2  ;;  %v2511_v23 = vmul.f32 %v2495_v40, %v12567_v7  ;;  %v2876_v8 = vld [vmem:[#allocation3 + $0x60] sm:$0xff]  ;;  %v2607_v2 = vld [vmem:[#allocation2 + $0x88] sm:$0xff] }
 0x428   :  { %2584 = vst.msk [vmem:[#allocation3 + $0x80] sm:$0xff] %vm1227_vm6, %v2545_v58  ;;  %v2923_v58 = vpack.c.bf16 %v2883_v4, %v2881_v59  ;;  %v2623_v60 = vmul.f32 %v2607_v2, %v12445_v18  ;;  %v2719_v40 = vld [vmem:[#allocation2 + $0x89] sm:$0xff]  ;;  %v12569_v18 = vld [vmem:[#allocation5_spill] sm:$0xff] }
 0x42a   :  { %3234 = vrot.lane.b32.xlu0 %v3202_v10, %s8327_s10  ;;  %2446 = vrot.lane.b32.xlu1 %v2399_v44, %s8330_s13  ;;  %v2657_v37 = vpop.permute.xlu0 %2656  ;;  %v2211_v45 = vpop.permute.xlu1 %2210  ;;  %v2878_v39 = vld [vmem:[#allocation3 + $0x70] sm:$0xff] }
 0x42b   :  { %2696 = vst.msk [vmem:[#allocation3 + $0x80] sm:$0xff] %vm1404_vm7, %v2657_v37  ;;  %v2920_v35 = vpack.c.bf16 %v2878_v39, %v2876_v8 }
 0x42c   :  { %2249 = vst.msk [vmem:[#allocation3 + $0x90] sm:$0xff] %vm696_vm3, %v2211_v45  ;;  %v2735_v45 = vmul.f32 %v2719_v40, %v12446_v15 }
 0x42d   :  { %3020 = vmatmul.mubr.bf16.gmra.mrb[12].mxu1 %v2920_v35 }
 0x42e   :  { %2558 = vrot.lane.b32.xlu1 %v2511_v23, %s8331_s14  ;;  %v2769_v10 = vpop.permute.xlu0 %2768  ;;  %v2323_v44 = vpop.permute.xlu1 %2322  ;;  %7710 = vmatprep.mubr.msk.bf16.mxu1 %vm193_vm0, %v2923_v58 }
 0x42f   :  { %2808 = vst.msk [vmem:[#allocation3 + $0x80] sm:$0xff] %vm1581_vm8, %v2769_v10  ;;  %v2887_v10 = vld [vmem:[#allocation3 + $0xb8] sm:$0xff] }
 0x430   :  { %2361 = vst.msk [vmem:[#allocation3 + $0x90] sm:$0xff] %vm873_vm4, %v2323_v44 }
 0x432   :  { %2670 = vrot.lane.b32.xlu1 %v2623_v60, %s8332_s15  ;;  %v2435_v39 = vpop.permute.xlu1 %2434  ;;  %v2101_v37 = vpop.permute.xlu0 %2100 }
 0x433   :  { %2473 = vst.msk [vmem:[#allocation3 + $0x90] sm:$0xff] %vm1050_vm5, %v2435_v39 }
 0x434   :  { %2138 = vst.msk [vmem:[#allocation3 + $0xa0] sm:$0xff] %vm519_vm2, %v2101_v37 }
 0x436   :  { %2782 = vrot.lane.b32.xlu1 %v2735_v45, %s8333_s16  ;;  %v2880_v39 = vld [vmem:[#allocation3 + $0x80] sm:$0xff] }
 0x441   :  { %v2547_v23 = vpop.permute.xlu1 %2546  ;;  %v2213_v4 = vpop.permute.xlu0 %2212 }
 0x442   :  { %2585 = vst.msk [vmem:[#allocation3 + $0x90] sm:$0xff] %vm1227_vm6, %v2547_v23  ;;  %v2885_v23 = vld [vmem:[#allocation3 + $0xa8] sm:$0xff] }
 0x443   :  { %2250 = vst.msk [vmem:[#allocation3 + $0xa0] sm:$0xff] %vm696_vm3, %v2213_v4  ;;  %v2925_v4 = vpack.c.bf16 %v2887_v10, %v2885_v23  ;;  %v2891_v23 = vld [vmem:[#allocation3 + $0xd8] sm:$0xff] }
 0x445   :  { %v2659_v8 = vpop.permute.xlu1 %2658  ;;  %v2325_v35 = vpop.permute.xlu0 %2324 }
 0x446   :  { %2697 = vst.msk [vmem:[#allocation3 + $0x90] sm:$0xff] %vm1404_vm7, %v2659_v8 }
 0x447   :  { %2362 = vst.msk [vmem:[#allocation3 + $0xa0] sm:$0xff] %vm873_vm4, %v2325_v35 }
 0x449   :  { %v2771_v60 = vpop.permute.xlu1 %2770  ;;  %v2437_v59 = vpop.permute.xlu0 %2436 }
 0x44a   :  { %2809 = vst.msk [vmem:[#allocation3 + $0x90] sm:$0xff] %vm1581_vm8, %v2771_v60 }
 0x44b   :  { %2474 = vst.msk [vmem:[#allocation3 + $0xa0] sm:$0xff] %vm1050_vm5, %v2437_v59 }
 0x44d   :  { %v2103_v2 = vpop.permute.xlu1 %2102  ;;  %v2549_v58 = vpop.permute.xlu0 %2548 }
 0x44e   :  { %2139 = vst.msk [vmem:[#allocation3 + $0xb0] sm:$0xff] %vm519_vm2, %v2103_v2 }
 0x44f   :  { %2586 = vst.msk [vmem:[#allocation3 + $0xa0] sm:$0xff] %vm1227_vm6, %v2549_v58 }
 0x451   :  { %v2661_v44 = vpop.permute.xlu0 %2660  ;;  %v2882_v37 = vld [vmem:[#allocation3 + $0x90] sm:$0xff] }
 0x452   :  { %v2215_v40 = vpop.permute.xlu1 %2214  ;;  %2698 = vst.msk [vmem:[#allocation3 + $0xa0] sm:$0xff] %vm1404_vm7, %v2661_v44  ;;  %v2922_v45 = vpack.c.bf16 %v2882_v37, %v2880_v39 }
 0x453   :  { %2251 = vst.msk [vmem:[#allocation3 + $0xb0] sm:$0xff] %vm696_vm3, %v2215_v40 }
 0x454   :  { %3028 = vmatmul.mubr.bf16.gmra.mrb[16].mxu1 %v2922_v45 }
 0x455   :  { %v2773_v8 = vpop.permute.xlu0 %2772  ;;  %7711 = vmatprep.mubr.msk.bf16.mxu1 %vm193_vm0, %v2925_v4 }
 0x456   :  { %v2327_v35 = vpop.permute.xlu1 %2326  ;;  %2810 = vst.msk [vmem:[#allocation3 + $0xa0] sm:$0xff] %vm1581_vm8, %v2773_v8 }
 0x457   :  { %2363 = vst.msk [vmem:[#allocation3 + $0xb0] sm:$0xff] %vm873_vm4, %v2327_v35 }
 0x459   :  { %v2105_v59 = vpop.permute.xlu0 %2104 }
 0x45a   :  { %v2439_v60 = vpop.permute.xlu1 %2438  ;;  %2140 = vst.msk [vmem:[#allocation3 + $0xc0] sm:$0xff] %vm519_vm2, %v2105_v59 }
 0x45b   :  { %2475 = vst.msk [vmem:[#allocation3 + $0xb0] sm:$0xff] %vm1050_vm5, %v2439_v60 }
 0x45d   :  { %v2884_v35 = vld [vmem:[#allocation3 + $0xa0] sm:$0xff] }
 0x468   :  { %v2551_v2 = vpop.permute.xlu1 %2550  ;;  %v2217_v58 = vpop.permute.xlu0 %2216 }
 0x469   :  { %2587 = vst.msk [vmem:[#allocation3 + $0xb0] sm:$0xff] %vm1227_vm6, %v2551_v2  ;;  %v2889_v2 = vld [vmem:[#allocation3 + $0xc8] sm:$0xff] }
 0x46a   :  { %2252 = vst.msk [vmem:[#allocation3 + $0xc0] sm:$0xff] %vm696_vm3, %v2217_v58  ;;  %v2927_v58 = vpack.c.bf16 %v2891_v23, %v2889_v2 }
 0x46c   :  { %v2663_v10 = vpop.permute.xlu1 %2662  ;;  %v2329_v44 = vpop.permute.xlu0 %2328 }
 0x46d   :  { %2699 = vst.msk [vmem:[#allocation3 + $0xb0] sm:$0xff] %vm1404_vm7, %v2663_v10 }
 0x46e   :  { %2364 = vst.msk [vmem:[#allocation3 + $0xc0] sm:$0xff] %vm873_vm4, %v2329_v44 }
 0x470   :  { %v2775_v40 = vpop.permute.xlu1 %2774  ;;  %v2441_v39 = vpop.permute.xlu0 %2440 }
 0x471   :  { %2811 = vst.msk [vmem:[#allocation3 + $0xb0] sm:$0xff] %vm1581_vm8, %v2775_v40 }
 0x472   :  { %2476 = vst.msk [vmem:[#allocation3 + $0xc0] sm:$0xff] %vm1050_vm5, %v2441_v39 }
 0x474   :  { %v2107_v37 = vpop.permute.xlu1 %2106  ;;  %v2553_v45 = vpop.permute.xlu0 %2552 }
 0x475   :  { %2141 = vst.msk [vmem:[#allocation3 + $0xd0] sm:$0xff] %vm519_vm2, %v2107_v37 }
 0x476   :  { %2588 = vst.msk [vmem:[#allocation3 + $0xc0] sm:$0xff] %vm1227_vm6, %v2553_v45 }
 0x478   :  { %v2665_v4 = vpop.permute.xlu0 %2664  ;;  %v2219_v8 = vpop.permute.xlu1 %2218  ;;  %v2886_v60 = vld [vmem:[#allocation3 + $0xb0] sm:$0xff] }
 0x479   :  { %2700 = vst.msk [vmem:[#allocation3 + $0xc0] sm:$0xff] %vm1404_vm7, %v2665_v4  ;;  %v2924_v59 = vpack.c.bf16 %v2886_v60, %v2884_v35  ;;  %v10359_v60 = vld [vmem:[%s10349_s17] ss:$0 sm:$0xff] }
 0x47a   :  { %2253 = vst.msk [vmem:[#allocation3 + $0xd0] sm:$0xff] %vm696_vm3, %v2219_v8  ;;  %v10354_v8 = vld [vmem:[%s10342_s6] ss:$0 sm:$0xff] }
 0x47b   :  { %3036 = vmatmul.mubr.bf16.gmra.mrb[20].mxu1 %v2924_v59 }
 0x47c   :  { %v2777_v10 = vpop.permute.xlu0 %2776  ;;  %v2331_v44 = vpop.permute.xlu1 %2330  ;;  %7712 = vmatprep.mubr.msk.bf16.mxu1 %vm193_vm0, %v2927_v58 }
 0x47d   :  { %2812 = vst.msk [vmem:[#allocation3 + $0xc0] sm:$0xff] %vm1581_vm8, %v2777_v10 }
 0x47e   :  { %2365 = vst.msk [vmem:[#allocation3 + $0xd0] sm:$0xff] %vm873_vm4, %v2331_v44 }
 0x480   :  { %v2443_v40 = vpop.permute.xlu1 %2442  ;;  %v2109_v39 = vpop.permute.xlu0 %2108 }
 0x481   :  { %2477 = vst.msk [vmem:[#allocation3 + $0xd0] sm:$0xff] %vm1050_vm5, %v2443_v40 }
 0x482   :  { %2142 = vst.msk [vmem:[#allocation3 + $0xe0] sm:$0xff] %vm519_vm2, %v2109_v39 }
 0x484   :  { %v2555_v37 = vpop.permute.xlu1 %2554  ;;  %v2221_v45 = vpop.permute.xlu0 %2220 }
 0x485   :  { %2589 = vst.msk [vmem:[#allocation3 + $0xd0] sm:$0xff] %vm1227_vm6, %v2555_v37 }
 0x486   :  { %2254 = vst.msk [vmem:[#allocation3 + $0xe0] sm:$0xff] %vm696_vm3, %v2221_v45 }
 0x488   :  { %v2667_v23 = vpop.permute.xlu1 %2666  ;;  %v2333_v4 = vpop.permute.xlu0 %2332 }
 0x489   :  { %2701 = vst.msk [vmem:[#allocation3 + $0xd0] sm:$0xff] %vm1404_vm7, %v2667_v23  ;;  %v2997_v35 = vpop.f32.mrb[0].mxu1 }
 0x48a   :  { %2366 = vst.msk [vmem:[#allocation3 + $0xe0] sm:$0xff] %vm873_vm4, %v2333_v4  ;;  %v3067_v59 = vmul.f32 %v10354_v8, %v2997_v35  ;;  %v2999_v2 = vpop.f32.mrb[1].mxu1 }
 0x48b   :  { %v3000_v58 = vpop.f32.mrb[2].mxu1 }
 0x48c   :  { %v2779_v10 = vpop.permute.xlu1 %2778  ;;  %v3090_v44 = vadd.f32 %v10359_v60, %v3067_v59  ;;  %v3068_v40 = vmul.f32 %v10354_v8, %v3000_v58  ;;  %v2445_v39 = vpop.permute.xlu0 %2444  ;;  %v2893_v59 = vld [vmem:[#allocation3 + $0xe8] sm:$0xff] }
 0x48d   :  { %2813 = vst.msk [vmem:[#allocation3 + $0xd0] sm:$0xff] %vm1581_vm8, %v2779_v10  ;;  %v3002_v37 = vpop.f32.mrb[3].mxu1  ;;  %v2888_v10 = vld [vmem:[#allocation3 + $0xc0] sm:$0xff] }
 0x48e   :  { %2478 = vst.msk [vmem:[#allocation3 + $0xe0] sm:$0xff] %vm1050_vm5, %v2445_v39  ;;  %v3106_v45 = vmax.f32 %v3090_v44, 0.0  ;;  %v3091_v23 = vadd.f32 %v10359_v60, %v3068_v40  ;;  %v12568_v40 = vld [vmem:[#allocation124_spill] sm:$0xff] }
 0x48f   :  { %v2929_v39 = vpack.c.bf16 %v12568_v40, %v2893_v59 }
 0x490   :  { %v2111_v4 = vpop.permute.xlu1 %2110  ;;  %3122 = vst.msk [vmem:[#allocation2 + $0x9] sm:$0xff] %vm193_vm0, %v3106_v45  ;;  %v3107_v35 = vmax.f32 %v3091_v23, 0.0  ;;  %v2557_v2 = vpop.permute.xlu0 %2556 }
 0x491   :  { %2143 = vst.msk [vmem:[#allocation3 + $0xf0] sm:$0xff] %vm519_vm2, %v2111_v4 }
 0x492   :  { %2590 = vst.msk [vmem:[#allocation3 + $0xe0] sm:$0xff] %vm1227_vm6, %v2557_v2 }
 0x493   :  { %3123 = vst.msk [vmem:[#allocation2 + $0x11] sm:$0xff] %vm193_vm0, %v3107_v35 }
 0x494   :  { %v2223_v58 = vpop.permute.xlu1 %2222  ;;  %v2890_v37 = vld [vmem:[#allocation3 + $0xd0] sm:$0xff]  ;;  %v2669_v15 = vpop.permute.xlu0 %2668 }
 0x495   :  { %2255 = vst.msk [vmem:[#allocation3 + $0xf0] sm:$0xff] %vm696_vm3, %v2223_v58  ;;  %v2926_v44 = vpack.c.bf16 %v2890_v37, %v2888_v10  ;;  %v12571_v10 = vld [vmem:[#allocation73_spill] sm:$0xff] }
 0x496   :  { %2702 = vst.msk [vmem:[#allocation3 + $0xe0] sm:$0xff] %vm1404_vm7, %v2669_v15 }
 0x497   :  { %3044 = vmatmul.mubr.bf16.gmra.mrb[24].mxu1 %v2926_v44  ;;  %v3298_v23 = vld [vmem:[#allocation2 + $0x2] sm:$0xff] }
 0x498   :  { %7713 = vmatprep.mubr.msk.bf16.mxu1 %vm193_vm0, %v2929_v39  ;;  %v2335_v45 = vpop.permute.xlu1 %2334  ;;  %v3187_v4 = vld [vmem:[#allocation2 + $0x9] sm:$0xff]  ;;  %v2781_v35 = vpop.permute.xlu0 %2780  ;;  %v3314_v7 = vmul.f32 %v3298_v23, %v12569_v18  ;;  %v12573_v23 = vld [vmem:[#allocation134_spill] sm:$0xff] }
 0x499   :  { %v3410_v2 = vld [vmem:[#allocation2 + $0x8] sm:$0xff]  ;;  %2367 = vst.msk [vmem:[#allocation3 + $0xf0] sm:$0xff] %vm873_vm4, %v2335_v45  ;;  %v3203_v52 = vmul.f32 %v3187_v4, %v12570_v29 }
 0x49a   :  { %2814 = vst.msk [vmem:[#allocation3 + $0xe0] sm:$0xff] %vm1581_vm8, %v2781_v35  ;;  %v3299_v58 = vld [vmem:[#allocation2 + $0xa] sm:$0xff]  ;;  %v3155_v59 = vmul.f32 %v3410_v2, %v12571_v10  ;;  %3346 = vrot.lane.b32.xlu0 %v3314_v7, %s8328_s11  ;;  %v3426_v40 = vmul.f32 %v3410_v2, %v12457_v17  ;;  %v4050_v17 = vld [vmem:[%s10394_s21] sm:$0xff] }
 0x49b   :  { %v3411_v15 = vld [vmem:[#allocation2 + $0x10] sm:$0xff]  ;;  %3236 = vrot.lane.b32.xlu1 %v3203_v52, %s8327_s10  ;;  %v4051_v10 = vld [vmem:[%s10394_s21 + $0x8] sm:$0xff] }
 0x49c   :  { %v2447_v37 = vpop.permute.xlu1 %2446  ;;  %3171 = vst.msk [vmem:[#allocation3 + $0x10] sm:$0xff] %vm193_vm0, %v3155_v59  ;;  %v3235_v44 = vpop.permute.xlu0 %3234  ;;  %v12572_v39 = vld [vmem:[#allocation7_spill] sm:$0xff]  ;;  %v3156_v35 = vmul.f32 %v3411_v15, %v12573_v23  ;;  %v12574_v7 = vld [vmem:[#allocation12_spill] sm:$0xff]  ;;  %v12575_v59 = vld [vmem:[#allocation10_spill] sm:$0xff] }
 0x49d   :  { %2479 = vst.msk [vmem:[#allocation3 + $0xf0] sm:$0xff] %vm1050_vm5, %v2447_v37  ;;  %v3315_v45 = vmul.f32 %v3299_v58, %v12572_v39  ;;  %v3538_v2 = vmul.f32 %v3187_v4, %v12574_v7  ;;  %v3427_v37 = vmul.f32 %v3411_v15, %v12575_v59  ;;  %v12577_v23 = vld [vmem:[#allocation45_spill] sm:$0xff]  ;;  %v4084_v4 = vpack.c.bf16 %v4051_v10, %v4050_v17  ;;  %v4055_v10 = vld [vmem:[%s10394_s21 + $0x28] sm:$0xff] }
 0x49e   :  { %3282 = vst.msk [vmem:[#allocation3] sm:$0xff] %vm519_vm2, %v3235_v44  ;;  %3458 = vrot.lane.b32.xlu0 %v3426_v40, %s8329_s12  ;;  %v3523_v44 = vld [vmem:[#allocation2 + $0x11] sm:$0xff]  ;;  %v4054_v17 = vld [vmem:[%s10394_s21 + $0x20] sm:$0xff] }
 0x49f   :  { %3348 = vrot.lane.b32.xlu1 %v3315_v45, %s8328_s11  ;;  %3172 = vst.msk [vmem:[#allocation3 + $0x20] sm:$0xff] %vm193_vm0, %v3156_v35  ;;  %v12576_v45 = vld [vmem:[#allocation14_spill] sm:$0xff]  ;;  %v3539_v39 = vmul.f32 %v3523_v44, %v12577_v23  ;;  %4118 = vmatpush1.bf16.msra.mxu0 %v4084_v4  ;;  %v12579_v23 = vld [vmem:[#allocation20_spill] sm:$0xff]  ;;  %v12580_v4 = vld [vmem:[#allocation23_spill] sm:$0xff] }
 0x4a0   :  { %v2559_v52 = vpop.permute.xlu1 %2558  ;;  %v3650_v35 = vmul.f32 %v3299_v58, %v12576_v45  ;;  %4119 = vmatprep.subr.bf16.mxu0 %v12320_v56 }
 0x4a1   :  { %2591 = vst.msk [vmem:[#allocation3 + $0xf0] sm:$0xff] %vm1227_vm6, %v2559_v52  ;;  %v4052_v52 = vld [vmem:[%s10394_s21 + $0x10] sm:$0xff] }
 0x4a2   :  { %3570 = vrot.lane.b32.xlu0 %v3538_v2, %s8330_s13  ;;  %v4053_v2 = vld [vmem:[%s10394_s21 + $0x18] sm:$0xff] }
 0x4a3   :  { %3460 = vrot.lane.b32.xlu1 %v3427_v37, %s8329_s12  ;;  %v12578_v37 = vld [vmem:[#allocation26_spill] sm:$0xff]  ;;  %v4085_v58 = vpack.c.bf16 %v4053_v2, %v4052_v52  ;;  %v3204_v52 = vmul.f32 %v3523_v44, %v12580_v4 }
 0x4a4   :  { %v2671_v40 = vpop.permute.xlu1 %2670 }
 0x4a5   :  { %2703 = vst.msk [vmem:[#allocation3 + $0xf0] sm:$0xff] %vm1404_vm7, %v2671_v40  ;;  %v3762_v40 = vmul.f32 %v3411_v15, %v12578_v37  ;;  %4120 = vmatpush1.bf16.msra.mxu0 %v4085_v58  ;;  %v2892_v15 = vld [vmem:[#allocation3 + $0xe0] sm:$0xff] }
 0x4a6   :  { %3682 = vrot.lane.b32.xlu0 %v3650_v35, %s8331_s14  ;;  %v3874_v35 = vmul.f32 %v3523_v44, %v12579_v23  ;;  %4121 = vmatprep.subr.bf16.mxu0 %v12320_v56  ;;  %v4056_v23 = vld [vmem:[%s10394_s21 + $0x30] sm:$0xff]  ;;  %v4057_v58 = vld [vmem:[%s10394_s21 + $0x38] sm:$0xff] }
 0x4a7   :  { %3572 = vrot.lane.b32.xlu1 %v3539_v39, %s8330_s13  ;;  %v4086_v39 = vpack.c.bf16 %v4055_v10, %v4054_v17  ;;  %v4058_v17 = vld [vmem:[%s10394_s21 + $0x40] sm:$0xff]  ;;  %v4059_v10 = vld [vmem:[%s10394_s21 + $0x48] sm:$0xff] }
 0x4a8   :  { %v2783_v59 = vpop.permute.xlu1 %2782 }
 0x4a9   :  { %2815 = vst.msk [vmem:[#allocation3 + $0xf0] sm:$0xff] %vm1581_vm8, %v2783_v59  ;;  %4122 = vmatpush1.bf16.msra.mxu0 %v4086_v39 }
 0x4aa   :  { %3794 = vrot.lane.b32.xlu0 %v3762_v40, %s8332_s15  ;;  %4123 = vmatprep.subr.bf16.mxu0 %v12320_v56 }
 0x4ae   :  { %3906 = vrot.lane.b32.xlu0 %v3874_v35, %s8333_s16  ;;  %v4087_v35 = vpack.c.bf16 %v4057_v58, %v4056_v23  ;;  %v4063_v58 = vld [vmem:[%s10394_s21 + $0x68] sm:$0xff] }
 0x4b0   :  { %v2894_v59 = vld [vmem:[#allocation3 + $0xf0] sm:$0xff]  ;;  %4124 = vmatpush1.bf16.msra.mxu0 %v4087_v35 }
 0x4b1   :  { %v2928_v2 = vpack.c.bf16 %v2894_v59, %v2892_v15  ;;  %v3005_v40 = vpop.f32.mrb[4].mxu1  ;;  %v4088_v59 = vpack.c.bf16 %v4059_v10, %v4058_v17  ;;  %4125 = vmatprep.subr.bf16.mxu0 %v12320_v56  ;;  %v4064_v17 = vld [vmem:[%s10394_s21 + $0x70] sm:$0xff]  ;;  %v4065_v10 = vld [vmem:[%s10394_s21 + $0x78] sm:$0xff] }
 0x4b2   :  { %v3069_v37 = vmul.f32 %v10354_v8, %v3005_v40  ;;  %v3007_v45 = vpop.f32.mrb[5].mxu1  ;;  %3238 = vrot.lane.b32.xlu0 %v3204_v52, %s8327_s10  ;;  %v4061_v52 = vld [vmem:[%s10394_s21 + $0x58] sm:$0xff] }
 0x4b3   :  { %3052 = vmatmul.mubr.bf16.gmra.mrb[28].mxu1 %v2928_v2  ;;  %v3008_v7 = vpop.f32.mrb[6].mxu1  ;;  %v4060_v45 = vld [vmem:[%s10394_s21 + $0x50] sm:$0xff] }
 0x4b4   :  { %v3092_v44 = vadd.f32 %v10359_v60, %v3069_v37  ;;  %v3070_v39 = vmul.f32 %v10354_v8, %v3008_v7  ;;  %v3010_v15 = vpop.f32.mrb[7].mxu1  ;;  %4126 = vmatpush1.bf16.msra.mxu0 %v4088_v59  ;;  %v4089_v37 = vpack.c.bf16 %v4061_v52, %v4060_v45  ;;  %v4062_v7 = vld [vmem:[%s10394_s21 + $0x60] sm:$0xff]  ;;  %v4091_v52 = vpack.c.bf16 %v4065_v10, %v4064_v17 }
 0x4b5   :  { %4127 = vmatprep.subr.bf16.mxu0 %v12320_v56  ;;  %v4090_v35 = vpack.c.bf16 %v4063_v58, %v4062_v7  ;;  %v12581_v15 = vld [vmem:[#allocation16_spill] sm:$0xff]  ;;  %v4066_v7 = vld [vmem:[%s10394_s21 + $0x80] sm:$0xff]  ;;  %v4067_v58 = vld [vmem:[%s10394_s21 + $0x88] sm:$0xff]  ;;  %s7669_s21 = sld [smem:[%s11926_s0 + %s8327_s10]]  }
 0x4b6   :  { %v3108_v2 = vmax.f32 %v3092_v44, 0.0  ;;  %v3093_v23 = vadd.f32 %v10359_v60, %v3070_v39 }
 0x4b8   :  { %3124 = vst.msk [vmem:[#allocation2 + $0x19] sm:$0xff] %vm193_vm0, %v3108_v2  ;;  %v3109_v40 = vmax.f32 %v3093_v23, 0.0  ;;  %4128 = vmatpush1.bf16.msra.mxu0 %v4089_v37  ;;  %v12582_v23 = vld [vmem:[#allocation133_spill] sm:$0xff] }
 0x4b9   :  { %4129 = vmatprep.subr.bf16.mxu0 %v12320_v56 }
 0x4ba   :  { %3125 = vst.msk [vmem:[#allocation2 + $0x21] sm:$0xff] %vm193_vm0, %v3109_v40 }
 0x4bc   :  { %4130 = vmatpush1.bf16.msra.mxu0 %v4090_v35  ;;  %v12583_v35 = vld [vmem:[#allocation18_spill] sm:$0xff] }
 0x4bd   :  { %4131 = vmatprep.subr.bf16.mxu0 %v12320_v56 }
 0x4bf   :  { %v3300_v44 = vld [vmem:[#allocation2 + $0x12] sm:$0xff] }
 0x4c0   :  { %v3316_v39 = vmul.f32 %v3300_v44, %v12469_v34  ;;  %v3651_v59 = vmul.f32 %v3300_v44, %v12581_v15  ;;  %v3412_v45 = vld [vmem:[#allocation2 + $0x18] sm:$0xff]  ;;  %v3986_v40 = vmul.f32 %v3300_v44, %v12582_v23  ;;  %4132 = vmatpush1.bf16.msra.mxu0 %v4091_v52  ;;  %v4092_v44 = vpack.c.bf16 %v4067_v58, %v4066_v7 }
 0x4c1   :  { %v3971_v2 = vld [vmem:[#allocation2 + $0x1a] sm:$0xff]  ;;  %v3428_v34 = vmul.f32 %v3412_v45, %v12472_v41  ;;  %v3763_v17 = vmul.f32 %v3412_v45, %v12583_v35  ;;  %v3157_v10 = vmul.f32 %v3412_v45, %v9343_v55  ;;  %v12584_v23 = vld [vmem:[#allocation84_spill] sm:$0xff]  ;;  %4133 = vmatprep.subr.bf16.mxu0 %v12320_v56  ;;  %v12587_v45 = vmov 0.0  }
 0x4c2   :  { %v3748_v4 = vld [vmem:[#allocation2 + $0x20] sm:$0xff]  ;;  %3350 = vrot.lane.b32.xlu0 %v3316_v39, %s8328_s11  ;;  %3684 = vrot.lane.b32.xlu1 %v3651_v59, %s8331_s14  ;;  %v3987_v37 = vmul.f32 %v3971_v2, %v9441_v19  ;;  %4002 = vst.msk [vmem:[#allocation3 + $0x8] sm:$0xff] %vm193_vm0, %v3986_v40  ;;  %v12585_v59 = vld [vmem:[#allocation31_spill] sm:$0xff] }
 0x4c3   :  { %v3158_v39 = vmul.f32 %v3748_v4, %v12584_v23  ;;  %v3524_v15 = vld [vmem:[#allocation2 + $0x19] sm:$0xff]  ;;  %3173 = vst.msk [vmem:[#allocation3 + $0x30] sm:$0xff] %vm193_vm0, %v3157_v10  ;;  %v12588_v23 = vld [vmem:[#allocation56_spill] sm:$0xff] }
 0x4c4   :  { %4003 = vst.msk [vmem:[#allocation3 + $0x18] sm:$0xff] %vm193_vm0, %v3987_v37  ;;  %v3540_v40 = vmul.f32 %v3524_v15, %v12585_v59  ;;  %v12586_v37 = vld [vmem:[#allocation66_spill] sm:$0xff]  ;;  %4134 = vmatpush1.bf16.msra.mxu0 %v4092_v44  ;;  %v12589_v55 = vld [vmem:[#allocation25_spill] sm:$0xff] }
 0x4c5   :  { %3174 = vst.msk [vmem:[#allocation3 + $0x40] sm:$0xff] %vm193_vm0, %v3158_v39  ;;  %v3875_v52 = vmul.f32 %v3524_v15, %v12586_v37  ;;  %7862 = vmatprep.subr.bf16.mxu0 %v12587_v45  ;;  %v3205_v10 = vmul.f32 %v3524_v15, %v12589_v55  ;;  %v12590_v44 = vld [vmem:[#allocation37_spill] sm:$0xff]  ;;  %v12591_v45 = vld [vmem:[#allocation27_spill] sm:$0xff] }
 0x4c6   :  { %3462 = vrot.lane.b32.xlu0 %v3428_v34, %s8329_s12  ;;  %3796 = vrot.lane.b32.xlu1 %v3763_v17, %s8332_s15  ;;  %v3652_v17 = vmul.f32 %v3971_v2, %v12588_v23  ;;  %v3764_v39 = vmul.f32 %v3748_v4, %v12590_v44  ;;  %v3317_v59 = vmul.f32 %v3971_v2, %v12591_v45  ;;  %v12594_v15 = vld [vmem:[#allocation9_spill] sm:$0xff] }
 0x4c9   :  { %v4019_v7 = vld [vmem:[#allocation3 + $0x8] sm:$0xff] }
 0x4ca   :  { %3574 = vrot.lane.b32.xlu0 %v3540_v40, %s8330_s13  ;;  %3908 = vrot.lane.b32.xlu1 %v3875_v52, %s8333_s16  ;;  %v3860_v40 = vld [vmem:[#allocation2 + $0x21] sm:$0xff]  ;;  %v12592_v52 = vld [vmem:[#allocation40_spill] sm:$0xff] }
 0x4cb   :  { %v4021_v58 = vld [vmem:[#allocation3 + $0x18] sm:$0xff] }
 0x4cc   :  { %v4069_v34 = vpack.c.bf16 %v4021_v58, %v4019_v7  ;;  %v3876_v7 = vmul.f32 %v3860_v40, %v12592_v52  ;;  %v12593_v58 = vld [vmem:[#allocation19_spill] sm:$0xff] }
 0x4cd   :  { %v3429_v23 = vmul.f32 %v3748_v4, %v12593_v58 }
 0x4ce   :  { %7716 = vmatprep.mubr.msk.bf16.mxu0 %vm193_vm0, %v4069_v34  ;;  %3686 = vrot.lane.b32.xlu0 %v3652_v17, %s8331_s14  ;;  %v3206_v34 = vmul.f32 %v3860_v40, %v12594_v15 }
 0x4cf   :  { %3240 = vrot.lane.b32.xlu1 %v3205_v10, %s8327_s10  ;;  %v12595_v10 = vld [vmem:[#allocation33_spill] sm:$0xff] }
 0x4d0   :  { %v3541_v44 = vmul.f32 %v3860_v40, %v12595_v10 }
 0x4d2   :  { %3798 = vrot.lane.b32.xlu0 %v3764_v39, %s8332_s15 }
 0x4d3   :  { %3352 = vrot.lane.b32.xlu1 %v3317_v59, %s8328_s11 }
 0x4d6   :  { %3910 = vrot.lane.b32.xlu0 %v3876_v7, %s8333_s16 }
 0x4d7   :  { %3464 = vrot.lane.b32.xlu1 %v3429_v23, %s8329_s12 }
 0x4d8   :  { %v3013_v17 = vpop.f32.mrb[8].mxu1 }
 0x4d9   :  { %v3071_v2 = vmul.f32 %v10354_v8, %v3013_v17  ;;  %v3015_v45 = vpop.f32.mrb[9].mxu1 }
 0x4da   :  { %3242 = vrot.lane.b32.xlu0 %v3206_v34, %s8327_s10  ;;  %v3016_v59 = vpop.f32.mrb[10].mxu1  ;;  %v12596_v45 = vld [vmem:[#allocation46_spill] sm:$0xff]  ;;  %v12597_v34 = vld [vmem:[#allocation35_spill] sm:$0xff] }
 0x4db   :  { %3576 = vrot.lane.b32.xlu1 %v3541_v44, %s8330_s13  ;;  %v3094_v39 = vadd.f32 %v10359_v60, %v3071_v2  ;;  %v3072_v4 = vmul.f32 %v10354_v8, %v3016_v59  ;;  %v3018_v7 = vpop.f32.mrb[11].mxu1 }
 0x4dd   :  { %v3110_v52 = vmax.f32 %v3094_v39, 0.0  ;;  %v3095_v23 = vadd.f32 %v10359_v60, %v3072_v4  ;;  %v12599_v4 = vld [vmem:[#allocation137_spill] sm:$0xff] }
 0x4df   :  { %3126 = vst.msk [vmem:[#allocation2 + $0x29] sm:$0xff] %vm193_vm0, %v3110_v52  ;;  %v3111_v15 = vmax.f32 %v3095_v23, 0.0  ;;  %v12600_v23 = vld [vmem:[#allocation109_spill] sm:$0xff] }
 0x4e1   :  { %3127 = vst.msk [vmem:[#allocation2 + $0x31] sm:$0xff] %vm193_vm0, %v3111_v15  ;;  %v12598_v15 = vld [vmem:[#allocation136_spill] sm:$0xff] }
 0x4e6   :  { %v3302_v40 = vld [vmem:[#allocation2 + $0x22] sm:$0xff] }
 0x4e7   :  { %v3318_v17 = vmul.f32 %v3302_v40, %v12596_v45  ;;  %v3653_v10 = vmul.f32 %v3302_v40, %v12597_v34  ;;  %v3414_v44 = vld [vmem:[#allocation2 + $0x28] sm:$0xff]  ;;  %v3988_v2 = vmul.f32 %v3302_v40, %v9450_v63 }
 0x4e8   :  { %v3638_v58 = vld [vmem:[#allocation2 + $0x2a] sm:$0xff]  ;;  %v3430_v59 = vmul.f32 %v3414_v44, %v12489_v54  ;;  %v3765_v52 = vmul.f32 %v3414_v44, %v12488_v33  ;;  %v3159_v7 = vmul.f32 %v3414_v44, %v12599_v4 }
 0x4e9   :  { %v3750_v55 = vld [vmem:[#allocation2 + $0x30] sm:$0xff]  ;;  %3354 = vrot.lane.b32.xlu0 %v3318_v17, %s8328_s11  ;;  %3688 = vrot.lane.b32.xlu1 %v3653_v10, %s8331_s14  ;;  %4004 = vst.msk [vmem:[#allocation3 + $0x28] sm:$0xff] %vm193_vm0, %v3988_v2  ;;  %v3989_v39 = vmul.f32 %v3638_v58, %v12598_v15  ;;  %v12602_v17 = vld [vmem:[#allocation42_spill] sm:$0xff]  ;;  %v3654_v44 = vmul.f32 %v3638_v58, %v12494_v6 }
 0x4ea   :  { %v3160_v45 = vmul.f32 %v3750_v55, %v12600_v23  ;;  %v3526_v34 = vld [vmem:[#allocation2 + $0x29] sm:$0xff]  ;;  %3175 = vst.msk [vmem:[#allocation3 + $0x50] sm:$0xff] %vm193_vm0, %v3159_v7  ;;  %v12603_v23 = vld [vmem:[#allocation44_spill] sm:$0xff] }
 0x4eb   :  { %4005 = vst.msk [vmem:[#allocation3 + $0x38] sm:$0xff] %vm193_vm0, %v3989_v39  ;;  %v12601_v10 = vld [vmem:[#allocation47_spill] sm:$0xff]  ;;  %v3877_v2 = vmul.f32 %v3526_v34, %v12602_v17  ;;  %v3862_v7 = vld [vmem:[#allocation2 + $0x31] sm:$0xff] }
 0x4ec   :  { %3176 = vst.msk [vmem:[#allocation3 + $0x60] sm:$0xff] %vm193_vm0, %v3160_v45  ;;  %v3542_v40 = vmul.f32 %v3526_v34, %v12601_v10  ;;  %v3319_v45 = vmul.f32 %v3638_v58, %v12496_v22 }
 0x4ed   :  { %3466 = vrot.lane.b32.xlu0 %v3430_v59, %s8329_s12  ;;  %3800 = vrot.lane.b32.xlu1 %v3765_v52, %s8332_s15  ;;  %v3207_v59 = vmul.f32 %v3526_v34, %v12603_v23  ;;  %v12604_v52 = vld [vmem:[#allocation57_spill] sm:$0xff]  ;;  %v12607_v34 = vld [vmem:[#allocation63_spill] sm:$0xff] }
 0x4ee   :  { %v3766_v39 = vmul.f32 %v3750_v55, %v12604_v52 }
 0x4f1   :  { %3578 = vrot.lane.b32.xlu0 %v3542_v40, %s8330_s13  ;;  %3912 = vrot.lane.b32.xlu1 %v3877_v2, %s8333_s16  ;;  %v12605_v40 = vld [vmem:[#allocation68_spill] sm:$0xff]  ;;  %v12606_v2 = vld [vmem:[#allocation50_spill] sm:$0xff] }
 0x4f2   :  { %v3878_v10 = vmul.f32 %v3862_v7, %v12605_v40  ;;  %v3431_v17 = vmul.f32 %v3750_v55, %v12606_v2 }
 0x4f5   :  { %3690 = vrot.lane.b32.xlu0 %v3654_v44, %s8331_s14  ;;  %3244 = vrot.lane.b32.xlu1 %v3207_v59, %s8327_s10  ;;  %v3208_v44 = vmul.f32 %v3862_v7, %v12607_v34  ;;  %v12608_v59 = vld [vmem:[#allocation52_spill] sm:$0xff]  ;;  %v12609_v34 = vld [vmem:[#allocation65_spill] sm:$0xff] }
 0x4f6   :  { %v3543_v6 = vmul.f32 %v3862_v7, %v12608_v59 }
 0x4f9   :  { %3802 = vrot.lane.b32.xlu0 %v3766_v39, %s8332_s15  ;;  %3356 = vrot.lane.b32.xlu1 %v3319_v45, %s8328_s11 }
 0x4fd   :  { %3914 = vrot.lane.b32.xlu0 %v3878_v10, %s8333_s16  ;;  %3468 = vrot.lane.b32.xlu1 %v3431_v17, %s8329_s12 }
 0x500   :  { %v3021_v52 = vpop.f32.mrb[12].mxu1 }
 0x501   :  { %v3073_v58 = vmul.f32 %v10354_v8, %v3021_v52  ;;  %v3023_v22 = vpop.f32.mrb[13].mxu1  ;;  %3246 = vrot.lane.b32.xlu0 %v3208_v44, %s8327_s10  ;;  %3580 = vrot.lane.b32.xlu1 %v3543_v6, %s8330_s13 }
 0x502   :  { %v3024_v39 = vpop.f32.mrb[14].mxu1 }
 0x503   :  { %v3096_v45 = vadd.f32 %v10359_v60, %v3073_v58  ;;  %v3074_v55 = vmul.f32 %v10354_v8, %v3024_v39  ;;  %v3026_v10 = vpop.f32.mrb[15].mxu1 }
 0x504   :  { %v12610_v10 = vld [vmem:[#allocation58_spill] sm:$0xff] }
 0x505   :  { %v3112_v2 = vmax.f32 %v3096_v45, 0.0  ;;  %v3097_v17 = vadd.f32 %v10359_v60, %v3074_v55 }
 0x507   :  { %3128 = vst.msk [vmem:[#allocation2 + $0x39] sm:$0xff] %vm193_vm0, %v3112_v2  ;;  %v3113_v7 = vmax.f32 %v3097_v17, 0.0  ;;  %v12611_v17 = vld [vmem:[#allocation141_spill] sm:$0xff] }
 0x509   :  { %3129 = vst.msk [vmem:[#allocation2 + $0x41] sm:$0xff] %vm193_vm0, %v3113_v7 }
 0x50c   :  { %v3347_v52 = vpop.permute.xlu0 %3346 }
 0x50d   :  { %v3237_v22 = vpop.permute.xlu1 %3236  ;;  %3394 = vst.msk [vmem:[#allocation3] sm:$0xff] %vm696_vm3, %v3347_v52 }
 0x50e   :  { %3283 = vst.msk [vmem:[#allocation3 + $0x10] sm:$0xff] %vm519_vm2, %v3237_v22  ;;  %v3304_v6 = vld [vmem:[#allocation2 + $0x32] sm:$0xff] }
 0x50f   :  { %v3320_v39 = vmul.f32 %v3304_v6, %v12609_v34  ;;  %v3655_v45 = vmul.f32 %v3304_v6, %v12610_v10  ;;  %v3416_v59 = vld [vmem:[#allocation2 + $0x38] sm:$0xff]  ;;  %v3990_v7 = vmul.f32 %v3304_v6, %v12611_v17 }
 0x510   :  { %v3459_v44 = vpop.permute.xlu0 %3458  ;;  %v3640_v2 = vld [vmem:[#allocation2 + $0x3a] sm:$0xff]  ;;  %v3432_v52 = vmul.f32 %v3416_v59, %v12391_v61  ;;  %v3767_v10 = vmul.f32 %v3416_v59, %v12505_v28 }
 0x511   :  { %v3349_v58 = vpop.permute.xlu1 %3348  ;;  %3506 = vst.msk [vmem:[#allocation3] sm:$0xff] %vm873_vm4, %v3459_v44  ;;  %v3752_v55 = vld [vmem:[#allocation2 + $0x40] sm:$0xff]  ;;  %3358 = vrot.lane.b32.xlu0 %v3320_v39, %s8328_s11  ;;  %3692 = vrot.lane.b32.xlu1 %v3655_v45, %s8331_s14  ;;  %v3991_v44 = vmul.f32 %v3640_v2, %v9461_v20 }
 0x512   :  { %3395 = vst.msk [vmem:[#allocation3 + $0x10] sm:$0xff] %vm696_vm3, %v3349_v58  ;;  %v3161_v58 = vmul.f32 %v3416_v59, %v9522_v14  ;;  %v3162_v40 = vmul.f32 %v3752_v55, %v12506_v3  ;;  %v3528_v6 = vld [vmem:[#allocation2 + $0x39] sm:$0xff] }
 0x513   :  { %4006 = vst.msk [vmem:[#allocation3 + $0x48] sm:$0xff] %vm193_vm0, %v3990_v7  ;;  %4007 = vst.msk [vmem:[#allocation3 + $0x58] sm:$0xff] %vm193_vm0, %v3991_v44  ;;  %v3544_v59 = vmul.f32 %v3528_v6, %v12393_v36  ;;  %v12612_v7 = vld [vmem:[#allocation61_spill] sm:$0xff]  ;;  %v12614_v44 = vld [vmem:[#allocation30_spill] sm:$0xff] }
 0x514   :  { %v3571_v22 = vpop.permute.xlu0 %3570  ;;  %3177 = vst.msk [vmem:[#allocation3 + $0x70] sm:$0xff] %vm193_vm0, %v3161_v58  ;;  %3178 = vst.msk [vmem:[#allocation3 + $0x80] sm:$0xff] %vm193_vm0, %v3162_v40  ;;  %v3879_v3 = vmul.f32 %v3528_v6, %v12612_v7  ;;  %v3768_v58 = vmul.f32 %v3752_v55, %v12614_v44  ;;  %v12620_v44 = vld [vmem:[#allocation78_spill] sm:$0xff]  ;;  %v12624_v36 = vld [vmem:[#allocation127_spill] sm:$0xff] }
 0x515   :  { %v3461_v34 = vpop.permute.xlu1 %3460  ;;  %3618 = vst.msk [vmem:[#allocation3] sm:$0xff] %vm1050_vm5, %v3571_v22  ;;  %3470 = vrot.lane.b32.xlu0 %v3432_v52, %s8329_s12  ;;  %3804 = vrot.lane.b32.xlu1 %v3767_v10, %s8332_s15  ;;  %v3656_v10 = vmul.f32 %v3640_v2, %v12395_v32  ;;  %v12613_v52 = vld [vmem:[#allocation11_spill] sm:$0xff] }
 0x516   :  { %3507 = vst.msk [vmem:[#allocation3 + $0x10] sm:$0xff] %vm873_vm4, %v3461_v34  ;;  %v3209_v22 = vmul.f32 %v3528_v6, %v12613_v52  ;;  %v12616_v6 = vld [vmem:[#allocation80_spill] sm:$0xff] }
 0x518   :  { %v3683_v39 = vpop.permute.xlu0 %3682 }
 0x519   :  { %v3573_v45 = vpop.permute.xlu1 %3572  ;;  %3730 = vst.msk [vmem:[#allocation3] sm:$0xff] %vm1227_vm6, %v3683_v39  ;;  %3582 = vrot.lane.b32.xlu0 %v3544_v59, %s8330_s13  ;;  %3916 = vrot.lane.b32.xlu1 %v3879_v3, %s8333_s16  ;;  %v12615_v39 = vld [vmem:[#allocation67_spill] sm:$0xff]  ;;  %v3864_v59 = vld [vmem:[#allocation2 + $0x41] sm:$0xff] }
 0x51a   :  { %3619 = vst.msk [vmem:[#allocation3 + $0x10] sm:$0xff] %vm1050_vm5, %v3573_v45  ;;  %v3321_v45 = vmul.f32 %v3640_v2, %v12615_v39  ;;  %v3880_v32 = vmul.f32 %v3864_v59, %v12616_v6 }
 0x51c   :  { %v3795_v34 = vpop.permute.xlu0 %3794 }
 0x51d   :  { %3842 = vst.msk [vmem:[#allocation3] sm:$0xff] %vm1404_vm7, %v3795_v34  ;;  %3694 = vrot.lane.b32.xlu0 %v3656_v10, %s8331_s14  ;;  %3248 = vrot.lane.b32.xlu1 %v3209_v22, %s8327_s10  ;;  %v12617_v34 = vld [vmem:[#allocation69_spill] sm:$0xff] }
 0x51e   :  { %v3433_v52 = vmul.f32 %v3752_v55, %v12617_v34  ;;  %v12618_v10 = vld [vmem:[#allocation81_spill] sm:$0xff] }
 0x51f   :  { %v3210_v2 = vmul.f32 %v3864_v59, %v12618_v10  ;;  %v12619_v22 = vld [vmem:[#allocation49_spill] sm:$0xff] }
 0x520   :  { %v3907_v40 = vpop.permute.xlu0 %3906 }
 0x521   :  { %3954 = vst.msk [vmem:[#allocation3] sm:$0xff] %vm1581_vm8, %v3907_v40  ;;  %3806 = vrot.lane.b32.xlu0 %v3768_v58, %s8332_s15  ;;  %3360 = vrot.lane.b32.xlu1 %v3321_v45, %s8328_s11  ;;  %v3545_v40 = vmul.f32 %v3864_v59, %v12619_v22 }
 0x524   :  { %v3239_v3 = vpop.permute.xlu0 %3238 }
 0x525   :  { %3284 = vst.msk [vmem:[#allocation3 + $0x20] sm:$0xff] %vm519_vm2, %v3239_v3  ;;  %3918 = vrot.lane.b32.xlu0 %v3880_v32, %s8333_s16  ;;  %3472 = vrot.lane.b32.xlu1 %v3433_v52, %s8329_s12 }
 0x527   :  { %v3029_v58 = vpop.f32.mrb[16].mxu1 }
 0x528   :  { %v10576_v39 = vld [vmem:[#allocation3] sm:$0xff]  ;;  %v3075_v45 = vmul.f32 %v10354_v8, %v3029_v58  ;;  %v3031_v6 = vpop.f32.mrb[17].mxu1 }
 0x529   :  { %4340 = vst.msk [vmem:[#allocation3] sm:$0xff] %vm193_vm0, %v12620_v44  ;;  %3250 = vrot.lane.b32.xlu0 %v3210_v2, %s8327_s10  ;;  %3584 = vrot.lane.b32.xlu1 %v3545_v40, %s8330_s13  ;;  %v3032_v32 = vpop.f32.mrb[18].mxu1 }
 0x52a   :  { %v3098_v55 = vadd.f32 %v10359_v60, %v3075_v45  ;;  %v3076_v52 = vmul.f32 %v10354_v8, %v3032_v32  ;;  %v3034_v3 = vpop.f32.mrb[19].mxu1  ;;  %v12621_v45 = vld [vmem:[#allocation39_spill] sm:$0xff] }
 0x52b   :  { %v12622_v3 = vld [vmem:[#allocation77_spill] sm:$0xff] }
 0x52c   :  { %v3114_v59 = vmax.f32 %v3098_v55, 0.0  ;;  %v3099_v10 = vadd.f32 %v10359_v60, %v3076_v52 }
 0x52e   :  { %3130 = vst.msk [vmem:[#allocation2 + $0x49] sm:$0xff] %vm193_vm0, %v3114_v59  ;;  %v3115_v22 = vmax.f32 %v3099_v10, 0.0 }
 0x530   :  { %3131 = vst.msk [vmem:[#allocation2 + $0x51] sm:$0xff] %vm193_vm0, %v3115_v22 }
 0x534   :  { %v3351_v44 = vpop.permute.xlu0 %3350  ;;  %v3685_v6 = vpop.permute.xlu1 %3684 }
 0x535   :  { %3396 = vst.msk [vmem:[#allocation3 + $0x20] sm:$0xff] %vm696_vm3, %v3351_v44  ;;  %v3306_v2 = vld [vmem:[#allocation2 + $0x42] sm:$0xff] }
 0x536   :  { %3731 = vst.msk [vmem:[#allocation3 + $0x10] sm:$0xff] %vm1227_vm6, %v3685_v6  ;;  %v3322_v32 = vmul.f32 %v3306_v2, %v12621_v45  ;;  %v3657_v55 = vmul.f32 %v3306_v2, %v12622_v3  ;;  %v3418_v34 = vld [vmem:[#allocation2 + $0x48] sm:$0xff]  ;;  %v3992_v52 = vmul.f32 %v3306_v2, %v9577_v25  ;;  %v12623_v3 = vld [vmem:[#allocation96_spill] sm:$0xff] }
 0x537   :  { %v3642_v10 = vld [vmem:[#allocation2 + $0x4a] sm:$0xff]  ;;  %v3434_v59 = vmul.f32 %v3418_v34, %v8886_v1  ;;  %v3769_v45 = vmul.f32 %v3418_v34, %v12516_v13 }
 0x538   :  { %v3463_v40 = vpop.permute.xlu0 %3462  ;;  %v3797_v58 = vpop.permute.xlu1 %3796  ;;  %v3754_v22 = vld [vmem:[#allocation2 + $0x50] sm:$0xff]  ;;  %3362 = vrot.lane.b32.xlu0 %v3322_v32, %s8328_s11  ;;  %3696 = vrot.lane.b32.xlu1 %v3657_v55, %s8331_s14  ;;  %4008 = vst.msk [vmem:[#allocation3 + $0x68] sm:$0xff] %vm193_vm0, %v3992_v52  ;;  %v12625_v55 = vld [vmem:[#allocation85_spill] sm:$0xff]  ;;  %v12626_v52 = vld [vmem:[#allocation70_spill] sm:$0xff] }
 0x539   :  { %3508 = vst.msk [vmem:[#allocation3 + $0x20] sm:$0xff] %vm873_vm4, %v3463_v40  ;;  %v3993_v40 = vmul.f32 %v3642_v10, %v9468_v21  ;;  %v3164_v7 = vmul.f32 %v3754_v22, %v12624_v36  ;;  %v3530_v2 = vld [vmem:[#allocation2 + $0x49] sm:$0xff] }
 0x53a   :  { %3843 = vst.msk [vmem:[#allocation3 + $0x10] sm:$0xff] %vm1404_vm7, %v3797_v58  ;;  %v3163_v58 = vmul.f32 %v3418_v34, %v12623_v3  ;;  %v3546_v34 = vmul.f32 %v3530_v2, %v12625_v55  ;;  %v3881_v36 = vmul.f32 %v3530_v2, %v12626_v52 }
 0x53b   :  { %4009 = vst.msk [vmem:[#allocation3 + $0x78] sm:$0xff] %vm193_vm0, %v3993_v40  ;;  %3180 = vst.msk [vmem:[#allocation3 + $0xa0] sm:$0xff] %vm193_vm0, %v3164_v7  ;;  %v12627_v40 = vld [vmem:[#allocation82_spill] sm:$0xff] }
 0x53c   :  { %v3575_v44 = vpop.permute.xlu0 %3574  ;;  %v3909_v6 = vpop.permute.xlu1 %3908  ;;  %3474 = vrot.lane.b32.xlu0 %v3434_v59, %s8329_s12  ;;  %3808 = vrot.lane.b32.xlu1 %v3769_v45, %s8332_s15  ;;  %3179 = vst.msk [vmem:[#allocation3 + $0x90] sm:$0xff] %vm193_vm0, %v3163_v58  ;;  %v4025_v45 = vld [vmem:[#allocation3 + $0x38] sm:$0xff]  ;;  %v3211_v7 = vmul.f32 %v3530_v2, %v12627_v40  ;;  %v3770_v2 = vmul.f32 %v3754_v22, %v8924_v47 }
 0x53d   :  { %3620 = vst.msk [vmem:[#allocation3 + $0x20] sm:$0xff] %vm1050_vm5, %v3575_v44 }
 0x53e   :  { %3955 = vst.msk [vmem:[#allocation3 + $0x10] sm:$0xff] %vm1581_vm8, %v3909_v6  ;;  %v3658_v6 = vmul.f32 %v3642_v10, %v12520_v49 }
 0x540   :  { %v3687_v32 = vpop.permute.xlu0 %3686  ;;  %3586 = vrot.lane.b32.xlu0 %v3546_v34, %s8330_s13  ;;  %3920 = vrot.lane.b32.xlu1 %v3881_v36, %s8333_s16 }
 0x541   :  { %3732 = vst.msk [vmem:[#allocation3 + $0x20] sm:$0xff] %vm1227_vm6, %v3687_v32  ;;  %v3241_v44 = vpop.permute.xlu1 %3240  ;;  %v4023_v32 = vld [vmem:[#allocation3 + $0x28] sm:$0xff] }
 0x542   :  { %3285 = vst.msk [vmem:[#allocation3 + $0x30] sm:$0xff] %vm519_vm2, %v3241_v44  ;;  %v4071_v36 = vpack.c.bf16 %v4025_v45, %v4023_v32  ;;  %v3323_v44 = vmul.f32 %v3642_v10, %v12521_v27  ;;  %v3435_v45 = vmul.f32 %v3754_v22, %v12522_v38  ;;  %v12628_v22 = vld [vmem:[#allocation13_spill] sm:$0xff] }
 0x544   :  { %v3799_v59 = vpop.permute.xlu0 %3798  ;;  %3698 = vrot.lane.b32.xlu0 %v3658_v6, %s8331_s14  ;;  %3252 = vrot.lane.b32.xlu1 %v3211_v7, %s8327_s10 }
 0x545   :  { %v4020_v58 = vld [vmem:[#allocation3 + $0x10] sm:$0xff]  ;;  %3844 = vst.msk [vmem:[#allocation3 + $0x20] sm:$0xff] %vm1404_vm7, %v3799_v59  ;;  %v3353_v55 = vpop.permute.xlu1 %3352 }
 0x546   :  { %v4068_v52 = vpack.c.bf16 %v4020_v58, %v10576_v39  ;;  %3397 = vst.msk [vmem:[#allocation3 + $0x30] sm:$0xff] %vm696_vm3, %v3353_v55  ;;  %v3866_v39 = vld [vmem:[#allocation2 + $0x51] sm:$0xff] }
 0x548   :  { %4150 = vmatmul.mubr.bf16.vlgmr.msra.gmra.mrb[32].mxu0 %v4068_v52  ;;  %v3911_v34 = vpop.permute.xlu0 %3910  ;;  %3810 = vrot.lane.b32.xlu0 %v3770_v2, %s8332_s15  ;;  %v3882_v52 = vmul.f32 %v3866_v39, %v8933_v9  ;;  %v12635_v9 = vld [vmem:[#allocation135_spill] sm:$0xff] }
 0x549   :  { %7717 = vmatprep.mubr.msk.bf16.mxu0 %vm193_vm0, %v4071_v36  ;;  %3956 = vst.msk [vmem:[#allocation3 + $0x20] sm:$0xff] %vm1581_vm8, %v3911_v34  ;;  %v3465_v59 = vpop.permute.xlu1 %3464  ;;  %3364 = vrot.lane.b32.xlu1 %v3323_v44, %s8328_s11  ;;  %v3212_v44 = vmul.f32 %v3866_v39, %v12628_v22 }
 0x54a   :  { %3509 = vst.msk [vmem:[#allocation3 + $0x30] sm:$0xff] %vm873_vm4, %v3465_v59  ;;  %v12629_v59 = vld [vmem:[#allocation86_spill] sm:$0xff] }
 0x54c   :  { %v3243_v55 = vpop.permute.xlu0 %3242  ;;  %3922 = vrot.lane.b32.xlu0 %v3882_v52, %s8333_s16 }
 0x54d   :  { %3286 = vst.msk [vmem:[#allocation3 + $0x40] sm:$0xff] %vm519_vm2, %v3243_v55  ;;  %v3577_v6 = vpop.permute.xlu1 %3576  ;;  %3476 = vrot.lane.b32.xlu1 %v3435_v45, %s8329_s12  ;;  %v3547_v55 = vmul.f32 %v3866_v39, %v12629_v59 }
 0x54e   :  { %v3037_v7 = vpop.f32.mrb[20].mxu1  ;;  %3621 = vst.msk [vmem:[#allocation3 + $0x30] sm:$0xff] %vm1050_vm5, %v3577_v6 }
 0x54f   :  { %v3077_v10 = vmul.f32 %v10354_v8, %v3037_v7  ;;  %v3039_v58 = vpop.f32.mrb[21].mxu1 }
 0x550   :  { %v3040_v32 = vpop.f32.mrb[22].mxu1  ;;  %3254 = vrot.lane.b32.xlu0 %v3212_v44, %s8327_s10  ;;  %v12630_v58 = vld [vmem:[#allocation91_spill] sm:$0xff] }
 0x551   :  { %v3100_v36 = vadd.f32 %v10359_v60, %v3077_v10  ;;  %v3078_v34 = vmul.f32 %v10354_v8, %v3040_v32  ;;  %v3042_v2 = vpop.f32.mrb[23].mxu1  ;;  %3588 = vrot.lane.b32.xlu1 %v3547_v55, %s8330_s13 }
 0x552   :  { %v12631_v2 = vld [vmem:[#allocation87_spill] sm:$0xff] }
 0x553   :  { %v3116_v38 = vmax.f32 %v3100_v36, 0.0  ;;  %v3101_v6 = vadd.f32 %v10359_v60, %v3078_v34 }
 0x555   :  { %3132 = vst.msk [vmem:[#allocation2 + $0x59] sm:$0xff] %vm193_vm0, %v3116_v38  ;;  %v3117_v52 = vmax.f32 %v3101_v6, 0.0 }
 0x557   :  { %3133 = vst.msk [vmem:[#allocation2 + $0x61] sm:$0xff] %vm193_vm0, %v3117_v52  ;;  %v12632_v52 = vld [vmem:[#allocation32_spill] sm:$0xff] }
 0x55b   :  { %v3355_v7 = vpop.permute.xlu0 %3354  ;;  %v3689_v10 = vpop.permute.xlu1 %3688 }
 0x55c   :  { %v3308_v45 = vld [vmem:[#allocation2 + $0x52] sm:$0xff]  ;;  %3398 = vst.msk [vmem:[#allocation3 + $0x40] sm:$0xff] %vm696_vm3, %v3355_v7  ;;  %v12633_v7 = vld [vmem:[#allocation139_spill] sm:$0xff] }
 0x55d   :  { %v3324_v32 = vmul.f32 %v3308_v45, %v12630_v58  ;;  %v3659_v22 = vmul.f32 %v3308_v45, %v12631_v2  ;;  %v3420_v39 = vld [vmem:[#allocation2 + $0x58] sm:$0xff]  ;;  %3733 = vst.msk [vmem:[#allocation3 + $0x30] sm:$0xff] %vm1227_vm6, %v3689_v10  ;;  %v3994_v38 = vmul.f32 %v3308_v45, %v9651_v51 }
 0x55e   :  { %v3644_v36 = vld [vmem:[#allocation2 + $0x5a] sm:$0xff]  ;;  %v3436_v44 = vmul.f32 %v3420_v39, %v12527_v42  ;;  %v3771_v58 = vmul.f32 %v3420_v39, %v12632_v52 }
 0x55f   :  { %v10650_v34 = vld [vmem:[#allocation2 + $0x60] sm:$0xff]  ;;  %3366 = vrot.lane.b32.xlu0 %v3324_v32, %s8328_s11  ;;  %3700 = vrot.lane.b32.xlu1 %v3659_v22, %s8331_s14  ;;  %4010 = vst.msk [vmem:[#allocation3 + $0x88] sm:$0xff] %vm193_vm0, %v3994_v38  ;;  %v3467_v55 = vpop.permute.xlu0 %3466  ;;  %v3801_v6 = vpop.permute.xlu1 %3800  ;;  %v3995_v2 = vmul.f32 %v3644_v36, %v12633_v7 }
 0x560   :  { %v12634_v10 = vld [vmem:[#allocation121_spill] sm:$0xff]  ;;  %v3166_v27 = vmul.f32 %v10650_v34, %v12635_v9  ;;  %3510 = vst.msk [vmem:[#allocation3 + $0x40] sm:$0xff] %vm873_vm4, %v3467_v55  ;;  %v12639_v55 = vld [vmem:[#allocation90_spill] sm:$0xff] }
 0x561   :  { %v3165_v59 = vmul.f32 %v3420_v39, %v12634_v10  ;;  %3845 = vst.msk [vmem:[#allocation3 + $0x30] sm:$0xff] %vm1404_vm7, %v3801_v6  ;;  %v3532_v22 = vld [vmem:[#allocation2 + $0x59] sm:$0xff]  ;;  %v12636_v39 = vld [vmem:[#allocation51_spill] sm:$0xff]  ;;  %v3868_v7 = vld [vmem:[#allocation2 + $0x61] sm:$0xff] }
 0x562   :  { %4011 = vst.msk [vmem:[#allocation3 + $0x98] sm:$0xff] %vm193_vm0, %v3995_v2  ;;  %3182 = vst.msk [vmem:[#allocation3 + $0xc0] sm:$0xff] %vm193_vm0, %v3166_v27  ;;  %v3548_v38 = vmul.f32 %v3532_v22, %v12636_v39  ;;  %v12637_v9 = vld [vmem:[#allocation89_spill] sm:$0xff]  ;;  %v3213_v27 = vmul.f32 %v3532_v22, %v12639_v55 }
 0x563   :  { %3478 = vrot.lane.b32.xlu0 %v3436_v44, %s8329_s12  ;;  %3812 = vrot.lane.b32.xlu1 %v3771_v58, %s8332_s15  ;;  %3181 = vst.msk [vmem:[#allocation3 + $0xb0] sm:$0xff] %vm193_vm0, %v3165_v59  ;;  %v3579_v45 = vpop.permute.xlu0 %3578  ;;  %v3913_v32 = vpop.permute.xlu1 %3912  ;;  %v3883_v10 = vmul.f32 %v3532_v22, %v12637_v9  ;;  %v12638_v44 = vld [vmem:[#allocation95_spill] sm:$0xff]  ;;  %v4022_v55 = vld [vmem:[#allocation3 + $0x20] sm:$0xff] }
 0x564   :  { %3622 = vst.msk [vmem:[#allocation3 + $0x40] sm:$0xff] %vm1050_vm5, %v3579_v45  ;;  %v3660_v59 = vmul.f32 %v3644_v36, %v12638_v44 }
 0x565   :  { %3957 = vst.msk [vmem:[#allocation3 + $0x30] sm:$0xff] %vm1581_vm8, %v3913_v32 }
 0x567   :  { %3590 = vrot.lane.b32.xlu0 %v3548_v38, %s8330_s13  ;;  %3924 = vrot.lane.b32.xlu1 %v3883_v10, %s8333_s16  ;;  %v3691_v58 = vpop.permute.xlu0 %3690  ;;  %v3245_v2 = vpop.permute.xlu1 %3244  ;;  %v4029_v10 = vld [vmem:[#allocation3 + $0x58] sm:$0xff] }
 0x568   :  { %3734 = vst.msk [vmem:[#allocation3 + $0x40] sm:$0xff] %vm1227_vm6, %v3691_v58  ;;  %v3772_v58 = vmul.f32 %v10650_v34, %v12534_v43 }
 0x569   :  { %3287 = vst.msk [vmem:[#allocation3 + $0x50] sm:$0xff] %vm519_vm2, %v3245_v2  ;;  %v3325_v2 = vmul.f32 %v3644_v36, %v12535_v11 }
 0x56a   :  { %v3045_v6 = vpop.f32.mrb[24].mxu1 }
 0x56b   :  { %v3079_v39 = vmul.f32 %v10354_v8, %v3045_v6  ;;  %v3047_v45 = vpop.f32.mrb[25].mxu1  ;;  %3702 = vrot.lane.b32.xlu0 %v3660_v59, %s8331_s14  ;;  %3256 = vrot.lane.b32.xlu1 %v3213_v27, %s8327_s10  ;;  %v3803_v22 = vpop.permute.xlu0 %3802  ;;  %v4027_v27 = vld [vmem:[#allocation3 + $0x48] sm:$0xff] }
 0x56c   :  { %v3048_v32 = vpop.f32.mrb[26].mxu1  ;;  %v4024_v6 = vld [vmem:[#allocation3 + $0x30] sm:$0xff]  ;;  %3846 = vst.msk [vmem:[#allocation3 + $0x40] sm:$0xff] %vm1404_vm7, %v3803_v22  ;;  %v3357_v59 = vpop.permute.xlu1 %3356 }
 0x56d   :  { %v3102_v38 = vadd.f32 %v10359_v60, %v3079_v39  ;;  %v3080_v44 = vmul.f32 %v10354_v8, %v3048_v32  ;;  %v3050_v9 = vpop.f32.mrb[27].mxu1  ;;  %v4070_v45 = vpack.c.bf16 %v4024_v6, %v4022_v55  ;;  %3399 = vst.msk [vmem:[#allocation3 + $0x50] sm:$0xff] %vm696_vm3, %v3357_v59  ;;  %v3884_v55 = vmul.f32 %v3868_v7, %v12536_v50  ;;  %v12642_v6 = vld [vmem:[#allocation62_spill] sm:$0xff] }
 0x56e   :  { %v4073_v9 = vpack.c.bf16 %v4029_v10, %v4027_v27  ;;  %v3437_v32 = vmul.f32 %v10650_v34, %v12537_v26  ;;  %v12640_v10 = vld [vmem:[#allocation94_spill] sm:$0xff] }
 0x56f   :  { %v3118_v42 = vmax.f32 %v3102_v38, 0.0  ;;  %v3103_v39 = vadd.f32 %v10359_v60, %v3080_v44  ;;  %3814 = vrot.lane.b32.xlu0 %v3772_v58, %s8332_s15  ;;  %3368 = vrot.lane.b32.xlu1 %v3325_v2, %s8328_s11  ;;  %v3915_v36 = vpop.permute.xlu0 %3914  ;;  %v3214_v44 = vmul.f32 %v3868_v7, %v12423_v16  ;;  %v3549_v38 = vmul.f32 %v3868_v7, %v12640_v10  ;;  %v12641_v58 = vld [vmem:[#allocation104_spill] sm:$0xff] }
 0x570   :  { %4158 = vmatmul.mubr.bf16.gmra.mrb[36].mxu0 %v4070_v45  ;;  %3958 = vst.msk [vmem:[#allocation3 + $0x40] sm:$0xff] %vm1581_vm8, %v3915_v36  ;;  %v3469_v60 = vpop.permute.xlu1 %3468 }
 0x571   :  { %3134 = vst.msk [vmem:[#allocation2 + $0x69] sm:$0xff] %vm193_vm0, %v3118_v42  ;;  %v3119_v8 = vmax.f32 %v3103_v39, 0.0  ;;  %7718 = vmatprep.mubr.msk.bf16.mxu0 %vm193_vm0, %v4073_v9 }
 0x572   :  { %3511 = vst.msk [vmem:[#allocation3 + $0x50] sm:$0xff] %vm873_vm4, %v3469_v60  ;;  %v12645_v60 = vld [vmem:[#allocation118_spill] sm:$0xff] }
 0x573   :  { %3135 = vst.msk [vmem:[#allocation2 + $0x71] sm:$0xff] %vm193_vm0, %v3119_v8  ;;  %3926 = vrot.lane.b32.xlu0 %v3884_v55, %s8333_s16  ;;  %3480 = vrot.lane.b32.xlu1 %v3437_v32, %s8329_s12  ;;  %v3247_v42 = vpop.permute.xlu0 %3246  ;;  %v12643_v8 = vld [vmem:[#allocation98_spill] sm:$0xff]  ;;  %v12644_v55 = vld [vmem:[#allocation140_spill] sm:$0xff] }
 0x574   :  { %3288 = vst.msk [vmem:[#allocation3 + $0x60] sm:$0xff] %vm519_vm2, %v3247_v42  ;;  %v3581_v22 = vpop.permute.xlu1 %3580 }
 0x575   :  { %3623 = vst.msk [vmem:[#allocation3 + $0x50] sm:$0xff] %vm1050_vm5, %v3581_v22 }
 0x577   :  { %3258 = vrot.lane.b32.xlu0 %v3214_v44, %s8327_s10  ;;  %3592 = vrot.lane.b32.xlu1 %v3549_v38, %s8330_s13  ;;  %v12646_v44 = vld [vmem:[#allocation138_spill] sm:$0xff] }
 0x578   :  { %v3310_v34 = vld [vmem:[#allocation2 + $0x62] sm:$0xff] }
 0x579   :  { %v3326_v2 = vmul.f32 %v3310_v34, %v12641_v58  ;;  %v3661_v59 = vmul.f32 %v3310_v34, %v12642_v6  ;;  %v3422_v45 = vld [vmem:[#allocation2 + $0x68] sm:$0xff]  ;;  %v3996_v9 = vmul.f32 %v3310_v34, %v9706_v53 }
 0x57a   :  { %v3646_v27 = vld [vmem:[#allocation2 + $0x6a] sm:$0xff]  ;;  %v3438_v7 = vmul.f32 %v3422_v45, %v12428_v12  ;;  %v3773_v36 = vmul.f32 %v3422_v45, %v12643_v8  ;;  %v3167_v42 = vmul.f32 %v3422_v45, %v12645_v60 }
 0x57b   :  { %v3758_v39 = vld [vmem:[#allocation2 + $0x70] sm:$0xff]  ;;  %3370 = vrot.lane.b32.xlu0 %v3326_v2, %s8328_s11  ;;  %3704 = vrot.lane.b32.xlu1 %v3661_v59, %s8331_s14  ;;  %4012 = vst.msk [vmem:[#allocation3 + $0xa8] sm:$0xff] %vm193_vm0, %v3996_v9  ;;  %v3997_v32 = vmul.f32 %v3646_v27, %v12644_v55 }
 0x57c   :  { %v3168_v38 = vmul.f32 %v3758_v39, %v12646_v44  ;;  %v3534_v22 = vld [vmem:[#allocation2 + $0x69] sm:$0xff]  ;;  %3183 = vst.msk [vmem:[#allocation3 + $0xd0] sm:$0xff] %vm193_vm0, %v3167_v42  ;;  %v12649_v44 = vld [vmem:[#allocation108_spill] sm:$0xff]  ;;  %v8313_v42 = vld [vmem:[%s10342_s6] ss:$0 sm:$0xff] }
 0x57d   :  { %4013 = vst.msk [vmem:[#allocation3 + $0xb8] sm:$0xff] %vm193_vm0, %v3997_v32  ;;  %v12647_v34 = vld [vmem:[#allocation107_spill] sm:$0xff]  ;;  %v3662_v55 = vmul.f32 %v3646_v27, %v12649_v44 }
 0x57e   :  { %3184 = vst.msk [vmem:[#allocation3 + $0xe0] sm:$0xff] %vm193_vm0, %v3168_v38  ;;  %v3550_v2 = vmul.f32 %v3534_v22, %v12647_v34  ;;  %v12648_v59 = vld [vmem:[#allocation99_spill] sm:$0xff] }
 0x57f   :  { %3482 = vrot.lane.b32.xlu0 %v3438_v7, %s8329_s12  ;;  %3816 = vrot.lane.b32.xlu1 %v3773_v36, %s8332_s15  ;;  %v3885_v9 = vmul.f32 %v3534_v22, %v12648_v59  ;;  %v12650_v36 = vld [vmem:[#allocation15_spill] sm:$0xff] }
 0x580   :  { %v3215_v12 = vmul.f32 %v3534_v22, %v12650_v36  ;;  %v3774_v22 = vmul.f32 %v3758_v39, %v12432_v46  ;;  %v3870_v36 = vld [vmem:[#allocation2 + $0x71] sm:$0xff] }
 0x583   :  { %3594 = vrot.lane.b32.xlu0 %v3550_v2, %s8330_s13  ;;  %3928 = vrot.lane.b32.xlu1 %v3885_v9, %s8333_s16  ;;  %v3359_v45 = vpop.permute.xlu0 %3358  ;;  %v3693_v7 = vpop.permute.xlu1 %3692  ;;  %v8314_v9 = vld [vmem:[%s10349_s17] ss:$0 sm:$0xff] }
 0x584   :  { %3400 = vst.msk [vmem:[#allocation3 + $0x60] sm:$0xff] %vm696_vm3, %v3359_v45  ;;  %v3327_v45 = vmul.f32 %v3646_v27, %v12548_v31  ;;  %v3439_v27 = vmul.f32 %v3758_v39, %v12551_v5 }
 0x585   :  { %3735 = vst.msk [vmem:[#allocation3 + $0x50] sm:$0xff] %vm1227_vm6, %v3693_v7 }
 0x586   :  { %v3053_v32 = vpop.f32.mrb[28].mxu1 }
 0x587   :  { %v3081_v38 = vmul.f32 %v8313_v42, %v3053_v32  ;;  %3706 = vrot.lane.b32.xlu0 %v3662_v55, %s8331_s14  ;;  %3260 = vrot.lane.b32.xlu1 %v3215_v12, %s8327_s10  ;;  %v3055_v2 = vpop.f32.mrb[29].mxu1  ;;  %v3471_v60 = vpop.permute.xlu0 %3470 }
 0x588   :  { %v3056_v34 = vpop.f32.mrb[30].mxu1  ;;  %3512 = vst.msk [vmem:[#allocation3 + $0x60] sm:$0xff] %vm873_vm4, %v3471_v60  ;;  %v3805_v7 = vpop.permute.xlu1 %3804 }
 0x589   :  { %v3104_v59 = vadd.f32 %v8314_v9, %v3081_v38  ;;  %v3082_v8 = vmul.f32 %v8313_v42, %v3056_v34  ;;  %v3058_v44 = vpop.f32.mrb[31].mxu1  ;;  %3847 = vst.msk [vmem:[#allocation3 + $0x50] sm:$0xff] %vm1404_vm7, %v3805_v7  ;;  %v3216_v34 = vmul.f32 %v3870_v36, %v12553_v24  ;;  %v12651_v38 = vld [vmem:[#allocation110_spill] sm:$0xff]  ;;  %v4033_v7 = vld [vmem:[#allocation3 + $0x78] sm:$0xff] }
 0x58a   :  { %v3886_v44 = vmul.f32 %v3870_v36, %v12550_v57 }
 0x58b   :  { %v3120_v32 = vmax.f32 %v3104_v59, 0.0  ;;  %v3105_v53 = vadd.f32 %v8314_v9, %v3082_v8  ;;  %3818 = vrot.lane.b32.xlu0 %v3774_v22, %s8332_s15  ;;  %3372 = vrot.lane.b32.xlu1 %v3327_v45, %s8328_s11  ;;  %v3583_v55 = vpop.permute.xlu0 %3582  ;;  %v12652_v9 = vld [vmem:[#allocation117_spill] sm:$0xff] }
 0x58c   :  { %3624 = vst.msk [vmem:[#allocation3 + $0x60] sm:$0xff] %vm1050_vm5, %v3583_v55  ;;  %v3917_v60 = vpop.permute.xlu1 %3916  ;;  %v4026_v45 = vld [vmem:[#allocation3 + $0x40] sm:$0xff] }
 0x58d   :  { %3136 = vst.msk [vmem:[#allocation2 + $0x79] sm:$0xff] %vm193_vm0, %v3120_v32  ;;  %v3121_v12 = vmax.f32 %v3105_v53, 0.0  ;;  %v3551_v53 = vmul.f32 %v3870_v36, %v12552_v30 }
 0x58e   :  { %3959 = vst.msk [vmem:[#allocation3 + $0x50] sm:$0xff] %vm1581_vm8, %v3917_v60  ;;  %v4031_v60 = vld [vmem:[#allocation3 + $0x68] sm:$0xff] }
 0x58f   :  { %3137 = vst.msk [vmem:[#allocation2 + $0x81] sm:$0xff] %vm193_vm0, %v3121_v12  ;;  %3930 = vrot.lane.b32.xlu0 %v3886_v44, %s8333_s16  ;;  %3484 = vrot.lane.b32.xlu1 %v3439_v27, %s8329_s12  ;;  %v3695_v8 = vpop.permute.xlu0 %3694 }
 0x590   :  { %3736 = vst.msk [vmem:[#allocation3 + $0x60] sm:$0xff] %vm1227_vm6, %v3695_v8  ;;  %v3249_v59 = vpop.permute.xlu1 %3248 }
 0x591   :  { %3289 = vst.msk [vmem:[#allocation3 + $0x70] sm:$0xff] %vm519_vm2, %v3249_v59 }
 0x593   :  { %3262 = vrot.lane.b32.xlu0 %v3216_v34, %s8327_s10  ;;  %3596 = vrot.lane.b32.xlu1 %v3551_v53, %s8330_s13  ;;  %v3807_v42 = vpop.permute.xlu0 %3806  ;;  %v4075_v34 = vpack.c.bf16 %v4033_v7, %v4031_v60 }
 0x594   :  { %v3647_v39 = vld [vmem:[#allocation2 + $0x72] sm:$0xff]  ;;  %3848 = vst.msk [vmem:[#allocation3 + $0x60] sm:$0xff] %vm1404_vm7, %v3807_v42  ;;  %v3361_v36 = vpop.permute.xlu1 %3360 }
 0x595   :  { %v3663_v2 = vmul.f32 %v3647_v39, %v12651_v38  ;;  %v3328_v22 = vmul.f32 %v3647_v39, %v12652_v9  ;;  %v4028_v32 = vld [vmem:[#allocation3 + $0x50] sm:$0xff]  ;;  %v3759_v12 = vld [vmem:[#allocation2 + $0x78] sm:$0xff]  ;;  %v3998_v44 = vmul.f32 %v3647_v39, %v9736_v62  ;;  %3401 = vst.msk [vmem:[#allocation3 + $0x70] sm:$0xff] %vm696_vm3, %v3361_v36 }
 0x596   :  { %v3648_v55 = vld [vmem:[#allocation2 + $0x7a] sm:$0xff]  ;;  %v4072_v27 = vpack.c.bf16 %v4028_v32, %v4026_v45  ;;  %v3649_v8 = vld [vmem:[#allocation2 + $0x82] sm:$0xff]  ;;  %v3775_v59 = vmul.f32 %v3759_v12, %v12434_v0  ;;  %v3440_v42 = vmul.f32 %v3759_v12, %v12556_v48 }
 0x597   :  { %3708 = vrot.lane.b32.xlu1 %v3663_v2, %s8331_s14  ;;  %3374 = vrot.lane.b32.xlu0 %v3328_v22, %s8328_s11  ;;  %4014 = vst.msk [vmem:[#allocation3 + $0xc8] sm:$0xff] %vm193_vm0, %v3998_v44  ;;  %v3919_v53 = vpop.permute.xlu0 %3918  ;;  %v12653_v9 = vld [vmem:[#allocation142_spill] sm:$0xff]  ;;  %v12654_v62 = vld [vmem:[#allocation103_spill] sm:$0xff]  ;;  %v3871_v22 = vld [vmem:[#allocation2 + $0x79] sm:$0xff] }
 0x598   :  { %4166 = vmatmul.mubr.bf16.gmra.mrb[40].mxu0 %v4072_v27  ;;  %v3999_v39 = vmul.f32 %v3648_v55, %v12653_v9  ;;  %v3169_v36 = vmul.f32 %v3759_v12, %v12654_v62  ;;  %3960 = vst.msk [vmem:[#allocation3 + $0x60] sm:$0xff] %vm1581_vm8, %v3919_v53  ;;  %v3473_v2 = vpop.permute.xlu1 %3472  ;;  %v12655_v45 = vld [vmem:[#allocation113_spill] sm:$0xff]  ;;  %v12656_v12 = vld [vmem:[#allocation74_spill] sm:$0xff]  ;;  %v12658_v53 = vld [vmem:[#allocation123_spill] sm:$0xff] }
 0x599   :  { %7719 = vmatprep.mubr.msk.bf16.mxu0 %vm193_vm0, %v4075_v34  ;;  %v4000_v7 = vmul.f32 %v3649_v8, %v12655_v45  ;;  %3513 = vst.msk [vmem:[#allocation3 + $0x70] sm:$0xff] %vm873_vm4, %v3473_v2  ;;  %v3887_v44 = vmul.f32 %v3871_v22, %v12656_v12  ;;  %v12657_v27 = vld [vmem:[#allocation54_spill] sm:$0xff]  ;;  %v12660_v2 = vld [vmem:[#allocation125_spill] sm:$0xff]  ;;  %v5230_v62 = vld [vmem:[%s10910_s3 + $0x50] sm:$0xff] }
 0x59a   :  { %4015 = vst.msk [vmem:[#allocation3 + $0xd8] sm:$0xff] %vm193_vm0, %v3999_v39  ;;  %3185 = vst.msk [vmem:[#allocation3 + $0xf0] sm:$0xff] %vm193_vm0, %v3169_v36  ;;  %v3552_v60 = vmul.f32 %v3871_v22, %v12657_v27  ;;  %v3760_v36 = vld [vmem:[#allocation2 + $0x80] sm:$0xff]  ;;  %v12661_v27 = vld [vmem:[#allocation43_spill] sm:$0xff] }
 0x59b   :  { %3820 = vrot.lane.b32.xlu1 %v3775_v59, %s8332_s15  ;;  %3486 = vrot.lane.b32.xlu0 %v3440_v42, %s8329_s12  ;;  %4016 = vst.msk [vmem:[#allocation3 + $0xe8] sm:$0xff] %vm193_vm0, %v4000_v7  ;;  %v3251_v32 = vpop.permute.xlu0 %3250  ;;  %v3664_v59 = vmul.f32 %v3648_v55, %v12658_v53  ;;  %v12659_v42 = vld [vmem:[#allocation115_spill] sm:$0xff]  ;;  %v3776_v7 = vmul.f32 %v3760_v36, %v12660_v2  ;;  %v3872_v12 = vld [vmem:[#allocation2 + $0x81] sm:$0xff] }
 0x59c   :  { %3290 = vst.msk [vmem:[#allocation3 + $0x80] sm:$0xff] %vm519_vm2, %v3251_v32  ;;  %v3585_v34 = vpop.permute.xlu1 %3584  ;;  %v3217_v39 = vmul.f32 %v3871_v22, %v12659_v42  ;;  %v3329_v32 = vmul.f32 %v3648_v55, %v12661_v27  ;;  %v4356_v45 = vld [vmem:[#allocation2 + $0x1] sm:$0xff] }
 0x59d   :  { %3625 = vst.msk [vmem:[#allocation3 + $0x70] sm:$0xff] %vm1050_vm5, %v3585_v34  ;;  %v12663_v34 = vld [vmem:[#allocation120_spill] sm:$0xff]  ;;  %v12665_v42 = vld [vmem:[#allocation122_spill] sm:$0xff] }
 0x59e   :  { %v3441_v53 = vmul.f32 %v3760_v36, %v12663_v34  ;;  %v3553_v55 = vmul.f32 %v3872_v12, %v12665_v42 }
 0x59f   :  { %3932 = vrot.lane.b32.xlu1 %v3887_v44, %s8333_s16  ;;  %3598 = vrot.lane.b32.xlu0 %v3552_v60, %s8330_s13  ;;  %v12662_v44 = vld [vmem:[#allocation76_spill] sm:$0xff] }
 0x5a0   :  { %v3888_v60 = vmul.f32 %v3872_v12, %v12662_v44 }
 0x5a3   :  { %3710 = vrot.lane.b32.xlu0 %v3664_v59, %s8331_s14  ;;  %3264 = vrot.lane.b32.xlu1 %v3217_v39, %s8327_s10  ;;  %v12664_v39 = vld [vmem:[#allocation6_spill] sm:$0xff] }
 0x5a4   :  { %v4372_v2 = vmul.f32 %v4356_v45, %v12664_v39 }
 0x5a7   :  { %3822 = vrot.lane.b32.xlu0 %v3776_v7, %s8332_s15  ;;  %3376 = vrot.lane.b32.xlu1 %v3329_v32, %s8328_s11  ;;  %v12666_v32 = vld [vmem:[#allocation64_spill] sm:$0xff] }
 0x5aa   :  { %v3363_v22 = vpop.permute.xlu0 %3362  ;;  %v3697_v59 = vpop.permute.xlu1 %3696 }
 0x5ab   :  { %3934 = vrot.lane.b32.xlu0 %v3888_v60, %s8333_s16  ;;  %3488 = vrot.lane.b32.xlu1 %v3441_v53, %s8329_s12  ;;  %3402 = vst.msk [vmem:[#allocation3 + $0x80] sm:$0xff] %vm696_vm3, %v3363_v22  ;;  %v3665_v60 = vmul.f32 %v3649_v8, %v12666_v32  ;;  %v3761_v53 = vld [vmem:[#allocation2 + $0x88] sm:$0xff]  ;;  %v12667_v22 = vld [vmem:[#allocation129_spill] sm:$0xff] }
 0x5ac   :  { %3737 = vst.msk [vmem:[#allocation3 + $0x70] sm:$0xff] %vm1227_vm6, %v3697_v59  ;;  %v3777_v39 = vmul.f32 %v3761_v53, %v12667_v22  ;;  %v4030_v22 = vld [vmem:[#allocation3 + $0x60] sm:$0xff] }
 0x5ae   :  { %v3475_v36 = vpop.permute.xlu0 %3474  ;;  %v3809_v7 = vpop.permute.xlu1 %3808 }
 0x5af   :  { %4404 = vrot.lane.b32.xlu0 %v4372_v2, %s8327_s10  ;;  %3600 = vrot.lane.b32.xlu1 %v3553_v55, %s8330_s13  ;;  %3514 = vst.msk [vmem:[#allocation3 + $0x80] sm:$0xff] %vm873_vm4, %v3475_v36  ;;  %v3873_v2 = vld [vmem:[#allocation2 + $0x89] sm:$0xff] }
 0x5b0   :  { %3849 = vst.msk [vmem:[#allocation3 + $0x70] sm:$0xff] %vm1404_vm7, %v3809_v7  ;;  %v12668_v55 = vld [vmem:[#allocation131_spill] sm:$0xff] }
 0x5b1   :  { %v3889_v36 = vmul.f32 %v3873_v2, %v12668_v55  ;;  %v4037_v7 = vld [vmem:[#allocation3 + $0x98] sm:$0xff] }
 0x5b2   :  { %v3587_v45 = vpop.permute.xlu0 %3586  ;;  %v3921_v12 = vpop.permute.xlu1 %3920 }
 0x5b3   :  { %3712 = vrot.lane.b32.xlu1 %v3665_v60, %s8331_s14  ;;  %3626 = vst.msk [vmem:[#allocation3 + $0x80] sm:$0xff] %vm1050_vm5, %v3587_v45 }
 0x5b4   :  { %3961 = vst.msk [vmem:[#allocation3 + $0x70] sm:$0xff] %vm1581_vm8, %v3921_v12 }
 0x5b6   :  { %v3699_v59 = vpop.permute.xlu0 %3698  ;;  %v3253_v8 = vpop.permute.xlu1 %3252 }
 0x5b7   :  { %3824 = vrot.lane.b32.xlu1 %v3777_v39, %s8332_s15  ;;  %3738 = vst.msk [vmem:[#allocation3 + $0x80] sm:$0xff] %vm1227_vm6, %v3699_v59  ;;  %v4035_v39 = vld [vmem:[#allocation3 + $0x88] sm:$0xff] }
 0x5b8   :  { %3291 = vst.msk [vmem:[#allocation3 + $0x90] sm:$0xff] %vm519_vm2, %v3253_v8  ;;  %v4077_v32 = vpack.c.bf16 %v4037_v7, %v4035_v39 }
 0x5ba   :  { %v3811_v60 = vpop.permute.xlu0 %3810 }
 0x5bb   :  { %3936 = vrot.lane.b32.xlu1 %v3889_v36, %s8333_s16  ;;  %v3365_v53 = vpop.permute.xlu1 %3364  ;;  %v4032_v45 = vld [vmem:[#allocation3 + $0x70] sm:$0xff]  ;;  %3850 = vst.msk [vmem:[#allocation3 + $0x80] sm:$0xff] %vm1404_vm7, %v3811_v60 }
 0x5bc   :  { %3403 = vst.msk [vmem:[#allocation3 + $0x90] sm:$0xff] %vm696_vm3, %v3365_v53  ;;  %v4074_v12 = vpack.c.bf16 %v4032_v45, %v4030_v22 }
 0x5be   :  { %4174 = vmatmul.mubr.bf16.gmra.mrb[44].mxu0 %v4074_v12  ;;  %v3923_v2 = vpop.permute.xlu0 %3922 }
 0x5bf   :  { %7720 = vmatprep.mubr.msk.bf16.mxu0 %vm193_vm0, %v4077_v32  ;;  %v3477_v59 = vpop.permute.xlu1 %3476  ;;  %3962 = vst.msk [vmem:[#allocation3 + $0x80] sm:$0xff] %vm1581_vm8, %v3923_v2  ;;  %v4041_v2 = vld [vmem:[#allocation3 + $0xb8] sm:$0xff] }
 0x5c0   :  { %3515 = vst.msk [vmem:[#allocation3 + $0x90] sm:$0xff] %vm873_vm4, %v3477_v59 }
 0x5c2   :  { %v3255_v8 = vpop.permute.xlu0 %3254 }
 0x5c3   :  { %v3589_v36 = vpop.permute.xlu1 %3588  ;;  %3292 = vst.msk [vmem:[#allocation3 + $0xa0] sm:$0xff] %vm519_vm2, %v3255_v8 }
 0x5c4   :  { %3627 = vst.msk [vmem:[#allocation3 + $0x90] sm:$0xff] %vm1050_vm5, %v3589_v36 }
 0x5c6   :  { %v4034_v36 = vld [vmem:[#allocation3 + $0x80] sm:$0xff] }
 0x5d1   :  { %v3367_v60 = vpop.permute.xlu0 %3366  ;;  %v3701_v53 = vpop.permute.xlu1 %3700 }
 0x5d2   :  { %3404 = vst.msk [vmem:[#allocation3 + $0xa0] sm:$0xff] %vm696_vm3, %v3367_v60 }
 0x5d3   :  { %3739 = vst.msk [vmem:[#allocation3 + $0x90] sm:$0xff] %vm1227_vm6, %v3701_v53 }
 0x5d5   :  { %v3479_v22 = vpop.permute.xlu0 %3478  ;;  %v3813_v7 = vpop.permute.xlu1 %3812 }
 0x5d6   :  { %3516 = vst.msk [vmem:[#allocation3 + $0xa0] sm:$0xff] %vm873_vm4, %v3479_v22  ;;  %v4039_v22 = vld [vmem:[#allocation3 + $0xa8] sm:$0xff] }
 0x5d7   :  { %3851 = vst.msk [vmem:[#allocation3 + $0x90] sm:$0xff] %vm1404_vm7, %v3813_v7  ;;  %v4079_v7 = vpack.c.bf16 %v4041_v2, %v4039_v22 }
 0x5d9   :  { %v3591_v32 = vpop.permute.xlu0 %3590  ;;  %v3925_v45 = vpop.permute.xlu1 %3924 }
 0x5da   :  { %3628 = vst.msk [vmem:[#allocation3 + $0xa0] sm:$0xff] %vm1050_vm5, %v3591_v32 }
 0x5db   :  { %3963 = vst.msk [vmem:[#allocation3 + $0x90] sm:$0xff] %vm1581_vm8, %v3925_v45 }
 0x5dd   :  { %v3703_v12 = vpop.permute.xlu0 %3702  ;;  %v3257_v39 = vpop.permute.xlu1 %3256 }
 0x5de   :  { %3740 = vst.msk [vmem:[#allocation3 + $0xa0] sm:$0xff] %vm1227_vm6, %v3703_v12 }
 0x5df   :  { %3293 = vst.msk [vmem:[#allocation3 + $0xb0] sm:$0xff] %vm519_vm2, %v3257_v39 }
 0x5e1   :  { %v3815_v59 = vpop.permute.xlu0 %3814  ;;  %v3369_v8 = vpop.permute.xlu1 %3368 }
 0x5e2   :  { %v4036_v60 = vld [vmem:[#allocation3 + $0x90] sm:$0xff]  ;;  %3852 = vst.msk [vmem:[#allocation3 + $0xa0] sm:$0xff] %vm1404_vm7, %v3815_v59 }
 0x5e3   :  { %3405 = vst.msk [vmem:[#allocation3 + $0xb0] sm:$0xff] %vm696_vm3, %v3369_v8  ;;  %v4076_v53 = vpack.c.bf16 %v4036_v60, %v4034_v36 }
 0x5e5   :  { %4182 = vmatmul.mubr.bf16.gmra.mrb[48].mxu0 %v4076_v53  ;;  %v3927_v32 = vpop.permute.xlu0 %3926  ;;  %v3481_v45 = vpop.permute.xlu1 %3480 }
 0x5e6   :  { %7721 = vmatprep.mubr.msk.bf16.mxu0 %vm193_vm0, %v4079_v7  ;;  %3964 = vst.msk [vmem:[#allocation3 + $0xa0] sm:$0xff] %vm1581_vm8, %v3927_v32  ;;  %v4045_v32 = vld [vmem:[#allocation3 + $0xd8] sm:$0xff] }
 0x5e7   :  { %3517 = vst.msk [vmem:[#allocation3 + $0xb0] sm:$0xff] %vm873_vm4, %v3481_v45 }
 0x5e9   :  { %v3259_v12 = vpop.permute.xlu0 %3258  ;;  %v3593_v39 = vpop.permute.xlu1 %3592 }
 0x5ea   :  { %3294 = vst.msk [vmem:[#allocation3 + $0xc0] sm:$0xff] %vm519_vm2, %v3259_v12 }
 0x5eb   :  { %3629 = vst.msk [vmem:[#allocation3 + $0xb0] sm:$0xff] %vm1050_vm5, %v3593_v39 }
 0x5ed   :  { %v3371_v59 = vpop.permute.xlu0 %3370  ;;  %v3705_v8 = vpop.permute.xlu1 %3704  ;;  %v4038_v39 = vld [vmem:[#allocation3 + $0xa0] sm:$0xff] }
 0x5ee   :  { %3406 = vst.msk [vmem:[#allocation3 + $0xc0] sm:$0xff] %vm696_vm3, %v3371_v59 }
 0x5ef   :  { %3741 = vst.msk [vmem:[#allocation3 + $0xb0] sm:$0xff] %vm1227_vm6, %v3705_v8 }
 0x5f1   :  { %v3483_v2 = vpop.permute.xlu0 %3482  ;;  %v3817_v36 = vpop.permute.xlu1 %3816 }
 0x5f2   :  { %3518 = vst.msk [vmem:[#allocation3 + $0xc0] sm:$0xff] %vm873_vm4, %v3483_v2  ;;  %v4043_v2 = vld [vmem:[#allocation3 + $0xc8] sm:$0xff] }
 0x5f3   :  { %3853 = vst.msk [vmem:[#allocation3 + $0xb0] sm:$0xff] %vm1404_vm7, %v3817_v36  ;;  %v4081_v36 = vpack.c.bf16 %v4045_v32, %v4043_v2 }
 0x5f5   :  { %v3595_v60 = vpop.permute.xlu0 %3594  ;;  %v3929_v53 = vpop.permute.xlu1 %3928 }
 0x5f6   :  { %3630 = vst.msk [vmem:[#allocation3 + $0xc0] sm:$0xff] %vm1050_vm5, %v3595_v60 }
 0x5f7   :  { %3965 = vst.msk [vmem:[#allocation3 + $0xb0] sm:$0xff] %vm1581_vm8, %v3929_v53 }
 0x5f9   :  { %v3707_v22 = vpop.permute.xlu0 %3706  ;;  %v3261_v7 = vpop.permute.xlu1 %3260 }
 0x5fa   :  { %3742 = vst.msk [vmem:[#allocation3 + $0xc0] sm:$0xff] %vm1227_vm6, %v3707_v22 }
 0x5fb   :  { %3295 = vst.msk [vmem:[#allocation3 + $0xd0] sm:$0xff] %vm519_vm2, %v3261_v7 }
 0x5fd   :  { %v3819_v45 = vpop.permute.xlu0 %3818  ;;  %v3373_v12 = vpop.permute.xlu1 %3372 }
 0x5fe   :  { %v4040_v59 = vld [vmem:[#allocation3 + $0xb0] sm:$0xff]  ;;  %3854 = vst.msk [vmem:[#allocation3 + $0xc0] sm:$0xff] %vm1404_vm7, %v3819_v45 }
 0x5ff   :  { %3407 = vst.msk [vmem:[#allocation3 + $0xd0] sm:$0xff] %vm696_vm3, %v3373_v12  ;;  %v4078_v8 = vpack.c.bf16 %v4040_v59, %v4038_v39 }
 0x601   :  { %4190 = vmatmul.mubr.bf16.gmra.mrb[52].mxu0 %v4078_v8  ;;  %v3931_v60 = vpop.permute.xlu0 %3930  ;;  %v3485_v53 = vpop.permute.xlu1 %3484 }
 0x602   :  { %7722 = vmatprep.mubr.msk.bf16.mxu0 %vm193_vm0, %v4081_v36  ;;  %3966 = vst.msk [vmem:[#allocation3 + $0xc0] sm:$0xff] %vm1581_vm8, %v3931_v60  ;;  %v4047_v60 = vld [vmem:[#allocation3 + $0xe8] sm:$0xff] }
 0x603   :  { %3519 = vst.msk [vmem:[#allocation3 + $0xd0] sm:$0xff] %vm873_vm4, %v3485_v53 }
 0x605   :  { %v3263_v22 = vpop.permute.xlu0 %3262  ;;  %v3597_v7 = vpop.permute.xlu1 %3596 }
 0x606   :  { %3296 = vst.msk [vmem:[#allocation3 + $0xe0] sm:$0xff] %vm519_vm2, %v3263_v22 }
 0x607   :  { %3631 = vst.msk [vmem:[#allocation3 + $0xd0] sm:$0xff] %vm1050_vm5, %v3597_v7  ;;  %v10869_v7 = vld [vmem:[%s10857_s25] ss:$0 sm:$0xff] }
 0x609   :  { %v3375_v45 = vpop.permute.xlu0 %3374  ;;  %v3709_v12 = vpop.permute.xlu1 %3708 }
 0x60a   :  { %3408 = vst.msk [vmem:[#allocation3 + $0xe0] sm:$0xff] %vm696_vm3, %v3375_v45  ;;  %v4042_v45 = vld [vmem:[#allocation3 + $0xc0] sm:$0xff] }
 0x60b   :  { %3743 = vst.msk [vmem:[#allocation3 + $0xd0] sm:$0xff] %vm1227_vm6, %v3709_v12 }
 0x60d   :  { %v3487_v32 = vpop.permute.xlu0 %3486  ;;  %v3821_v39 = vpop.permute.xlu1 %3820 }
 0x60e   :  { %3520 = vst.msk [vmem:[#allocation3 + $0xe0] sm:$0xff] %vm873_vm4, %v3487_v32 }
 0x60f   :  { %3855 = vst.msk [vmem:[#allocation3 + $0xd0] sm:$0xff] %vm1404_vm7, %v3821_v39 }
 0x611   :  { %v3599_v59 = vpop.permute.xlu0 %3598  ;;  %v3933_v8 = vpop.permute.xlu1 %3932 }
 0x612   :  { %3632 = vst.msk [vmem:[#allocation3 + $0xe0] sm:$0xff] %vm1050_vm5, %v3599_v59  ;;  %v10874_v59 = vld [vmem:[%s10864_s29] ss:$0 sm:$0xff] }
 0x613   :  { %3967 = vst.msk [vmem:[#allocation3 + $0xd0] sm:$0xff] %vm1581_vm8, %v3933_v8  ;;  %v12669_v8 = vld [vmem:[#allocation100_spill] sm:$0xff] }
 0x614   :  { %v4083_v55 = vpack.c.bf16 %v12669_v8, %v4047_v60 }
 0x615   :  { %v3711_v2 = vpop.permute.xlu0 %3710  ;;  %v3265_v36 = vpop.permute.xlu1 %3264 }
 0x616   :  { %3744 = vst.msk [vmem:[#allocation3 + $0xe0] sm:$0xff] %vm1227_vm6, %v3711_v2 }
 0x617   :  { %3297 = vst.msk [vmem:[#allocation3 + $0xf0] sm:$0xff] %vm519_vm2, %v3265_v36 }
 0x619   :  { %v3823_v53 = vpop.permute.xlu0 %3822  ;;  %v3377_v22 = vpop.permute.xlu1 %3376 }
 0x61a   :  { %v4044_v12 = vld [vmem:[#allocation3 + $0xd0] sm:$0xff]  ;;  %3856 = vst.msk [vmem:[#allocation3 + $0xe0] sm:$0xff] %vm1404_vm7, %v3823_v53 }
 0x61b   :  { %3409 = vst.msk [vmem:[#allocation3 + $0xf0] sm:$0xff] %vm696_vm3, %v3377_v22  ;;  %v4080_v32 = vpack.c.bf16 %v4044_v12, %v4042_v45  ;;  %v4151_v39 = vpop.f32.mrb[32].mxu0  ;;  %v12670_v12 = vld [vmem:[#allocation34_spill] sm:$0xff] }
 0x61c   :  { %v4221_v2 = vmul.f32 %v10869_v7, %v4151_v39  ;;  %v4153_v36 = vpop.f32.mrb[33].mxu0  ;;  %v12671_v60 = vmax.f32 %v12670_v12, 0.0 }
 0x61d   :  { %4198 = vmatmul.mubr.bf16.gmra.mrb[56].mxu0 %v4080_v32  ;;  %v3935_v42 = vpop.permute.xlu0 %3934  ;;  %v3489_v34 = vpop.permute.xlu1 %3488 }
 0x61e   :  { %7723 = vmatprep.mubr.msk.bf16.mxu0 %vm193_vm0, %v4083_v55  ;;  %v4244_v44 = vadd.f32 %v10874_v59, %v4221_v2  ;;  %3968 = vst.msk [vmem:[#allocation3 + $0xe0] sm:$0xff] %vm1581_vm8, %v3935_v42  ;;  %v4154_v53 = vpop.f32.mrb[34].mxu0  ;;  %v12672_v55 = vld [vmem:[#allocation126_spill] sm:$0xff] }
 0x61f   :  { %3521 = vst.msk [vmem:[#allocation3 + $0xf0] sm:$0xff] %vm873_vm4, %v3489_v34  ;;  %v4222_v22 = vmul.f32 %v10869_v7, %v4154_v53  ;;  %v4156_v45 = vpop.f32.mrb[35].mxu0  ;;  %v12673_v42 = vmax.f32 %v12672_v55, 0.0 }
 0x620   :  { %v4260_v8 = vadd.f32 %v4244_v44, %v12671_v60 }
 0x621   :  { %v4245_v39 = vadd.f32 %v10874_v59, %v4222_v22  ;;  %v4405_v32 = vpop.permute.xlu0 %4404  ;;  %v3601_v36 = vpop.permute.xlu1 %3600 }
 0x622   :  { %v4276_v27 = vmax.f32 %v4260_v8, 0.0  ;;  %4452 = vst.msk [vmem:[#allocation3] sm:$0xff] %vm519_vm2, %v4405_v32 }
 0x623   :  { %3633 = vst.msk [vmem:[#allocation3 + $0xf0] sm:$0xff] %vm1050_vm5, %v3601_v36  ;;  %v4261_v2 = vadd.f32 %v4245_v39, %v12673_v42  ;;  %v12674_v39 = vld [vmem:[#allocation73_spill] sm:$0xff] }
 0x624   :  { %4292 = vst.msk [vmem:[#allocation2 + $0x9] sm:$0xff] %vm193_vm0, %v4276_v27  ;;  %v12675_v42 = vld [vmem:[#allocation17_spill] sm:$0xff] }
 0x625   :  { %v4277_v34 = vmax.f32 %v4261_v2, 0.0  ;;  %v3713_v53 = vpop.permute.xlu1 %3712 }
 0x626   :  { %3745 = vst.msk [vmem:[#allocation3 + $0xf0] sm:$0xff] %vm1227_vm6, %v3713_v53 }
 0x627   :  { %4293 = vst.msk [vmem:[#allocation2 + $0x11] sm:$0xff] %vm193_vm0, %v4277_v34  ;;  %v12676_v34 = vld [vmem:[#allocation7_spill] sm:$0xff] }
 0x629   :  { %v3825_v44 = vpop.permute.xlu1 %3824 }
 0x62a   :  { %3857 = vst.msk [vmem:[#allocation3 + $0xf0] sm:$0xff] %vm1404_vm7, %v3825_v44 }
 0x62b   :  { %v4468_v22 = vld [vmem:[#allocation2 + $0x2] sm:$0xff] }
 0x62c   :  { %v4357_v45 = vld [vmem:[#allocation2 + $0x9] sm:$0xff]  ;;  %v4484_v60 = vmul.f32 %v4468_v22, %v12569_v18  ;;  %v12677_v18 = vld [vmem:[#allocation134_spill] sm:$0xff] }
 0x62d   :  { %v4580_v12 = vld [vmem:[#allocation2 + $0x8] sm:$0xff]  ;;  %v4373_v8 = vmul.f32 %v4357_v45, %v12570_v29  ;;  %v3937_v32 = vpop.permute.xlu1 %3936  ;;  %v12678_v29 = vld [vmem:[#allocation12_spill] sm:$0xff] }
 0x62e   :  { %v4325_v36 = vmul.f32 %v4580_v12, %v12674_v39  ;;  %3969 = vst.msk [vmem:[#allocation3 + $0xf0] sm:$0xff] %vm1581_vm8, %v3937_v32  ;;  %4516 = vrot.lane.b32.xlu0 %v4484_v60, %s8328_s11  ;;  %v4469_v27 = vld [vmem:[#allocation2 + $0xa] sm:$0xff]  ;;  %v4596_v2 = vmul.f32 %v4580_v12, %v12675_v42  ;;  %v4708_v22 = vmul.f32 %v4357_v45, %v12678_v29  ;;  %v12679_v12 = vld [vmem:[#allocation10_spill] sm:$0xff] }
 0x62f   :  { %4406 = vrot.lane.b32.xlu1 %v4373_v8, %s8327_s10  ;;  %v4581_v55 = vld [vmem:[#allocation2 + $0x10] sm:$0xff]  ;;  %v4485_v53 = vmul.f32 %v4469_v27, %v12676_v34  ;;  %v4046_v8 = vld [vmem:[#allocation3 + $0xe0] sm:$0xff]  ;;  %v12680_v42 = vld [vmem:[#allocation14_spill] sm:$0xff] }
 0x630   :  { %4341 = vst.msk [vmem:[#allocation3 + $0x10] sm:$0xff] %vm193_vm0, %v4325_v36  ;;  %v4326_v44 = vmul.f32 %v4581_v55, %v12677_v18  ;;  %v4597_v60 = vmul.f32 %v4581_v55, %v12679_v12  ;;  %v4693_v39 = vld [vmem:[#allocation2 + $0x11] sm:$0xff]  ;;  %v12681_v34 = vld [vmem:[#allocation45_spill] sm:$0xff]  ;;  %v5221_v45 = vld [vmem:[%s10910_s3 + $0x8] sm:$0xff] }
 0x631   :  { %v5220_v18 = vld [vmem:[%s10910_s3] sm:$0xff]  ;;  %v5222_v12 = vld [vmem:[%s10910_s3 + $0x10] sm:$0xff] }
 0x632   :  { %4628 = vrot.lane.b32.xlu0 %v4596_v2, %s8329_s12  ;;  %4342 = vst.msk [vmem:[#allocation3 + $0x20] sm:$0xff] %vm193_vm0, %v4326_v44  ;;  %v4820_v2 = vmul.f32 %v4469_v27, %v12680_v42  ;;  %v5254_v44 = vpack.c.bf16 %v5221_v45, %v5220_v18  ;;  %v12682_v29 = vld [vmem:[#allocation26_spill] sm:$0xff]  ;;  %v5223_v27 = vld [vmem:[%s10910_s3 + $0x18] sm:$0xff] }
 0x633   :  { %4518 = vrot.lane.b32.xlu1 %v4485_v53, %s8328_s11  ;;  %v4709_v53 = vmul.f32 %v4693_v39, %v12681_v34  ;;  %v5225_v42 = vld [vmem:[%s10910_s3 + $0x28] sm:$0xff]  ;;  %v5227_v34 = vld [vmem:[%s10910_s3 + $0x38] sm:$0xff] }
 0x634   :  { %5288 = vmatpush1.bf16.msra.mxu1 %v5254_v44  ;;  %v12684_v44 = vld [vmem:[#allocation23_spill] sm:$0xff] }
 0x635   :  { %v4048_v32 = vld [vmem:[#allocation3 + $0xf0] sm:$0xff]  ;;  %5289 = vmatprep.subr.bf16.mxu1 %v12320_v56 }
 0x636   :  { %4740 = vrot.lane.b32.xlu0 %v4708_v22, %s8330_s13  ;;  %v4082_v36 = vpack.c.bf16 %v4048_v32, %v4046_v8  ;;  %v4932_v22 = vmul.f32 %v4581_v55, %v12682_v29  ;;  %v12683_v8 = vld [vmem:[#allocation20_spill] sm:$0xff]  ;;  %v4374_v29 = vmul.f32 %v4693_v39, %v12684_v44 }
 0x637   :  { %4630 = vrot.lane.b32.xlu1 %v4597_v60, %s8329_s12  ;;  %v5255_v60 = vpack.c.bf16 %v5223_v27, %v5222_v12  ;;  %v5044_v32 = vmul.f32 %v4693_v39, %v12683_v8  ;;  %v5228_v27 = vld [vmem:[%s10910_s3 + $0x40] sm:$0xff] }
 0x638   :  { %4206 = vmatmul.mubr.bf16.gmra.mrb[60].mxu0 %v4082_v36  ;;  %v5224_v36 = vld [vmem:[%s10910_s3 + $0x20] sm:$0xff] }
 0x639   :  { %5290 = vmatpush1.bf16.msra.mxu1 %v5255_v60  ;;  %v5256_v55 = vpack.c.bf16 %v5225_v42, %v5224_v36  ;;  %v5229_v60 = vld [vmem:[%s10910_s3 + $0x48] sm:$0xff] }
 0x63a   :  { %4852 = vrot.lane.b32.xlu0 %v4820_v2, %s8331_s14  ;;  %5291 = vmatprep.subr.bf16.mxu1 %v12320_v56  ;;  %v5226_v2 = vld [vmem:[%s10910_s3 + $0x30] sm:$0xff] }
 0x63b   :  { %4742 = vrot.lane.b32.xlu1 %v4709_v53, %s8330_s13  ;;  %v12685_v42 = vld [vmem:[#allocation111_spill] sm:$0xff] }
 0x63d   :  { %5292 = vmatpush1.bf16.msra.mxu1 %v5256_v55 }
 0x63e   :  { %4964 = vrot.lane.b32.xlu0 %v4932_v22, %s8332_s15  ;;  %v5257_v22 = vpack.c.bf16 %v5227_v34, %v5226_v2  ;;  %5293 = vmatprep.subr.bf16.mxu1 %v12320_v56  ;;  %v5258_v2 = vpack.c.bf16 %v5229_v60, %v5228_v27 }
 0x641   :  { %5294 = vmatpush1.bf16.msra.mxu1 %v5257_v22  ;;  %v5233_v22 = vld [vmem:[%s10910_s3 + $0x68] sm:$0xff] }
 0x642   :  { %5076 = vrot.lane.b32.xlu0 %v5044_v32, %s8333_s16  ;;  %5295 = vmatprep.subr.bf16.mxu1 %v12320_v56 }
 0x643   :  { %v4159_v53 = vpop.f32.mrb[36].mxu0 }
 0x644   :  { %v4223_v18 = vmul.f32 %v10869_v7, %v4159_v53  ;;  %v4161_v45 = vpop.f32.mrb[37].mxu0  ;;  %v12686_v53 = vmax.f32 %v12685_v42, 0.0 }
 0x645   :  { %v4162_v12 = vpop.f32.mrb[38].mxu0  ;;  %v12687_v45 = vld [vmem:[#allocation128_spill] sm:$0xff]  ;;  %5296 = vmatpush1.bf16.msra.mxu1 %v5258_v2  ;;  %v12691_v2 = vld [vmem:[#allocation133_spill] sm:$0xff] }
 0x646   :  { %v4246_v8 = vadd.f32 %v10874_v59, %v4223_v18  ;;  %v4224_v32 = vmul.f32 %v10869_v7, %v4162_v12  ;;  %4408 = vrot.lane.b32.xlu0 %v4374_v29, %s8327_s10  ;;  %v4164_v36 = vpop.f32.mrb[39].mxu0  ;;  %v12688_v44 = vmax.f32 %v12687_v45, 0.0  ;;  %v5231_v12 = vld [vmem:[%s10910_s3 + $0x58] sm:$0xff]  ;;  %5297 = vmatprep.subr.bf16.mxu1 %v12320_v56 }
 0x647   :  { %v5259_v36 = vpack.c.bf16 %v5231_v12, %v5230_v62  ;;  %v5235_v12 = vld [vmem:[%s10910_s3 + $0x78] sm:$0xff] }
 0x648   :  { %v4262_v39 = vadd.f32 %v4246_v8, %v12686_v53  ;;  %v4247_v55 = vadd.f32 %v10874_v59, %v4224_v32  ;;  %v5232_v8 = vld [vmem:[%s10910_s3 + $0x60] sm:$0xff]  ;;  %v12689_v32 = vld [vmem:[#allocation16_spill] sm:$0xff] }
 0x649   :  { %5298 = vmatpush1.bf16.msra.mxu1 %v5259_v36  ;;  %v5260_v27 = vpack.c.bf16 %v5233_v22, %v5232_v8  ;;  %v12690_v53 = vld [vmem:[#allocation36_spill] sm:$0xff]  ;;  %v12692_v22 = vld [vmem:[#allocation21_spill] sm:$0xff] }
 0x64a   :  { %v4278_v34 = vmax.f32 %v4262_v39, 0.0  ;;  %v4263_v18 = vadd.f32 %v4247_v55, %v12688_v44  ;;  %5299 = vmatprep.subr.bf16.mxu1 %v12320_v56 }
 0x64c   :  { %4294 = vst.msk [vmem:[#allocation2 + $0x19] sm:$0xff] %vm193_vm0, %v4278_v34  ;;  %v4279_v29 = vmax.f32 %v4263_v18, 0.0  ;;  %v5234_v18 = vld [vmem:[%s10910_s3 + $0x70] sm:$0xff] }
 0x64d   :  { %5300 = vmatpush1.bf16.msra.mxu1 %v5260_v27  ;;  %v5261_v8 = vpack.c.bf16 %v5235_v12, %v5234_v18 }
 0x64e   :  { %4295 = vst.msk [vmem:[#allocation2 + $0x21] sm:$0xff] %vm193_vm0, %v4279_v29  ;;  %5301 = vmatprep.subr.bf16.mxu1 %v12320_v56 }
 0x651   :  { %5302 = vmatpush1.bf16.msra.mxu1 %v5261_v8 }
 0x652   :  { %5303 = vmatprep.subr.bf16.mxu1 %v12320_v56 }
 0x653   :  { %v4805_v60 = vld [vmem:[#allocation2 + $0x12] sm:$0xff] }
 0x654   :  { %v4821_v42 = vmul.f32 %v4805_v60, %v12689_v32  ;;  %v4486_v39 = vmul.f32 %v4805_v60, %v12690_v53  ;;  %v4917_v55 = vld [vmem:[#allocation2 + $0x18] sm:$0xff]  ;;  %v5156_v34 = vmul.f32 %v4805_v60, %v12691_v2  ;;  %v5236_v53 = vld [vmem:[%s10910_s3 + $0x80] sm:$0xff] }
 0x655   :  { %v5141_v62 = vld [vmem:[#allocation2 + $0x1a] sm:$0xff]  ;;  %v4933_v29 = vmul.f32 %v4917_v55, %v12583_v35  ;;  %v4598_v36 = vmul.f32 %v4917_v55, %v12472_v41  ;;  %v4327_v27 = vmul.f32 %v4917_v55, %v12692_v22  ;;  %v12693_v60 = vld [vmem:[#allocation84_spill] sm:$0xff]  ;;  %v12694_v35 = vld [vmem:[#allocation31_spill] sm:$0xff] }
 0x656   :  { %v4918_v45 = vld [vmem:[#allocation2 + $0x20] sm:$0xff]  ;;  %4854 = vrot.lane.b32.xlu1 %v4821_v42, %s8331_s14  ;;  %4520 = vrot.lane.b32.xlu0 %v4486_v39, %s8328_s11  ;;  %v5157_v44 = vmul.f32 %v5141_v62, %v9441_v19  ;;  %5172 = vst.msk [vmem:[#allocation3 + $0x8] sm:$0xff] %vm193_vm0, %v5156_v34  ;;  %v5237_v39 = vld [vmem:[%s10910_s3 + $0x88] sm:$0xff]  ;;  %s8352_s3 = smov 22  }
 0x657   :  { %v4328_v32 = vmul.f32 %v4918_v45, %v12693_v60  ;;  %v5029_v42 = vld [vmem:[#allocation2 + $0x19] sm:$0xff]  ;;  %4343 = vst.msk [vmem:[#allocation3 + $0x30] sm:$0xff] %vm193_vm0, %v4327_v27  ;;  %v5262_v19 = vpack.c.bf16 %v5237_v39, %v5236_v53  ;;  %v12701_v39 = vld [vmem:[#allocation40_spill] sm:$0xff] }
 0x658   :  { %5173 = vst.msk [vmem:[#allocation3 + $0x18] sm:$0xff] %vm193_vm0, %v5157_v44  ;;  %v5045_v41 = vmul.f32 %v5029_v42, %v12586_v37  ;;  %v4710_v2 = vmul.f32 %v5029_v42, %v12694_v35  ;;  %v12695_v44 = vld [vmem:[#allocation25_spill] sm:$0xff]  ;;  %v12698_v37 = vld [vmem:[#allocation27_spill] sm:$0xff] }
 0x659   :  { %4344 = vst.msk [vmem:[#allocation3 + $0x40] sm:$0xff] %vm193_vm0, %v4328_v32  ;;  %5304 = vmatpush1.bf16.msra.mxu1 %v5262_v19  ;;  %v4375_v18 = vmul.f32 %v5029_v42, %v12695_v44  ;;  %v4487_v22 = vmul.f32 %v5141_v62, %v12698_v37  ;;  %v12699_v27 = vld [vmem:[#allocation37_spill] sm:$0xff]  ;;  %v5030_v32 = vld [vmem:[#allocation2 + $0x21] sm:$0xff]  ;;  %v12700_v42 = vld [vmem:[#allocation19_spill] sm:$0xff] }
 0x65a   :  { %4966 = vrot.lane.b32.xlu1 %v4933_v29, %s8332_s15  ;;  %4632 = vrot.lane.b32.xlu0 %v4598_v36, %s8329_s12  ;;  %v12696_v29 = vmov 0.0   ;;  %v12697_v36 = vld [vmem:[#allocation56_spill] sm:$0xff]  ;;  %v4934_v60 = vmul.f32 %v4918_v45, %v12699_v27  ;;  %v4599_v53 = vmul.f32 %v4918_v45, %v12700_v42  ;;  %v5046_v19 = vmul.f32 %v5030_v32, %v12701_v39  ;;  %v12702_v35 = vld [vmem:[#allocation33_spill] sm:$0xff] }
 0x65b   :  { %7874 = vmatprep.subr.bf16.mxu1 %v12696_v29  ;;  %v4822_v8 = vmul.f32 %v5141_v62, %v12697_v36  ;;  %v12706_v42 = vld [vmem:[#allocation132_spill] sm:$0xff]  ;;  %7870 = vmatprep.mubr.msk.bf16.mxu0 %vm8348_vm9, %v12696_v29 }
 0x65d   :  { %v5189_v55 = vld [vmem:[#allocation3 + $0x8] sm:$0xff] }
 0x65e   :  { %5078 = vrot.lane.b32.xlu1 %v5045_v41, %s8333_s16  ;;  %4744 = vrot.lane.b32.xlu0 %v4710_v2, %s8330_s13  ;;  %v4711_v2 = vmul.f32 %v5030_v32, %v12702_v35 }
 0x65f   :  { %v5191_v34 = vld [vmem:[#allocation3 + $0x18] sm:$0xff] }
 0x660   :  { %v5239_v12 = vpack.c.bf16 %v5191_v34, %v5189_v55  ;;  %v12703_v34 = vld [vmem:[#allocation9_spill] sm:$0xff] }
 0x661   :  { %v4376_v44 = vmul.f32 %v5030_v32, %v12703_v34 }
 0x662   :  { %4410 = vrot.lane.b32.xlu1 %v4375_v18, %s8327_s10  ;;  %7726 = vmatprep.mubr.msk.bf16.mxu1 %vm193_vm0, %v5239_v12 }
 0x663   :  { %4856 = vrot.lane.b32.xlu0 %v4822_v8, %s8331_s14  ;;  %v12704_v8 = vld [vmem:[#allocation130_spill] sm:$0xff] }
 0x664   :  { %v12705_v37 = vmax.f32 %v12704_v8, 0.0 }
 0x666   :  { %4522 = vrot.lane.b32.xlu1 %v4487_v22, %s8328_s11 }
 0x667   :  { %4968 = vrot.lane.b32.xlu0 %v4934_v60, %s8332_s15 }
 0x66a   :  { %4634 = vrot.lane.b32.xlu1 %v4599_v53, %s8329_s12  ;;  %v12707_v53 = vmax.f32 %v12706_v42, 0.0 }
 0x66b   :  { %5080 = vrot.lane.b32.xlu0 %v5046_v19, %s8333_s16  ;;  %v4167_v41 = vpop.f32.mrb[40].mxu0 }
 0x66c   :  { %v4225_v62 = vmul.f32 %v10869_v7, %v4167_v41  ;;  %v4169_v55 = vpop.f32.mrb[41].mxu0  ;;  %v12708_v41 = vld [vmem:[#allocation35_spill] sm:$0xff] }
 0x66d   :  { %v4170_v18 = vpop.f32.mrb[42].mxu0 }
 0x66e   :  { %4746 = vrot.lane.b32.xlu1 %v4711_v2, %s8330_s13  ;;  %v4248_v12 = vadd.f32 %v10874_v59, %v4225_v62  ;;  %v4226_v45 = vmul.f32 %v10869_v7, %v4170_v18  ;;  %v4172_v36 = vpop.f32.mrb[43].mxu0  ;;  %v12709_v2 = vld [vmem:[#allocation46_spill] sm:$0xff] }
 0x66f   :  { %4412 = vrot.lane.b32.xlu0 %v4376_v44, %s8327_s10 }
 0x670   :  { %v4264_v22 = vadd.f32 %v4248_v12, %v12705_v37  ;;  %v4249_v27 = vadd.f32 %v10874_v59, %v4226_v45  ;;  %v12710_v37 = vld [vmem:[#allocation109_spill] sm:$0xff] }
 0x672   :  { %v4280_v60 = vmax.f32 %v4264_v22, 0.0  ;;  %v4265_v39 = vadd.f32 %v4249_v27, %v12707_v53  ;;  %v12714_v53 = vld [vmem:[#allocation57_spill] sm:$0xff] }
 0x674   :  { %4296 = vst.msk [vmem:[#allocation2 + $0x29] sm:$0xff] %vm193_vm0, %v4280_v60  ;;  %v4281_v32 = vmax.f32 %v4265_v39, 0.0 }
 0x676   :  { %4297 = vst.msk [vmem:[#allocation2 + $0x31] sm:$0xff] %vm193_vm0, %v4281_v32  ;;  %v12715_v32 = vld [vmem:[#allocation38_spill] sm:$0xff] }
 0x67b   :  { %v4807_v19 = vld [vmem:[#allocation2 + $0x22] sm:$0xff] }
 0x67c   :  { %v4823_v35 = vmul.f32 %v4807_v19, %v12708_v41  ;;  %v4488_v62 = vmul.f32 %v4807_v19, %v12709_v2  ;;  %v4919_v55 = vld [vmem:[#allocation2 + $0x28] sm:$0xff]  ;;  %v5158_v18 = vmul.f32 %v4807_v19, %v9450_v63 }
 0x67d   :  { %v4808_v34 = vld [vmem:[#allocation2 + $0x2a] sm:$0xff]  ;;  %v4935_v12 = vmul.f32 %v4919_v55, %v12488_v33  ;;  %v4600_v45 = vmul.f32 %v4919_v55, %v12489_v54  ;;  %v4329_v8 = vmul.f32 %v4919_v55, %v12599_v4  ;;  %v12711_v63 = vld [vmem:[#allocation42_spill] sm:$0xff] }
 0x67e   :  { %v4920_v44 = vld [vmem:[#allocation2 + $0x30] sm:$0xff]  ;;  %4858 = vrot.lane.b32.xlu1 %v4823_v35, %s8331_s14  ;;  %4524 = vrot.lane.b32.xlu0 %v4488_v62, %s8328_s11  ;;  %5174 = vst.msk [vmem:[#allocation3 + $0x28] sm:$0xff] %vm193_vm0, %v5158_v18  ;;  %v5159_v36 = vmul.f32 %v4808_v34, %v12598_v15  ;;  %v4489_v19 = vmul.f32 %v4808_v34, %v12715_v32  ;;  %v12717_v62 = vld [vmem:[#allocation50_spill] sm:$0xff] }
 0x67f   :  { %v4330_v22 = vmul.f32 %v4920_v44, %v12710_v37  ;;  %v5031_v27 = vld [vmem:[#allocation2 + $0x29] sm:$0xff]  ;;  %4345 = vst.msk [vmem:[#allocation3 + $0x50] sm:$0xff] %vm193_vm0, %v4329_v8  ;;  %v4936_v39 = vmul.f32 %v4920_v44, %v12714_v53  ;;  %v5032_v41 = vld [vmem:[#allocation2 + $0x31] sm:$0xff]  ;;  %v4601_v55 = vmul.f32 %v4920_v44, %v12717_v62  ;;  %v12720_v44 = vld [vmem:[#allocation29_spill] sm:$0xff] }
 0x680   :  { %5175 = vst.msk [vmem:[#allocation3 + $0x38] sm:$0xff] %vm193_vm0, %v5159_v36  ;;  %v5047_v33 = vmul.f32 %v5031_v27, %v12711_v63  ;;  %v12712_v54 = vld [vmem:[#allocation47_spill] sm:$0xff]  ;;  %v4377_v15 = vmul.f32 %v5031_v27, %v12603_v23  ;;  %v12716_v35 = vld [vmem:[#allocation68_spill] sm:$0xff]  ;;  %v12724_v62 = vld [vmem:[#allocation58_spill] sm:$0xff] }
 0x681   :  { %4346 = vst.msk [vmem:[#allocation3 + $0x60] sm:$0xff] %vm193_vm0, %v4330_v22  ;;  %v4712_v60 = vmul.f32 %v5031_v27, %v12712_v54  ;;  %v12713_v4 = vld [vmem:[#allocation55_spill] sm:$0xff]  ;;  %v5048_v2 = vmul.f32 %v5032_v41, %v12716_v35  ;;  %v12718_v36 = vld [vmem:[#allocation52_spill] sm:$0xff] }
 0x682   :  { %4970 = vrot.lane.b32.xlu1 %v4935_v12, %s8332_s15  ;;  %4636 = vrot.lane.b32.xlu0 %v4600_v45, %s8329_s12  ;;  %v4824_v42 = vmul.f32 %v4808_v34, %v12713_v4  ;;  %v4713_v34 = vmul.f32 %v5032_v41, %v12718_v36  ;;  %v12719_v8 = vld [vmem:[#allocation63_spill] sm:$0xff]  ;;  %v12722_v4 = vld [vmem:[#allocation28_spill] sm:$0xff] }
 0x683   :  { %v4378_v37 = vmul.f32 %v5032_v41, %v12719_v8 }
 0x686   :  { %5082 = vrot.lane.b32.xlu1 %v5047_v33, %s8333_s16  ;;  %4748 = vrot.lane.b32.xlu0 %v4712_v60, %s8330_s13  ;;  %v12721_v33 = vmax.f32 %v12720_v44, 0.0 }
 0x68a   :  { %4414 = vrot.lane.b32.xlu1 %v4377_v15, %s8327_s10  ;;  %4860 = vrot.lane.b32.xlu0 %v4824_v42, %s8331_s14  ;;  %v12723_v42 = vmax.f32 %v12722_v4, 0.0 }
 0x68e   :  { %4972 = vrot.lane.b32.xlu0 %v4936_v39, %s8332_s15  ;;  %4526 = vrot.lane.b32.xlu1 %v4489_v19, %s8328_s11 }
 0x691   :  { %v4175_v23 = vpop.f32.mrb[44].mxu0 }
 0x692   :  { %5084 = vrot.lane.b32.xlu0 %v5048_v2, %s8333_s16  ;;  %4638 = vrot.lane.b32.xlu1 %v4601_v55, %s8329_s12  ;;  %v4227_v18 = vmul.f32 %v10869_v7, %v4175_v23  ;;  %v4177_v12 = vpop.f32.mrb[45].mxu0  ;;  %v12725_v23 = vld [vmem:[#allocation65_spill] sm:$0xff] }
 0x693   :  { %v4178_v45 = vpop.f32.mrb[46].mxu0 }
 0x694   :  { %v4250_v22 = vadd.f32 %v10874_v59, %v4227_v18  ;;  %v4228_v27 = vmul.f32 %v10869_v7, %v4178_v45  ;;  %v4180_v63 = vpop.f32.mrb[47].mxu0 }
 0x696   :  { %4750 = vrot.lane.b32.xlu1 %v4713_v34, %s8330_s13  ;;  %4416 = vrot.lane.b32.xlu0 %v4378_v37, %s8327_s10  ;;  %v4266_v54 = vadd.f32 %v4250_v22, %v12721_v33  ;;  %v4251_v60 = vadd.f32 %v10874_v59, %v4228_v27  ;;  %v12726_v33 = vld [vmem:[#allocation116_spill] sm:$0xff] }
 0x698   :  { %v4282_v15 = vmax.f32 %v4266_v54, 0.0  ;;  %v4267_v53 = vadd.f32 %v4251_v60, %v12723_v42  ;;  %v12728_v60 = vld [vmem:[#allocation72_spill] sm:$0xff]  ;;  %v12729_v42 = vld [vmem:[#allocation11_spill] sm:$0xff] }
 0x69a   :  { %4298 = vst.msk [vmem:[#allocation2 + $0x39] sm:$0xff] %vm193_vm0, %v4282_v15  ;;  %v4283_v39 = vmax.f32 %v4267_v53, 0.0 }
 0x69c   :  { %4299 = vst.msk [vmem:[#allocation2 + $0x41] sm:$0xff] %vm193_vm0, %v4283_v39  ;;  %v12730_v39 = vld [vmem:[#allocation75_spill] sm:$0xff] }
 0x6a0   :  { %v4517_v32 = vpop.permute.xlu0 %4516 }
 0x6a1   :  { %v4407_v19 = vpop.permute.xlu1 %4406  ;;  %4564 = vst.msk [vmem:[#allocation3] sm:$0xff] %vm696_vm3, %v4517_v32  ;;  %v4809_v41 = vld [vmem:[#allocation2 + $0x32] sm:$0xff] }
 0x6a2   :  { %4453 = vst.msk [vmem:[#allocation3 + $0x10] sm:$0xff] %vm519_vm2, %v4407_v19  ;;  %v4825_v55 = vmul.f32 %v4809_v41, %v12724_v62  ;;  %v4490_v18 = vmul.f32 %v4809_v41, %v12725_v23  ;;  %v4921_v12 = vld [vmem:[#allocation2 + $0x38] sm:$0xff]  ;;  %v5160_v34 = vmul.f32 %v4809_v41, %v12611_v17  ;;  %v12731_v41 = vld [vmem:[#allocation30_spill] sm:$0xff] }
 0x6a3   :  { %v4810_v45 = vld [vmem:[#allocation2 + $0x3a] sm:$0xff]  ;;  %v4937_v8 = vmul.f32 %v4921_v12, %v12505_v28  ;;  %v4602_v27 = vmul.f32 %v4921_v12, %v12391_v61  ;;  %v4331_v44 = vmul.f32 %v4921_v12, %v9522_v14 }
 0x6a4   :  { %v4629_v35 = vpop.permute.xlu0 %4628  ;;  %v4922_v36 = vld [vmem:[#allocation2 + $0x40] sm:$0xff]  ;;  %4862 = vrot.lane.b32.xlu1 %v4825_v55, %s8331_s14  ;;  %4528 = vrot.lane.b32.xlu0 %v4490_v18, %s8328_s11  ;;  %5176 = vst.msk [vmem:[#allocation3 + $0x48] sm:$0xff] %vm193_vm0, %v5160_v34  ;;  %v5161_v63 = vmul.f32 %v4810_v45, %v9461_v20  ;;  %v4826_v32 = vmul.f32 %v4810_v45, %v12730_v39 }
 0x6a5   :  { %v4519_v2 = vpop.permute.xlu1 %4518  ;;  %4676 = vst.msk [vmem:[#allocation3] sm:$0xff] %vm873_vm4, %v4629_v35  ;;  %v4332_v54 = vmul.f32 %v4922_v36, %v12726_v33  ;;  %v5033_v17 = vld [vmem:[#allocation2 + $0x39] sm:$0xff]  ;;  %v4938_v35 = vmul.f32 %v4922_v36, %v12731_v41  ;;  %v5034_v55 = vld [vmem:[#allocation2 + $0x41] sm:$0xff] }
 0x6a6   :  { %4565 = vst.msk [vmem:[#allocation3 + $0x10] sm:$0xff] %vm696_vm3, %v4519_v2  ;;  %v12727_v14 = vld [vmem:[#allocation61_spill] sm:$0xff]  ;;  %v4714_v15 = vmul.f32 %v5033_v17, %v12728_v60  ;;  %v4379_v53 = vmul.f32 %v5033_v17, %v12729_v42  ;;  %v12732_v2 = vld [vmem:[#allocation67_spill] sm:$0xff] }
 0x6a7   :  { %5177 = vst.msk [vmem:[#allocation3 + $0x58] sm:$0xff] %vm193_vm0, %v5161_v63  ;;  %4347 = vst.msk [vmem:[#allocation3 + $0x70] sm:$0xff] %vm193_vm0, %v4331_v44  ;;  %v5049_v28 = vmul.f32 %v5033_v17, %v12727_v14  ;;  %v4491_v62 = vmul.f32 %v4810_v45, %v12732_v2  ;;  %v12737_v14 = vld [vmem:[#allocation49_spill] sm:$0xff] }
 0x6a8   :  { %v4741_v37 = vpop.permute.xlu0 %4740  ;;  %4974 = vrot.lane.b32.xlu1 %v4937_v8, %s8332_s15  ;;  %4640 = vrot.lane.b32.xlu0 %v4602_v27, %s8329_s12  ;;  %4348 = vst.msk [vmem:[#allocation3 + $0x80] sm:$0xff] %vm193_vm0, %v4332_v54  ;;  %v12733_v8 = vld [vmem:[#allocation80_spill] sm:$0xff] }
 0x6a9   :  { %v4631_v22 = vpop.permute.xlu1 %4630  ;;  %4788 = vst.msk [vmem:[#allocation3] sm:$0xff] %vm1050_vm5, %v4741_v37  ;;  %v5050_v37 = vmul.f32 %v5034_v55, %v12733_v8  ;;  %v12735_v54 = vld [vmem:[#allocation48_spill] sm:$0xff] }
 0x6aa   :  { %4677 = vst.msk [vmem:[#allocation3 + $0x10] sm:$0xff] %vm873_vm4, %v4631_v22  ;;  %v12734_v22 = vld [vmem:[#allocation69_spill] sm:$0xff]  ;;  %v12736_v17 = vmax.f32 %v12735_v54, 0.0 }
 0x6ab   :  { %v4603_v27 = vmul.f32 %v4922_v36, %v12734_v22  ;;  %v12738_v36 = vld [vmem:[#allocation81_spill] sm:$0xff] }
 0x6ac   :  { %v4853_v61 = vpop.permute.xlu0 %4852  ;;  %5086 = vrot.lane.b32.xlu1 %v5049_v28, %s8333_s16  ;;  %4752 = vrot.lane.b32.xlu0 %v4714_v15, %s8330_s13  ;;  %v4715_v28 = vmul.f32 %v5034_v55, %v12737_v14  ;;  %v4380_v60 = vmul.f32 %v5034_v55, %v12738_v36  ;;  %v12745_v54 = vld [vmem:[#allocation85_spill] sm:$0xff] }
 0x6ad   :  { %v4743_v20 = vpop.permute.xlu1 %4742  ;;  %4900 = vst.msk [vmem:[#allocation3] sm:$0xff] %vm1227_vm6, %v4853_v61 }
 0x6ae   :  { %4789 = vst.msk [vmem:[#allocation3 + $0x10] sm:$0xff] %vm1050_vm5, %v4743_v20 }
 0x6b0   :  { %v4965_v4 = vpop.permute.xlu0 %4964  ;;  %4418 = vrot.lane.b32.xlu1 %v4379_v53, %s8327_s10  ;;  %4864 = vrot.lane.b32.xlu0 %v4826_v32, %s8331_s14 }
 0x6b1   :  { %5012 = vst.msk [vmem:[#allocation3] sm:$0xff] %vm1404_vm7, %v4965_v4  ;;  %v12739_v4 = vld [vmem:[#allocation59_spill] sm:$0xff] }
 0x6b2   :  { %v12740_v42 = vmax.f32 %v12739_v4, 0.0 }
 0x6b4   :  { %v5077_v19 = vpop.permute.xlu0 %5076  ;;  %4976 = vrot.lane.b32.xlu0 %v4938_v35, %s8332_s15  ;;  %4530 = vrot.lane.b32.xlu1 %v4491_v62, %s8328_s11  ;;  %v12741_v35 = vld [vmem:[#allocation77_spill] sm:$0xff]  ;;  %v12742_v62 = vld [vmem:[#allocation39_spill] sm:$0xff] }
 0x6b5   :  { %5124 = vst.msk [vmem:[#allocation3] sm:$0xff] %vm1581_vm8, %v5077_v19 }
 0x6b8   :  { %v4183_v23 = vpop.f32.mrb[48].mxu0  ;;  %v4409_v12 = vpop.permute.xlu0 %4408  ;;  %5088 = vrot.lane.b32.xlu0 %v5050_v37, %s8333_s16  ;;  %4642 = vrot.lane.b32.xlu1 %v4603_v27, %s8329_s12 }
 0x6b9   :  { %v4229_v18 = vmul.f32 %v10869_v7, %v4183_v23  ;;  %v4185_v34 = vpop.f32.mrb[49].mxu0  ;;  %4454 = vst.msk [vmem:[#allocation3 + $0x20] sm:$0xff] %vm519_vm2, %v4409_v12 }
 0x6ba   :  { %v4186_v63 = vpop.f32.mrb[50].mxu0 }
 0x6bb   :  { %v4252_v45 = vadd.f32 %v10874_v59, %v4229_v18  ;;  %v4230_v44 = vmul.f32 %v10869_v7, %v4186_v63  ;;  %v4188_v33 = vpop.f32.mrb[51].mxu0 }
 0x6bc   :  { %4754 = vrot.lane.b32.xlu1 %v4715_v28, %s8330_s13  ;;  %4420 = vrot.lane.b32.xlu0 %v4380_v60, %s8327_s10 }
 0x6bd   :  { %v4268_v61 = vadd.f32 %v4252_v45, %v12736_v17  ;;  %v4253_v20 = vadd.f32 %v10874_v59, %v4230_v44  ;;  %v12743_v44 = vld [vmem:[#allocation127_spill] sm:$0xff] }
 0x6bf   :  { %v4284_v15 = vmax.f32 %v4268_v61, 0.0  ;;  %v4269_v53 = vadd.f32 %v4253_v20, %v12740_v42 }
 0x6c1   :  { %4300 = vst.msk [vmem:[#allocation2 + $0x49] sm:$0xff] %vm193_vm0, %v4284_v15  ;;  %v4285_v39 = vmax.f32 %v4269_v53, 0.0 }
 0x6c3   :  { %4301 = vst.msk [vmem:[#allocation2 + $0x51] sm:$0xff] %vm193_vm0, %v4285_v39 }
 0x6c8   :  { %v4811_v32 = vld [vmem:[#allocation2 + $0x42] sm:$0xff]  ;;  %v4855_v19 = vpop.permute.xlu1 %4854  ;;  %v4521_v41 = vpop.permute.xlu0 %4520 }
 0x6c9   :  { %v4827_v2 = vmul.f32 %v4811_v32, %v12741_v35  ;;  %v4492_v55 = vmul.f32 %v4811_v32, %v12742_v62  ;;  %v4923_v23 = vld [vmem:[#allocation2 + $0x48] sm:$0xff]  ;;  %4901 = vst.msk [vmem:[#allocation3 + $0x10] sm:$0xff] %vm1227_vm6, %v4855_v19  ;;  %v5162_v34 = vmul.f32 %v4811_v32, %v9577_v25  ;;  %v5195_v32 = vld [vmem:[#allocation3 + $0x38] sm:$0xff] }
 0x6ca   :  { %4566 = vst.msk [vmem:[#allocation3 + $0x20] sm:$0xff] %vm696_vm3, %v4521_v41  ;;  %v4812_v18 = vld [vmem:[#allocation2 + $0x4a] sm:$0xff]  ;;  %v4939_v8 = vmul.f32 %v4923_v23, %v12516_v13  ;;  %v4604_v27 = vmul.f32 %v4923_v23, %v8886_v1  ;;  %v4333_v45 = vmul.f32 %v4923_v23, %v12623_v3  ;;  %v12744_v13 = vld [vmem:[#allocation70_spill] sm:$0xff]  ;;  %v5188_v23 = vld [vmem:[#allocation3] sm:$0xff] }
 0x6cb   :  { %v11117_v12 = vld [vmem:[#allocation2 + $0x50] sm:$0xff]  ;;  %4866 = vrot.lane.b32.xlu1 %v4827_v2, %s8331_s14  ;;  %4532 = vrot.lane.b32.xlu0 %v4492_v55, %s8328_s11  ;;  %5178 = vst.msk [vmem:[#allocation3 + $0x68] sm:$0xff] %vm193_vm0, %v5162_v34  ;;  %v5163_v63 = vmul.f32 %v4812_v18, %v9468_v21  ;;  %v4828_v60 = vmul.f32 %v4812_v18, %v12520_v49 }
 0x6cc   :  { %v4967_v37 = vpop.permute.xlu1 %4966  ;;  %v4633_v22 = vpop.permute.xlu0 %4632  ;;  %v4334_v33 = vmul.f32 %v11117_v12, %v12743_v44  ;;  %v5035_v25 = vld [vmem:[#allocation2 + $0x49] sm:$0xff]  ;;  %4349 = vst.msk [vmem:[#allocation3 + $0x90] sm:$0xff] %vm193_vm0, %v4333_v45  ;;  %v4940_v2 = vmul.f32 %v11117_v12, %v8924_v47  ;;  %v12749_v45 = vld [vmem:[#allocation60_spill] sm:$0xff] }
 0x6cd   :  { %5013 = vst.msk [vmem:[#allocation3 + $0x10] sm:$0xff] %vm1404_vm7, %v4967_v37  ;;  %v5051_v3 = vmul.f32 %v5035_v25, %v12744_v13  ;;  %v4716_v17 = vmul.f32 %v5035_v25, %v12745_v54  ;;  %v4381_v36 = vmul.f32 %v5035_v25, %v12627_v40  ;;  %v12746_v19 = vld [vmem:[#allocation79_spill] sm:$0xff]  ;;  %v12750_v44 = vmax.f32 %v12749_v45, 0.0  ;;  %v12752_v13 = vld [vmem:[#allocation22_spill] sm:$0xff] }
 0x6ce   :  { %4678 = vst.msk [vmem:[#allocation3 + $0x20] sm:$0xff] %vm873_vm4, %v4633_v22  ;;  %v12747_v40 = vmax.f32 %v12746_v19, 0.0  ;;  %v12748_v62 = vld [vmem:[#allocation83_spill] sm:$0xff]  ;;  %v5193_v22 = vld [vmem:[#allocation3 + $0x28] sm:$0xff] }
 0x6cf   :  { %4978 = vrot.lane.b32.xlu1 %v4939_v8, %s8332_s15  ;;  %4644 = vrot.lane.b32.xlu0 %v4604_v27, %s8329_s12  ;;  %5179 = vst.msk [vmem:[#allocation3 + $0x78] sm:$0xff] %vm193_vm0, %v5163_v63  ;;  %4350 = vst.msk [vmem:[#allocation3 + $0xa0] sm:$0xff] %vm193_vm0, %v4334_v33  ;;  %v4493_v55 = vmul.f32 %v4812_v18, %v12748_v62  ;;  %v5036_v27 = vld [vmem:[#allocation2 + $0x51] sm:$0xff]  ;;  %v5241_v47 = vpack.c.bf16 %v5195_v32, %v5193_v22  ;;  %v12759_v62 = vld [vmem:[#allocation121_spill] sm:$0xff] }
 0x6d0   :  { %v5079_v1 = vpop.permute.xlu1 %5078  ;;  %v4745_v21 = vpop.permute.xlu0 %4744 }
 0x6d1   :  { %5125 = vst.msk [vmem:[#allocation3 + $0x10] sm:$0xff] %vm1581_vm8, %v5079_v1  ;;  %v12751_v1 = vld [vmem:[#allocation88_spill] sm:$0xff] }
 0x6d2   :  { %4790 = vst.msk [vmem:[#allocation3 + $0x20] sm:$0xff] %vm1050_vm5, %v4745_v21  ;;  %v5052_v21 = vmul.f32 %v5036_v27, %v12751_v1 }
 0x6d3   :  { %5090 = vrot.lane.b32.xlu1 %v5051_v3, %s8333_s16  ;;  %4756 = vrot.lane.b32.xlu0 %v4716_v17, %s8330_s13  ;;  %v4605_v3 = vmul.f32 %v11117_v12, %v12752_v13 }
 0x6d4   :  { %v4191_v61 = vpop.f32.mrb[52].mxu0  ;;  %v4411_v14 = vpop.permute.xlu1 %4410 }
 0x6d5   :  { %v4231_v20 = vmul.f32 %v10869_v7, %v4191_v61  ;;  %v4193_v28 = vpop.f32.mrb[53].mxu0  ;;  %4455 = vst.msk [vmem:[#allocation3 + $0x30] sm:$0xff] %vm519_vm2, %v4411_v14  ;;  %v4857_v15 = vpop.permute.xlu0 %4856  ;;  %v12753_v61 = vld [vmem:[#allocation86_spill] sm:$0xff]  ;;  %v12754_v14 = vld [vmem:[#allocation13_spill] sm:$0xff] }
 0x6d6   :  { %v4194_v4 = vpop.f32.mrb[54].mxu0  ;;  %4902 = vst.msk [vmem:[#allocation3 + $0x20] sm:$0xff] %vm1227_vm6, %v4857_v15  ;;  %v4382_v28 = vmul.f32 %v5036_v27, %v12754_v14 }
 0x6d7   :  { %v4254_v42 = vadd.f32 %v10874_v59, %v4231_v20  ;;  %v4232_v53 = vmul.f32 %v10869_v7, %v4194_v4  ;;  %4422 = vrot.lane.b32.xlu1 %v4381_v36, %s8327_s10  ;;  %4868 = vrot.lane.b32.xlu0 %v4828_v60, %s8331_s14  ;;  %v4196_v39 = vpop.f32.mrb[55].mxu0  ;;  %v4717_v20 = vmul.f32 %v5036_v27, %v12753_v61  ;;  %v12755_v60 = vld [vmem:[#allocation87_spill] sm:$0xff] }
 0x6d8   :  { %v4523_v35 = vpop.permute.xlu1 %4522  ;;  %v5190_v34 = vld [vmem:[#allocation3 + $0x10] sm:$0xff] }
 0x6d9   :  { %v4270_v41 = vadd.f32 %v4254_v42, %v12747_v40  ;;  %v4255_v49 = vadd.f32 %v10874_v59, %v4232_v53  ;;  %v4969_v8 = vpop.permute.xlu0 %4968  ;;  %4567 = vst.msk [vmem:[#allocation3 + $0x30] sm:$0xff] %vm696_vm3, %v4523_v35  ;;  %v5238_v37 = vpack.c.bf16 %v5190_v34, %v5188_v23  ;;  %v12756_v4 = vld [vmem:[#allocation91_spill] sm:$0xff] }
 0x6da   :  { %5014 = vst.msk [vmem:[#allocation3 + $0x20] sm:$0xff] %vm1404_vm7, %v4969_v8  ;;  %v12758_v35 = vld [vmem:[#allocation139_spill] sm:$0xff] }
 0x6db   :  { %v4286_v63 = vmax.f32 %v4270_v41, 0.0  ;;  %v4271_v33 = vadd.f32 %v4255_v49, %v12750_v44  ;;  %4980 = vrot.lane.b32.xlu0 %v4940_v2, %s8332_s15  ;;  %4534 = vrot.lane.b32.xlu1 %v4493_v55, %s8328_s11  ;;  %v12757_v41 = vld [vmem:[#allocation92_spill] sm:$0xff]  ;;  %v12760_v23 = vld [vmem:[#allocation135_spill] sm:$0xff]  ;;  %v12763_v44 = vld [vmem:[#allocation90_spill] sm:$0xff] }
 0x6dc   :  { %5320 = vmatmul.mubr.bf16.vlgmr.msra.gmra.mrb[32].mxu1 %v5238_v37  ;;  %v4635_v25 = vpop.permute.xlu1 %4634  ;;  %v12762_v37 = vld [vmem:[#allocation51_spill] sm:$0xff] }
 0x6dd   :  { %4302 = vst.msk [vmem:[#allocation2 + $0x59] sm:$0xff] %vm193_vm0, %v4286_v63  ;;  %v4287_v18 = vmax.f32 %v4271_v33, 0.0  ;;  %7727 = vmatprep.mubr.msk.bf16.mxu1 %vm193_vm0, %v5241_v47  ;;  %v5081_v54 = vpop.permute.xlu0 %5080  ;;  %v12764_v47 = vld [vmem:[#allocation95_spill] sm:$0xff] }
 0x6de   :  { %4679 = vst.msk [vmem:[#allocation3 + $0x30] sm:$0xff] %vm873_vm4, %v4635_v25 }
 0x6df   :  { %4303 = vst.msk [vmem:[#allocation2 + $0x61] sm:$0xff] %vm193_vm0, %v4287_v18  ;;  %5092 = vrot.lane.b32.xlu0 %v5052_v21, %s8333_s16  ;;  %4646 = vrot.lane.b32.xlu1 %v4605_v3, %s8329_s12 }
 0x6e0   :  { %5126 = vst.msk [vmem:[#allocation3 + $0x20] sm:$0xff] %vm1581_vm8, %v5081_v54  ;;  %v4747_v17 = vpop.permute.xlu1 %4746 }
 0x6e1   :  { %4791 = vst.msk [vmem:[#allocation3 + $0x30] sm:$0xff] %vm1050_vm5, %v4747_v17  ;;  %v4413_v36 = vpop.permute.xlu0 %4412  ;;  %v12765_v17 = vld [vmem:[#allocation97_spill] sm:$0xff] }
 0x6e2   :  { %4456 = vst.msk [vmem:[#allocation3 + $0x40] sm:$0xff] %vm519_vm2, %v4413_v36  ;;  %v12766_v61 = vmax.f32 %v12765_v17, 0.0 }
 0x6e3   :  { %4758 = vrot.lane.b32.xlu1 %v4717_v20, %s8330_s13  ;;  %4424 = vrot.lane.b32.xlu0 %v4382_v28, %s8327_s10 }
 0x6e4   :  { %v4813_v12 = vld [vmem:[#allocation2 + $0x52] sm:$0xff] }
 0x6e5   :  { %v4829_v15 = vmul.f32 %v4813_v12, %v12755_v60  ;;  %v4494_v42 = vmul.f32 %v4813_v12, %v12756_v4  ;;  %v4925_v53 = vld [vmem:[#allocation2 + $0x58] sm:$0xff]  ;;  %v5164_v19 = vmul.f32 %v4813_v12, %v9651_v51 }
 0x6e6   :  { %v4814_v39 = vld [vmem:[#allocation2 + $0x5a] sm:$0xff]  ;;  %v4941_v40 = vmul.f32 %v4925_v53, %v12632_v52  ;;  %v4606_v49 = vmul.f32 %v4925_v53, %v12757_v41  ;;  %v4335_v55 = vmul.f32 %v4925_v53, %v12759_v62  ;;  %v5199_v62 = vld [vmem:[#allocation3 + $0x58] sm:$0xff] }
 0x6e7   :  { %v4926_v32 = vld [vmem:[#allocation2 + $0x60] sm:$0xff]  ;;  %4870 = vrot.lane.b32.xlu1 %v4829_v15, %s8331_s14  ;;  %4536 = vrot.lane.b32.xlu0 %v4494_v42, %s8328_s11  ;;  %5180 = vst.msk [vmem:[#allocation3 + $0x88] sm:$0xff] %vm193_vm0, %v5164_v19  ;;  %v5165_v2 = vmul.f32 %v4814_v39, %v12758_v35  ;;  %v4830_v18 = vmul.f32 %v4814_v39, %v12764_v47  ;;  %v12773_v47 = vld [vmem:[#allocation140_spill] sm:$0xff] }
 0x6e8   :  { %v4336_v34 = vmul.f32 %v4926_v32, %v12760_v23  ;;  %v5037_v8 = vld [vmem:[#allocation2 + $0x59] sm:$0xff]  ;;  %4351 = vst.msk [vmem:[#allocation3 + $0xb0] sm:$0xff] %vm193_vm0, %v4335_v55  ;;  %v4942_v14 = vmul.f32 %v4926_v32, %v12534_v43  ;;  %v4495_v28 = vmul.f32 %v4814_v39, %v12535_v11  ;;  %v5038_v15 = vld [vmem:[#allocation2 + $0x61] sm:$0xff]  ;;  %v4607_v43 = vmul.f32 %v4926_v32, %v12537_v26 }
 0x6e9   :  { %5181 = vst.msk [vmem:[#allocation3 + $0x98] sm:$0xff] %vm193_vm0, %v5165_v2  ;;  %v12761_v51 = vld [vmem:[#allocation89_spill] sm:$0xff]  ;;  %v4718_v22 = vmul.f32 %v5037_v8, %v12762_v37  ;;  %v4383_v33 = vmul.f32 %v5037_v8, %v12763_v44  ;;  %v5054_v11 = vmul.f32 %v5038_v15, %v12536_v50  ;;  %v4384_v41 = vmul.f32 %v5038_v15, %v12423_v16  ;;  %v12772_v44 = vld [vmem:[#allocation24_spill] sm:$0xff] }
 0x6ea   :  { %4352 = vst.msk [vmem:[#allocation3 + $0xc0] sm:$0xff] %vm193_vm0, %v4336_v34  ;;  %v5053_v52 = vmul.f32 %v5037_v8, %v12761_v51  ;;  %v5192_v16 = vld [vmem:[#allocation3 + $0x20] sm:$0xff]  ;;  %v12769_v34 = vld [vmem:[#allocation102_spill] sm:$0xff] }
 0x6eb   :  { %4982 = vrot.lane.b32.xlu1 %v4941_v40, %s8332_s15  ;;  %4648 = vrot.lane.b32.xlu0 %v4606_v49, %s8329_s12  ;;  %v4719_v40 = vmul.f32 %v5038_v15, %v12640_v10 }
 0x6ef   :  { %5094 = vrot.lane.b32.xlu1 %v5053_v52, %s8333_s16  ;;  %4760 = vrot.lane.b32.xlu0 %v4718_v22, %s8330_s13  ;;  %v5197_v52 = vld [vmem:[#allocation3 + $0x48] sm:$0xff] }
 0x6f0   :  { %v4199_v27 = vpop.f32.mrb[56].mxu0  ;;  %v4859_v25 = vpop.permute.xlu1 %4858 }
 0x6f1   :  { %v4233_v63 = vmul.f32 %v10869_v7, %v4199_v27  ;;  %v4201_v45 = vpop.f32.mrb[57].mxu0  ;;  %v4525_v1 = vpop.permute.xlu0 %4524  ;;  %4903 = vst.msk [vmem:[#allocation3 + $0x30] sm:$0xff] %vm1227_vm6, %v4859_v25  ;;  %v5243_v27 = vpack.c.bf16 %v5199_v62, %v5197_v52  ;;  %v12781_v62 = vld [vmem:[#allocation93_spill] sm:$0xff] }
 0x6f2   :  { %4568 = vst.msk [vmem:[#allocation3 + $0x40] sm:$0xff] %vm696_vm3, %v4525_v1  ;;  %v4202_v13 = vpop.f32.mrb[58].mxu0 }
 0x6f3   :  { %v4256_v21 = vadd.f32 %v10874_v59, %v4233_v63  ;;  %4426 = vrot.lane.b32.xlu1 %v4383_v33, %s8327_s10  ;;  %4872 = vrot.lane.b32.xlu0 %v4830_v18, %s8331_s14  ;;  %v4234_v3 = vmul.f32 %v10869_v7, %v4202_v13  ;;  %v4204_v54 = vpop.f32.mrb[59].mxu0  ;;  %v12767_v7 = vld [vmem:[#allocation41_spill] sm:$0xff]  ;;  %v12771_v63 = vld [vmem:[#allocation98_spill] sm:$0xff] }
 0x6f4   :  { %v4971_v12 = vpop.permute.xlu1 %4970  ;;  %v12768_v42 = vmax.f32 %v12767_v7, 0.0  ;;  %v12774_v13 = vld [vmem:[#allocation138_spill] sm:$0xff]  ;;  %v12775_v54 = vld [vmem:[#allocation99_spill] sm:$0xff] }
 0x6f5   :  { %v4272_v20 = vadd.f32 %v4256_v21, %v12766_v61  ;;  %v4257_v36 = vadd.f32 %v10874_v59, %v4234_v3  ;;  %v4637_v60 = vpop.permute.xlu0 %4636  ;;  %5015 = vst.msk [vmem:[#allocation3 + $0x30] sm:$0xff] %vm1404_vm7, %v4971_v12  ;;  %v12776_v61 = vld [vmem:[#allocation107_spill] sm:$0xff]  ;;  %v8315_v12 = vld [vmem:[%s10857_s25] ss:$0 sm:$0xff]  ;;  %s8350_s25 = smov 18  }
 0x6f6   :  { %4680 = vst.msk [vmem:[#allocation3 + $0x40] sm:$0xff] %vm873_vm4, %v4637_v60  ;;  %s7671_s28 = sld [smem:[%s11926_s0 + %s8350_s25]]  }
 0x6f7   :  { %v4288_v4 = vmax.f32 %v4272_v20, 0.0  ;;  %4984 = vrot.lane.b32.xlu0 %v4942_v14, %s8332_s15  ;;  %4538 = vrot.lane.b32.xlu1 %v4495_v28, %s8328_s11  ;;  %v4273_v53 = vadd.f32 %v4257_v36, %v12768_v42  ;;  %v12778_v42 = vld [vmem:[#allocation108_spill] sm:$0xff] }
 0x6f8   :  { %v5083_v39 = vpop.permute.xlu1 %5082 }
 0x6f9   :  { %4304 = vst.msk [vmem:[#allocation2 + $0x69] sm:$0xff] %vm193_vm0, %v4288_v4  ;;  %v4289_v59 = vmax.f32 %v4273_v53, 0.0  ;;  %v4749_v19 = vpop.permute.xlu0 %4748  ;;  %v12777_v4 = vld [vmem:[#allocation15_spill] sm:$0xff] }
 0x6fa   :  { %5127 = vst.msk [vmem:[#allocation3 + $0x30] sm:$0xff] %vm1581_vm8, %v5083_v39 }
 0x6fb   :  { %4792 = vst.msk [vmem:[#allocation3 + $0x40] sm:$0xff] %vm1050_vm5, %v4749_v19  ;;  %5096 = vrot.lane.b32.xlu0 %v5054_v11, %s8333_s16  ;;  %4650 = vrot.lane.b32.xlu1 %v4607_v43, %s8329_s12  ;;  %v8316_v43 = vld [vmem:[%s10864_s29] ss:$0 sm:$0xff]  ;;  %s8351_s29 = smov 19  }
 0x6fc   :  { %4305 = vst.msk [vmem:[#allocation2 + $0x71] sm:$0xff] %vm193_vm0, %v4289_v59  ;;  %v4415_v50 = vpop.permute.xlu1 %4414  ;;  %s7672_s2 = sld [smem:[%s11926_s0 + %s8351_s29]]  }
 0x6fd   :  { %v4861_v49 = vpop.permute.xlu0 %4860  ;;  %4457 = vst.msk [vmem:[#allocation3 + $0x50] sm:$0xff] %vm519_vm2, %v4415_v50  ;;  %s7685_s29 = sld [smem:[%s11926_s0 + %s8328_s11]]  }
 0x6fe   :  { %4904 = vst.msk [vmem:[#allocation3 + $0x40] sm:$0xff] %vm1227_vm6, %v4861_v49 }
 0x6ff   :  { %4762 = vrot.lane.b32.xlu1 %v4719_v40, %s8330_s13  ;;  %4428 = vrot.lane.b32.xlu0 %v4384_v41, %s8327_s10  ;;  %v12779_v40 = vld [vmem:[#allocation71_spill] sm:$0xff] }
 0x700   :  { %v4815_v26 = vld [vmem:[#allocation2 + $0x62] sm:$0xff]  ;;  %v4527_v55 = vpop.permute.xlu1 %4526  ;;  %v12780_v41 = vmax.f32 %v12779_v40, 0.0 }
 0x701   :  { %v4927_v32 = vld [vmem:[#allocation2 + $0x68] sm:$0xff]  ;;  %v4831_v35 = vmul.f32 %v4815_v26, %v12642_v6  ;;  %v4496_v2 = vmul.f32 %v4815_v26, %v12641_v58  ;;  %v4973_v10 = vpop.permute.xlu0 %4972  ;;  %v5166_v8 = vmul.f32 %v4815_v26, %v12769_v34  ;;  %4569 = vst.msk [vmem:[#allocation3 + $0x50] sm:$0xff] %vm696_vm3, %v4527_v55 }
 0x702   :  { %v5194_v23 = vld [vmem:[#allocation3 + $0x30] sm:$0xff]  ;;  %5016 = vst.msk [vmem:[#allocation3 + $0x40] sm:$0xff] %vm1404_vm7, %v4973_v10  ;;  %v4943_v45 = vmul.f32 %v4927_v32, %v12771_v63  ;;  %v4608_v33 = vmul.f32 %v4927_v32, %v12772_v44  ;;  %v12782_v10 = vmax.f32 %v12781_v62, 0.0 }
 0x703   :  { %4874 = vrot.lane.b32.xlu1 %v4831_v35, %s8331_s14  ;;  %4540 = vrot.lane.b32.xlu0 %v4496_v2, %s8328_s11  ;;  %v5240_v51 = vpack.c.bf16 %v5194_v23, %v5192_v16  ;;  %v4816_v6 = vld [vmem:[#allocation2 + $0x6a] sm:$0xff]  ;;  %v12770_v58 = vld [vmem:[#allocation118_spill] sm:$0xff]  ;;  %5182 = vst.msk [vmem:[#allocation3 + $0xa8] sm:$0xff] %vm193_vm0, %v5166_v8 }
 0x704   :  { %v4928_v37 = vld [vmem:[#allocation2 + $0x70] sm:$0xff]  ;;  %v4337_v22 = vmul.f32 %v4927_v32, %v12770_v58  ;;  %v5167_v18 = vmul.f32 %v4816_v6, %v12773_v47  ;;  %v4639_v1 = vpop.permute.xlu1 %4638  ;;  %v4832_v53 = vmul.f32 %v4816_v6, %v12778_v42  ;;  %v4497_v32 = vmul.f32 %v4816_v6, %v12548_v31  ;;  %v5201_v42 = vld [vmem:[#allocation3 + $0x68] sm:$0xff] }
 0x705   :  { %5328 = vmatmul.mubr.bf16.gmra.mrb[36].mxu1 %v5240_v51  ;;  %v5085_v25 = vpop.permute.xlu0 %5084  ;;  %v5039_v21 = vld [vmem:[#allocation2 + $0x69] sm:$0xff]  ;;  %v4338_v3 = vmul.f32 %v4928_v37, %v12774_v13  ;;  %4681 = vst.msk [vmem:[#allocation3 + $0x50] sm:$0xff] %vm873_vm4, %v4639_v1  ;;  %v4944_v26 = vmul.f32 %v4928_v37, %v12432_v46  ;;  %v5040_v35 = vld [vmem:[#allocation2 + $0x71] sm:$0xff]  ;;  %v4609_v34 = vmul.f32 %v4928_v37, %v12551_v5  ;;  %v12783_v37 = vld [vmem:[#allocation117_spill] sm:$0xff] }
 0x706   :  { %4353 = vst.msk [vmem:[#allocation3 + $0xd0] sm:$0xff] %vm193_vm0, %v4337_v22  ;;  %7728 = vmatprep.mubr.msk.bf16.mxu1 %vm193_vm0, %v5243_v27  ;;  %5183 = vst.msk [vmem:[#allocation3 + $0xb8] sm:$0xff] %vm193_vm0, %v5167_v18  ;;  %v5055_v17 = vmul.f32 %v5039_v21, %v12775_v54  ;;  %v4720_v20 = vmul.f32 %v5039_v21, %v12776_v61  ;;  %v4385_v7 = vmul.f32 %v5039_v21, %v12777_v4  ;;  %v12785_v18 = vld [vmem:[#allocation103_spill] sm:$0xff]  ;;  %v12786_v1 = vld [vmem:[#allocation113_spill] sm:$0xff] }
 0x707   :  { %5128 = vst.msk [vmem:[#allocation3 + $0x40] sm:$0xff] %vm1581_vm8, %v5085_v25  ;;  %4986 = vrot.lane.b32.xlu1 %v4943_v45, %s8332_s15  ;;  %4652 = vrot.lane.b32.xlu0 %v4608_v33, %s8329_s12  ;;  %v5056_v23 = vmul.f32 %v5040_v35, %v12550_v57  ;;  %v4721_v8 = vmul.f32 %v5040_v35, %v12552_v30  ;;  %v12788_v54 = vld [vmem:[#allocation54_spill] sm:$0xff]  ;;  %v5203_v61 = vld [vmem:[#allocation3 + $0x78] sm:$0xff] }
 0x708   :  { %4354 = vst.msk [vmem:[#allocation3 + $0xe0] sm:$0xff] %vm193_vm0, %v4338_v3  ;;  %v4751_v14 = vpop.permute.xlu1 %4750  ;;  %v4386_v51 = vmul.f32 %v5040_v35, %v12553_v24  ;;  %v12784_v24 = vld [vmem:[#allocation101_spill] sm:$0xff]  ;;  %v12792_v40 = vld [vmem:[#allocation43_spill] sm:$0xff] }
 0x709   :  { %v4417_v28 = vpop.permute.xlu0 %4416  ;;  %4793 = vst.msk [vmem:[#allocation3 + $0x50] sm:$0xff] %vm1050_vm5, %v4751_v14 }
 0x70a   :  { %4458 = vst.msk [vmem:[#allocation3 + $0x60] sm:$0xff] %vm519_vm2, %v4417_v28  ;;  %v12789_v28 = vld [vmem:[#allocation115_spill] sm:$0xff] }
 0x70b   :  { %5098 = vrot.lane.b32.xlu1 %v5055_v17, %s8333_s16  ;;  %4764 = vrot.lane.b32.xlu0 %v4720_v20, %s8330_s13  ;;  %v4207_v36 = vpop.f32.mrb[60].mxu0 }
 0x70c   :  { %v4235_v60 = vmul.f32 %v8315_v12, %v4207_v36  ;;  %v4209_v15 = vpop.f32.mrb[61].mxu0 }
 0x70d   :  { %v4210_v11 = vpop.f32.mrb[62].mxu0 }
 0x70e   :  { %v4258_v59 = vadd.f32 %v8316_v43, %v4235_v60  ;;  %v4236_v39 = vmul.f32 %v8315_v12, %v4210_v11  ;;  %v4212_v19 = vpop.f32.mrb[63].mxu0  ;;  %v12790_v12 = vld [vmem:[#allocation123_spill] sm:$0xff]  ;;  %v5196_v15 = vld [vmem:[#allocation3 + $0x40] sm:$0xff]  ;;  %v5245_v11 = vpack.c.bf16 %v5203_v61, %v5201_v42 }
 0x70f   :  { %4430 = vrot.lane.b32.xlu1 %v4385_v7, %s8327_s10  ;;  %4876 = vrot.lane.b32.xlu0 %v4832_v53, %s8331_s14 }
 0x710   :  { %v4274_v50 = vadd.f32 %v4258_v59, %v12780_v41  ;;  %v4259_v49 = vadd.f32 %v8316_v43, %v4236_v39  ;;  %v12791_v39 = vld [vmem:[#allocation125_spill] sm:$0xff] }
 0x712   :  { %v4290_v2 = vmax.f32 %v4274_v50, 0.0  ;;  %v4275_v55 = vadd.f32 %v4259_v49, %v12782_v10  ;;  %v12795_v10 = vld [vmem:[#allocation122_spill] sm:$0xff] }
 0x713   :  { %4988 = vrot.lane.b32.xlu0 %v4944_v26, %s8332_s15  ;;  %4542 = vrot.lane.b32.xlu1 %v4497_v32, %s8328_s11  ;;  %v12793_v32 = vld [vmem:[#allocation76_spill] sm:$0xff] }
 0x714   :  { %4306 = vst.msk [vmem:[#allocation2 + $0x79] sm:$0xff] %vm193_vm0, %v4290_v2  ;;  %v4291_v16 = vmax.f32 %v4275_v55, 0.0  ;;  %v12794_v2 = vld [vmem:[#allocation120_spill] sm:$0xff] }
 0x716   :  { %4307 = vst.msk [vmem:[#allocation2 + $0x81] sm:$0xff] %vm193_vm0, %v4291_v16  ;;  %v4863_v46 = vpop.permute.xlu1 %4862  ;;  %v4529_v31 = vpop.permute.xlu0 %4528  ;;  %v12796_v16 = vld [vmem:[#allocation64_spill] sm:$0xff] }
 0x717   :  { %5100 = vrot.lane.b32.xlu0 %v5056_v23, %s8333_s16  ;;  %4654 = vrot.lane.b32.xlu1 %v4609_v34, %s8329_s12  ;;  %4905 = vst.msk [vmem:[#allocation3 + $0x50] sm:$0xff] %vm1227_vm6, %v4863_v46 }
 0x718   :  { %4570 = vst.msk [vmem:[#allocation3 + $0x60] sm:$0xff] %vm696_vm3, %v4529_v31 }
 0x71a   :  { %v4975_v5 = vpop.permute.xlu1 %4974  ;;  %v4641_v52 = vpop.permute.xlu0 %4640 }
 0x71b   :  { %4766 = vrot.lane.b32.xlu1 %v4721_v8, %s8330_s13  ;;  %4432 = vrot.lane.b32.xlu0 %v4386_v51, %s8327_s10  ;;  %v4817_v57 = vld [vmem:[#allocation2 + $0x72] sm:$0xff]  ;;  %5017 = vst.msk [vmem:[#allocation3 + $0x50] sm:$0xff] %vm1404_vm7, %v4975_v5 }
 0x71c   :  { %v4833_v6 = vmul.f32 %v4817_v57, %v12651_v38  ;;  %v4498_v58 = vmul.f32 %v4817_v57, %v12783_v37  ;;  %v4929_v22 = vld [vmem:[#allocation2 + $0x78] sm:$0xff]  ;;  %4682 = vst.msk [vmem:[#allocation3 + $0x60] sm:$0xff] %vm873_vm4, %v4641_v52  ;;  %v5168_v27 = vmul.f32 %v4817_v57, %v12784_v24  ;;  %v5043_v57 = vld [vmem:[#allocation2 + $0x89] sm:$0xff] }
 0x71d   :  { %v4818_v30 = vld [vmem:[#allocation2 + $0x7a] sm:$0xff]  ;;  %v4819_v63 = vld [vmem:[#allocation2 + $0x82] sm:$0xff]  ;;  %v4945_v45 = vmul.f32 %v4929_v22, %v12434_v0  ;;  %v4610_v33 = vmul.f32 %v4929_v22, %v12556_v48  ;;  %v4339_v25 = vmul.f32 %v4929_v22, %v12785_v18 }
 0x71e   :  { %5184 = vst.msk [vmem:[#allocation3 + $0xc8] sm:$0xff] %vm193_vm0, %v5168_v27  ;;  %v5087_v38 = vpop.permute.xlu1 %5086  ;;  %v4753_v44 = vpop.permute.xlu0 %4752  ;;  %v5169_v47 = vmul.f32 %v4818_v30, %v12653_v9  ;;  %v5170_v21 = vmul.f32 %v4819_v63, %v12786_v1  ;;  %v5041_v13 = vld [vmem:[#allocation2 + $0x79] sm:$0xff]  ;;  %v12787_v9 = vld [vmem:[#allocation74_spill] sm:$0xff]  ;;  %v4834_v60 = vmul.f32 %v4818_v30, %v12790_v12  ;;  %v4499_v41 = vmul.f32 %v4818_v30, %v12792_v40  ;;  %v5207_v27 = vld [vmem:[#allocation3 + $0x98] sm:$0xff] }
 0x71f   :  { %4878 = vrot.lane.b32.xlu1 %v4833_v6, %s8331_s14  ;;  %4544 = vrot.lane.b32.xlu0 %v4498_v58, %s8328_s11  ;;  %5129 = vst.msk [vmem:[#allocation3 + $0x50] sm:$0xff] %vm1581_vm8, %v5087_v38  ;;  %v5057_v3 = vmul.f32 %v5041_v13, %v12787_v9  ;;  %v4722_v17 = vmul.f32 %v5041_v13, %v12788_v54  ;;  %v4930_v53 = vld [vmem:[#allocation2 + $0x80] sm:$0xff]  ;;  %v4931_v34 = vld [vmem:[#allocation2 + $0x88] sm:$0xff] }
 0x720   :  { %4794 = vst.msk [vmem:[#allocation3 + $0x60] sm:$0xff] %vm1050_vm5, %v4753_v44  ;;  %v4387_v36 = vmul.f32 %v5041_v13, %v12789_v28  ;;  %v4946_v19 = vmul.f32 %v4930_v53, %v12791_v39  ;;  %v5042_v50 = vld [vmem:[#allocation2 + $0x81] sm:$0xff]  ;;  %v4611_v62 = vmul.f32 %v4930_v53, %v12794_v2  ;;  %v4835_v23 = vmul.f32 %v4819_v63, %v12796_v16  ;;  %v12797_v8 = vld [vmem:[#allocation129_spill] sm:$0xff]  ;;  %v12798_v6 = vld [vmem:[#allocation131_spill] sm:$0xff] }
 0x721   :  { %5185 = vst.msk [vmem:[#allocation3 + $0xd8] sm:$0xff] %vm193_vm0, %v5169_v47  ;;  %4355 = vst.msk [vmem:[#allocation3 + $0xf0] sm:$0xff] %vm193_vm0, %v4339_v25  ;;  %v5058_v35 = vmul.f32 %v5042_v50, %v12793_v32  ;;  %v4723_v55 = vmul.f32 %v5042_v50, %v12795_v10  ;;  %v4947_v51 = vmul.f32 %v4931_v34, %v12797_v8  ;;  %v5205_v47 = vld [vmem:[#allocation3 + $0x88] sm:$0xff] }
 0x722   :  { %5186 = vst.msk [vmem:[#allocation3 + $0xe8] sm:$0xff] %vm193_vm0, %v5170_v21  ;;  %v4419_v0 = vpop.permute.xlu1 %4418  ;;  %v4865_v48 = vpop.permute.xlu0 %4864  ;;  %v5059_v37 = vmul.f32 %v5043_v57, %v12798_v6  ;;  %v5247_v18 = vpack.c.bf16 %v5207_v27, %v5205_v47 }
 0x723   :  { %4990 = vrot.lane.b32.xlu1 %v4945_v45, %s8332_s15  ;;  %4656 = vrot.lane.b32.xlu0 %v4610_v33, %s8329_s12  ;;  %4459 = vst.msk [vmem:[#allocation3 + $0x70] sm:$0xff] %vm519_vm2, %v4419_v0 }
 0x724   :  { %4906 = vst.msk [vmem:[#allocation3 + $0x60] sm:$0xff] %vm1227_vm6, %v4865_v48 }
 0x725   :  { %v5213_v16 = vld [vmem:[#allocation3 + $0xc8] sm:$0xff] }
 0x726   :  { %v4977_v20 = vpop.permute.xlu0 %4976  ;;  %v4531_v14 = vpop.permute.xlu1 %4530  ;;  %v5198_v4 = vld [vmem:[#allocation3 + $0x50] sm:$0xff] }
 0x727   :  { %5102 = vrot.lane.b32.xlu1 %v5057_v3, %s8333_s16  ;;  %4768 = vrot.lane.b32.xlu0 %v4722_v17, %s8330_s13  ;;  %5018 = vst.msk [vmem:[#allocation3 + $0x60] sm:$0xff] %vm1404_vm7, %v4977_v20  ;;  %v5242_v7 = vpack.c.bf16 %v5198_v4, %v5196_v15  ;;  %v5209_v4 = vld [vmem:[#allocation3 + $0xa8] sm:$0xff] }
 0x728   :  { %4571 = vst.msk [vmem:[#allocation3 + $0x70] sm:$0xff] %vm696_vm3, %v4531_v14  ;;  %v5211_v14 = vld [vmem:[#allocation3 + $0xb8] sm:$0xff] }
 0x729   :  { %5336 = vmatmul.mubr.bf16.gmra.mrb[40].mxu1 %v5242_v7  ;;  %v5249_v7 = vpack.c.bf16 %v5211_v14, %v5209_v4  ;;  %v5215_v32 = vld [vmem:[#allocation3 + $0xd8] sm:$0xff] }
 0x72a   :  { %v5089_v43 = vpop.permute.xlu0 %5088  ;;  %v4643_v59 = vpop.permute.xlu1 %4642  ;;  %7729 = vmatprep.mubr.msk.bf16.mxu1 %vm193_vm0, %v5245_v11 }
 0x72b   :  { %4434 = vrot.lane.b32.xlu1 %v4387_v36, %s8327_s10  ;;  %4880 = vrot.lane.b32.xlu0 %v4834_v60, %s8331_s14  ;;  %5130 = vst.msk [vmem:[#allocation3 + $0x60] sm:$0xff] %vm1581_vm8, %v5089_v43  ;;  %s8349_s10 = smov 17  }
 0x72c   :  { %4683 = vst.msk [vmem:[#allocation3 + $0x70] sm:$0xff] %vm873_vm4, %v4643_v59  ;;  %s7670_s24 = sld [smem:[%s11926_s0 + %s8349_s10]]   ;;  %s8356_s10 = smov 2  }
 0x72e   :  { %v4755_v49 = vpop.permute.xlu1 %4754  ;;  %v4421_v26 = vpop.permute.xlu0 %4420 }
 0x72f   :  { %4992 = vrot.lane.b32.xlu0 %v4946_v19, %s8332_s15  ;;  %4546 = vrot.lane.b32.xlu1 %v4499_v41, %s8328_s11  ;;  %4795 = vst.msk [vmem:[#allocation3 + $0x70] sm:$0xff] %vm1050_vm5, %v4755_v49  ;;  %s8367_s11 = smov 36  }
 0x730   :  { %4460 = vst.msk [vmem:[#allocation3 + $0x80] sm:$0xff] %vm519_vm2, %v4421_v26 }
 0x732   :  { %v5200_v38 = vld [vmem:[#allocation3 + $0x60] sm:$0xff] }
 0x733   :  { %5104 = vrot.lane.b32.xlu0 %v5058_v35, %s8333_s16  ;;  %4658 = vrot.lane.b32.xlu1 %v4611_v62, %s8329_s12  ;;  %s8345_s12 = smov 13  }
 0x737   :  { %4770 = vrot.lane.b32.xlu1 %v4723_v55, %s8330_s13 }
 0x73b   :  { %4882 = vrot.lane.b32.xlu1 %v4835_v23, %s8331_s14  ;;  %v5251_v23 = vpack.c.bf16 %v5215_v32, %v5213_v16  ;;  %v5438_v32 = vld [vmem:[%s7668_s18 + $0x20] sm:$0xff] }
 0x73d   :  { %v4867_v46 = vpop.permute.xlu1 %4866  ;;  %v4533_v31 = vpop.permute.xlu0 %4532 }
 0x73e   :  { %4907 = vst.msk [vmem:[#allocation3 + $0x70] sm:$0xff] %vm1227_vm6, %v4867_v46 }
 0x73f   :  { %4572 = vst.msk [vmem:[#allocation3 + $0x80] sm:$0xff] %vm696_vm3, %v4533_v31  ;;  %4994 = vrot.lane.b32.xlu1 %v4947_v51, %s8332_s15  ;;  %s11500_s15 = sld [smem:[%s11926_s0 + %s8352_s3]]  }
 0x740   :  { %s7686_s3 = sld [smem:[%s11926_s0 + %s8366_s30]]  }
 0x741   :  { %v4979_v5 = vpop.permute.xlu1 %4978  ;;  %v4645_v52 = vpop.permute.xlu0 %4644 }
 0x742   :  { %5019 = vst.msk [vmem:[#allocation3 + $0x70] sm:$0xff] %vm1404_vm7, %v4979_v5 }
 0x743   :  { %4684 = vst.msk [vmem:[#allocation3 + $0x80] sm:$0xff] %vm873_vm4, %v4645_v52  ;;  %5106 = vrot.lane.b32.xlu1 %v5059_v37, %s8333_s16  ;;  %s7666_s16 = sld [smem:[%s11926_s0 + %s8345_s12]]  }
 0x745   :  { %v5091_v58 = vpop.permute.xlu1 %5090  ;;  %v4757_v22 = vpop.permute.xlu0 %4756 }
 0x746   :  { %5131 = vst.msk [vmem:[#allocation3 + $0x70] sm:$0xff] %vm1581_vm8, %v5091_v58 }
 0x747   :  { %4796 = vst.msk [vmem:[#allocation3 + $0x80] sm:$0xff] %vm1050_vm5, %v4757_v22 }
 0x749   :  { %v4423_v30 = vpop.permute.xlu1 %4422  ;;  %v4869_v24 = vpop.permute.xlu0 %4868 }
 0x74a   :  { %4461 = vst.msk [vmem:[#allocation3 + $0x90] sm:$0xff] %vm519_vm2, %v4423_v30  ;;  %v5217_v30 = vld [vmem:[#allocation3 + $0xe8] sm:$0xff] }
 0x74b   :  { %4908 = vst.msk [vmem:[#allocation3 + $0x80] sm:$0xff] %vm1227_vm6, %v4869_v24 }
 0x74d   :  { %v4981_v63 = vpop.permute.xlu0 %4980  ;;  %v4535_v45 = vpop.permute.xlu1 %4534  ;;  %v5202_v44 = vld [vmem:[#allocation3 + $0x70] sm:$0xff] }
 0x74e   :  { %5020 = vst.msk [vmem:[#allocation3 + $0x80] sm:$0xff] %vm1404_vm7, %v4981_v63  ;;  %v5244_v33 = vpack.c.bf16 %v5202_v44, %v5200_v38  ;;  %v5219_v44 = vld [vmem:[#allocation3 + $0xf8] sm:$0xff] }
 0x74f   :  { %4573 = vst.msk [vmem:[#allocation3 + $0x90] sm:$0xff] %vm696_vm3, %v4535_v45 }
 0x750   :  { %5344 = vmatmul.mubr.bf16.gmra.mrb[44].mxu1 %v5244_v33  ;;  %v5253_v33 = vpack.c.bf16 %v5219_v44, %v5217_v30 }
 0x751   :  { %v5093_v25 = vpop.permute.xlu0 %5092  ;;  %v4647_v1 = vpop.permute.xlu1 %4646  ;;  %7730 = vmatprep.mubr.msk.bf16.mxu1 %vm193_vm0, %v5247_v18 }
 0x752   :  { %5132 = vst.msk [vmem:[#allocation3 + $0x80] sm:$0xff] %vm1581_vm8, %v5093_v25 }
 0x753   :  { %4685 = vst.msk [vmem:[#allocation3 + $0x90] sm:$0xff] %vm873_vm4, %v4647_v1 }
 0x755   :  { %v4759_v21 = vpop.permute.xlu1 %4758  ;;  %v4425_v13 = vpop.permute.xlu0 %4424 }
 0x756   :  { %4797 = vst.msk [vmem:[#allocation3 + $0x90] sm:$0xff] %vm1050_vm5, %v4759_v21  ;;  %v11404_v21 = vld [vmem:[%s7666_s16] ss:$0 sm:$0xff]  ;;  %s8353_s16 = smov 23  }
 0x757   :  { %4462 = vst.msk [vmem:[#allocation3 + $0xa0] sm:$0xff] %vm519_vm2, %v4425_v13  ;;  %s11511_s6 = sld [smem:[%s11926_s0 + %s8353_s16]]   ;;  %s8368_s16 = smov 38  }
 0x759   :  { %v4871_v0 = vpop.permute.xlu1 %4870  ;;  %v4537_v48 = vpop.permute.xlu0 %4536  ;;  %v5204_v12 = vld [vmem:[#allocation3 + $0x80] sm:$0xff] }
 0x75a   :  { %4909 = vst.msk [vmem:[#allocation3 + $0x90] sm:$0xff] %vm1227_vm6, %v4871_v0 }
 0x75b   :  { %4574 = vst.msk [vmem:[#allocation3 + $0xa0] sm:$0xff] %vm696_vm3, %v4537_v48 }
 0x75d   :  { %v4983_v9 = vpop.permute.xlu1 %4982  ;;  %v4649_v3 = vpop.permute.xlu0 %4648 }
 0x75e   :  { %5021 = vst.msk [vmem:[#allocation3 + $0x90] sm:$0xff] %vm1404_vm7, %v4983_v9  ;;  %v11408_v9 = vld [vmem:[%s7667_s7] ss:$0 sm:$0xff]  ;;  %s8354_s7 = smov 20  }
 0x75f   :  { %4686 = vst.msk [vmem:[#allocation3 + $0xa0] sm:$0xff] %vm873_vm4, %v4649_v3  ;;  %s7673_s17 = sld [smem:[%s11926_s0 + %s8354_s7]]   ;;  %s8369_s7 = smov 34  }
 0x761   :  { %v5095_v54 = vpop.permute.xlu1 %5094  ;;  %v4761_v17 = vpop.permute.xlu0 %4760 }
 0x762   :  { %5133 = vst.msk [vmem:[#allocation3 + $0x90] sm:$0xff] %vm1581_vm8, %v5095_v54 }
 0x763   :  { %4798 = vst.msk [vmem:[#allocation3 + $0xa0] sm:$0xff] %vm1050_vm5, %v4761_v17 }
 0x765   :  { %v4427_v61 = vpop.permute.xlu1 %4426  ;;  %v4873_v20 = vpop.permute.xlu0 %4872 }
 0x766   :  { %4463 = vst.msk [vmem:[#allocation3 + $0xb0] sm:$0xff] %vm519_vm2, %v4427_v61 }
 0x767   :  { %4910 = vst.msk [vmem:[#allocation3 + $0xa0] sm:$0xff] %vm1227_vm6, %v4873_v20 }
 0x769   :  { %v4985_v28 = vpop.permute.xlu0 %4984  ;;  %v4539_v36 = vpop.permute.xlu1 %4538  ;;  %v5206_v60 = vld [vmem:[#allocation3 + $0x90] sm:$0xff] }
 0x76a   :  { %5022 = vst.msk [vmem:[#allocation3 + $0xa0] sm:$0xff] %vm1404_vm7, %v4985_v28  ;;  %v5246_v15 = vpack.c.bf16 %v5206_v60, %v5204_v12 }
 0x76b   :  { %4575 = vst.msk [vmem:[#allocation3 + $0xb0] sm:$0xff] %vm696_vm3, %v4539_v36 }
 0x76c   :  { %5352 = vmatmul.mubr.bf16.gmra.mrb[48].mxu1 %v5246_v15 }
 0x76d   :  { %v5097_v42 = vpop.permute.xlu0 %5096  ;;  %v4651_v53 = vpop.permute.xlu1 %4650  ;;  %7731 = vmatprep.mubr.msk.bf16.mxu1 %vm193_vm0, %v5249_v7 }
 0x76e   :  { %5134 = vst.msk [vmem:[#allocation3 + $0xa0] sm:$0xff] %vm1581_vm8, %v5097_v42 }
 0x76f   :  { %4687 = vst.msk [vmem:[#allocation3 + $0xb0] sm:$0xff] %vm873_vm4, %v4651_v53 }
 0x771   :  { %v4763_v11 = vpop.permute.xlu1 %4762  ;;  %v4429_v43 = vpop.permute.xlu0 %4428 }
 0x772   :  { %4799 = vst.msk [vmem:[#allocation3 + $0xb0] sm:$0xff] %vm1050_vm5, %v4763_v11 }
 0x773   :  { %4464 = vst.msk [vmem:[#allocation3 + $0xc0] sm:$0xff] %vm519_vm2, %v4429_v43 }
 0x775   :  { %v4875_v59 = vpop.permute.xlu1 %4874  ;;  %v4541_v39 = vpop.permute.xlu0 %4540  ;;  %v5208_v62 = vld [vmem:[#allocation3 + $0xa0] sm:$0xff] }
 0x776   :  { %4911 = vst.msk [vmem:[#allocation3 + $0xb0] sm:$0xff] %vm1227_vm6, %v4875_v59 }
 0x777   :  { %4576 = vst.msk [vmem:[#allocation3 + $0xc0] sm:$0xff] %vm696_vm3, %v4541_v39 }
 0x779   :  { %v4987_v19 = vpop.permute.xlu1 %4986  ;;  %v4653_v40 = vpop.permute.xlu0 %4652 }
 0x77a   :  { %5023 = vst.msk [vmem:[#allocation3 + $0xb0] sm:$0xff] %vm1404_vm7, %v4987_v19 }
 0x77b   :  { %4688 = vst.msk [vmem:[#allocation3 + $0xc0] sm:$0xff] %vm873_vm4, %v4653_v40  ;;  %v5434_v40 = vld [vmem:[%s7668_s18] sm:$0xff] }
 0x77d   :  { %v5099_v41 = vpop.permute.xlu1 %5098  ;;  %v4765_v50 = vpop.permute.xlu0 %4764 }
 0x77e   :  { %5135 = vst.msk [vmem:[#allocation3 + $0xb0] sm:$0xff] %vm1581_vm8, %v5099_v41  ;;  %v5435_v41 = vld [vmem:[%s7668_s18 + $0x8] sm:$0xff] }
 0x77f   :  { %4800 = vst.msk [vmem:[#allocation3 + $0xc0] sm:$0xff] %vm1050_vm5, %v4765_v50  ;;  %v5442_v50 = vpack.c.bf16 %v5435_v41, %v5434_v40 }
 0x781   :  { %v4431_v49 = vpop.permute.xlu1 %4430  ;;  %v4877_v26 = vpop.permute.xlu0 %4876  ;;  %7863 = vmatpush3.bf16.msra.mxu0 %v5442_v50  ;;  %7875 = vmatpush3.bf16.msra.mxu1 %v5442_v50 }
 0x782   :  { %4465 = vst.msk [vmem:[#allocation3 + $0xd0] sm:$0xff] %vm519_vm2, %v4431_v49  ;;  %7864 = vmatprep.subr.bf16.mxu0 %v12696_v29  ;;  %v5436_v49 = vld [vmem:[%s7668_s18 + $0x10] sm:$0xff]  ;;  %7876 = vmatprep.subr.bf16.mxu1 %v12696_v29 }
 0x783   :  { %4912 = vst.msk [vmem:[#allocation3 + $0xc0] sm:$0xff] %vm1227_vm6, %v4877_v26  ;;  %v5437_v26 = vld [vmem:[%s7668_s18 + $0x18] sm:$0xff] }
 0x785   :  { %v4989_v35 = vpop.permute.xlu0 %4988  ;;  %v4543_v2 = vpop.permute.xlu1 %4542  ;;  %v5210_v10 = vld [vmem:[#allocation3 + $0xb0] sm:$0xff] }
 0x786   :  { %5024 = vst.msk [vmem:[#allocation3 + $0xc0] sm:$0xff] %vm1404_vm7, %v4989_v35  ;;  %v5248_v55 = vpack.c.bf16 %v5210_v10, %v5208_v62  ;;  %v5439_v62 = vld [vmem:[%s7668_s18 + $0x28] sm:$0xff] }
 0x787   :  { %4577 = vst.msk [vmem:[#allocation3 + $0xd0] sm:$0xff] %vm696_vm3, %v4543_v2  ;;  %v5443_v2 = vpack.c.bf16 %v5437_v26, %v5436_v49 }
 0x788   :  { %5360 = vmatmul.mubr.bf16.gmra.mrb[52].mxu1 %v5248_v55 }
 0x789   :  { %v5101_v34 = vpop.permute.xlu0 %5100  ;;  %v4655_v46 = vpop.permute.xlu1 %4654  ;;  %7732 = vmatprep.mubr.msk.bf16.mxu1 %vm193_vm0, %v5251_v23  ;;  %7865 = vmatpush3.bf16.msra.mxu0 %v5443_v2  ;;  %v5444_v23 = vpack.c.bf16 %v5439_v62, %v5438_v32  ;;  %v7738_v62 = vld [vmem:[%s7669_s21] ss:$0 sm:$0xff] }
 0x78a   :  { %5136 = vst.msk [vmem:[#allocation3 + $0xc0] sm:$0xff] %vm1581_vm8, %v5101_v34  ;;  %7866 = vmatprep.subr.bf16.mxu0 %v12696_v29  ;;  %7877 = vmatpush3.bf16.msra.mxu1 %v5443_v2 }
 0x78b   :  { %4689 = vst.msk [vmem:[#allocation3 + $0xd0] sm:$0xff] %vm873_vm4, %v4655_v46  ;;  %7878 = vmatprep.subr.bf16.mxu1 %v12696_v29 }
 0x78d   :  { %v4767_v31 = vpop.permute.xlu1 %4766  ;;  %v4433_v8 = vpop.permute.xlu0 %4432  ;;  %7867 = vmatpush3.bf16.msra.mxu0 %v5444_v23 }
 0x78e   :  { %4801 = vst.msk [vmem:[#allocation3 + $0xd0] sm:$0xff] %vm1050_vm5, %v4767_v31  ;;  %v5440_v31 = vld [vmem:[%s7668_s18 + $0x30] sm:$0xff]  ;;  %7868 = vmatprep.subr.bf16.mxu0 %v12696_v29  ;;  %7879 = vmatpush3.bf16.msra.mxu1 %v5444_v23 }
 0x78f   :  { %4466 = vst.msk [vmem:[#allocation3 + $0xe0] sm:$0xff] %vm519_vm2, %v4433_v8  ;;  %v5441_v8 = vld [vmem:[%s7668_s18 + $0x38] sm:$0xff]  ;;  %7880 = vmatprep.subr.bf16.mxu1 %v12696_v29  ;;  %s8355_s18 = smov 21  }
 0x790   :  { %s7674_s21 = sld [smem:[%s11926_s0 + %s8355_s18]]   ;;  %s8370_s18 = smov 35  }
 0x791   :  { %v4879_v51 = vpop.permute.xlu1 %4878  ;;  %v4545_v57 = vpop.permute.xlu0 %4544  ;;  %v5212_v63 = vld [vmem:[#allocation3 + $0xc0] sm:$0xff] }
 0x792   :  { %4913 = vst.msk [vmem:[#allocation3 + $0xd0] sm:$0xff] %vm1227_vm6, %v4879_v51 }
 0x793   :  { %4578 = vst.msk [vmem:[#allocation3 + $0xe0] sm:$0xff] %vm696_vm3, %v4545_v57 }
 0x795   :  { %v4991_v5 = vpop.permute.xlu1 %4990  ;;  %v4657_v52 = vpop.permute.xlu0 %4656 }
 0x796   :  { %5025 = vst.msk [vmem:[#allocation3 + $0xd0] sm:$0xff] %vm1404_vm7, %v4991_v5  ;;  %v5445_v5 = vpack.c.bf16 %v5441_v8, %v5440_v31 }
 0x797   :  { %4690 = vst.msk [vmem:[#allocation3 + $0xe0] sm:$0xff] %vm873_vm4, %v4657_v52 }
 0x798   :  { %7869 = vmatpush3.bf16.msra.mxu0 %v5445_v5  ;;  %7881 = vmatpush3.bf16.msra.mxu1 %v5445_v5 }
 0x799   :  { %v5103_v6 = vpop.permute.xlu1 %5102  ;;  %v4769_v37 = vpop.permute.xlu0 %4768 }
 0x79a   :  { %5137 = vst.msk [vmem:[#allocation3 + $0xd0] sm:$0xff] %vm1581_vm8, %v5103_v6 }
 0x79b   :  { %4802 = vst.msk [vmem:[#allocation3 + $0xe0] sm:$0xff] %vm1050_vm5, %v4769_v37 }
 0x79d   :  { %v4435_v58 = vpop.permute.xlu1 %4434  ;;  %v4881_v22 = vpop.permute.xlu0 %4880 }
 0x79e   :  { %4467 = vst.msk [vmem:[#allocation3 + $0xf0] sm:$0xff] %vm519_vm2, %v4435_v58 }
 0x79f   :  { %4914 = vst.msk [vmem:[#allocation3 + $0xe0] sm:$0xff] %vm1227_vm6, %v4881_v22 }
 0x7a1   :  { %v4993_v24 = vpop.permute.xlu0 %4992  ;;  %v4547_v27 = vpop.permute.xlu1 %4546  ;;  %v5214_v45 = vld [vmem:[#allocation3 + $0xd0] sm:$0xff] }
 0x7a2   :  { %5026 = vst.msk [vmem:[#allocation3 + $0xe0] sm:$0xff] %vm1404_vm7, %v4993_v24  ;;  %v5250_v38 = vpack.c.bf16 %v5214_v45, %v5212_v63 }
 0x7a3   :  { %4579 = vst.msk [vmem:[#allocation3 + $0xf0] sm:$0xff] %vm696_vm3, %v4547_v27  ;;  %vm7648_vm3 = vcmask 370024  }
 0x7a4   :  { %5368 = vmatmul.mubr.bf16.gmra.mrb[56].mxu1 %v5250_v38 }
 0x7a5   :  { %7733 = vmatprep.mubr.msk.bf16.mxu1 %vm193_vm0, %v5253_v33  ;;  %v5105_v47 = vpop.permute.xlu0 %5104  ;;  %v4659_v18 = vpop.permute.xlu1 %4658  ;;  %vm7633_vm0 = vcmask 1041408  }
 0x7a6   :  { %5138 = vst.msk [vmem:[#allocation3 + $0xe0] sm:$0xff] %vm1581_vm8, %v5105_v47  ;;  %vm7635_vm2 = vmor %vm7634_vm1, %vm7633_vm0 }
 0x7a7   :  { %4691 = vst.msk [vmem:[#allocation3 + $0xf0] sm:$0xff] %vm873_vm4, %v4659_v18 }
 0x7a9   :  { %v4771_v25 = vpop.permute.xlu1 %4770 }
 0x7aa   :  { %4803 = vst.msk [vmem:[#allocation3 + $0xf0] sm:$0xff] %vm1050_vm5, %v4771_v25 }
 0x7ad   :  { %v4883_v1 = vpop.permute.xlu1 %4882  ;;  %v5216_v12 = vld [vmem:[#allocation3 + $0xe0] sm:$0xff] }
 0x7ae   :  { %4915 = vst.msk [vmem:[#allocation3 + $0xf0] sm:$0xff] %vm1227_vm6, %v4883_v1 }
 0x7af   :  { %v5321_v13 = vpop.f32.mrb[32].mxu1 }
 0x7b0   :  { %v5391_v0 = vmul.f32 %v11404_v21, %v5321_v13  ;;  %v5323_v48 = vpop.f32.mrb[33].mxu1 }
 0x7b1   :  { %v5324_v3 = vpop.f32.mrb[34].mxu1  ;;  %v4995_v54 = vpop.permute.xlu1 %4994 }
 0x7b2   :  { %v5392_v17 = vmul.f32 %v11404_v21, %v5324_v3  ;;  %5027 = vst.msk [vmem:[#allocation3 + $0xf0] sm:$0xff] %vm1404_vm7, %v4995_v54  ;;  %v5326_v61 = vpop.f32.mrb[35].mxu1  ;;  %v5414_v20 = vadd.f32 %v11408_v9, %v5391_v0 }
 0x7b4   :  { %v5415_v14 = vadd.f32 %v11408_v9, %v5392_v17 }
 0x7b5   :  { %v5107_v28 = vpop.permute.xlu1 %5106 }
 0x7b6   :  { %v5430_v36 = vpack.c.bf16 %v5415_v14, %v5414_v20  ;;  %5139 = vst.msk [vmem:[#allocation3 + $0xf0] sm:$0xff] %vm1581_vm8, %v5107_v28 }
 0x7b8   :  { %5446 = vxpose.xlu0.c.b16.start [1/4] (short) (narrow) %v5430_v36, 16 }
 0x7bd   :  { %v5218_v60 = vld [vmem:[#allocation3 + $0xf0] sm:$0xff] }
 0x7be   :  { %v5252_v15 = vpack.c.bf16 %v5218_v60, %v5216_v12 }
 0x7c0   :  { %5376 = vmatmul.mubr.bf16.gmra.mrb[60].mxu1 %v5252_v15 }
 0x7c1   :  { %7882 = vmatprep.mubr.msk.bf16.mxu1 %vm8348_vm9, %v12696_v29 }
 0x7d8   :  { %v5329_v4 = vpop.f32.mrb[36].mxu1 }
 0x7d9   :  { %v5393_v7 = vmul.f32 %v11404_v21, %v5329_v4  ;;  %v5331_v42 = vpop.f32.mrb[37].mxu1 }
 0x7da   :  { %v5332_v53 = vpop.f32.mrb[38].mxu1 }
 0x7db   :  { %v5394_v11 = vmul.f32 %v11404_v21, %v5332_v53  ;;  %v5334_v43 = vpop.f32.mrb[39].mxu1  ;;  %v5416_v59 = vadd.f32 %v11408_v9, %v5393_v7 }
 0x7dd   :  { %v5417_v39 = vadd.f32 %v11408_v9, %v5394_v11 }
 0x7df   :  { %v5431_v19 = vpack.c.bf16 %v5417_v39, %v5416_v59 }
 0x7e1   :  { %5447 = vxpose.xlu0.c.b16.cont [2/4] (short) (narrow) %v5431_v19, 16 }
 0x7fc   :  { %v5337_v35 = vpop.f32.mrb[40].mxu1 }
 0x7fd   :  { %v5395_v10 = vmul.f32 %v11404_v21, %v5337_v35  ;;  %v5339_v55 = vpop.f32.mrb[41].mxu1 }
 0x7fe   :  { %v5340_v16 = vpop.f32.mrb[42].mxu1 }
 0x7ff   :  { %v5396_v34 = vmul.f32 %v11404_v21, %v5340_v16  ;;  %v5342_v46 = vpop.f32.mrb[43].mxu1  ;;  %v5418_v51 = vadd.f32 %v11408_v9, %v5395_v10 }
 0x801   :  { %v5419_v57 = vadd.f32 %v11408_v9, %v5396_v34 }
 0x803   :  { %v5432_v52 = vpack.c.bf16 %v5419_v57, %v5418_v51 }
 0x805   :  { %5448 = vxpose.xlu0.c.b16.cont [3/4] (short) (narrow) %v5432_v52, 16 }
 0x823   :  { %v5345_v6 = vpop.f32.mrb[44].mxu1 }
 0x824   :  { %v5397_v37 = vmul.f32 %v11404_v21, %v5345_v6  ;;  %v5347_v58 = vpop.f32.mrb[45].mxu1 }
 0x825   :  { %v5348_v22 = vpop.f32.mrb[46].mxu1 }
 0x826   :  { %v5398_v30 = vmul.f32 %v11404_v21, %v5348_v22  ;;  %v5350_v24 = vpop.f32.mrb[47].mxu1  ;;  %v5420_v27 = vadd.f32 %v11408_v9, %v5397_v37 }
 0x828   :  { %v5421_v63 = vadd.f32 %v11408_v9, %v5398_v30 }
 0x82a   :  { %v5433_v45 = vpack.c.bf16 %v5421_v63, %v5420_v27 }
 0x82c   :  { %5449 = vxpose.xlu0.c.b16.end [4/4] (short) (narrow) %v5433_v45, 16 }
 0x83f   :  { %v5353_v38 = vpop.f32.mrb[48].mxu1 }
 0x840   :  { %v5399_v44 = vmul.f32 %v11404_v21, %v5353_v38  ;;  %v5355_v33 = vpop.f32.mrb[49].mxu1 }
 0x841   :  { %v5356_v47 = vpop.f32.mrb[50].mxu1 }
 0x842   :  { %v5400_v18 = vmul.f32 %v11404_v21, %v5356_v47  ;;  %v5358_v25 = vpop.f32.mrb[51].mxu1  ;;  %v5422_v1 = vadd.f32 %v11408_v9, %v5399_v44  ;;  %v7739_v47 = vld [vmem:[%s7670_s24] ss:$0 sm:$0xff]  ;;  %s7655_s24 = sld [smem:[%s11926_s0 + %s8356_s10]]   ;;  %s8371_s10 = smov 40  }
 0x843   :  { %v7740_v25 = vld [vmem:[%s7671_s28] ss:$0 sm:$0xff]  ;;  %s8359_s28 = smov 25  }
 0x844   :  { %v5423_v13 = vadd.f32 %v11408_v9, %v5400_v18  ;;  %s7678_s1 = sld [smem:[%s11926_s0 + %s8359_s28]]   ;;  %s8373_s28 = smov 37  }
 0x846   :  { %v5506_v0 = vpack.c.bf16 %v5423_v13, %v5422_v1  ;;  %v5624_v13 = vld [vmem:[%s7672_s2] sm:$0xff]  ;;  %s8360_s2 = smov 28  }
 0x847   :  { %s7681_s14 = sld [smem:[%s11926_s0 + %s8360_s2]]   ;;  %s8374_s2 = smov 39  }
 0x848   :  { %5510 = vxpose.xlu1.c.b16.start [1/4] (short) (narrow) %v5506_v0, 16  ;;  %s7692_s12 = sld [smem:[%s11926_s0 + %s8374_s2]]  }
 0x85b   :  { %v5361_v48 = vpop.f32.mrb[52].mxu1 }
 0x85c   :  { %v5401_v3 = vmul.f32 %v11404_v21, %v5361_v48  ;;  %v5363_v54 = vpop.f32.mrb[53].mxu1 }
 0x85d   :  { %v5364_v17 = vpop.f32.mrb[54].mxu1 }
 0x85e   :  { %v5402_v61 = vmul.f32 %v11404_v21, %v5364_v17  ;;  %v5366_v20 = vpop.f32.mrb[55].mxu1  ;;  %v5424_v14 = vadd.f32 %v11408_v9, %v5401_v3 }
 0x860   :  { %v5425_v28 = vadd.f32 %v11408_v9, %v5402_v61 }
 0x862   :  { %v5507_v36 = vpack.c.bf16 %v5425_v28, %v5424_v14 }
 0x864   :  { %5511 = vxpose.xlu1.c.b16.cont [2/4] (short) (narrow) %v5507_v36, 16 }
 0x877   :  { %v5369_v12 = vpop.f32.mrb[56].mxu1 }
 0x878   :  { %v5403_v60 = vmul.f32 %v11404_v21, %v5369_v12  ;;  %v5371_v15 = vpop.f32.mrb[57].mxu1 }
 0x879   :  { %v5372_v4 = vpop.f32.mrb[58].mxu1 }
 0x87a   :  { %v5404_v7 = vmul.f32 %v11404_v21, %v5372_v4  ;;  %v5374_v42 = vpop.f32.mrb[59].mxu1  ;;  %v5426_v53 = vadd.f32 %v11408_v9, %v5403_v60 }
 0x87c   :  { %v5427_v11 = vadd.f32 %v11408_v9, %v5404_v7 }
 0x87e   :  { %v5508_v43 = vpack.c.bf16 %v5427_v11, %v5426_v53 }
 0x880   :  { %5512 = vxpose.xlu1.c.b16.cont [3/4] (short) (narrow) %v5508_v43, 16 }
 0x886   :  { %v5454_v59 = vpop.trf.xlu0 }
 0x887   :  { %7871 = vmatmul.mubr.msk.bf16.vlgmr.msra.gmra.mrb[64].mxu0 %vm5462_vm10, %v5454_v59 }
 0x888   :  { %5744 = vmatprep.mubr.bf16.mxu0 %v12320_v56 }
 0x893   :  { %v5377_v39 = vpop.f32.mrb[60].mxu1 }
 0x894   :  { %v5405_v19 = vmul.f32 %v11404_v21, %v5377_v39  ;;  %v5379_v40 = vpop.f32.mrb[61].mxu1 }
 0x895   :  { %v5380_v41 = vpop.f32.mrb[62].mxu1  ;;  %v5675_v40 = vld [vmem:[%s11500_s15 + $0x18] sm:$0xff] }
 0x896   :  { %v5406_v50 = vmul.f32 %v11404_v21, %v5380_v41  ;;  %v5382_v49 = vpop.f32.mrb[63].mxu1  ;;  %v5428_v26 = vadd.f32 %v11408_v9, %v5405_v19  ;;  %v5681_v41 = vld [vmem:[%s11500_s15 + $0x48] sm:$0xff] }
 0x897   :  { %v5700_v49 = vpack.c.bf16 %v5681_v41, %v5675_v40  ;;  %v5847_v40 = vld [vmem:[%s11511_s6 + $0x30] sm:$0xff]  ;;  %v5688_v41 = vld [vmem:[%s11500_s15 + $0x80] sm:$0xff] }
 0x898   :  { %v5429_v32 = vadd.f32 %v11408_v9, %v5406_v50  ;;  %v5673_v50 = vld [vmem:[%s11500_s15 + $0x8] sm:$0xff] }
 0x899   :  { %5755 = vmatprep.subr.bf16.mxu1 %v5700_v49 }
 0x89a   :  { %v5509_v35 = vpack.c.bf16 %v5429_v32, %v5428_v26  ;;  %v5679_v26 = vld [vmem:[%s11500_s15 + $0x38] sm:$0xff]  ;;  %v5674_v32 = vld [vmem:[%s11500_s15 + $0x10] sm:$0xff] }
 0x89c   :  { %5513 = vxpose.xlu1.c.b16.end [4/4] (short) (narrow) %v5509_v35, 16  ;;  %v5680_v35 = vld [vmem:[%s11500_s15 + $0x40] sm:$0xff] }
 0x8f6   :  { %v5518_v2 = vpop.trf.xlu1 }
 0x8f7   :  { %7883 = vmatmul.mubr.msk.bf16.vlgmr.msra.gmra.mrb[64].mxu1 %vm5462_vm10, %v5518_v2  ;;  %v5698_v2 = vpack.c.bf16 %v5679_v26, %v5673_v50  ;;  %v5694_v50 = vld [vmem:[%s11500_s15 + $0xb0] sm:$0xff] }
 0x8f8   :  { %5787 = vmatprep.mubr.bf16.mxu1 %v12320_v56  ;;  %v5707_v26 = vpack.c.bf16 %v5694_v50, %v5688_v41 }
 0x8f9   :  { %5712 = vmatprep.subr.bf16.mxu0 %v5698_v2  ;;  %v8357_v2 = vmov 1966171168  }
 0x95a   :  { %v5500_v10 = vpop.f32.mrb[64].mxu0 }
 0x95b   :  { %v5576_v21 = vadd.f32 %v7738_v62, %v5500_v10  ;;  %v7872_v55 = vpop.f32.mrb[65].mxu0  ;;  %v5672_v10 = vld [vmem:[%s11500_s15] sm:$0xff] }
 0x95c   :  { %v5503_v16 = vpop.f32.mrb[66].mxu0  ;;  %v5687_v55 = vld [vmem:[%s11500_s15 + $0x78] sm:$0xff] }
 0x95d   :  { %v5581_v9 = vsel %vm5580_vm11, %v5576_v21, 0.0  ;;  %v7873_v23 = vpop.f32.mrb[67].mxu0 }
 0x95e   :  { %5582 = vadd.xlane.f32.xlu0 %v5581_v9  ;;  %v5693_v9 = vld [vmem:[%s11500_s15 + $0xa8] sm:$0xff] }
 0x95f   :  { %v5685_v23 = vld [vmem:[%s11500_s15 + $0x68] sm:$0xff] }
 0x9ca   :  { %v5563_v34 = vpop.f32.mrb[64].mxu1 }
 0x9cb   :  { %v5577_v46 = vadd.f32 %v7738_v62, %v5563_v34  ;;  %v7884_v31 = vpop.f32.mrb[65].mxu1  ;;  %v5699_v62 = vpack.c.bf16 %v5680_v35, %v5674_v32  ;;  %v5691_v34 = vld [vmem:[%s11500_s15 + $0x98] sm:$0xff]  ;;  %v5627_v32 = vld [vmem:[%s7655_s24] sm:$0x3]  ;;  %s8365_s24 = smov 31  }
 0x9cc   :  { %v5566_v8 = vpop.f32.mrb[66].mxu1  ;;  %v5704_v31 = vpack.c.bf16 %v5691_v34, %v5685_v23  ;;  %v5849_v35 = vpack.c.bf16 %v5627_v32, %v5627_v32  ;;  %s7684_s26 = sld [smem:[%s11926_s0 + %s8365_s24]]  }
 0x9cd   :  { %v7885_v51 = vpop.f32.mrb[67].mxu1  ;;  %v5584_v57 = vsel %vm5580_vm11, %v5577_v46, 0.0  ;;  %5756 = vmatpush1.bf16.msra.mxu1 %v5699_v62  ;;  %v5686_v8 = vld [vmem:[%s11500_s15 + $0x70] sm:$0xff]  ;;  %v5900_v62 = vunpack.c.l.s4 %v8357_v2  ;;  %s11877_s24 = sld [smem:[%s11926_s0 + %s8371_s10]]  }
 0x9ce   :  { %5585 = vadd.xlane.f32.xlu1 %v5584_v57  ;;  %v5692_v51 = vld [vmem:[%s11500_s15 + $0xa0] sm:$0xff] }
 0x9cf   :  { %v5684_v57 = vld [vmem:[%s11500_s15 + $0x60] sm:$0xff]  ;;  %v5901_v34 = vunpack.c.0.s8 %v5900_v62 }
 0x9eb   :  { %v5583_v5 = vpop.xlane.xlu0 %5582 }
 0x9ec   :  { %v5588_v52 = vmul.f32 0.03125, %v5583_v5  ;;  %v5705_v5 = vpack.c.bf16 %v5692_v51, %v5686_v8 }
 0x9ee   :  { %v5590_v6 = vsub.f32 %v5576_v21, %v5588_v52  ;;  %v5678_v21 = vld [vmem:[%s11500_s15 + $0x30] sm:$0xff] }
 0x9ef   :  { %v5697_v16 = vpack.c.bf16 %v5678_v21, %v5672_v10  ;;  %v5690_v52 = vld [vmem:[%s11500_s15 + $0x90] sm:$0xff]  ;;  %v5902_v10 = vlaneseq }
 0x9f0   :  { %v5592_v37 = vmul.f32 %v5590_v6, %v5590_v6 }
 0x9f1   :  { %5713 = vmatpush1.bf16.msra.mxu0 %v5697_v16 }
 0x9f2   :  { %v5594_v58 = vsel %vm5580_vm11, %v5592_v37, 0.0  ;;  %5714 = vmatprep.subr.bf16.mxu0 %v5704_v31  ;;  %v5677_v37 = vld [vmem:[%s11500_s15 + $0x28] sm:$0xff] }
 0x9f3   :  { %5595 = vadd.xlane.f32.xlu0 %v5594_v58  ;;  %v5683_v58 = vld [vmem:[%s11500_s15 + $0x58] sm:$0xff] }
 0xa5b   :  { %v5586_v22 = vpop.xlane.xlu1 %5585 }
 0xa5c   :  { %v5589_v30 = vmul.f32 0.03125, %v5586_v22  ;;  %v5842_v22 = vld [vmem:[%s11511_s6 + $0x8] sm:$0xff] }
 0xa5e   :  { %v5591_v24 = vsub.f32 %v5577_v46, %v5589_v30  ;;  %v5706_v46 = vpack.c.bf16 %v5693_v9, %v5687_v55  ;;  %v5844_v30 = vld [vmem:[%s11511_s6 + $0x18] sm:$0xff] }
 0xa60   :  { %v5593_v27 = vmul.f32 %v5591_v24, %v5591_v24  ;;  %5757 = vmatprep.subr.bf16.mxu1 %v5706_v46  ;;  %v11564_v46 = vshrl.u32 %v5902_v10, 7 }
 0xa61   :  { %5758 = vmatpush1.bf16.msra.mxu1 %v5705_v5 }
 0xa62   :  { %v5597_v63 = vsel %vm5580_vm11, %v5593_v27, 0.0  ;;  %v5851_v27 = vpack.c.bf16 %v5844_v30, %v5842_v22  ;;  %v5904_v22 = vsub.s32 %v5901_v34, %v11564_v46 }
 0xa63   :  { %5598 = vadd.xlane.f32.xlu0 %v5597_v63 }
 0xa64   :  { %5857 = vmatprep.subr.bf16.mxu1 %v5851_v27 }
 0xa80   :  { %v5596_v45 = vpop.xlane.xlu0 %5595 }
 0xa81   :  { %v5600_v38 = vmul.f32 0.03125, %v5596_v45 }
 0xa83   :  { %v5602_v44 = vadd.f32 1e-05, %v5600_v38 }
 0xa85   :  { %8245 = vrsqrt.f32 %v5602_v44 }
 0xa8f   :  { %v8246_v33 = vpop.eup %8245 }
 0xa90   :  { %v5606_v18 = vmul.f32 %v8246_v33, %v5590_v6  ;;  %v5703_v6 = vpack.c.bf16 %v5690_v52, %v5684_v57 }
 0xa92   :  { %v5614_v1 = vmul.f32 %v7739_v47, %v5606_v18  ;;  %5715 = vmatpush1.bf16.msra.mxu0 %v5703_v6 }
 0xa94   :  { %v5622_v0 = vadd.f32 %v7740_v25, %v5614_v1  ;;  %v7741_v1 = vld [vmem:[%s7673_s17] ss:$0 sm:$0xff]  ;;  %s8363_s17 = smov 30  }
 0xa95   :  { %s7683_s20 = sld [smem:[%s11926_s0 + %s8363_s17]]  }
 0xa96   :  { %v11477_v48 = vadd.f32 %v5624_v13, %v5622_v0  ;;  %s7687_s17 = sld [smem:[%s11926_s0 + %s8369_s7]]  }
 0xa98   :  { %v5630_v3 = vsel %vm5580_vm11, %v11477_v48, 0.0 }
 0xa99   :  { %5631 = vadd.xlane.f32.xlu1 %v5630_v3 }
 0xaf0   :  { %v5599_v54 = vpop.xlane.xlu0 %5598 }
 0xaf1   :  { %v5601_v17 = vmul.f32 0.03125, %v5599_v54  ;;  %v7742_v54 = vld [vmem:[%s7674_s21] ss:$0 sm:$0xff]  ;;  %s8364_s21 = smov 29  }
 0xaf2   :  { %s7682_s23 = sld [smem:[%s11926_s0 + %s8364_s21]]  }
 0xaf3   :  { %v5603_v61 = vadd.f32 1e-05, %v5601_v17  ;;  %v5841_v17 = vld [vmem:[%s11511_s6] sm:$0xff]  ;;  %s7688_s21 = sld [smem:[%s11926_s0 + %s8370_s18]]  }
 0xaf5   :  { %8247 = vrsqrt.f32 %v5603_v61  ;;  %v5843_v61 = vld [vmem:[%s11511_s6 + $0x10] sm:$0xff] }
 0xaff   :  { %v8248_v20 = vpop.eup %8247 }
 0xb00   :  { %v5607_v14 = vmul.f32 %v8248_v20, %v5591_v24  ;;  %v5702_v24 = vpack.c.bf16 %v5683_v58, %v5677_v37 }
 0xb02   :  { %v5615_v28 = vmul.f32 %v7739_v47, %v5607_v14  ;;  %5798 = vmatprep.subr.bf16.mxu0 %v5702_v24  ;;  %v5676_v14 = vld [vmem:[%s11500_s15 + $0x20] sm:$0xff] }
 0xb04   :  { %v5623_v36 = vadd.f32 %v7740_v25, %v5615_v28  ;;  %v5682_v28 = vld [vmem:[%s11500_s15 + $0x50] sm:$0xff] }
 0xb06   :  { %v11481_v12 = vadd.f32 %v5624_v13, %v5623_v36  ;;  %v5846_v36 = vld [vmem:[%s11511_s6 + $0x28] sm:$0xff] }
 0xb08   :  { %v5633_v60 = vsel %vm5580_vm11, %v11481_v12, 0.0 }
 0xb09   :  { %5634 = vadd.xlane.f32.xlu0 %v5633_v60  ;;  %v5848_v60 = vld [vmem:[%s11511_s6 + $0x38] sm:$0xff] }
 0xb26   :  { %v5632_v15 = vpop.xlane.xlu1 %5631 }
 0xb27   :  { %v5636_v4 = vmul.f32 0.03125, %v5632_v15  ;;  %v5689_v15 = vld [vmem:[%s11500_s15 + $0x88] sm:$0xff] }
 0xb29   :  { %v11486_v7 = vsub.f32 %v11477_v48, %v5636_v4  ;;  %v5695_v4 = vld [vmem:[%s11500_s15 + $0xb8] sm:$0xff]  ;;  %s8361_s15 = smov 26  }
 0xb2a   :  { %s7679_s5 = sld [smem:[%s11926_s0 + %s8361_s15]]  }
 0xb2b   :  { %v5640_v42 = vmul.f32 %v11486_v7, %v11486_v7  ;;  %s7689_s15 = sld [smem:[%s11926_s0 + %s8367_s11]]  }
 0xb2d   :  { %v5642_v53 = vsel %vm5580_vm11, %v5640_v42, 0.0 }
 0xb2e   :  { %5643 = vadd.xlane.f32.xlu1 %v5642_v53  ;;  %v5850_v53 = vpack.c.bf16 %v5843_v61, %v5841_v17 }
 0xb96   :  { %v5635_v11 = vpop.xlane.xlu0 %5634 }
 0xb97   :  { %v5637_v43 = vmul.f32 0.03125, %v5635_v11  ;;  %v5701_v11 = vpack.c.bf16 %v5682_v28, %v5676_v14 }
 0xb99   :  { %v11492_v59 = vsub.f32 %v11481_v12, %v5637_v43  ;;  %v5845_v43 = vld [vmem:[%s11511_s6 + $0x20] sm:$0xff]  ;;  %s8362_s6 = smov 27  }
 0xb9a   :  { %v5852_v49 = vpack.c.bf16 %v5847_v40, %v5845_v43  ;;  %s7680_s9 = sld [smem:[%s11926_s0 + %s8362_s6]]  }
 0xb9b   :  { %v5641_v39 = vmul.f32 %v11492_v59, %v11492_v59  ;;  %s7691_s6 = sld [smem:[%s11926_s0 + %s8368_s16]]  }
 0xb9d   :  { %v5645_v19 = vsel %vm5580_vm11, %v5641_v39, 0.0  ;;  %v5853_v39 = vpack.c.bf16 %v5848_v60, %v5846_v36 }
 0xb9e   :  { %5646 = vadd.xlane.f32.xlu0 %v5645_v19  ;;  %v5708_v19 = vpack.c.bf16 %v5695_v4, %v5689_v15 }
 0xbbb   :  { %v5644_v63 = vpop.xlane.xlu1 %5643 }
 0xbbc   :  { %v5648_v45 = vmul.f32 0.03125, %v5644_v63  ;;  %v11579_v63 = vsub.s32 0, %v11564_v46 }
 0xbbe   :  { %v5650_v38 = vadd.f32 1e-05, %v5648_v45 }
 0xbc0   :  { %8249 = vrsqrt.f32 %v5650_v38 }
 0xbca   :  { %v8250_v18 = vpop.eup %8249 }
 0xbcb   :  { %v5654_v25 = vmul.f32 %v8250_v18, %v11486_v7 }
 0xbcd   :  { %v5662_v0 = vmul.f32 %v7741_v1, %v5654_v25 }
 0xbcf   :  { %v5670_v7 = vadd.f32 %v7742_v54, %v5662_v0 }
 0xc2b   :  { %v5647_v44 = vpop.xlane.xlu0 %5646 }
 0xc2c   :  { %v5649_v33 = vmul.f32 0.03125, %v5647_v44 }
 0xc2e   :  { %v5651_v47 = vadd.f32 1e-05, %v5649_v33 }
 0xc30   :  { %8251 = vrsqrt.f32 %v5651_v47 }
 0xc3a   :  { %v8252_v13 = vpop.eup %8251 }
 0xc3b   :  { %v5655_v3 = vmul.f32 %v8252_v13, %v11492_v59 }
 0xc3d   :  { %v5663_v20 = vmul.f32 %v7741_v1, %v5655_v3 }
 0xc3f   :  { %v5671_v42 = vadd.f32 %v7742_v54, %v5663_v20 }
 0xc41   :  { %v5696_v59 = vpack.c.bf16 %v5671_v42, %v5670_v7 }
 0xc43   :  { %7743 = vmatmul.mubr.msk.bf16.vlgmr.msra.gmra.mrb[68].mxu0 %vm5580_vm11, %v5696_v59  ;;  %7744 = vmatmul.mubr.msk.bf16.vlgmr.msra.gmra.mrb[68].mxu1 %vm5580_vm11, %v5696_v59 }
 0xc44   :  { %5858 = vmatpush1.bf16.msra.mxu1 %v5850_v53  ;;  %5799 = vmatpush1.bf16.msra.mxu0 %v5701_v11 }
 0xc45   :  { %5859 = vmatprep.subr.bf16.mxu1 %v5853_v39  ;;  %5800 = vmatprep.subr.bf16.mxu0 %v5708_v19 }
 0xc46   :  { %5830 = vmatprep.mubr.bf16.mxu0 %v12320_v56  ;;  %5889 = vmatprep.mubr.bf16.mxu1 %v12320_v56 }
 0xc48   :  { %5860 = vmatpush1.bf16.msra.mxu1 %v5852_v49  ;;  %5801 = vmatpush1.bf16.msra.mxu0 %v5707_v26 }
 0xc49   :  { %7886 = vmatprep.subr.bf16.mxu0 %v12696_v29  ;;  %7892 = vmatprep.subr.bf16.mxu1 %v12696_v29 }
 0xc4b   :  { %7745 = vmatmul.mubr.msk.bf16.vlgmr.msra.gmra.mrb[72].mxu0 %vm5580_vm11, %v5696_v59  ;;  %7746 = vmatmul.mubr.msk.bf16.vlgmr.msra.gmra.mrb[72].mxu1 %vm5580_vm11, %v5849_v35 }
 0xc4c   :  { %7888 = vmatprep.mubr.msk.bf16.mxu0 %vm8348_vm9, %v12696_v29  ;;  %7894 = vmatprep.mubr.msk.bf16.mxu1 %vm8348_vm9, %v12696_v29 }
 0xd16   :  { %v5746_v21 = vpop.f32.mrb[68].mxu0  ;;  %v5789_v55 = vpop.f32.mrb[68].mxu1 }
 0xd17   :  { %v6024_v16 = vpack.c.bf16 %v5789_v55, %v5789_v55  ;;  %v5748_v9 = vpop.f32.mrb[69].mxu0  ;;  %v11562_v23 = vpop.f32.mrb[69].mxu1 }
 0xd18   :  { %v5750_v31 = vpop.f32.mrb[70].mxu0  ;;  %v5793_v8 = vpop.f32.mrb[70].mxu1  ;;  %v6028_v35 = vpack.c.bf16 %v11562_v23, %v11562_v23 }
 0xd19   :  { %v8215_v51 = vpack.i.bf16 %v5793_v8, %v5789_v55  ;;  %v6025_v57 = vpack.c.bf16 %v5793_v8, %v5793_v8  ;;  %v5752_v5 = vpop.f32.mrb[71].mxu0  ;;  %v11566_v52 = vpop.f32.mrb[71].mxu1  ;;  %v6036_v6 = vsel %vm5462_vm10, %v6024_v16, 0 }
 0xd1a   :  { %v8225_v37 = vpack.i.bf16 %v11566_v52, %v11562_v23  ;;  %7887 = vmatpush3.bf16.xpose.msra.mxu0 %v6036_v6  ;;  %v6029_v2 = vpack.c.bf16 %v11566_v52, %v11566_v52 }
 0xd1b   :  { %8216 = vrot.lane.b32.xlu1 %v8215_v51, %s8330_s13  ;;  %v6082_v58 = vsel %vm5462_vm10, %v6025_v57, 0  ;;  %7898 = vmatprep.subr.bf16.mxu0 %v12696_v29 }
 0xd1c   :  { %7893 = vmatpush3.bf16.xpose.msra.mxu1 %v6082_v58  ;;  %v6266_v8 = vsel %vm5462_vm10, %v6029_v2, 0 }
 0xd1d   :  { %7904 = vmatprep.subr.bf16.mxu1 %v12696_v29 }
 0xd1e   :  { %v11576_v30 = vpop.f32.mrb[72].mxu0  ;;  %v5891_v24 = vpop.f32.mrb[72].mxu1 }
 0xd1f   :  { %v5905_v27 = vrot.slane %v5891_v24, %v5904_v22  ;;  %8226 = vrot.lane.b32.xlu1 %v8225_v37, %s8330_s13  ;;  %v11582_v45 = vpop.f32.mrb[73].mxu0  ;;  %v5893_v38 = vpop.f32.mrb[73].mxu1  ;;  %v6505_v24 = vpack.c.bf16 %v11576_v30, %v11576_v30 }
 0xd20   :  { %v5940_v44 = vrot.slane %v5893_v38, %v5904_v22  ;;  %v11584_v33 = vpop.f32.mrb[74].mxu0  ;;  %v5895_v47 = vpop.f32.mrb[74].mxu1 }
 0xd21   :  { %v5906_v18 = vcombine.high %v5905_v27, %v5905_v27  ;;  %v5913_v25 = vrot.slane %v5905_v27, %v5904_v22  ;;  %v8235_v1 = vpack.i.bf16 %v11584_v33, %v11576_v30  ;;  %v11588_v13 = vpop.f32.mrb[75].mxu0  ;;  %v5896_v0 = vpop.f32.mrb[75].mxu1  ;;  %v6506_v27 = vpack.c.bf16 %v11584_v33, %v11584_v33 }
 0xd22   :  { %v5941_v3 = vcombine.high %v5940_v44, %v5940_v44  ;;  %v5948_v54 = vrot.slane %v5940_v44, %v5904_v22  ;;  %v8240_v17 = vpack.i.bf16 %v11588_v13, %v11582_v45  ;;  %v6518_v47 = vsel %vm6516_vm12, %v6505_v24, 0 }
 0xd23   :  { %v5920_v61 = vrot.slane %v5906_v18, %v5904_v22  ;;  %v5924_v20 = vrot.slane %v5913_v25, %v11579_v63  ;;  %v6564_v18 = vsel %vm6516_vm12, %v6506_v27, 0 }
 0xd24   :  { %v5955_v14 = vrot.slane %v5941_v3, %v5904_v22  ;;  %v5959_v28 = vrot.slane %v5948_v54, %v11579_v63 }
 0xd25   :  { %v5928_v36 = vrot.slane %v5920_v61, %v11579_v63  ;;  %v5931_v60 = vadd.f32 %v5924_v20, %v5746_v21 }
 0xd26   :  { %v5963_v15 = vrot.slane %v5955_v14, %v11579_v63  ;;  %v5966_v4 = vadd.f32 %v5959_v28, %v5748_v9 }
 0xd27   :  { %v5932_v7 = vadd.f32 %v5928_v36, %v5750_v31  ;;  %v6016_v42 = vpack.c.bf16 %v5931_v60, %v5931_v60  ;;  %v6220_v31 = vsel %vm5462_vm10, %v6028_v35, 0 }
 0xd28   :  { %v5967_v53 = vadd.f32 %v5963_v15, %v5752_v5  ;;  %v6020_v57 = vpack.c.bf16 %v5966_v4, %v5966_v4 }
 0xd29   :  { %v6017_v11 = vpack.c.bf16 %v5932_v7, %v5932_v7  ;;  %7889 = vmatmul.mubr.msk.bf16.vlgmr.msra.gmra.mrb[76].mxu0 %vm5462_vm10, %v6016_v42  ;;  %v8220_v43 = vpack.i.bf16 %v5932_v7, %v5931_v60 }
 0xd2a   :  { %v8230_v59 = vpack.i.bf16 %v5967_v53, %v5966_v4  ;;  %7900 = vmatprep.mubr.msk.bf16.mxu0 %vm8348_vm9, %v12696_v29  ;;  %v6021_v5 = vpack.c.bf16 %v5967_v53, %v5967_v53 }
 0xd2b   :  { %8221 = vrot.lane.b32.xlu0 %v8220_v43, %s8330_s13  ;;  %7895 = vmatmul.mubr.msk.bf16.vlgmr.msra.gmra.mrb[76].mxu1 %vm5462_vm10, %v6017_v11 }
 0xd2c   :  { %8231 = vrot.lane.b32.xlu1 %v8230_v59, %s8330_s13  ;;  %7906 = vmatprep.mubr.msk.bf16.mxu1 %vm8348_vm9, %v12696_v29 }
 0xd8d   :  { %v8217_v39 = vpop.permute.xlu1 %8216 }
 0xd8e   :  { %v8219_v19 = vunpack.i.h.bf16 %v8217_v39  ;;  %v8218_v40 = vunpack.i.l.bf16 %v8217_v39 }
 0xd90   :  { %v6027_v41 = vpack.c.bf16 %v8219_v19, %v8219_v19  ;;  %v6026_v50 = vpack.c.bf16 %v8218_v40, %v8218_v40 }
 0xd91   :  { %v8227_v21 = vpop.permute.xlu1 %8226 }
 0xd92   :  { %v6128_v49 = vsel %vm5462_vm10, %v6026_v50, 0  ;;  %v6174_v26 = vsel %vm5462_vm10, %v6027_v41, 0  ;;  %v8229_v9 = vunpack.i.h.bf16 %v8227_v21  ;;  %v8228_v34 = vunpack.i.l.bf16 %v8227_v21 }
 0xd93   :  { %7899 = vmatpush3.bf16.xpose.msra.mxu0 %v6128_v49  ;;  %7905 = vmatpush3.bf16.xpose.msra.mxu1 %v6174_v26 }
 0xd94   :  { %7910 = vmatprep.subr.bf16.mxu0 %v12696_v29  ;;  %7916 = vmatprep.subr.bf16.mxu1 %v12696_v29  ;;  %v6031_v23 = vpack.c.bf16 %v8229_v9, %v8229_v9  ;;  %v6030_v51 = vpack.c.bf16 %v8228_v34, %v8228_v34 }
 0xd96   :  { %v6312_v6 = vsel %vm5462_vm10, %v6030_v51, 0  ;;  %v6358_v37 = vsel %vm5462_vm10, %v6031_v23, 0 }
 0xd9d   :  { %v8222_v32 = vpop.permute.xlu0 %8221 }
 0xd9e   :  { %v8224_v62 = vunpack.i.h.bf16 %v8222_v32  ;;  %v8223_v10 = vunpack.i.l.bf16 %v8222_v32  ;;  %v8232_v52 = vpop.permute.xlu1 %8231 }
 0xd9f   :  { %v8234_v58 = vunpack.i.h.bf16 %v8232_v52  ;;  %v8233_v22 = vunpack.i.l.bf16 %v8232_v52 }
 0xda0   :  { %v6019_v55 = vpack.c.bf16 %v8224_v62, %v8224_v62  ;;  %v6018_v16 = vpack.c.bf16 %v8223_v10, %v8223_v10 }
 0xda1   :  { %v6023_v38 = vpack.c.bf16 %v8234_v58, %v8234_v58  ;;  %v6022_v44 = vpack.c.bf16 %v8233_v22, %v8233_v22 }
 0xda2   :  { %7901 = vmatmul.mubr.msk.bf16.vlgmr.msra.gmra.mrb[80].mxu0 %vm5462_vm10, %v6018_v16  ;;  %7907 = vmatmul.mubr.msk.bf16.vlgmr.msra.gmra.mrb[80].mxu1 %vm5462_vm10, %v6019_v55 }
 0xda3   :  { %7911 = vmatpush3.bf16.xpose.msra.mxu0 %v6220_v31  ;;  %7917 = vmatpush3.bf16.xpose.msra.mxu1 %v6266_v8 }
 0xda4   :  { %7912 = vmatprep.mubr.msk.bf16.mxu0 %vm8348_vm9, %v12696_v29  ;;  %7918 = vmatprep.mubr.msk.bf16.mxu1 %vm8348_vm9, %v12696_v29 }
 0xda5   :  { %7922 = vmatprep.subr.bf16.mxu0 %v12696_v29  ;;  %7928 = vmatprep.subr.bf16.mxu1 %v12696_v29 }
 0xdaa   :  { %7913 = vmatmul.mubr.msk.bf16.vlgmr.msra.gmra.mrb[84].mxu0 %vm5462_vm10, %v6020_v57  ;;  %7919 = vmatmul.mubr.msk.bf16.vlgmr.msra.gmra.mrb[84].mxu1 %vm5462_vm10, %v6021_v5 }
 0xdab   :  { %7923 = vmatpush3.bf16.xpose.msra.mxu0 %v6312_v6  ;;  %7929 = vmatpush3.bf16.xpose.msra.mxu1 %v6358_v37 }
 0xdac   :  { %7924 = vmatprep.mubr.msk.bf16.mxu0 %vm8348_vm9, %v12696_v29  ;;  %7930 = vmatprep.mubr.msk.bf16.mxu1 %vm8348_vm9, %v12696_v29 }
 0xdad   :  { %7934 = vmatprep.subr.bf16.mxu0 %v12696_v29  ;;  %7940 = vmatprep.subr.bf16.mxu1 %v12696_v29 }
 0xdb2   :  { %7925 = vmatmul.mubr.msk.bf16.vlgmr.msra.gmra.mrb[88].mxu0 %vm5462_vm10, %v6022_v44  ;;  %7931 = vmatmul.mubr.msk.bf16.vlgmr.msra.gmra.mrb[88].mxu1 %vm5462_vm10, %v6023_v38 }
 0xdb3   :  { %7935 = vmatpush3.bf16.msra.mxu0 %v6518_v47  ;;  %7941 = vmatpush3.bf16.msra.mxu1 %v6564_v18 }
 0xdb4   :  { %7936 = vmatprep.mubr.msk.bf16.mxu0 %vm8348_vm9, %v12696_v29  ;;  %7942 = vmatprep.mubr.msk.bf16.mxu1 %vm8348_vm9, %v12696_v29 }
 0xdb5   :  { %7946 = vmatprep.subr.bf16.mxu0 %v12696_v29  ;;  %7952 = vmatprep.subr.bf16.mxu1 %v12696_v29 }
 0xdfc   :  { %v6072_v25 = vpop.f32.mrb[76].mxu0 }
 0xdfd   :  { %v6400_v0 = vmul.f32 0.125, %v6072_v25  ;;  %v7890_v3 = vpop.f32.mrb[77].mxu0 }
 0xdfe   :  { %v6075_v54 = vpop.f32.mrb[78].mxu0  ;;  %v6118_v61 = vpop.f32.mrb[76].mxu1 }
 0xdff   :  { %v6401_v20 = vmul.f32 0.125, %v6118_v61  ;;  %v7891_v14 = vpop.f32.mrb[79].mxu0  ;;  %v7896_v28 = vpop.f32.mrb[77].mxu1  ;;  %v6409_v36 = vsel %vm6408_vm13, %v6400_v0, -inf }
 0xe00   :  { %v6121_v60 = vpop.f32.mrb[78].mxu1  ;;  %6410 = vmax.xlane.f32.xlu0 %v6409_v36 }
 0xe01   :  { %v7897_v15 = vpop.f32.mrb[79].mxu1  ;;  %v6412_v4 = vsel %vm6408_vm13, %v6401_v20, -inf }
 0xe02   :  { %6413 = vmax.xlane.f32.xlu1 %v6412_v4 }
 0xe75   :  { %v6164_v7 = vpop.f32.mrb[80].mxu0  ;;  %v6210_v42 = vpop.f32.mrb[80].mxu1 }
 0xe76   :  { %v6402_v53 = vmul.f32 0.125, %v6164_v7  ;;  %v7902_v11 = vpop.f32.mrb[81].mxu0  ;;  %v7908_v43 = vpop.f32.mrb[81].mxu1  ;;  %v6403_v19 = vmul.f32 0.125, %v6210_v42 }
 0xe77   :  { %v6167_v59 = vpop.f32.mrb[82].mxu0  ;;  %v6213_v39 = vpop.f32.mrb[82].mxu1 }
 0xe78   :  { %v7903_v40 = vpop.f32.mrb[83].mxu0  ;;  %v7909_v41 = vpop.f32.mrb[83].mxu1  ;;  %v6415_v50 = vsel %vm6408_vm13, %v6402_v53, -inf  ;;  %v6418_v49 = vsel %vm6408_vm13, %v6403_v19, -inf }
 0xe79   :  { %6416 = vmax.xlane.f32.xlu0 %v6415_v50 }
 0xe7d   :  { %v6302_v26 = vpop.f32.mrb[84].mxu1  ;;  %6419 = vmax.xlane.f32.xlu0 %v6418_v49  ;;  %v6256_v32 = vpop.f32.mrb[84].mxu0 }
 0xe7e   :  { %v6405_v35 = vmul.f32 0.125, %v6302_v26  ;;  %v6404_v2 = vmul.f32 0.125, %v6256_v32  ;;  %v7914_v62 = vpop.f32.mrb[85].mxu0  ;;  %v7920_v10 = vpop.f32.mrb[85].mxu1 }
 0xe7f   :  { %v6259_v21 = vpop.f32.mrb[86].mxu0  ;;  %v6305_v55 = vpop.f32.mrb[86].mxu1 }
 0xe80   :  { %v7915_v16 = vpop.f32.mrb[87].mxu0  ;;  %v7921_v9 = vpop.f32.mrb[87].mxu1  ;;  %v6424_v34 = vsel %vm6408_vm13, %v6405_v35, -inf  ;;  %v6421_v31 = vsel %vm6408_vm13, %v6404_v2, -inf }
 0xe81   :  { %6425 = vmax.xlane.f32.xlu0 %v6424_v34  ;;  %6422 = vmax.xlane.f32.xlu1 %v6421_v31 }
 0xe85   :  { %v6348_v8 = vpop.f32.mrb[88].mxu0  ;;  %v6394_v23 = vpop.f32.mrb[88].mxu1 }
 0xe86   :  { %v6406_v51 = vmul.f32 0.125, %v6348_v8  ;;  %v6407_v57 = vmul.f32 0.125, %v6394_v23  ;;  %v7926_v5 = vpop.f32.mrb[89].mxu0  ;;  %v7932_v52 = vpop.f32.mrb[89].mxu1 }
 0xe87   :  { %v6351_v6 = vpop.f32.mrb[90].mxu0  ;;  %v6397_v37 = vpop.f32.mrb[90].mxu1 }
 0xe88   :  { %v7927_v58 = vpop.f32.mrb[91].mxu0  ;;  %v7933_v22 = vpop.f32.mrb[91].mxu1  ;;  %v6430_v24 = vsel %vm6408_vm13, %v6407_v57, -inf  ;;  %v6427_v27 = vsel %vm6408_vm13, %v6406_v51, -inf }
 0xe89   :  { %6431 = vmax.xlane.f32.xlu0 %v6430_v24  ;;  %6428 = vmax.xlane.f32.xlu1 %v6427_v27 }
 0xe8d   :  { %v6411_v38 = vpop.xlane.xlu0 %6410 }
 0xe8e   :  { %v6433_v44 = vsub.f32 %v6400_v0, %v6411_v38 }
 0xe8f   :  { %v6414_v47 = vpop.xlane.xlu1 %6413 }
 0xe90   :  { %v6441_v18 = vmul.f32 1.442695, %v6433_v44  ;;  %v6434_v25 = vsub.f32 %v6401_v20, %v6414_v47 }
 0xe92   :  { %8253 = vpow2.f32 %v6441_v18  ;;  %v6443_v3 = vmul.f32 1.442695, %v6434_v25  ;;  %v6509_v18 = vpack.c.bf16 %v11582_v45, %v11582_v45 }
 0xe94   :  { %8255 = vpow2.f32 %v6443_v3 }
 0xe9c   :  { %v8254_v54 = vpop.eup %8253 }
 0xe9d   :  { %v6457_v61 = vsel %vm6408_vm13, %v8254_v54, 0.0 }
 0xe9e   :  { %v8256_v14 = vpop.eup %8255  ;;  %6458 = vadd.xlane.f32.xlu1 %v6457_v61 }
 0xe9f   :  { %v6460_v28 = vsel %vm6408_vm13, %v8256_v14, 0.0 }
 0xea0   :  { %6461 = vadd.xlane.f32.xlu0 %v6460_v28  ;;  %v6510_v28 = vpack.c.bf16 %v11588_v13, %v11588_v13 }
 0xea2   :  { %v6748_v13 = vsel %vm6516_vm12, %v6510_v28, 0 }
 0xf06   :  { %v6417_v36 = vpop.xlane.xlu0 %6416 }
 0xf07   :  { %v6435_v60 = vsub.f32 %v6402_v53, %v6417_v36 }
 0xf09   :  { %v6445_v15 = vmul.f32 1.442695, %v6435_v60  ;;  %v6702_v60 = vsel %vm6516_vm12, %v6509_v18, 0 }
 0xf0a   :  { %v6420_v4 = vpop.xlane.xlu0 %6419 }
 0xf0b   :  { %8257 = vpow2.f32 %v6445_v15  ;;  %v6436_v0 = vsub.f32 %v6403_v19, %v6420_v4 }
 0xf0d   :  { %v6447_v7 = vmul.f32 1.442695, %v6436_v0 }
 0xf0e   :  { %v6426_v42 = vpop.xlane.xlu0 %6425  ;;  %v6423_v20 = vpop.xlane.xlu1 %6422 }
 0xf0f   :  { %8259 = vpow2.f32 %v6447_v7  ;;  %v6438_v11 = vsub.f32 %v6405_v35, %v6426_v42  ;;  %v6437_v43 = vsub.f32 %v6404_v2, %v6423_v20 }
 0xf11   :  { %v6449_v59 = vmul.f32 1.442695, %v6437_v43  ;;  %v6451_v39 = vmul.f32 1.442695, %v6438_v11 }
 0xf13   :  { %8261 = vpow2.f32 %v6449_v59 }
 0xf14   :  { %8263 = vpow2.f32 %v6451_v39 }
 0xf15   :  { %v8258_v40 = vpop.eup %8257 }
 0xf16   :  { %v6432_v41 = vpop.xlane.xlu0 %6431  ;;  %v6429_v50 = vpop.xlane.xlu1 %6428  ;;  %v6463_v49 = vsel %vm6408_vm13, %v8258_v40, 0.0 }
 0xf17   :  { %v6440_v53 = vsub.f32 %v6407_v57, %v6432_v41  ;;  %v6439_v26 = vsub.f32 %v6406_v51, %v6429_v50  ;;  %6464 = vadd.xlane.f32.xlu1 %v6463_v49 }
 0xf19   :  { %v8260_v32 = vpop.eup %8259  ;;  %v6453_v19 = vmul.f32 1.442695, %v6439_v26  ;;  %v6455_v62 = vmul.f32 1.442695, %v6440_v53 }
 0xf1a   :  { %v6466_v10 = vsel %vm6408_vm13, %v8260_v32, 0.0 }
 0xf1b   :  { %6467 = vadd.xlane.f32.xlu0 %v6466_v10  ;;  %8265 = vpow2.f32 %v6453_v19 }
 0xf1c   :  { %8267 = vpow2.f32 %v6455_v62 }
 0xf1d   :  { %v11658_v35 = vpop.eup %8261 }
 0xf1e   :  { %v6469_v2 = vsel %vm6408_vm13, %v11658_v35, 0.0  ;;  %v11662_v21 = vpop.eup %8263 }
 0xf1f   :  { %6470 = vadd.xlane.f32.xlu0 %v6469_v2  ;;  %v6472_v55 = vsel %vm6408_vm13, %v11662_v21, 0.0 }
 0xf23   :  { %6473 = vadd.xlane.f32.xlu0 %v6472_v55 }
 0xf25   :  { %v11666_v16 = vpop.eup %8265 }
 0xf26   :  { %v6475_v9 = vsel %vm6408_vm13, %v11666_v16, 0.0  ;;  %v11670_v34 = vpop.eup %8267 }
 0xf27   :  { %6476 = vadd.xlane.f32.xlu0 %v6475_v9  ;;  %v6478_v31 = vsel %vm6408_vm13, %v11670_v34, 0.0 }
 0xf28   :  { %8236 = vrot.lane.b32.xlu1 %v8235_v1, %s8330_s13 }
 0xf2b   :  { %v6459_v8 = vpop.xlane.xlu1 %6458  ;;  %6479 = vadd.xlane.f32.xlu0 %v6478_v31 }
 0xf2c   :  { %8269 = vrcp.f32 %v6459_v8  ;;  %8241 = vrot.lane.b32.xlu1 %v8240_v17, %s8330_s13  ;;  %s8358_s13 = smov 24  }
 0xf2d   :  { %v6462_v23 = vpop.xlane.xlu0 %6461  ;;  %s11710_s27 = sld [smem:[%s11926_s0 + %s8358_s13]]   ;;  %s8372_s13 = smov 41  }
 0xf2e   :  { %8271 = vrcp.f32 %v6462_v23 }
 0xf33   :  { %v6895_v19 = vld [vmem:[%s11710_s27 + $0x40] sm:$0xff]  ;;  %v6896_v62 = vld [vmem:[%s11710_s27 + $0x48] sm:$0xff]  ;;  %v6897_v55 = vld [vmem:[%s11710_s27 + $0x50] sm:$0xff] }
 0xf34   :  { %v6904_v2 = vpack.c.bf16 %v6896_v62, %v6895_v19  ;;  %v6900_v31 = vld [vmem:[%s11710_s27 + $0x68] sm:$0xff]  ;;  %v6996_v23 = vld [vmem:[%s11710_s27 + $0x80] sm:$0xff]  ;;  %v6888_v62 = vld [vmem:[%s11710_s27 + $0x30] sm:$0xff] }
 0xf36   :  { %v8270_v51 = vpop.eup %8269 }
 0xf37   :  { %v6489_v57 = vmul.f32 %v8270_v51, %v8254_v54  ;;  %v6997_v51 = vld [vmem:[%s11710_s27 + $0x88] sm:$0xff] }
 0xf38   :  { %v8272_v5 = vpop.eup %8271 }
 0xf39   :  { %v6490_v52 = vmul.f32 %v8272_v5, %v8256_v14  ;;  %v6497_v6 = vpack.c.bf16 %v6489_v57, %v6489_v57  ;;  %v7005_v57 = vpack.c.bf16 %v6997_v51, %v6996_v23  ;;  %v6901_v5 = vld [vmem:[%s11710_s27 + $0x70] sm:$0xff] }
 0xf3b   :  { %7937 = vmatmul.mubr.msk.bf16.vlgmr.msra.gmra.mrb[92].mxu0 %vm6408_vm13, %v6497_v6  ;;  %v6498_v30 = vpack.c.bf16 %v6490_v52, %v6490_v52  ;;  %v6902_v52 = vld [vmem:[%s11710_s27 + $0x78] sm:$0xff] }
 0xf3c   :  { %7948 = vmatprep.mubr.msk.bf16.mxu0 %vm8348_vm9, %v12696_v29  ;;  %v6907_v6 = vpack.c.bf16 %v6902_v52, %v6901_v5  ;;  %v7057_v52 = vld [vmem:[%s11710_s27 + $0xd0] sm:$0xff] }
 0xf3d   :  { %7943 = vmatmul.mubr.msk.bf16.vlgmr.msra.gmra.mrb[92].mxu1 %vm6408_vm13, %v6498_v30  ;;  %v6998_v30 = vld [vmem:[%s11710_s27 + $0x90] sm:$0xff] }
 0xf3e   :  { %7954 = vmatprep.mubr.msk.bf16.mxu1 %vm8348_vm9, %v12696_v29 }
 0xfa4   :  { %v6465_v33 = vpop.xlane.xlu1 %6464 }
 0xfa5   :  { %8273 = vrcp.f32 %v6465_v33  ;;  %v6999_v33 = vld [vmem:[%s11710_s27 + $0x98] sm:$0xff] }
 0xfa8   :  { %v6468_v1 = vpop.xlane.xlu0 %6467  ;;  %v8237_v17 = vpop.permute.xlu1 %8236 }
 0xfa9   :  { %8275 = vrcp.f32 %v6468_v1  ;;  %v8239_v37 = vunpack.i.h.bf16 %v8237_v17  ;;  %v8238_v58 = vunpack.i.l.bf16 %v8237_v17  ;;  %v7006_v1 = vpack.c.bf16 %v6999_v33, %v6998_v30 }
 0xfab   :  { %v6508_v22 = vpack.c.bf16 %v8239_v37, %v8239_v37  ;;  %v6507_v24 = vpack.c.bf16 %v8238_v58, %v8238_v58 }
 0xfac   :  { %v6471_v27 = vpop.xlane.xlu0 %6470  ;;  %v8242_v54 = vpop.permute.xlu1 %8241 }
 0xfad   :  { %v6610_v38 = vsel %vm6516_vm12, %v6507_v24, 0  ;;  %v6656_v44 = vsel %vm6516_vm12, %v6508_v22, 0  ;;  %8277 = vrcp.f32 %v6471_v27  ;;  %v8243_v15 = vunpack.i.l.bf16 %v8242_v54  ;;  %v7000_v24 = vld [vmem:[%s11710_s27 + $0xa0] sm:$0xff]  ;;  %v7001_v27 = vld [vmem:[%s11710_s27 + $0xa8] sm:$0xff] }
 0xfae   :  { %7947 = vmatpush3.bf16.msra.mxu0 %v6610_v38  ;;  %7953 = vmatpush3.bf16.msra.mxu1 %v6656_v44  ;;  %v8244_v42 = vunpack.i.h.bf16 %v8242_v54  ;;  %v7007_v18 = vpack.c.bf16 %v7001_v27, %v7000_v24  ;;  %v7002_v54 = vld [vmem:[%s11710_s27 + $0xb0] sm:$0xff]  ;;  %v7059_v24 = vld [vmem:[%s11710_s27 + $0xe0] sm:$0xff]  ;;  %v7060_v27 = vld [vmem:[%s11710_s27 + $0xe8] sm:$0xff] }
 0xfaf   :  { %v8274_v47 = vpop.eup %8273  ;;  %7958 = vmatprep.subr.bf16.mxu0 %v12696_v29  ;;  %7964 = vmatprep.subr.bf16.mxu1 %v12696_v29  ;;  %v6511_v20 = vpack.c.bf16 %v8243_v15, %v8243_v15  ;;  %v6883_v15 = vld [vmem:[%s11710_s27 + $0x8] sm:$0xff] }
 0xfb0   :  { %v6491_v25 = vmul.f32 %v8274_v47, %v8258_v40  ;;  %v6474_v3 = vpop.xlane.xlu0 %6473  ;;  %v6512_v39 = vpack.c.bf16 %v8244_v42, %v8244_v42 }
 0xfb1   :  { %8279 = vrcp.f32 %v6474_v3  ;;  %v6794_v41 = vsel %vm6516_vm12, %v6511_v20, 0  ;;  %v6884_v20 = vld [vmem:[%s11710_s27 + $0x10] sm:$0xff] }
 0xfb2   :  { %v6499_v61 = vpack.c.bf16 %v6491_v25, %v6491_v25  ;;  %v6840_v26 = vsel %vm6516_vm12, %v6512_v39, 0 }
 0xfb3   :  { %v8276_v14 = vpop.eup %8275 }
 0xfb4   :  { %v6492_v36 = vmul.f32 %v8276_v14, %v8260_v32  ;;  %7949 = vmatmul.mubr.msk.bf16.vlgmr.msra.gmra.mrb[96].mxu0 %vm6408_vm13, %v6499_v61  ;;  %v6477_v4 = vpop.xlane.xlu0 %6476  ;;  %v7003_v61 = vld [vmem:[%s11710_s27 + $0xb8] sm:$0xff] }
 0xfb5   :  { %7959 = vmatpush3.bf16.msra.mxu0 %v6702_v60  ;;  %7960 = vmatprep.mubr.msk.bf16.mxu0 %vm8348_vm9, %v12696_v29  ;;  %8281 = vrcp.f32 %v6477_v4  ;;  %v7008_v14 = vpack.c.bf16 %v7003_v61, %v7002_v54  ;;  %v6882_v60 = vld [vmem:[%s11710_s27] sm:$0xff] }
 0xfb6   :  { %v6500_v45 = vpack.c.bf16 %v6492_v36, %v6492_v36  ;;  %7970 = vmatprep.subr.bf16.mxu0 %v12696_v29 }
 0xfb7   :  { %v8278_v0 = vpop.eup %8277 }
 0xfb8   :  { %7955 = vmatmul.mubr.msk.bf16.vlgmr.msra.gmra.mrb[96].mxu1 %vm6408_vm13, %v6500_v45  ;;  %v6493_v7 = vmul.f32 %v8278_v0, %v11658_v35  ;;  %v6480_v11 = vpop.xlane.xlu0 %6479 }
 0xfb9   :  { %7965 = vmatpush3.bf16.msra.mxu1 %v6748_v13  ;;  %7966 = vmatprep.mubr.msk.bf16.mxu1 %vm8348_vm9, %v12696_v29  ;;  %8283 = vrcp.f32 %v6480_v11  ;;  %v6891_v13 = vpack.c.bf16 %v6883_v15, %v6882_v60  ;;  %v6885_v11 = vld [vmem:[%s11710_s27 + $0x18] sm:$0xff] }
 0xfba   :  { %7976 = vmatprep.subr.bf16.mxu1 %v12696_v29  ;;  %v6501_v43 = vpack.c.bf16 %v6493_v7, %v6493_v7  ;;  %v6892_v39 = vpack.c.bf16 %v6885_v11, %v6884_v20  ;;  %v7767_v20 = vld [vmem:[%s7678_s1] ss:$0 sm:$0xff]  ;;  %s7690_s1 = sld [smem:[%s11926_s0 + %s8373_s28]]  }
 0xfbb   :  { %v8280_v59 = vpop.eup %8279 }
 0xfbc   :  { %v6494_v40 = vmul.f32 %v8280_v59, %v11662_v21  ;;  %7961 = vmatmul.mubr.msk.bf16.vlgmr.msra.gmra.mrb[100].mxu0 %vm6408_vm13, %v6501_v43 }
 0xfbd   :  { %7971 = vmatpush3.bf16.msra.mxu0 %v6794_v41  ;;  %7972 = vmatprep.mubr.msk.bf16.mxu0 %vm8348_vm9, %v12696_v29  ;;  %v6886_v41 = vld [vmem:[%s11710_s27 + $0x20] sm:$0xff] }
 0xfbe   :  { %v6502_v50 = vpack.c.bf16 %v6494_v40, %v6494_v40  ;;  %8006 = vmatprep.subr.bf16.mxu0 %v12696_v29 }
 0xfbf   :  { %v8282_v49 = vpop.eup %8281 }
 0xfc0   :  { %v6495_v53 = vmul.f32 %v8282_v49, %v11666_v16  ;;  %7967 = vmatmul.mubr.msk.bf16.vlgmr.msra.gmra.mrb[100].mxu1 %vm6408_vm13, %v6502_v50  ;;  %v6898_v16 = vld [vmem:[%s11710_s27 + $0x58] sm:$0xff]  ;;  %v6887_v50 = vld [vmem:[%s11710_s27 + $0x28] sm:$0xff] }
 0xfc1   :  { %7977 = vmatpush3.bf16.msra.mxu1 %v6840_v26  ;;  %7978 = vmatprep.mubr.msk.bf16.mxu1 %vm8348_vm9, %v12696_v29  ;;  %v6905_v9 = vpack.c.bf16 %v6898_v16, %v6897_v55 }
 0xfc2   :  { %v6503_v32 = vpack.c.bf16 %v6495_v53, %v6495_v53  ;;  %7982 = vmatprep.subr.bf16.mxu1 %v12696_v29 }
 0xfc3   :  { %v8284_v10 = vpop.eup %8283 }
 0xfc4   :  { %v6496_v35 = vmul.f32 %v8284_v10, %v11670_v34  ;;  %7973 = vmatmul.mubr.msk.bf16.vlgmr.msra.gmra.mrb[104].mxu0 %vm6408_vm13, %v6503_v32  ;;  %v6899_v34 = vld [vmem:[%s11710_s27 + $0x60] sm:$0xff]  ;;  %v6893_v32 = vpack.c.bf16 %v6887_v50, %v6886_v41  ;;  %v6889_v10 = vld [vmem:[%s11710_s27 + $0x38] sm:$0xff] }
 0xfc5   :  { %8014 = vmatprep.mubr.msk.bf16.mxu0 %vm8348_vm9, %v12696_v29  ;;  %v6906_v8 = vpack.c.bf16 %v6900_v31, %v6899_v34  ;;  %8007 = vmatpush3.bf16.msra.mxu0 %v7005_v57  ;;  %v6894_v16 = vpack.c.bf16 %v6889_v10, %v6888_v62  ;;  %v7055_v34 = vld [vmem:[%s11710_s27 + $0xc0] sm:$0xff]  ;;  %v7056_v31 = vld [vmem:[%s11710_s27 + $0xc8] sm:$0xff] }
 0xfc6   :  { %v6504_v21 = vpack.c.bf16 %v6496_v35, %v6496_v35  ;;  %8008 = vmatprep.subr.bf16.mxu0 %v12696_v29  ;;  %v7064_v57 = vpack.c.bf16 %v7056_v31, %v7055_v34  ;;  %v7170_v34 = vld [vmem:[%s7681_s14 + $0x8] sm:$0xff]  ;;  %v7171_v31 = vld [vmem:[%s7681_s14 + $0x10] sm:$0xff] }
 0xfc8   :  { %7979 = vmatmul.mubr.msk.bf16.vlgmr.msra.gmra.mrb[104].mxu1 %vm6408_vm13, %v6504_v21 }
 0xfc9   :  { %7983 = vmatpush3.bf16.msra.mxu1 %v6904_v2  ;;  %7990 = vmatprep.mubr.msk.bf16.mxu1 %vm8348_vm9, %v12696_v29 }
 0xfca   :  { %7984 = vmatprep.subr.bf16.mxu1 %v12696_v29  ;;  %8009 = vmatpush3.bf16.msra.mxu0 %v7006_v1 }
 0xfcb   :  { %8010 = vmatprep.subr.bf16.mxu0 %v12696_v29 }
 0xfcd   :  { %7985 = vmatpush3.bf16.msra.mxu1 %v6905_v9 }
 0xfce   :  { %7986 = vmatprep.subr.bf16.mxu1 %v12696_v29  ;;  %8011 = vmatpush3.bf16.msra.mxu0 %v7007_v18  ;;  %v7062_v18 = vld [vmem:[%s11710_s27 + $0xf8] sm:$0xff] }
 0xfcf   :  { %8012 = vmatprep.subr.bf16.mxu0 %v12696_v29 }
 0xfd1   :  { %7987 = vmatpush3.bf16.msra.mxu1 %v6906_v8 }
 0xfd2   :  { %7988 = vmatprep.subr.bf16.mxu1 %v12696_v29  ;;  %8013 = vmatpush3.bf16.msra.mxu0 %v7008_v14 }
 0xfd3   :  { %8030 = vmatprep.subr.bf16.mxu0 %v12696_v29 }
 0xfd5   :  { %7989 = vmatpush3.bf16.msra.mxu1 %v6907_v6  ;;  %v7058_v6 = vld [vmem:[%s11710_s27 + $0xd8] sm:$0xff] }
 0xfd6   :  { %7994 = vmatprep.subr.bf16.mxu1 %v12696_v29 }
0x100e   :  { %v11747_v17 = vpop.f32.mrb[92].mxu0 }
0x100f   :  { %v7938_v37 = vpop.f32.mrb[93].mxu0 }
0x1010   :  { %v6557_v58 = vpop.f32.mrb[94].mxu0  ;;  %v11750_v22 = vpop.f32.mrb[92].mxu1 }
0x1011   :  { %v6890_v38 = vpack.c.bf16 %v11750_v22, %v11747_v17  ;;  %v7939_v44 = vpop.f32.mrb[95].mxu0  ;;  %v7944_v47 = vpop.f32.mrb[93].mxu1  ;;  %v7065_v58 = vpack.c.bf16 %v7058_v6, %v7057_v52 }
0x1012   :  { %v6603_v25 = vpop.f32.mrb[94].mxu1  ;;  %v7066_v44 = vpack.c.bf16 %v7060_v27, %v7059_v24  ;;  %v7061_v47 = vld [vmem:[%s11710_s27 + $0xf0] sm:$0xff]  ;;  %s7694_s27 = sld [smem:[%s11926_s0 + %s8372_s13]]  }
0x1013   :  { %v7945_v3 = vpop.f32.mrb[95].mxu1  ;;  %v7067_v17 = vpack.c.bf16 %v7062_v18, %v7061_v47  ;;  %v7769_v47 = vld [vmem:[%s7680_s9] ss:$0 sm:$0xff] }
0x1087   :  { %v6646_v28 = vpop.f32.mrb[96].mxu0 }
0x1088   :  { %v7950_v36 = vpop.f32.mrb[97].mxu0 }
0x1089   :  { %v6649_v4 = vpop.f32.mrb[98].mxu0 }
0x108a   :  { %v7951_v45 = vpop.f32.mrb[99].mxu0 }
0x108b   :  { %v6692_v0 = vpop.f32.mrb[96].mxu1 }
0x108c   :  { %v6903_v7 = vpack.c.bf16 %v6692_v0, %v6646_v28  ;;  %v7956_v42 = vpop.f32.mrb[97].mxu1 }
0x108d   :  { %v6695_v43 = vpop.f32.mrb[98].mxu1 }
0x108e   :  { %v7957_v59 = vpop.f32.mrb[99].mxu1  ;;  %7991 = vmatmul.mubr.msk.bf16.vlgmr.msra.gmra.mrb[108].mxu1 %vm5462_vm10, %v6903_v7 }
0x108f   :  { %7995 = vmatpush3.bf16.msra.mxu1 %v6891_v13  ;;  %8002 = vmatprep.mubr.msk.bf16.mxu1 %vm8348_vm9, %v12696_v29  ;;  %v6738_v40 = vpop.f32.mrb[100].mxu0 }
0x1090   :  { %7996 = vmatprep.subr.bf16.mxu1 %v12696_v29  ;;  %v7962_v49 = vpop.f32.mrb[101].mxu0 }
0x1091   :  { %v6741_v53 = vpop.f32.mrb[102].mxu0 }
0x1092   :  { %v7963_v26 = vpop.f32.mrb[103].mxu0 }
0x1093   :  { %7997 = vmatpush3.bf16.msra.mxu1 %v6892_v39  ;;  %v6784_v19 = vpop.f32.mrb[100].mxu1 }
0x1094   :  { %7998 = vmatprep.subr.bf16.mxu1 %v12696_v29  ;;  %v7004_v35 = vpack.c.bf16 %v6784_v19, %v6738_v40  ;;  %v7968_v2 = vpop.f32.mrb[101].mxu1 }
0x1095   :  { %v6787_v21 = vpop.f32.mrb[102].mxu1 }
0x1096   :  { %v7969_v55 = vpop.f32.mrb[103].mxu1  ;;  %8015 = vmatmul.mubr.msk.bf16.vlgmr.msra.gmra.mrb[108].mxu0 %vm5462_vm10, %v7004_v35 }
0x1097   :  { %7999 = vmatpush3.bf16.msra.mxu1 %v6893_v32  ;;  %v6830_v9 = vpop.f32.mrb[104].mxu0  ;;  %8034 = vmatprep.mubr.msk.bf16.mxu0 %vm8348_vm9, %v12696_v29 }
0x1098   :  { %8000 = vmatprep.subr.bf16.mxu1 %v12696_v29  ;;  %v7974_v8 = vpop.f32.mrb[105].mxu0 }
0x1099   :  { %v6833_v23 = vpop.f32.mrb[106].mxu0 }
0x109a   :  { %v7975_v51 = vpop.f32.mrb[107].mxu0  ;;  %v7172_v23 = vld [vmem:[%s7681_s14 + $0x18] sm:$0xff] }
0x109b   :  { %8001 = vmatpush3.bf16.msra.mxu1 %v6894_v16  ;;  %v6876_v5 = vpop.f32.mrb[104].mxu1  ;;  %v7175_v51 = vpack.c.bf16 %v7172_v23, %v7171_v31 }
0x109c   :  { %8018 = vmatprep.subr.bf16.mxu1 %v12696_v29  ;;  %v7063_v30 = vpack.c.bf16 %v6876_v5, %v6830_v9  ;;  %v7980_v33 = vpop.f32.mrb[105].mxu1  ;;  %v7169_v9 = vld [vmem:[%s7681_s14] sm:$0xff]  ;;  %s8376_s14 = smov 42  }
0x109d   :  { %v6879_v1 = vpop.f32.mrb[106].mxu1  ;;  %v7174_v8 = vpack.c.bf16 %v7170_v34, %v7169_v9  ;;  %s11921_s4 = sld [smem:[%s11926_s0 + %s8376_s14]]   ;;  %s8377_s0 = smov 45  }
0x109e   :  { %8003 = vmatmul.mubr.msk.bf16.vlgmr.msra.gmra.mrb[112].mxu1 %vm5462_vm10, %v6890_v38  ;;  %v7981_v37 = vpop.f32.mrb[107].mxu1 }
0x109f   :  { %8019 = vmatpush3.bf16.msra.mxu1 %v7064_v57  ;;  %8026 = vmatprep.mubr.msk.bf16.mxu1 %vm8348_vm9, %v12696_v29 }
0x10a0   :  { %8020 = vmatprep.subr.bf16.mxu1 %v12696_v29  ;;  %8031 = vmatpush3.bf16.msra.mxu0 %v7174_v8 }
0x10a1   :  { %8032 = vmatprep.subr.bf16.mxu0 %v12696_v29 }
0x10a3   :  { %8021 = vmatpush3.bf16.msra.mxu1 %v7065_v58  ;;  %v7768_v58 = vld [vmem:[%s7679_s5] ss:$0 sm:$0xff] }
0x10a4   :  { %8022 = vmatprep.subr.bf16.mxu1 %v12696_v29  ;;  %8033 = vmatpush3.bf16.msra.mxu0 %v7175_v51 }
0x10a7   :  { %8023 = vmatpush3.bf16.msra.mxu1 %v7066_v44 }
0x10a8   :  { %8024 = vmatprep.subr.bf16.mxu1 %v12696_v29 }
0x10ab   :  { %8025 = vmatpush3.bf16.msra.mxu1 %v7067_v17 }
0x10ac   :  { %8038 = vmatprep.subr.bf16.mxu1 %v12696_v29 }
0x10ae   :  { %8027 = vmatmul.mubr.msk.bf16.vlgmr.msra.gmra.mrb[116].mxu1 %vm5462_vm10, %v7063_v30 }
0x10af   :  { %8042 = vmatprep.mubr.msk.bf16.mxu1 %vm8348_vm9, %v12696_v29 }
0x1161   :  { %v6945_v22 = vpop.f32.mrb[108].mxu1 }
0x1162   :  { %v7992_v38 = vpop.f32.mrb[109].mxu1 }
0x1163   :  { %v6948_v25 = vpop.f32.mrb[110].mxu1 }
0x1164   :  { %v7993_v3 = vpop.f32.mrb[111].mxu1 }
0x1165   :  { %v7246_v3 = vld [vmem:[%s7683_s20 + $0x8] sm:$0xff] }
0x1169   :  { %v7046_v54 = vpop.f32.mrb[108].mxu0 }
0x116a   :  { %v8016_v61 = vpop.f32.mrb[109].mxu0 }
0x116b   :  { %v7049_v14 = vpop.f32.mrb[110].mxu0  ;;  %v7247_v61 = vld [vmem:[%s7683_s20 + $0x10] sm:$0xff] }
0x116c   :  { %v8017_v28 = vpop.f32.mrb[111].mxu0 }
0x1171   :  { %v6989_v36 = vpop.f32.mrb[112].mxu1 }
0x1172   :  { %v6990_v60 = vadd.f32 %v6989_v36, %v6945_v22  ;;  %v8004_v15 = vpop.f32.mrb[113].mxu1 }
0x1173   :  { %v6992_v4 = vpop.f32.mrb[114].mxu1 }
0x1174   :  { %v6993_v45 = vadd.f32 %v6992_v4, %v6948_v25  ;;  %v8005_v0 = vpop.f32.mrb[115].mxu1  ;;  %v7053_v13 = vadd.f32 %v7046_v54, %v6990_v60  ;;  %v7245_v25 = vld [vmem:[%s7683_s20] sm:$0xff] }
0x1175   :  { %v7250_v54 = vpack.c.bf16 %v7246_v3, %v7245_v25  ;;  %v7775_v3 = vld [vmem:[%s7686_s3] ss:$0 sm:$0xff] }
0x1176   :  { %v7054_v7 = vadd.f32 %v7049_v14, %v6993_v45  ;;  %v7248_v14 = vld [vmem:[%s7683_s20 + $0x18] sm:$0xff] }
0x1177   :  { %8039 = vmatpush3.bf16.msra.mxu1 %v7250_v54  ;;  %v7251_v28 = vpack.c.bf16 %v7248_v14, %v7247_v61 }
0x1178   :  { %8040 = vmatprep.subr.bf16.mxu1 %v12696_v29 }
0x117b   :  { %8041 = vmatpush3.bf16.msra.mxu1 %v7251_v28 }
0x117c   :  { %8046 = vmatprep.subr.bf16.mxu1 %v12696_v29 }
0x1181   :  { %v7105_v42 = vpop.f32.mrb[116].mxu1 }
0x1182   :  { %v7112_v11 = vadd.f32 %v7105_v42, %v7053_v13  ;;  %v8028_v43 = vpop.f32.mrb[117].mxu1 }
0x1183   :  { %v7108_v59 = vpop.f32.mrb[118].mxu1 }
0x1184   :  { %v7121_v39 = vadd.f32 %v7767_v20, %v7112_v11  ;;  %v7113_v40 = vadd.f32 %v7108_v59, %v7054_v7  ;;  %v8029_v41 = vpop.f32.mrb[119].mxu1 }
0x1186   :  { %v11804_v50 = vadd.f32 %v7121_v39, %v11477_v48  ;;  %v7122_v49 = vadd.f32 %v7767_v20, %v7113_v40 }
0x1188   :  { %v11807_v53 = vadd.f32 %v7122_v49, %v11481_v12  ;;  %v7127_v26 = vsel %vm5580_vm11, %v11804_v50, 0.0 }
0x1189   :  { %7128 = vadd.xlane.f32.xlu0 %v7127_v26 }
0x118a   :  { %v7130_v32 = vsel %vm5580_vm11, %v11807_v53, 0.0 }
0x118b   :  { %7131 = vadd.xlane.f32.xlu1 %v7130_v32 }
0x1216   :  { %v7129_v19 = vpop.xlane.xlu0 %7128 }
0x1217   :  { %v7133_v62 = vmul.f32 0.03125, %v7129_v19 }
0x1218   :  { %v7132_v10 = vpop.xlane.xlu1 %7131 }
0x1219   :  { %v7135_v35 = vsub.f32 %v11804_v50, %v7133_v62  ;;  %v7134_v2 = vmul.f32 0.03125, %v7132_v10 }
0x121b   :  { %v7136_v48 = vsub.f32 %v11807_v53, %v7134_v2  ;;  %v7137_v21 = vmul.f32 %v7135_v35, %v7135_v35 }
0x121d   :  { %v7139_v12 = vsel %vm5580_vm11, %v7137_v21, 0.0  ;;  %v7138_v55 = vmul.f32 %v7136_v48, %v7136_v48  ;;  %v7772_v21 = vld [vmem:[%s7684_s26] ss:$0 sm:$0xff] }
0x121e   :  { %7140 = vadd.xlane.f32.xlu0 %v7139_v12 }
0x121f   :  { %v7142_v16 = vsel %vm5580_vm11, %v7138_v55, 0.0 }
0x1222   :  { %7143 = vadd.xlane.f32.xlu0 %v7142_v16 }
0x12ab   :  { %v7141_v57 = vpop.xlane.xlu0 %7140 }
0x12ac   :  { %v7145_v5 = vmul.f32 0.03125, %v7141_v57 }
0x12ae   :  { %v7147_v52 = vadd.f32 1e-05, %v7145_v5 }
0x12af   :  { %v7144_v6 = vpop.xlane.xlu0 %7143 }
0x12b0   :  { %8285 = vrsqrt.f32 %v7147_v52  ;;  %v7146_v30 = vmul.f32 0.03125, %v7144_v6 }
0x12b2   :  { %v7148_v33 = vadd.f32 1e-05, %v7146_v30 }
0x12b4   :  { %8287 = vrsqrt.f32 %v7148_v33 }
0x12ba   :  { %v8286_v1 = vpop.eup %8285 }
0x12bb   :  { %v7151_v37 = vmul.f32 %v8286_v1, %v7135_v35 }
0x12bd   :  { %v7159_v27 = vmul.f32 %v7768_v58, %v7151_v37 }
0x12be   :  { %v8288_v24 = vpop.eup %8287 }
0x12bf   :  { %v7152_v44 = vmul.f32 %v8288_v24, %v7136_v48  ;;  %v7167_v17 = vadd.f32 %v7769_v47, %v7159_v27 }
0x12c1   :  { %v7160_v18 = vmul.f32 %v7768_v58, %v7152_v44 }
0x12c3   :  { %v7168_v22 = vadd.f32 %v7769_v47, %v7160_v18 }
0x12c5   :  { %v7173_v38 = vpack.c.bf16 %v7168_v22, %v7167_v17 }
0x12c7   :  { %8035 = vmatmul.mubr.msk.bf16.vlgmr.msra.gmra.mrb[112].mxu0 %vm5580_vm11, %v7173_v38  ;;  %v7774_v38 = vld [vmem:[%s7685_s29] ss:$0 sm:$0xff] }
0x12c8   :  { %7487 = vmatprep.mubr.bf16.mxu0 %v12320_v56  ;;  %v7770_v56 = vld [vmem:[%s7682_s23] ss:$0 sm:$0xff] }
0x139a   :  { %v7220_v36 = vpop.f32.mrb[112].mxu0 }
0x139b   :  { %v7221_v60 = vadd.f32 %v7770_v56, %v7220_v36  ;;  %v8036_v15 = vpop.f32.mrb[113].mxu0 }
0x139c   :  { %v7223_v4 = vpop.f32.mrb[114].mxu0 }
0x139d   :  { %v7227_v45 = vmul.f32 %v7221_v60, %v7221_v60  ;;  %v7224_v0 = vadd.f32 %v7770_v56, %v7223_v4  ;;  %v8037_v13 = vpop.f32.mrb[115].mxu0 }
0x139f   :  { %v7229_v7 = vmul.f32 %v7227_v45, %v7221_v60  ;;  %v7228_v42 = vmul.f32 %v7224_v0, %v7224_v0 }
0x13a1   :  { %v7231_v20 = vmul.f32 0.044715, %v7229_v7  ;;  %v7230_v11 = vmul.f32 %v7228_v42, %v7224_v0 }
0x13a3   :  { %v7233_v43 = vadd.f32 %v7231_v20, %v7221_v60  ;;  %v7232_v59 = vmul.f32 0.044715, %v7230_v11 }
0x13a5   :  { %v7235_v39 = vmul.f32 0.7978846, %v7233_v43  ;;  %v7234_v40 = vadd.f32 %v7232_v59, %v7224_v0 }
0x13a7   :  { %8289 = vtanh.f32 %v7235_v39  ;;  %v7236_v41 = vmul.f32 0.7978846, %v7234_v40 }
0x13a9   :  { %8291 = vtanh.f32 %v7236_v41 }
0x13b1   :  { %v8290_v49 = vpop.eup %8289 }
0x13b2   :  { %v7239_v26 = vadd.f32 1.0, %v8290_v49 }
0x13b3   :  { %v8292_v32 = vpop.eup %8291 }
0x13b4   :  { %v7241_v19 = vmul.f32 0.5, %v7239_v26  ;;  %v7240_v62 = vadd.f32 1.0, %v8292_v32 }
0x13b6   :  { %v7242_v10 = vmul.f32 0.5, %v7240_v62  ;;  %v7243_v35 = vmul.f32 %v7241_v19, %v7221_v60 }
0x13b8   :  { %v7244_v2 = vmul.f32 %v7242_v10, %v7224_v0 }
0x13ba   :  { %v7249_v48 = vpack.c.bf16 %v7244_v2, %v7243_v35 }
0x13bc   :  { %8043 = vmatmul.mubr.msk.bf16.vlgmr.msra.gmra.mrb[120].mxu1 %vm5580_vm11, %v7249_v48 }
0x13bd   :  { %8050 = vmatprep.mubr.msk.bf16.mxu1 %vm8348_vm9, %v12696_v29 }
0x148f   :  { %v7296_v12 = vpop.f32.mrb[120].mxu1 }
0x1490   :  { %v7297_v55 = vadd.f32 %v7772_v21, %v7296_v12  ;;  %v8044_v16 = vpop.f32.mrb[121].mxu1 }
0x1491   :  { %v7299_v9 = vpop.f32.mrb[122].mxu1 }
0x1492   :  { %v7303_v34 = vadd.f32 %v7297_v55, %v11804_v50  ;;  %v7300_v31 = vadd.f32 %v7772_v21, %v7299_v9  ;;  %v8045_v8 = vpop.f32.mrb[123].mxu1  ;;  %v7420_v9 = vld [vmem:[%s7689_s15 + $0x8] sm:$0xff] }
0x1494   :  { %v7304_v23 = vadd.f32 %v7300_v31, %v11807_v53  ;;  %v7307_v51 = vsel %vm5580_vm11, %v7303_v34, 0.0  ;;  %v7419_v31 = vld [vmem:[%s7689_s15] sm:$0xff] }
0x1495   :  { %7308 = vadd.xlane.f32.xlu0 %v7307_v51  ;;  %v7497_v51 = vld [vmem:[%s7691_s6 + $0x8] sm:$0xff] }
0x1496   :  { %v7310_v57 = vsel %vm5580_vm11, %v7304_v23, 0.0 }
0x1499   :  { %7311 = vadd.xlane.f32.xlu0 %v7310_v57  ;;  %v7421_v57 = vld [vmem:[%s7689_s15 + $0x10] sm:$0xff] }
0x1522   :  { %v7309_v5 = vpop.xlane.xlu0 %7308 }
0x1523   :  { %v7313_v52 = vmul.f32 0.03125, %v7309_v5 }
0x1525   :  { %v7315_v6 = vsub.f32 %v7303_v34, %v7313_v52  ;;  %v7422_v34 = vld [vmem:[%s7689_s15 + $0x18] sm:$0xff]  ;;  %v7429_v52 = vpack.c.bf16 %v7421_v57, %v7419_v31  ;;  %v7441_v31 = vsub.s32 1, %v11564_v46  ;;  %v7779_v57 = vld [vmem:[%s7692_s12] ss:$0 sm:$0xff] }
0x1526   :  { %v7312_v30 = vpop.xlane.xlu0 %7311  ;;  %v7430_v8 = vpack.c.bf16 %v7422_v34, %v7420_v9  ;;  %v90_v34 = vstv %s7694_s27 }
0x1527   :  { %v7314_v33 = vmul.f32 0.03125, %v7312_v30  ;;  %v7317_v1 = vmul.f32 %v7315_v6, %v7315_v6  ;;  %v7426_v30 = vld [vmem:[%s7689_s15 + $0x38] sm:$0xff]  ;;  %91 = vst [vmem:[#allocation4] sm:$0x1] %v90_v34 }
0x1528   :  { %7455 = vmatprep.subr.bf16.mxu0 %v7430_v8  ;;  %v8375_v8 = vmov 1983009808  }
0x1529   :  { %v7316_v37 = vsub.f32 %v7304_v23, %v7314_v33  ;;  %v7319_v58 = vsel %vm5580_vm11, %v7317_v1, 0.0  ;;  %v7496_v23 = vld [vmem:[%s7691_s6] sm:$0xff]  ;;  %v7498_v33 = vld [vmem:[%s7691_s6 + $0x10] sm:$0xff]  ;;  %7456 = vmatpush1.bf16.msra.mxu0 %v7429_v52 }
0x152a   :  { %7320 = vadd.xlane.f32.xlu0 %v7319_v58  ;;  %v7500_v5 = vpack.c.bf16 %v7497_v51, %v7496_v23  ;;  %v7423_v58 = vld [vmem:[%s7689_s15 + $0x20] sm:$0xff]  ;;  %v7626_v23 = vunpack.c.l.s4 %v8375_v8 }
0x152b   :  { %v7318_v50 = vmul.f32 %v7316_v37, %v7316_v37 }
0x152c   :  { %8047 = vmatpush3.bf16.msra.mxu1 %v7500_v5  ;;  %v7627_v52 = vunpack.c.0.s8 %v7626_v23 }
0x152d   :  { %v7322_v24 = vsel %vm5580_vm11, %v7318_v50, 0.0  ;;  %v7425_v50 = vld [vmem:[%s7689_s15 + $0x30] sm:$0xff]  ;;  %8048 = vmatprep.subr.bf16.mxu1 %v12696_v29 }
0x152e   :  { %7323 = vadd.xlane.f32.xlu0 %v7322_v24 }
0x15b7   :  { %v7321_v53 = vpop.xlane.xlu0 %7320 }
0x15b8   :  { %v7325_v27 = vmul.f32 0.03125, %v7321_v53  ;;  %v7431_v53 = vpack.c.bf16 %v7425_v50, %v7423_v58 }
0x15ba   :  { %v7327_v44 = vadd.f32 1e-05, %v7325_v27 }
0x15bb   :  { %v7324_v47 = vpop.xlane.xlu0 %7323 }
0x15bc   :  { %8293 = vrsqrt.f32 %v7327_v44  ;;  %v7326_v18 = vmul.f32 0.03125, %v7324_v47 }
0x15be   :  { %v7328_v17 = vadd.f32 1e-05, %v7326_v18 }
0x15c0   :  { %8295 = vrsqrt.f32 %v7328_v17  ;;  %v7776_v17 = vld [vmem:[%s7687_s17] ss:$0 sm:$0xff] }
0x15c6   :  { %v8294_v22 = vpop.eup %8293 }
0x15c7   :  { %v7331_v25 = vmul.f32 %v8294_v22, %v7315_v6  ;;  %v7424_v6 = vld [vmem:[%s7689_s15 + $0x28] sm:$0xff] }
0x15c8   :  { %v7432_v1 = vpack.c.bf16 %v7426_v30, %v7424_v6 }
0x15c9   :  { %v7339_v54 = vmul.f32 %v7774_v38, %v7331_v25  ;;  %v7777_v25 = vld [vmem:[%s7688_s21] ss:$0 sm:$0xff] }
0x15ca   :  { %v8296_v61 = vpop.eup %8295  ;;  %7457 = vmatprep.subr.bf16.mxu0 %v7432_v1 }
0x15cb   :  { %v7332_v14 = vmul.f32 %v8296_v61, %v7316_v37  ;;  %v7347_v28 = vadd.f32 %v7775_v3, %v7339_v54  ;;  %v7499_v37 = vld [vmem:[%s7691_s6 + $0x18] sm:$0xff]  ;;  %7458 = vmatpush1.bf16.msra.mxu0 %v7431_v53 }
0x15cc   :  { %v7501_v24 = vpack.c.bf16 %v7499_v37, %v7498_v33  ;;  %8054 = vmatprep.subr.bf16.mxu0 %v12696_v29 }
0x15cd   :  { %v7340_v56 = vmul.f32 %v7774_v38, %v7332_v14  ;;  %v7349_v36 = vsel %vm5580_vm11, %v7347_v28, 0.0 }
0x15ce   :  { %v7350_v60 = vrot.slane %v7349_v36, 4  ;;  %8049 = vmatpush3.bf16.msra.mxu1 %v7501_v24  ;;  %v7630_v24 = vsub.s32 %v7627_v52, %v11564_v46 }
0x15cf   :  { %v7348_v15 = vadd.f32 %v7775_v3, %v7340_v56 }
0x15d0   :  { %v7351_v4 = vadd.f32 %v7350_v60, %v7349_v36 }
0x15d1   :  { %v7356_v45 = vsel %vm5580_vm11, %v7348_v15, 0.0  ;;  %v7550_v15 = vld [vmem:[%s11877_s24] sm:$0xff] }
0x15d2   :  { %v7352_v0 = vrot.slane %v7351_v4, 2  ;;  %v7357_v13 = vrot.slane %v7356_v45, 4 }
0x15d4   :  { %v7353_v7 = vadd.f32 %v7352_v0, %v7351_v4  ;;  %v7358_v42 = vadd.f32 %v7357_v13, %v7356_v45  ;;  %v7551_v4 = vld [vmem:[%s11877_s24 + $0x8] sm:$0xff] }
0x15d6   :  { %v7354_v20 = vrot.slane %v7353_v7, 1  ;;  %v7359_v11 = vrot.slane %v7358_v42, 2 }
0x15d8   :  { %v7360_v43 = vadd.f32 %v7359_v11, %v7358_v42  ;;  %v7355_v59 = vadd.f32 %v7354_v20, %v7353_v7  ;;  %v7567_v7 = vpack.c.bf16 %v7551_v4, %v7550_v15  ;;  %v7552_v20 = vld [vmem:[%s11877_s24 + $0x10] sm:$0xff]  ;;  %v7553_v11 = vld [vmem:[%s11877_s24 + $0x18] sm:$0xff] }
0x15da   :  { %v7361_v39 = vrot.slane %v7360_v43, 1  ;;  %v7364_v41 = vmul.f32 0.125, %v7355_v59  ;;  %v7554_v59 = vld [vmem:[%s11877_s24 + $0x20] sm:$0xff] }
0x15dc   :  { %v7362_v40 = vadd.f32 %v7361_v39, %v7360_v43  ;;  %v7568_v43 = vpack.c.bf16 %v7553_v11, %v7552_v20  ;;  %v7555_v39 = vld [vmem:[%s11877_s24 + $0x28] sm:$0xff] }
0x15de   :  { %v7365_v49 = vmul.f32 0.125, %v7362_v40  ;;  %v7569_v40 = vpack.c.bf16 %v7555_v39, %v7554_v59 }
0x15e0   :  { %v7371_v26 = vsel %vm7370_vm14, %v7365_v49, %v7364_v41 }
0x15e1   :  { %v7374_v32 = vsel %vm7373_vm15, %v7371_v26, 0.0 }
0x15e2   :  { %7375 = vadd.xlane.f32.xlu0 %v7374_v32  ;;  %v7558_v32 = vld [vmem:[%s11877_s24 + $0x40] sm:$0xff] }
0x166f   :  { %v7376_v19 = vpop.xlane.xlu0 %7375 }
0x1670   :  { %v7377_v62 = vmul.f32 0.03125, %v7376_v19  ;;  %v7559_v19 = vld [vmem:[%s11877_s24 + $0x48] sm:$0xff] }
0x1672   :  { %v7379_v10 = vrot.slane %v7377_v62, 1  ;;  %v7382_v35 = vsub.f32 %v7364_v41, %v7377_v62  ;;  %v7556_v41 = vld [vmem:[%s11877_s24 + $0x30] sm:$0xff]  ;;  %v7571_v62 = vpack.c.bf16 %v7559_v19, %v7558_v32 }
0x1674   :  { %v7383_v2 = vsub.f32 %v7365_v49, %v7379_v10  ;;  %v7384_v21 = vmul.f32 %v7382_v35, %v7382_v35  ;;  %v7557_v49 = vld [vmem:[%s11877_s24 + $0x38] sm:$0xff]  ;;  %v7560_v10 = vld [vmem:[%s11877_s24 + $0x50] sm:$0xff] }
0x1675   :  { %v7570_v26 = vpack.c.bf16 %v7557_v49, %v7556_v41 }
0x1676   :  { %v7385_v48 = vmul.f32 %v7383_v2, %v7383_v2 }
0x1678   :  { %v7388_v12 = vrot.slane %v7385_v48, 7  ;;  %v7562_v48 = vld [vmem:[%s11877_s24 + $0x60] sm:$0xff] }
0x167a   :  { %v7389_v55 = vsel %vm7370_vm14, %v7388_v12, %v7384_v21  ;;  %v7563_v21 = vld [vmem:[%s11877_s24 + $0x68] sm:$0xff] }
0x167b   :  { %v7391_v16 = vsel %vm7373_vm15, %v7389_v55, 0.0  ;;  %v7573_v12 = vpack.c.bf16 %v7563_v21, %v7562_v48  ;;  %v7564_v55 = vld [vmem:[%s11877_s24 + $0x70] sm:$0xff] }
0x167c   :  { %7392 = vadd.xlane.f32.xlu0 %v7391_v16  ;;  %v7565_v16 = vld [vmem:[%s11877_s24 + $0x78] sm:$0xff] }
0x167d   :  { %v7574_v9 = vpack.c.bf16 %v7565_v16, %v7564_v55 }
0x1709   :  { %v7393_v27 = vpop.xlane.xlu0 %7392 }
0x170a   :  { %v7394_v44 = vmul.f32 0.03125, %v7393_v27 }
0x170c   :  { %v7395_v47 = vadd.f32 1e-05, %v7394_v44 }
0x170e   :  { %8297 = vrsqrt.f32 %v7395_v47 }
0x1718   :  { %v8298_v18 = vpop.eup %8297 }
0x1719   :  { %v7398_v22 = vrot.slane %v8298_v18, 1  ;;  %v7401_v38 = vmul.f32 %v8298_v18, %v7382_v35  ;;  %v7561_v35 = vld [vmem:[%s11877_s24 + $0x58] sm:$0xff] }
0x171b   :  { %v7402_v3 = vmul.f32 %v7398_v22, %v7383_v2  ;;  %v7409_v54 = vmul.f32 %v7776_v17, %v7401_v38  ;;  %v7572_v2 = vpack.c.bf16 %v7561_v35, %v7560_v10  ;;  %v7781_v38 = vld [vmem:[#allocation4] ss:$0 sm:$0xff] }
0x171d   :  { %v7410_v61 = vmul.f32 %v7776_v17, %v7402_v3  ;;  %v7417_v14 = vadd.f32 %v7777_v25, %v7409_v54 }
0x171f   :  { %v7418_v28 = vadd.f32 %v7777_v25, %v7410_v61  ;;  %v7427_v56 = vpack.c.bf16 %v7417_v14, %v7417_v14 }
0x1721   :  { %v7428_v36 = vpack.c.bf16 %v7418_v28, %v7418_v28  ;;  %v7447_v45 = vunpack.c.l.b16 %v7427_v56 }
0x1723   :  { %v7448_v60 = vunpack.c.l.b16 %v7428_v36 }
0x1725   :  { %v7449_v0 = vrot.slane %v7448_v60, 7 }
0x1727   :  { %v7450_v13 = vsel %vm7370_vm14, %v7449_v0, %v7447_v45 }
0x1728   :  { %v7451_v42 = vpack.c.b16 %v7450_v13, %v7450_v13 }
0x172a   :  { %7778 = vmatmul.mubr.msk.bf16.vlgmr.msra.gmra.mrb[116].mxu0 %vm5580_vm11, %v7451_v42  ;;  %8051 = vmatmul.mubr.msk.bf16.vlgmr.msra.gmra.mrb[124].mxu1 %vm5580_vm11, %v7451_v42 }
0x172b   :  { %8055 = vmatpush3.bf16.msra.mxu0 %v7567_v7  ;;  %8070 = vmatprep.mubr.msk.bf16.mxu0 %vm8348_vm9, %v12696_v29 }
0x172c   :  { %8056 = vmatprep.subr.bf16.mxu0 %v12696_v29 }
0x172f   :  { %8057 = vmatpush3.bf16.msra.mxu0 %v7568_v43 }
0x1730   :  { %8058 = vmatprep.subr.bf16.mxu0 %v12696_v29 }
0x1733   :  { %8059 = vmatpush3.bf16.msra.mxu0 %v7569_v40 }
0x1734   :  { %8060 = vmatprep.subr.bf16.mxu0 %v12696_v29 }
0x1737   :  { %8061 = vmatpush3.bf16.msra.mxu0 %v7570_v26 }
0x1738   :  { %8062 = vmatprep.subr.bf16.mxu0 %v12696_v29 }
0x173b   :  { %8063 = vmatpush3.bf16.msra.mxu0 %v7571_v62 }
0x173c   :  { %8064 = vmatprep.subr.bf16.mxu0 %v12696_v29 }
0x173f   :  { %8065 = vmatpush3.bf16.msra.mxu0 %v7572_v2 }
0x1740   :  { %8066 = vmatprep.subr.bf16.mxu0 %v12696_v29 }
0x1743   :  { %8067 = vmatpush3.bf16.msra.mxu0 %v7573_v12 }
0x1744   :  { %8068 = vmatprep.subr.bf16.mxu0 %v12696_v29  ;;  %v7433_v29 = vld [vmem:[%s7690_s1] sm:$0x3] }
0x1745   :  { %v7438_v51 = vrot.slane %v7433_v29, %v11579_v63  ;;  %v7442_v5 = vrot.slane %v7433_v29, %v7441_v31 }
0x1747   :  { %8069 = vmatpush3.bf16.msra.mxu0 %v7574_v9 }
0x17fd   :  { %v7489_v6 = vpop.f32.mrb[116].mxu0  ;;  %v7543_v30 = vpop.f32.mrb[124].mxu1 }
0x17fe   :  { %v7490_v33 = vadd.f32 %v7489_v6, %v7438_v51  ;;  %v7544_v1 = vadd.f32 %v7779_v57, %v7543_v30  ;;  %v7491_v37 = vpop.f32.mrb[117].mxu0  ;;  %v8052_v58 = vpop.f32.mrb[125].mxu1 }
0x17ff   :  { %v7492_v50 = vadd.f32 %v7491_v37, %v7442_v5  ;;  %v7493_v63 = vpop.f32.mrb[118].mxu0  ;;  %v7546_v53 = vpop.f32.mrb[126].mxu1 }
0x1800   :  { %v7549_v27 = vmax.f32 %v7544_v1, 0.0  ;;  %v7494_v44 = vpop.f32.mrb[119].mxu0  ;;  %v8053_v47 = vpop.f32.mrb[127].mxu1 }
0x1801   :  { %v7624_v18 = vcombine.low %v7490_v33, %v7492_v50 }
0x1802   :  { %v7566_v17 = vpack.c.bf16 %v7549_v27, %v7549_v27 }
0x1803   :  { %v7631_v22 = vrot.slane %v7624_v18, %v7630_v24 }
0x1804   :  { %8071 = vmatmul.mubr.bf16.vlgmr.msra.gmra.mrb[120].mxu0 %v7566_v17 }
0x1805   :  { %7636 = vst.msk [vmem:[%s11921_s4] sm:$0xf] %vm7635_vm2, %v7631_v22 }
0x18d7   :  { %v7616_v25 = vpop.f32.mrb[120].mxu0 }
0x18d8   :  { %v7617_v3 = vadd.f32 %v7781_v38, %v7616_v25  ;;  %v8072_v54 = vpop.f32.mrb[121].mxu0 }
0x18d9   :  { %v7619_v61 = vpop.f32.mrb[122].mxu0 }
0x18da   :  { %v7644_v46 = vrot.slane %v7617_v3, %v7630_v24  ;;  %v8073_v14 = vpop.f32.mrb[123].mxu0 }
0x18dc   :  { %7645 = vrot.lane.b32.xlu0 %v7644_v46, %s8377_s0 }
0x194e   :  { %v7646_v28 = vpop.permute.xlu0 %7645 }
0x194f   :  { %7649 = vst.msk [vmem:[%s11921_s4 + $0x2] sm:$0x3] %vm7648_vm3, %v7646_v28 }

</bundles_post_ra>
